<compile_context>
chip_gen: v5e
topology: v5e:2x2
jax: 0.10.0
libtpu: 0.0.40
codegen_flags: <defaults>
</compile_context>

<pallas_src>
import jax
import jax.numpy as jnp
import numpy as np
from jax.experimental import pallas as pl
from jax.experimental.pallas import tpu as pltpu

# ---- config (matches the PyTorch module) ------------------------------------
N_EMBD = 32
N_HEAD = 6
N_LAYER = 6
HEAD_SIZE = N_EMBD // N_HEAD          # 5
HEAD_PAD = 8                          # padded head size (lane-aligned)
QKV_K_OFF = N_HEAD * HEAD_PAD         # 48
QKV_V_OFF = 2 * N_HEAD * HEAD_PAD     # 96
QKV_W = 3 * N_HEAD * HEAD_PAD         # 144
FF_HIDDEN = 4 * N_EMBD                # 128
LN_EPS = 1e-5
BLOCK_SIZE = 20                       # causal-mask buffer size in the reference
NEG = -1e30                           # finite additive mask (no -inf -> no 0*inf risk)


# ---- kernel ------------------------------------------------------------------
def _layer_norm(x, gamma, beta):
    mean = jnp.mean(x, axis=-1, keepdims=True)
    var = jnp.mean((x - mean) ** 2, axis=-1, keepdims=True)
    return (x - mean) * jax.lax.rsqrt(var + LN_EPS) * gamma + beta


def gpt_kernel(idx_ref, locs_ref, mask_ref, sel_ref,
               wqkv_ref, wproj_ref, w1_ref, w2_ref, vecs_ref, fin_ref,
               out_ref):
    R, C = idx_ref.shape              # R = rows in this slab (whole batch elements)

    fin = fin_ref[...]                            # (72, 32), rows 8-sublane aligned
    wp = fin[0:8, :]                              # Linear(2,32) weight; rows 2..7 zero
    bp = fin[8:9, :]
    lnfg = fin[16:17, :]
    lnfb = fin[24:25, :]
    blm = fin[32:33, :]
    wlm = fin[40:72, :]                           # (32, 32)

    # position embedding: Linear(2, 32) (locs lane-padded 2 -> 8 host-side)
    pos_emb = jnp.dot(locs_ref[...], wp, preferred_element_type=jnp.float32) + bp
    x = idx_ref[...] + pos_emb                    # (R, C)

    mask6 = mask_ref[...]                         # (R, 6R) additive 0 / -1e30
    sel = sel_ref[...]                            # (6R, 48) block-diag 0/1 selector

    for l in range(N_LAYER):
        vec = vecs_ref[l]                         # (56, 128), one vector per 8-row block
        ln1g = vec[0:1, :C]
        ln1b = vec[8:9, :C]
        ln2g = vec[16:17, :C]
        ln2b = vec[24:25, :C]
        bproj = vec[32:33, :C]
        b2 = vec[40:41, :C]
        b1 = vec[48:49, :]                        # (1, 128)

        # ---------- multi-head self attention, batched across all heads ----------
        h_in = _layer_norm(x, ln1g, ln1b)                                      # (R, 32)
        qkv = jnp.dot(h_in, wqkv_ref[l], preferred_element_type=jnp.float32)  # (R, 144)
        q = qkv[:, 0:QKV_K_OFF]                   # (R, 48), scale folded in
        k = qkv[:, QKV_K_OFF:QKV_V_OFF]           # (R, 48)
        v = qkv[:, QKV_V_OFF:QKV_W]               # (R, 48)

        # runtime block-diagonal K / V: head h occupies rows h*R..h*R+R-1 and
        # lanes 8h..8h+7 (selector precomputed host-side)
        k_bd = jnp.concatenate([k] * N_HEAD, axis=0) * sel                    # (6R, 48)
        v_bd = jnp.concatenate([v] * N_HEAD, axis=0) * sel                    # (6R, 48)

        # all-head QK^T in one matmul; column block h == wei of head h
        wei = jax.lax.dot_general(q, k_bd, (((1,), (1,)), ((), ())),
                                  preferred_element_type=jnp.float32)         # (R, 6R)
        wei = wei + mask6
        m = jnp.max(wei, axis=-1, keepdims=True)  # shared per-row max (softmax is
        e = jnp.exp(wei - m)                      # shift-invariant per head segment)
        # per-head denominators replicated to the 8 lanes of each head block
        denom = jnp.dot(e, sel, preferred_element_type=jnp.float32)           # (R, 48)
        o = jnp.dot(e, v_bd, preferred_element_type=jnp.float32) \
            * pl.reciprocal(denom, approx=True)                               # (R, 48)
        # single fused output projection for all heads
        sa = jnp.dot(o, wproj_ref[l], preferred_element_type=jnp.float32) + bproj
        x = x + sa

        # ---------- feed forward ----------
        f_in = _layer_norm(x, ln2g, ln2b)
        hdn = jnp.dot(f_in, w1_ref[l], preferred_element_type=jnp.float32) + b1
        hdn = jnp.maximum(hdn, 0.0)
        x = x + jnp.dot(hdn, w2_ref[l], preferred_element_type=jnp.float32) + b2

    # final LayerNorm + lm_head
    x = _layer_norm(x, lnfg, lnfb)
    out_ref[...] = jnp.dot(x, wlm, preferred_element_type=jnp.float32) + blm


# ---- host-side constants (mask / selector) ------------------------------------
def _build_consts(T, R):
    rows = np.arange(R)[:, None]
    cols = np.arange(R)[None, :]
    # block-diagonal causal mask: same batch element (row//T == col//T) and col <= row
    allow = ((rows // T) == (cols // T)) & (rows >= cols)
    mask = np.where(allow, 0.0, NEG).astype(np.float32)          # (R, R)
    mask6 = np.tile(mask, (1, N_HEAD))                           # (R, 6R)

    j = np.arange(N_HEAD * R)[:, None]
    c = np.arange(N_HEAD * HEAD_PAD)[None, :]
    sel = ((j // R) == (c // HEAD_PAD)).astype(np.float32)       # (6R, 48)
    return jnp.asarray(mask6), jnp.asarray(sel)


# ---- wrapper -----------------------------------------------------------------
def _resident_spec(arr):
    nd = arr.ndim
    return pl.BlockSpec(arr.shape, lambda i, _nd=nd: (0,) * _nd)


def _grid_config(B, T):
    """1 step on single-TC chips (v5e/v6e); try a 2-way CORE_PARALLEL split on v7x."""
    try:
        kind = jax.devices()[0].device_kind.lower()
    except Exception:
        kind = ""
    if "v7" in kind and B % 2 == 0 and ((B // 2) * T) % 8 == 0:
        return 2, (pltpu.CORE_PARALLEL,)
    return 1, ("arbitrary",)


def _run(idx, locs, packed, n_steps, dim_semantics):
    B, T, C = idx.shape
    R = (B * T) // n_steps

    idx_flat = idx.reshape(B * T, C)
    locs_flat = jnp.pad(locs.reshape(B * T, 2), ((0, 0), (0, 6)))   # lane-pad 2 -> 8
    mask6, sel = _build_consts(T, R)

    wqkv, wproj_p, w1, w2, vecs, fin = packed

    in_specs = [
        pl.BlockSpec((R, C), lambda i: (i, 0)),       # activations slab
        pl.BlockSpec((R, 8), lambda i: (i, 0)),       # padded locs slab
        _resident_spec(mask6),
        _resident_spec(sel),
        _resident_spec(wqkv),
        _resident_spec(wproj_p),
        _resident_spec(w1),
        _resident_spec(w2),
        _resident_spec(vecs),
        _resident_spec(fin),
    ]

    out = pl.pallas_call(
        gpt_kernel,
        out_shape=jax.ShapeDtypeStruct((B * T, C), jnp.float32),
        grid=(n_steps,),
        in_specs=in_specs,
        out_specs=pl.BlockSpec((R, C), lambda i: (i, 0)),
        compiler_params=pltpu.CompilerParams(dimension_semantics=dim_semantics),
    )(idx_flat, locs_flat, mask6, sel, wqkv, wproj_p, w1, w2, vecs, fin)
    return out.reshape(B, T, C)


def gpt_forward(idx, locs, packed):
    B, T, C = idx.shape
    assert C == N_EMBD and T <= BLOCK_SIZE
    n_steps, sem = _grid_config(B, T)
    if n_steps > 1:
        try:
            out = _run(idx, locs, packed, n_steps, sem)
            jax.block_until_ready(out)
            return out
        except Exception:
            pass  # fall back to the single-step path below
    return _run(idx, locs, packed, 1, ("arbitrary",))


# ---- deterministic parameter init (matches module's _init_weights) -----------
def init_params(key):
    kiter = iter(jax.random.split(key, 32))

    def nrm(shape):
        return 0.02 * jax.random.normal(next(kiter), shape, dtype=jnp.float32)

    PROJ_IN = N_HEAD * HEAD_SIZE                      # 30
    wp = nrm((2, N_EMBD))
    bp = jnp.zeros((1, N_EMBD), jnp.float32)

    ln1g = jnp.ones((N_LAYER, N_EMBD), jnp.float32)
    ln1b = jnp.zeros((N_LAYER, N_EMBD), jnp.float32)
    wk = nrm((N_LAYER, N_EMBD, PROJ_IN))
    wq = nrm((N_LAYER, N_EMBD, PROJ_IN))
    wv = nrm((N_LAYER, N_EMBD, PROJ_IN))
    wproj = nrm((N_LAYER, PROJ_IN, N_EMBD))
    bproj = jnp.zeros((N_LAYER, N_EMBD), jnp.float32)
    ln2g = jnp.ones((N_LAYER, N_EMBD), jnp.float32)
    ln2b = jnp.zeros((N_LAYER, N_EMBD), jnp.float32)
    w1 = nrm((N_LAYER, N_EMBD, FF_HIDDEN))
    b1 = jnp.zeros((N_LAYER, FF_HIDDEN), jnp.float32)
    w2 = nrm((N_LAYER, FF_HIDDEN, N_EMBD))
    b2 = jnp.zeros((N_LAYER, N_EMBD), jnp.float32)

    lnfg = jnp.ones((1, N_EMBD), jnp.float32)
    lnfb = jnp.zeros((1, N_EMBD), jnp.float32)
    wlm = nrm((N_EMBD, N_EMBD))
    blm = jnp.zeros((1, N_EMBD), jnp.float32)

    return [wp, bp, ln1g, ln1b, wk, wq, wv, wproj, bproj,
            ln2g, ln2b, w1, b1, w2, b2, lnfg, lnfb, wlm, blm]


# ---- one-time host-side packing into kernel slabs -----------------------------
def pack_params(params):
    (wp, bp, ln1g, ln1b, wk, wq, wv, wproj, bproj,
     ln2g, ln2b, w1, b1, w2, b2, lnfg, lnfb, wlm, blm) = params

    scale = HEAD_SIZE ** (-0.5)                       # reference scales by real head_size

    def pad_heads(w):                                 # (L, 32, 30) -> (L, 32, 48)
        w = w.reshape(N_LAYER, N_EMBD, N_HEAD, HEAD_SIZE)
        w = jnp.pad(w, ((0, 0), (0, 0), (0, 0), (0, HEAD_PAD - HEAD_SIZE)))
        return w.reshape(N_LAYER, N_EMBD, N_HEAD * HEAD_PAD)

    wqkv = jnp.concatenate(
        [pad_heads(wq) * scale, pad_heads(wk), pad_heads(wv)], axis=-1)  # (L, 32, 144)

    wproj_p = wproj.reshape(N_LAYER, N_HEAD, HEAD_SIZE, N_EMBD)
    wproj_p = jnp.pad(wproj_p, ((0, 0), (0, 0), (0, HEAD_PAD - HEAD_SIZE), (0, 0)))
    wproj_p = wproj_p.reshape(N_LAYER, N_HEAD * HEAD_PAD, N_EMBD)        # (L, 48, 32)

    # per-layer vector slab: one vector per 8-row block (8-sublane aligned)
    vecs = jnp.zeros((N_LAYER, 56, FF_HIDDEN), jnp.float32)              # (L, 56, 128)
    vecs = vecs.at[:, 0, :N_EMBD].set(ln1g)
    vecs = vecs.at[:, 8, :N_EMBD].set(ln1b)
    vecs = vecs.at[:, 16, :N_EMBD].set(ln2g)
    vecs = vecs.at[:, 24, :N_EMBD].set(ln2b)
    vecs = vecs.at[:, 32, :N_EMBD].set(bproj)
    vecs = vecs.at[:, 40, :N_EMBD].set(b2)
    vecs = vecs.at[:, 48, :].set(b1)

    # final slab: 8-sublane-aligned rows
    fin = jnp.zeros((72, N_EMBD), jnp.float32)                           # (72, 32)
    fin = fin.at[0:2, :].set(wp)                      # rows 2:8 stay zero (locs lane-pad)
    fin = fin.at[8, :].set(bp[0])
    fin = fin.at[16, :].set(lnfg[0])
    fin = fin.at[24, :].set(lnfb[0])
    fin = fin.at[32, :].set(blm[0])
    fin = fin.at[40:72, :].set(wlm)

    return [wqkv, wproj_p, w1, w2, vecs, fin]


# ---- pure-JAX reference (for a sanity check) ----------------------------------
def gpt_reference(idx, locs, params):
    (wp, bp, ln1g, ln1b, wk, wq, wv, wproj, bproj,
     ln2g, ln2b, w1, b1, w2, b2, lnfg, lnfb, wlm, blm) = params

    def ln(x, g, bta):
        m = jnp.mean(x, -1, keepdims=True)
        v = jnp.mean((x - m) ** 2, -1, keepdims=True)
        return (x - m) / jnp.sqrt(v + LN_EPS) * g + bta

    B, T, C = idx.shape
    x = idx + (locs @ wp + bp)
    mask = jnp.tril(jnp.ones((T, T), bool))
    for l in range(N_LAYER):
        h_in = ln(x, ln1g[l], ln1b[l])
        k = (h_in @ wk[l]).reshape(B, T, N_HEAD, HEAD_SIZE)
        q = (h_in @ wq[l]).reshape(B, T, N_HEAD, HEAD_SIZE)
        v = (h_in @ wv[l]).reshape(B, T, N_HEAD, HEAD_SIZE)
        wei = jnp.einsum('bthd,bshd->bhts', q, k) * HEAD_SIZE ** (-0.5)
        wei = jnp.where(mask[None, None], wei, -jnp.inf)
        wei = jax.nn.softmax(wei, axis=-1)
        o = jnp.einsum('bhts,bshd->bthd', wei, v).reshape(B, T, N_HEAD * HEAD_SIZE)
        x = x + (o @ wproj[l] + bproj[l])
        f = ln(x, ln2g[l], ln2b[l])
        x = x + (jnp.maximum(f @ w1[l] + b1[l], 0.0) @ w2[l] + b2[l])
    x = ln(x, lnfg, lnfb)
    return x @ wlm + blm


if __name__ == "__main__":
    key = jax.random.PRNGKey(0)
    kp, ki, kl = jax.random.split(key, 3)

    B, T = 4, 8                      # B x T x n_embd "token embeddings" (idx)
    params = init_params(kp)
    packed = pack_params(params)
    idx = jax.random.normal(ki, (B, T, N_EMBD), dtype=jnp.float32)
    locs = jax.random.normal(kl, (B, T, 2), dtype=jnp.float32)

    logits = gpt_forward(idx, locs, packed)
    logits = jax.block_until_ready(logits)

    ref = gpt_reference(idx, locs, params)
    assert logits.shape == (B, T, N_EMBD)
    assert np.allclose(np.asarray(logits), np.asarray(ref), atol=2e-2, rtol=2e-2), \
        "Pallas kernel output mismatch vs. pure-JAX reference"

    # TODO(synk): `targets is not None` branch (AE.decode + MSELoss) depends on an
    # external AE model and is not part of this kernel.
    print("KERNEL_OK")
</pallas_src>

<mosaic_0001>
module attributes {stable_mosaic.version = 11 : i64} {
  func.func @gpt_kernel(%arg0: i32, %arg1: memref<32x32xf32, #tpu.memory_space<vmem>>, %arg2: memref<32x8xf32, #tpu.memory_space<vmem>>, %arg3: memref<32x192xf32, #tpu.memory_space<vmem>>, %arg4: memref<192x48xf32, #tpu.memory_space<vmem>>, %arg5: memref<6x32x144xf32, #tpu.memory_space<vmem>>, %arg6: memref<6x48x32xf32, #tpu.memory_space<vmem>>, %arg7: memref<6x32x128xf32, #tpu.memory_space<vmem>>, %arg8: memref<6x128x32xf32, #tpu.memory_space<vmem>>, %arg9: memref<6x56x128xf32, #tpu.memory_space<vmem>>, %arg10: memref<72x32xf32, #tpu.memory_space<vmem>>, %arg11: memref<32x32xf32, #tpu.memory_space<vmem>>) attributes {dimension_semantics = [#tpu.dimension_semantics<arbitrary>], iteration_bounds = array<i64: 1>, scalar_prefetch = 0 : i64, scratch_operands = 0 : i64, tpu.core_type = #tpu.core_type<tc>, window_params = [{transform_indices = @transform_0, window_bounds = array<i64: 32, 32>}, {transform_indices = @transform_1, window_bounds = array<i64: 32, 8>}, {pipeline_mode = #tpu.pipeline_mode<synchronous>, transform_indices = @transform_2, window_bounds = array<i64: 32, 192>}, {pipeline_mode = #tpu.pipeline_mode<synchronous>, transform_indices = @transform_3, window_bounds = array<i64: 192, 48>}, {pipeline_mode = #tpu.pipeline_mode<synchronous>, transform_indices = @transform_4, window_bounds = array<i64: 6, 32, 144>}, {pipeline_mode = #tpu.pipeline_mode<synchronous>, transform_indices = @transform_5, window_bounds = array<i64: 6, 48, 32>}, {pipeline_mode = #tpu.pipeline_mode<synchronous>, transform_indices = @transform_6, window_bounds = array<i64: 6, 32, 128>}, {pipeline_mode = #tpu.pipeline_mode<synchronous>, transform_indices = @transform_7, window_bounds = array<i64: 6, 128, 32>}, {pipeline_mode = #tpu.pipeline_mode<synchronous>, transform_indices = @transform_8, window_bounds = array<i64: 6, 56, 128>}, {pipeline_mode = #tpu.pipeline_mode<synchronous>, transform_indices = @transform_9, window_bounds = array<i64: 72, 32>}, {transform_indices = @transform_10, window_bounds = array<i64: 32, 32>}]} {
    %c0 = arith.constant 0 : index
    %c0_0 = arith.constant 0 : index
    %0 = vector.load %arg10[%c0, %c0_0] : memref<72x32xf32, #tpu.memory_space<vmem>>, vector<72x32xf32>
    %1 = vector.extract_strided_slice %0 {offsets = [0, 0], sizes = [8, 32], strides = [1, 1]} : vector<72x32xf32> to vector<8x32xf32>
    %2 = vector.extract_strided_slice %0 {offsets = [8, 0], sizes = [1, 32], strides = [1, 1]} : vector<72x32xf32> to vector<1x32xf32>
    %3 = vector.extract_strided_slice %0 {offsets = [16, 0], sizes = [1, 32], strides = [1, 1]} : vector<72x32xf32> to vector<1x32xf32>
    %4 = vector.extract_strided_slice %0 {offsets = [24, 0], sizes = [1, 32], strides = [1, 1]} : vector<72x32xf32> to vector<1x32xf32>
    %5 = vector.extract_strided_slice %0 {offsets = [32, 0], sizes = [1, 32], strides = [1, 1]} : vector<72x32xf32> to vector<1x32xf32>
    %6 = vector.extract_strided_slice %0 {offsets = [40, 0], sizes = [32, 32], strides = [1, 1]} : vector<72x32xf32> to vector<32x32xf32>
    %c0_1 = arith.constant 0 : index
    %c0_2 = arith.constant 0 : index
    %7 = vector.load %arg2[%c0_1, %c0_2] : memref<32x8xf32, #tpu.memory_space<vmem>>, vector<32x8xf32>
    %cst = arith.constant dense<0.000000e+00> : vector<32x32xf32>
    %8 = tpu.matmul %7, %1, %cst {dimension_numbers = #tpu.dot_dimension_numbers<[1], [0], [0], [1], [0, 0, 1, 1], [], []>} : vector<32x8xf32>, vector<8x32xf32>, vector<32x32xf32> -> vector<32x32xf32>
    %9 = vector.broadcast %2 : vector<1x32xf32> to vector<32x32xf32>
    %10 = arith.addf %8, %9 : vector<32x32xf32>
    %c0_3 = arith.constant 0 : index
    %c0_4 = arith.constant 0 : index
    %11 = vector.load %arg1[%c0_3, %c0_4] : memref<32x32xf32, #tpu.memory_space<vmem>>, vector<32x32xf32>
    %12 = arith.addf %11, %10 : vector<32x32xf32>
    %c0_5 = arith.constant 0 : index
    %c0_6 = arith.constant 0 : index
    %13 = vector.load %arg3[%c0_5, %c0_6] : memref<32x192xf32, #tpu.memory_space<vmem>>, vector<32x192xf32>
    %c0_7 = arith.constant 0 : index
    %c0_8 = arith.constant 0 : index
    %14 = vector.load %arg4[%c0_7, %c0_8] : memref<192x48xf32, #tpu.memory_space<vmem>>, vector<192x48xf32>
    %c0_9 = arith.constant 0 : index
    %c0_10 = arith.constant 0 : index
    %c0_11 = arith.constant 0 : index
    %15 = vector.load %arg9[%c0_9, %c0_10, %c0_11] : memref<6x56x128xf32, #tpu.memory_space<vmem>>, vector<1x56x128xf32>
    %16 = vector.shape_cast %15 : vector<1x56x128xf32> to vector<56x128xf32>
    %17 = vector.extract_strided_slice %16 {offsets = [0, 0], sizes = [1, 32], strides = [1, 1]} : vector<56x128xf32> to vector<1x32xf32>
    %18 = vector.extract_strided_slice %16 {offsets = [8, 0], sizes = [1, 32], strides = [1, 1]} : vector<56x128xf32> to vector<1x32xf32>
    %19 = vector.extract_strided_slice %16 {offsets = [16, 0], sizes = [1, 32], strides = [1, 1]} : vector<56x128xf32> to vector<1x32xf32>
    %20 = vector.extract_strided_slice %16 {offsets = [24, 0], sizes = [1, 32], strides = [1, 1]} : vector<56x128xf32> to vector<1x32xf32>
    %21 = vector.extract_strided_slice %16 {offsets = [32, 0], sizes = [1, 32], strides = [1, 1]} : vector<56x128xf32> to vector<1x32xf32>
    %22 = vector.extract_strided_slice %16 {offsets = [40, 0], sizes = [1, 32], strides = [1, 1]} : vector<56x128xf32> to vector<1x32xf32>
    %23 = vector.extract_strided_slice %16 {offsets = [48, 0], sizes = [1, 128], strides = [1, 1]} : vector<56x128xf32> to vector<1x128xf32>
    %cst_12 = arith.constant dense<0.000000e+00> : vector<32xf32>
    %24 = vector.multi_reduction <add>, %12, %cst_12 [1] : vector<32x32xf32> to vector<32xf32>
    %25 = vector.shape_cast %24 : vector<32xf32> to vector<32x1xf32>
    %cst_13 = arith.constant 3.200000e+01 : f32
    %26 = vector.broadcast %cst_13 : f32 to vector<32x1xf32>
    %27 = arith.divf %25, %26 : vector<32x1xf32>
    %28 = vector.broadcast %27 : vector<32x1xf32> to vector<32x32xf32>
    %29 = arith.subf %12, %28 : vector<32x32xf32>
    %30 = arith.mulf %29, %29 : vector<32x32xf32>
    %cst_14 = arith.constant dense<0.000000e+00> : vector<32xf32>
    %31 = vector.multi_reduction <add>, %30, %cst_14 [1] : vector<32x32xf32> to vector<32xf32>
    %32 = vector.shape_cast %31 : vector<32xf32> to vector<32x1xf32>
    %cst_15 = arith.constant 3.200000e+01 : f32
    %33 = vector.broadcast %cst_15 : f32 to vector<32x1xf32>
    %34 = arith.divf %32, %33 : vector<32x1xf32>
    %35 = vector.broadcast %27 : vector<32x1xf32> to vector<32x32xf32>
    %36 = arith.subf %12, %35 : vector<32x32xf32>
    %cst_16 = arith.constant 9.99999974E-6 : f32
    %37 = vector.broadcast %cst_16 : f32 to vector<32x1xf32>
    %38 = arith.addf %34, %37 : vector<32x1xf32>
    %39 = math.rsqrt %38 : vector<32x1xf32>
    %40 = vector.broadcast %39 : vector<32x1xf32> to vector<32x32xf32>
    %41 = arith.mulf %36, %40 : vector<32x32xf32>
    %42 = vector.broadcast %17 : vector<1x32xf32> to vector<32x32xf32>
    %43 = arith.mulf %41, %42 : vector<32x32xf32>
    %44 = vector.broadcast %18 : vector<1x32xf32> to vector<32x32xf32>
    %45 = arith.addf %43, %44 : vector<32x32xf32>
    %c0_17 = arith.constant 0 : index
    %c0_18 = arith.constant 0 : index
    %c0_19 = arith.constant 0 : index
    %46 = vector.load %arg5[%c0_17, %c0_18, %c0_19] : memref<6x32x144xf32, #tpu.memory_space<vmem>>, vector<1x32x144xf32>
    %47 = vector.shape_cast %46 : vector<1x32x144xf32> to vector<32x144xf32>
    %cst_20 = arith.constant dense<0.000000e+00> : vector<32x144xf32>
    %48 = tpu.matmul %45, %47, %cst_20 {dimension_numbers = #tpu.dot_dimension_numbers<[1], [0], [0], [1], [0, 0, 1, 1], [], []>} : vector<32x32xf32>, vector<32x144xf32>, vector<32x144xf32> -> vector<32x144xf32>
    %49 = vector.extract_strided_slice %48 {offsets = [0, 0], sizes = [32, 48], strides = [1, 1]} : vector<32x144xf32> to vector<32x48xf32>
    %50 = vector.extract_strided_slice %48 {offsets = [0, 48], sizes = [32, 48], strides = [1, 1]} : vector<32x144xf32> to vector<32x48xf32>
    %51 = vector.extract_strided_slice %48 {offsets = [0, 96], sizes = [32, 48], strides = [1, 1]} : vector<32x144xf32> to vector<32x48xf32>
    %52 = tpu.concatenate %50, %50, %50, %50, %50, %50 in 0 : vector<32x48xf32>, vector<32x48xf32>, vector<32x48xf32>, vector<32x48xf32>, vector<32x48xf32>, vector<32x48xf32> -> vector<192x48xf32>
    %53 = arith.mulf %52, %14 : vector<192x48xf32>
    %54 = tpu.concatenate %51, %51, %51, %51, %51, %51 in 0 : vector<32x48xf32>, vector<32x48xf32>, vector<32x48xf32>, vector<32x48xf32>, vector<32x48xf32>, vector<32x48xf32> -> vector<192x48xf32>
    %55 = arith.mulf %54, %14 : vector<192x48xf32>
    %cst_21 = arith.constant dense<0.000000e+00> : vector<32x192xf32>
    %56 = tpu.matmul %49, %53, %cst_21 {dimension_numbers = #tpu.dot_dimension_numbers<[1], [1], [0], [0], [0, 0, 1, 0], [], []>} : vector<32x48xf32>, vector<192x48xf32>, vector<32x192xf32> -> vector<32x192xf32>
    %57 = arith.addf %56, %13 : vector<32x192xf32>
    %cst_22 = arith.constant dense<0xFF800000> : vector<32xf32>
    %58 = vector.multi_reduction <maximumf>, %57, %cst_22 [1] : vector<32x192xf32> to vector<32xf32>
    %59 = vector.shape_cast %58 : vector<32xf32> to vector<32x1xf32>
    %60 = vector.broadcast %59 : vector<32x1xf32> to vector<32x192xf32>
    %61 = arith.subf %57, %60 : vector<32x192xf32>
    %62 = math.exp %61 : vector<32x192xf32>
    %cst_23 = arith.constant dense<0.000000e+00> : vector<32x48xf32>
    %63 = tpu.matmul %62, %14, %cst_23 {dimension_numbers = #tpu.dot_dimension_numbers<[1], [0], [0], [1], [0, 0, 1, 1], [], []>} : vector<32x192xf32>, vector<192x48xf32>, vector<32x48xf32> -> vector<32x48xf32>
    %cst_24 = arith.constant dense<0.000000e+00> : vector<32x48xf32>
    %64 = tpu.matmul %62, %55, %cst_24 {dimension_numbers = #tpu.dot_dimension_numbers<[1], [0], [0], [1], [0, 0, 1, 1], [], []>} : vector<32x192xf32>, vector<192x48xf32>, vector<32x48xf32> -> vector<32x48xf32>
    %65 = tpu.reciprocal %63 {approx = true} : vector<32x48xf32> -> vector<32x48xf32>
    %66 = arith.mulf %64, %65 : vector<32x48xf32>
    %c0_25 = arith.constant 0 : index
    %c0_26 = arith.constant 0 : index
    %c0_27 = arith.constant 0 : index
    %67 = vector.load %arg6[%c0_25, %c0_26, %c0_27] : memref<6x48x32xf32, #tpu.memory_space<vmem>>, vector<1x48x32xf32>
    %68 = vector.shape_cast %67 : vector<1x48x32xf32> to vector<48x32xf32>
    %cst_28 = arith.constant dense<0.000000e+00> : vector<32x32xf32>
    %69 = tpu.matmul %66, %68, %cst_28 {dimension_numbers = #tpu.dot_dimension_numbers<[1], [0], [0], [1], [0, 0, 1, 1], [], []>} : vector<32x48xf32>, vector<48x32xf32>, vector<32x32xf32> -> vector<32x32xf32>
    %70 = vector.broadcast %21 : vector<1x32xf32> to vector<32x32xf32>
    %71 = arith.addf %69, %70 : vector<32x32xf32>
    %72 = arith.addf %12, %71 : vector<32x32xf32>
    %cst_29 = arith.constant dense<0.000000e+00> : vector<32xf32>
    %73 = vector.multi_reduction <add>, %72, %cst_29 [1] : vector<32x32xf32> to vector<32xf32>
    %74 = vector.shape_cast %73 : vector<32xf32> to vector<32x1xf32>
    %cst_30 = arith.constant 3.200000e+01 : f32
    %75 = vector.broadcast %cst_30 : f32 to vector<32x1xf32>
    %76 = arith.divf %74, %75 : vector<32x1xf32>
    %77 = vector.broadcast %76 : vector<32x1xf32> to vector<32x32xf32>
    %78 = arith.subf %72, %77 : vector<32x32xf32>
    %79 = arith.mulf %78, %78 : vector<32x32xf32>
    %cst_31 = arith.constant dense<0.000000e+00> : vector<32xf32>
    %80 = vector.multi_reduction <add>, %79, %cst_31 [1] : vector<32x32xf32> to vector<32xf32>
    %81 = vector.shape_cast %80 : vector<32xf32> to vector<32x1xf32>
    %cst_32 = arith.constant 3.200000e+01 : f32
    %82 = vector.broadcast %cst_32 : f32 to vector<32x1xf32>
    %83 = arith.divf %81, %82 : vector<32x1xf32>
    %84 = vector.broadcast %76 : vector<32x1xf32> to vector<32x32xf32>
    %85 = arith.subf %72, %84 : vector<32x32xf32>
    %cst_33 = arith.constant 9.99999974E-6 : f32
    %86 = vector.broadcast %cst_33 : f32 to vector<32x1xf32>
    %87 = arith.addf %83, %86 : vector<32x1xf32>
    %88 = math.rsqrt %87 : vector<32x1xf32>
    %89 = vector.broadcast %88 : vector<32x1xf32> to vector<32x32xf32>
    %90 = arith.mulf %85, %89 : vector<32x32xf32>
    %91 = vector.broadcast %19 : vector<1x32xf32> to vector<32x32xf32>
    %92 = arith.mulf %90, %91 : vector<32x32xf32>
    %93 = vector.broadcast %20 : vector<1x32xf32> to vector<32x32xf32>
    %94 = arith.addf %92, %93 : vector<32x32xf32>
    %c0_34 = arith.constant 0 : index
    %c0_35 = arith.constant 0 : index
    %c0_36 = arith.constant 0 : index
    %95 = vector.load %arg7[%c0_34, %c0_35, %c0_36] : memref<6x32x128xf32, #tpu.memory_space<vmem>>, vector<1x32x128xf32>
    %96 = vector.shape_cast %95 : vector<1x32x128xf32> to vector<32x128xf32>
    %cst_37 = arith.constant dense<0.000000e+00> : vector<32x128xf32>
    %97 = tpu.matmul %94, %96, %cst_37 {dimension_numbers = #tpu.dot_dimension_numbers<[1], [0], [0], [1], [0, 0, 1, 1], [], []>} : vector<32x32xf32>, vector<32x128xf32>, vector<32x128xf32> -> vector<32x128xf32>
    %98 = vector.broadcast %23 : vector<1x128xf32> to vector<32x128xf32>
    %99 = arith.addf %97, %98 : vector<32x128xf32>
    %cst_38 = arith.constant 0.000000e+00 : f32
    %100 = vector.broadcast %cst_38 : f32 to vector<32x128xf32>
    %101 = arith.maximumf %99, %100 : vector<32x128xf32>
    %c0_39 = arith.constant 0 : index
    %c0_40 = arith.constant 0 : index
    %c0_41 = arith.constant 0 : index
    %102 = vector.load %arg8[%c0_39, %c0_40, %c0_41] : memref<6x128x32xf32, #tpu.memory_space<vmem>>, vector<1x128x32xf32>
    %103 = vector.shape_cast %102 : vector<1x128x32xf32> to vector<128x32xf32>
    %cst_42 = arith.constant dense<0.000000e+00> : vector<32x32xf32>
    %104 = tpu.matmul %101, %103, %cst_42 {dimension_numbers = #tpu.dot_dimension_numbers<[1], [0], [0], [1], [0, 0, 1, 1], [], []>} : vector<32x128xf32>, vector<128x32xf32>, vector<32x32xf32> -> vector<32x32xf32>
    %105 = arith.addf %72, %104 : vector<32x32xf32>
    %106 = vector.broadcast %22 : vector<1x32xf32> to vector<32x32xf32>
    %107 = arith.addf %105, %106 : vector<32x32xf32>
    %c1 = arith.constant 1 : index
    %c0_43 = arith.constant 0 : index
    %c0_44 = arith.constant 0 : index
    %108 = vector.load %arg9[%c1, %c0_43, %c0_44] : memref<6x56x128xf32, #tpu.memory_space<vmem>>, vector<1x56x128xf32>
    %109 = vector.shape_cast %108 : vector<1x56x128xf32> to vector<56x128xf32>
    %110 = vector.extract_strided_slice %109 {offsets = [0, 0], sizes = [1, 32], strides = [1, 1]} : vector<56x128xf32> to vector<1x32xf32>
    %111 = vector.extract_strided_slice %109 {offsets = [8, 0], sizes = [1, 32], strides = [1, 1]} : vector<56x128xf32> to vector<1x32xf32>
    %112 = vector.extract_strided_slice %109 {offsets = [16, 0], sizes = [1, 32], strides = [1, 1]} : vector<56x128xf32> to vector<1x32xf32>
    %113 = vector.extract_strided_slice %109 {offsets = [24, 0], sizes = [1, 32], strides = [1, 1]} : vector<56x128xf32> to vector<1x32xf32>
    %114 = vector.extract_strided_slice %109 {offsets = [32, 0], sizes = [1, 32], strides = [1, 1]} : vector<56x128xf32> to vector<1x32xf32>
    %115 = vector.extract_strided_slice %109 {offsets = [40, 0], sizes = [1, 32], strides = [1, 1]} : vector<56x128xf32> to vector<1x32xf32>
    %116 = vector.extract_strided_slice %109 {offsets = [48, 0], sizes = [1, 128], strides = [1, 1]} : vector<56x128xf32> to vector<1x128xf32>
    %cst_45 = arith.constant dense<0.000000e+00> : vector<32xf32>
    %117 = vector.multi_reduction <add>, %107, %cst_45 [1] : vector<32x32xf32> to vector<32xf32>
    %118 = vector.shape_cast %117 : vector<32xf32> to vector<32x1xf32>
    %cst_46 = arith.constant 3.200000e+01 : f32
    %119 = vector.broadcast %cst_46 : f32 to vector<32x1xf32>
    %120 = arith.divf %118, %119 : vector<32x1xf32>
    %121 = vector.broadcast %120 : vector<32x1xf32> to vector<32x32xf32>
    %122 = arith.subf %107, %121 : vector<32x32xf32>
    %123 = arith.mulf %122, %122 : vector<32x32xf32>
    %cst_47 = arith.constant dense<0.000000e+00> : vector<32xf32>
    %124 = vector.multi_reduction <add>, %123, %cst_47 [1] : vector<32x32xf32> to vector<32xf32>
    %125 = vector.shape_cast %124 : vector<32xf32> to vector<32x1xf32>
    %cst_48 = arith.constant 3.200000e+01 : f32
    %126 = vector.broadcast %cst_48 : f32 to vector<32x1xf32>
    %127 = arith.divf %125, %126 : vector<32x1xf32>
    %128 = vector.broadcast %120 : vector<32x1xf32> to vector<32x32xf32>
    %129 = arith.subf %107, %128 : vector<32x32xf32>
    %cst_49 = arith.constant 9.99999974E-6 : f32
    %130 = vector.broadcast %cst_49 : f32 to vector<32x1xf32>
    %131 = arith.addf %127, %130 : vector<32x1xf32>
    %132 = math.rsqrt %131 : vector<32x1xf32>
    %133 = vector.broadcast %132 : vector<32x1xf32> to vector<32x32xf32>
    %134 = arith.mulf %129, %133 : vector<32x32xf32>
    %135 = vector.broadcast %110 : vector<1x32xf32> to vector<32x32xf32>
    %136 = arith.mulf %134, %135 : vector<32x32xf32>
    %137 = vector.broadcast %111 : vector<1x32xf32> to vector<32x32xf32>
    %138 = arith.addf %136, %137 : vector<32x32xf32>
    %c1_50 = arith.constant 1 : index
    %c0_51 = arith.constant 0 : index
    %c0_52 = arith.constant 0 : index
    %139 = vector.load %arg5[%c1_50, %c0_51, %c0_52] : memref<6x32x144xf32, #tpu.memory_space<vmem>>, vector<1x32x144xf32>
    %140 = vector.shape_cast %139 : vector<1x32x144xf32> to vector<32x144xf32>
    %cst_53 = arith.constant dense<0.000000e+00> : vector<32x144xf32>
    %141 = tpu.matmul %138, %140, %cst_53 {dimension_numbers = #tpu.dot_dimension_numbers<[1], [0], [0], [1], [0, 0, 1, 1], [], []>} : vector<32x32xf32>, vector<32x144xf32>, vector<32x144xf32> -> vector<32x144xf32>
    %142 = vector.extract_strided_slice %141 {offsets = [0, 0], sizes = [32, 48], strides = [1, 1]} : vector<32x144xf32> to vector<32x48xf32>
    %143 = vector.extract_strided_slice %141 {offsets = [0, 48], sizes = [32, 48], strides = [1, 1]} : vector<32x144xf32> to vector<32x48xf32>
    %144 = vector.extract_strided_slice %141 {offsets = [0, 96], sizes = [32, 48], strides = [1, 1]} : vector<32x144xf32> to vector<32x48xf32>
    %145 = tpu.concatenate %143, %143, %143, %143, %143, %143 in 0 : vector<32x48xf32>, vector<32x48xf32>, vector<32x48xf32>, vector<32x48xf32>, vector<32x48xf32>, vector<32x48xf32> -> vector<192x48xf32>
    %146 = arith.mulf %145, %14 : vector<192x48xf32>
    %147 = tpu.concatenate %144, %144, %144, %144, %144, %144 in 0 : vector<32x48xf32>, vector<32x48xf32>, vector<32x48xf32>, vector<32x48xf32>, vector<32x48xf32>, vector<32x48xf32> -> vector<192x48xf32>
    %148 = arith.mulf %147, %14 : vector<192x48xf32>
    %cst_54 = arith.constant dense<0.000000e+00> : vector<32x192xf32>
    %149 = tpu.matmul %142, %146, %cst_54 {dimension_numbers = #tpu.dot_dimension_numbers<[1], [1], [0], [0], [0, 0, 1, 0], [], []>} : vector<32x48xf32>, vector<192x48xf32>, vector<32x192xf32> -> vector<32x192xf32>
    %150 = arith.addf %149, %13 : vector<32x192xf32>
    %cst_55 = arith.constant dense<0xFF800000> : vector<32xf32>
    %151 = vector.multi_reduction <maximumf>, %150, %cst_55 [1] : vector<32x192xf32> to vector<32xf32>
    %152 = vector.shape_cast %151 : vector<32xf32> to vector<32x1xf32>
    %153 = vector.broadcast %152 : vector<32x1xf32> to vector<32x192xf32>
    %154 = arith.subf %150, %153 : vector<32x192xf32>
    %155 = math.exp %154 : vector<32x192xf32>
    %cst_56 = arith.constant dense<0.000000e+00> : vector<32x48xf32>
    %156 = tpu.matmul %155, %14, %cst_56 {dimension_numbers = #tpu.dot_dimension_numbers<[1], [0], [0], [1], [0, 0, 1, 1], [], []>} : vector<32x192xf32>, vector<192x48xf32>, vector<32x48xf32> -> vector<32x48xf32>
    %cst_57 = arith.constant dense<0.000000e+00> : vector<32x48xf32>
    %157 = tpu.matmul %155, %148, %cst_57 {dimension_numbers = #tpu.dot_dimension_numbers<[1], [0], [0], [1], [0, 0, 1, 1], [], []>} : vector<32x192xf32>, vector<192x48xf32>, vector<32x48xf32> -> vector<32x48xf32>
    %158 = tpu.reciprocal %156 {approx = true} : vector<32x48xf32> -> vector<32x48xf32>
    %159 = arith.mulf %157, %158 : vector<32x48xf32>
    %c1_58 = arith.constant 1 : index
    %c0_59 = arith.constant 0 : index
    %c0_60 = arith.constant 0 : index
    %160 = vector.load %arg6[%c1_58, %c0_59, %c0_60] : memref<6x48x32xf32, #tpu.memory_space<vmem>>, vector<1x48x32xf32>
    %161 = vector.shape_cast %160 : vector<1x48x32xf32> to vector<48x32xf32>
    %cst_61 = arith.constant dense<0.000000e+00> : vector<32x32xf32>
    %162 = tpu.matmul %159, %161, %cst_61 {dimension_numbers = #tpu.dot_dimension_numbers<[1], [0], [0], [1], [0, 0, 1, 1], [], []>} : vector<32x48xf32>, vector<48x32xf32>, vector<32x32xf32> -> vector<32x32xf32>
    %163 = vector.broadcast %114 : vector<1x32xf32> to vector<32x32xf32>
    %164 = arith.addf %162, %163 : vector<32x32xf32>
    %165 = arith.addf %107, %164 : vector<32x32xf32>
    %cst_62 = arith.constant dense<0.000000e+00> : vector<32xf32>
    %166 = vector.multi_reduction <add>, %165, %cst_62 [1] : vector<32x32xf32> to vector<32xf32>
    %167 = vector.shape_cast %166 : vector<32xf32> to vector<32x1xf32>
    %cst_63 = arith.constant 3.200000e+01 : f32
    %168 = vector.broadcast %cst_63 : f32 to vector<32x1xf32>
    %169 = arith.divf %167, %168 : vector<32x1xf32>
    %170 = vector.broadcast %169 : vector<32x1xf32> to vector<32x32xf32>
    %171 = arith.subf %165, %170 : vector<32x32xf32>
    %172 = arith.mulf %171, %171 : vector<32x32xf32>
    %cst_64 = arith.constant dense<0.000000e+00> : vector<32xf32>
    %173 = vector.multi_reduction <add>, %172, %cst_64 [1] : vector<32x32xf32> to vector<32xf32>
    %174 = vector.shape_cast %173 : vector<32xf32> to vector<32x1xf32>
    %cst_65 = arith.constant 3.200000e+01 : f32
    %175 = vector.broadcast %cst_65 : f32 to vector<32x1xf32>
    %176 = arith.divf %174, %175 : vector<32x1xf32>
    %177 = vector.broadcast %169 : vector<32x1xf32> to vector<32x32xf32>
    %178 = arith.subf %165, %177 : vector<32x32xf32>
    %cst_66 = arith.constant 9.99999974E-6 : f32
    %179 = vector.broadcast %cst_66 : f32 to vector<32x1xf32>
    %180 = arith.addf %176, %179 : vector<32x1xf32>
    %181 = math.rsqrt %180 : vector<32x1xf32>
    %182 = vector.broadcast %181 : vector<32x1xf32> to vector<32x32xf32>
    %183 = arith.mulf %178, %182 : vector<32x32xf32>
    %184 = vector.broadcast %112 : vector<1x32xf32> to vector<32x32xf32>
    %185 = arith.mulf %183, %184 : vector<32x32xf32>
    %186 = vector.broadcast %113 : vector<1x32xf32> to vector<32x32xf32>
    %187 = arith.addf %185, %186 : vector<32x32xf32>
    %c1_67 = arith.constant 1 : index
    %c0_68 = arith.constant 0 : index
    %c0_69 = arith.constant 0 : index
    %188 = vector.load %arg7[%c1_67, %c0_68, %c0_69] : memref<6x32x128xf32, #tpu.memory_space<vmem>>, vector<1x32x128xf32>
    %189 = vector.shape_cast %188 : vector<1x32x128xf32> to vector<32x128xf32>
    %cst_70 = arith.constant dense<0.000000e+00> : vector<32x128xf32>
    %190 = tpu.matmul %187, %189, %cst_70 {dimension_numbers = #tpu.dot_dimension_numbers<[1], [0], [0], [1], [0, 0, 1, 1], [], []>} : vector<32x32xf32>, vector<32x128xf32>, vector<32x128xf32> -> vector<32x128xf32>
    %191 = vector.broadcast %116 : vector<1x128xf32> to vector<32x128xf32>
    %192 = arith.addf %190, %191 : vector<32x128xf32>
    %cst_71 = arith.constant 0.000000e+00 : f32
    %193 = vector.broadcast %cst_71 : f32 to vector<32x128xf32>
    %194 = arith.maximumf %192, %193 : vector<32x128xf32>
    %c1_72 = arith.constant 1 : index
    %c0_73 = arith.constant 0 : index
    %c0_74 = arith.constant 0 : index
    %195 = vector.load %arg8[%c1_72, %c0_73, %c0_74] : memref<6x128x32xf32, #tpu.memory_space<vmem>>, vector<1x128x32xf32>
    %196 = vector.shape_cast %195 : vector<1x128x32xf32> to vector<128x32xf32>
    %cst_75 = arith.constant dense<0.000000e+00> : vector<32x32xf32>
    %197 = tpu.matmul %194, %196, %cst_75 {dimension_numbers = #tpu.dot_dimension_numbers<[1], [0], [0], [1], [0, 0, 1, 1], [], []>} : vector<32x128xf32>, vector<128x32xf32>, vector<32x32xf32> -> vector<32x32xf32>
    %198 = arith.addf %165, %197 : vector<32x32xf32>
    %199 = vector.broadcast %115 : vector<1x32xf32> to vector<32x32xf32>
    %200 = arith.addf %198, %199 : vector<32x32xf32>
    %c2 = arith.constant 2 : index
    %c0_76 = arith.constant 0 : index
    %c0_77 = arith.constant 0 : index
    %201 = vector.load %arg9[%c2, %c0_76, %c0_77] : memref<6x56x128xf32, #tpu.memory_space<vmem>>, vector<1x56x128xf32>
    %202 = vector.shape_cast %201 : vector<1x56x128xf32> to vector<56x128xf32>
    %203 = vector.extract_strided_slice %202 {offsets = [0, 0], sizes = [1, 32], strides = [1, 1]} : vector<56x128xf32> to vector<1x32xf32>
    %204 = vector.extract_strided_slice %202 {offsets = [8, 0], sizes = [1, 32], strides = [1, 1]} : vector<56x128xf32> to vector<1x32xf32>
    %205 = vector.extract_strided_slice %202 {offsets = [16, 0], sizes = [1, 32], strides = [1, 1]} : vector<56x128xf32> to vector<1x32xf32>
    %206 = vector.extract_strided_slice %202 {offsets = [24, 0], sizes = [1, 32], strides = [1, 1]} : vector<56x128xf32> to vector<1x32xf32>
    %207 = vector.extract_strided_slice %202 {offsets = [32, 0], sizes = [1, 32], strides = [1, 1]} : vector<56x128xf32> to vector<1x32xf32>
    %208 = vector.extract_strided_slice %202 {offsets = [40, 0], sizes = [1, 32], strides = [1, 1]} : vector<56x128xf32> to vector<1x32xf32>
    %209 = vector.extract_strided_slice %202 {offsets = [48, 0], sizes = [1, 128], strides = [1, 1]} : vector<56x128xf32> to vector<1x128xf32>
    %cst_78 = arith.constant dense<0.000000e+00> : vector<32xf32>
    %210 = vector.multi_reduction <add>, %200, %cst_78 [1] : vector<32x32xf32> to vector<32xf32>
    %211 = vector.shape_cast %210 : vector<32xf32> to vector<32x1xf32>
    %cst_79 = arith.constant 3.200000e+01 : f32
    %212 = vector.broadcast %cst_79 : f32 to vector<32x1xf32>
    %213 = arith.divf %211, %212 : vector<32x1xf32>
    %214 = vector.broadcast %213 : vector<32x1xf32> to vector<32x32xf32>
    %215 = arith.subf %200, %214 : vector<32x32xf32>
    %216 = arith.mulf %215, %215 : vector<32x32xf32>
    %cst_80 = arith.constant dense<0.000000e+00> : vector<32xf32>
    %217 = vector.multi_reduction <add>, %216, %cst_80 [1] : vector<32x32xf32> to vector<32xf32>
    %218 = vector.shape_cast %217 : vector<32xf32> to vector<32x1xf32>
    %cst_81 = arith.constant 3.200000e+01 : f32
    %219 = vector.broadcast %cst_81 : f32 to vector<32x1xf32>
    %220 = arith.divf %218, %219 : vector<32x1xf32>
    %221 = vector.broadcast %213 : vector<32x1xf32> to vector<32x32xf32>
    %222 = arith.subf %200, %221 : vector<32x32xf32>
    %cst_82 = arith.constant 9.99999974E-6 : f32
    %223 = vector.broadcast %cst_82 : f32 to vector<32x1xf32>
    %224 = arith.addf %220, %223 : vector<32x1xf32>
    %225 = math.rsqrt %224 : vector<32x1xf32>
    %226 = vector.broadcast %225 : vector<32x1xf32> to vector<32x32xf32>
    %227 = arith.mulf %222, %226 : vector<32x32xf32>
    %228 = vector.broadcast %203 : vector<1x32xf32> to vector<32x32xf32>
    %229 = arith.mulf %227, %228 : vector<32x32xf32>
    %230 = vector.broadcast %204 : vector<1x32xf32> to vector<32x32xf32>
    %231 = arith.addf %229, %230 : vector<32x32xf32>
    %c2_83 = arith.constant 2 : index
    %c0_84 = arith.constant 0 : index
    %c0_85 = arith.constant 0 : index
    %232 = vector.load %arg5[%c2_83, %c0_84, %c0_85] : memref<6x32x144xf32, #tpu.memory_space<vmem>>, vector<1x32x144xf32>
    %233 = vector.shape_cast %232 : vector<1x32x144xf32> to vector<32x144xf32>
    %cst_86 = arith.constant dense<0.000000e+00> : vector<32x144xf32>
    %234 = tpu.matmul %231, %233, %cst_86 {dimension_numbers = #tpu.dot_dimension_numbers<[1], [0], [0], [1], [0, 0, 1, 1], [], []>} : vector<32x32xf32>, vector<32x144xf32>, vector<32x144xf32> -> vector<32x144xf32>
    %235 = vector.extract_strided_slice %234 {offsets = [0, 0], sizes = [32, 48], strides = [1, 1]} : vector<32x144xf32> to vector<32x48xf32>
    %236 = vector.extract_strided_slice %234 {offsets = [0, 48], sizes = [32, 48], strides = [1, 1]} : vector<32x144xf32> to vector<32x48xf32>
    %237 = vector.extract_strided_slice %234 {offsets = [0, 96], sizes = [32, 48], strides = [1, 1]} : vector<32x144xf32> to vector<32x48xf32>
    %238 = tpu.concatenate %236, %236, %236, %236, %236, %236 in 0 : vector<32x48xf32>, vector<32x48xf32>, vector<32x48xf32>, vector<32x48xf32>, vector<32x48xf32>, vector<32x48xf32> -> vector<192x48xf32>
    %239 = arith.mulf %238, %14 : vector<192x48xf32>
    %240 = tpu.concatenate %237, %237, %237, %237, %237, %237 in 0 : vector<32x48xf32>, vector<32x48xf32>, vector<32x48xf32>, vector<32x48xf32>, vector<32x48xf32>, vector<32x48xf32> -> vector<192x48xf32>
    %241 = arith.mulf %240, %14 : vector<192x48xf32>
    %cst_87 = arith.constant dense<0.000000e+00> : vector<32x192xf32>
    %242 = tpu.matmul %235, %239, %cst_87 {dimension_numbers = #tpu.dot_dimension_numbers<[1], [1], [0], [0], [0, 0, 1, 0], [], []>} : vector<32x48xf32>, vector<192x48xf32>, vector<32x192xf32> -> vector<32x192xf32>
    %243 = arith.addf %242, %13 : vector<32x192xf32>
    %cst_88 = arith.constant dense<0xFF800000> : vector<32xf32>
    %244 = vector.multi_reduction <maximumf>, %243, %cst_88 [1] : vector<32x192xf32> to vector<32xf32>
    %245 = vector.shape_cast %244 : vector<32xf32> to vector<32x1xf32>
    %246 = vector.broadcast %245 : vector<32x1xf32> to vector<32x192xf32>
    %247 = arith.subf %243, %246 : vector<32x192xf32>
    %248 = math.exp %247 : vector<32x192xf32>
    %cst_89 = arith.constant dense<0.000000e+00> : vector<32x48xf32>
    %249 = tpu.matmul %248, %14, %cst_89 {dimension_numbers = #tpu.dot_dimension_numbers<[1], [0], [0], [1], [0, 0, 1, 1], [], []>} : vector<32x192xf32>, vector<192x48xf32>, vector<32x48xf32> -> vector<32x48xf32>
    %cst_90 = arith.constant dense<0.000000e+00> : vector<32x48xf32>
    %250 = tpu.matmul %248, %241, %cst_90 {dimension_numbers = #tpu.dot_dimension_numbers<[1], [0], [0], [1], [0, 0, 1, 1], [], []>} : vector<32x192xf32>, vector<192x48xf32>, vector<32x48xf32> -> vector<32x48xf32>
    %251 = tpu.reciprocal %249 {approx = true} : vector<32x48xf32> -> vector<32x48xf32>
    %252 = arith.mulf %250, %251 : vector<32x48xf32>
    %c2_91 = arith.constant 2 : index
    %c0_92 = arith.constant 0 : index
    %c0_93 = arith.constant 0 : index
    %253 = vector.load %arg6[%c2_91, %c0_92, %c0_93] : memref<6x48x32xf32, #tpu.memory_space<vmem>>, vector<1x48x32xf32>
    %254 = vector.shape_cast %253 : vector<1x48x32xf32> to vector<48x32xf32>
    %cst_94 = arith.constant dense<0.000000e+00> : vector<32x32xf32>
    %255 = tpu.matmul %252, %254, %cst_94 {dimension_numbers = #tpu.dot_dimension_numbers<[1], [0], [0], [1], [0, 0, 1, 1], [], []>} : vector<32x48xf32>, vector<48x32xf32>, vector<32x32xf32> -> vector<32x32xf32>
    %256 = vector.broadcast %207 : vector<1x32xf32> to vector<32x32xf32>
    %257 = arith.addf %255, %256 : vector<32x32xf32>
    %258 = arith.addf %200, %257 : vector<32x32xf32>
    %cst_95 = arith.constant dense<0.000000e+00> : vector<32xf32>
    %259 = vector.multi_reduction <add>, %258, %cst_95 [1] : vector<32x32xf32> to vector<32xf32>
    %260 = vector.shape_cast %259 : vector<32xf32> to vector<32x1xf32>
    %cst_96 = arith.constant 3.200000e+01 : f32
    %261 = vector.broadcast %cst_96 : f32 to vector<32x1xf32>
    %262 = arith.divf %260, %261 : vector<32x1xf32>
    %263 = vector.broadcast %262 : vector<32x1xf32> to vector<32x32xf32>
    %264 = arith.subf %258, %263 : vector<32x32xf32>
    %265 = arith.mulf %264, %264 : vector<32x32xf32>
    %cst_97 = arith.constant dense<0.000000e+00> : vector<32xf32>
    %266 = vector.multi_reduction <add>, %265, %cst_97 [1] : vector<32x32xf32> to vector<32xf32>
    %267 = vector.shape_cast %266 : vector<32xf32> to vector<32x1xf32>
    %cst_98 = arith.constant 3.200000e+01 : f32
    %268 = vector.broadcast %cst_98 : f32 to vector<32x1xf32>
    %269 = arith.divf %267, %268 : vector<32x1xf32>
    %270 = vector.broadcast %262 : vector<32x1xf32> to vector<32x32xf32>
    %271 = arith.subf %258, %270 : vector<32x32xf32>
    %cst_99 = arith.constant 9.99999974E-6 : f32
    %272 = vector.broadcast %cst_99 : f32 to vector<32x1xf32>
    %273 = arith.addf %269, %272 : vector<32x1xf32>
    %274 = math.rsqrt %273 : vector<32x1xf32>
    %275 = vector.broadcast %274 : vector<32x1xf32> to vector<32x32xf32>
    %276 = arith.mulf %271, %275 : vector<32x32xf32>
    %277 = vector.broadcast %205 : vector<1x32xf32> to vector<32x32xf32>
    %278 = arith.mulf %276, %277 : vector<32x32xf32>
    %279 = vector.broadcast %206 : vector<1x32xf32> to vector<32x32xf32>
    %280 = arith.addf %278, %279 : vector<32x32xf32>
    %c2_100 = arith.constant 2 : index
    %c0_101 = arith.constant 0 : index
    %c0_102 = arith.constant 0 : index
    %281 = vector.load %arg7[%c2_100, %c0_101, %c0_102] : memref<6x32x128xf32, #tpu.memory_space<vmem>>, vector<1x32x128xf32>
    %282 = vector.shape_cast %281 : vector<1x32x128xf32> to vector<32x128xf32>
    %cst_103 = arith.constant dense<0.000000e+00> : vector<32x128xf32>
    %283 = tpu.matmul %280, %282, %cst_103 {dimension_numbers = #tpu.dot_dimension_numbers<[1], [0], [0], [1], [0, 0, 1, 1], [], []>} : vector<32x32xf32>, vector<32x128xf32>, vector<32x128xf32> -> vector<32x128xf32>
    %284 = vector.broadcast %209 : vector<1x128xf32> to vector<32x128xf32>
    %285 = arith.addf %283, %284 : vector<32x128xf32>
    %cst_104 = arith.constant 0.000000e+00 : f32
    %286 = vector.broadcast %cst_104 : f32 to vector<32x128xf32>
    %287 = arith.maximumf %285, %286 : vector<32x128xf32>
    %c2_105 = arith.constant 2 : index
    %c0_106 = arith.constant 0 : index
    %c0_107 = arith.constant 0 : index
    %288 = vector.load %arg8[%c2_105, %c0_106, %c0_107] : memref<6x128x32xf32, #tpu.memory_space<vmem>>, vector<1x128x32xf32>
    %289 = vector.shape_cast %288 : vector<1x128x32xf32> to vector<128x32xf32>
    %cst_108 = arith.constant dense<0.000000e+00> : vector<32x32xf32>
    %290 = tpu.matmul %287, %289, %cst_108 {dimension_numbers = #tpu.dot_dimension_numbers<[1], [0], [0], [1], [0, 0, 1, 1], [], []>} : vector<32x128xf32>, vector<128x32xf32>, vector<32x32xf32> -> vector<32x32xf32>
    %291 = arith.addf %258, %290 : vector<32x32xf32>
    %292 = vector.broadcast %208 : vector<1x32xf32> to vector<32x32xf32>
    %293 = arith.addf %291, %292 : vector<32x32xf32>
    %c3 = arith.constant 3 : index
    %c0_109 = arith.constant 0 : index
    %c0_110 = arith.constant 0 : index
    %294 = vector.load %arg9[%c3, %c0_109, %c0_110] : memref<6x56x128xf32, #tpu.memory_space<vmem>>, vector<1x56x128xf32>
    %295 = vector.shape_cast %294 : vector<1x56x128xf32> to vector<56x128xf32>
    %296 = vector.extract_strided_slice %295 {offsets = [0, 0], sizes = [1, 32], strides = [1, 1]} : vector<56x128xf32> to vector<1x32xf32>
    %297 = vector.extract_strided_slice %295 {offsets = [8, 0], sizes = [1, 32], strides = [1, 1]} : vector<56x128xf32> to vector<1x32xf32>
    %298 = vector.extract_strided_slice %295 {offsets = [16, 0], sizes = [1, 32], strides = [1, 1]} : vector<56x128xf32> to vector<1x32xf32>
    %299 = vector.extract_strided_slice %295 {offsets = [24, 0], sizes = [1, 32], strides = [1, 1]} : vector<56x128xf32> to vector<1x32xf32>
    %300 = vector.extract_strided_slice %295 {offsets = [32, 0], sizes = [1, 32], strides = [1, 1]} : vector<56x128xf32> to vector<1x32xf32>
    %301 = vector.extract_strided_slice %295 {offsets = [40, 0], sizes = [1, 32], strides = [1, 1]} : vector<56x128xf32> to vector<1x32xf32>
    %302 = vector.extract_strided_slice %295 {offsets = [48, 0], sizes = [1, 128], strides = [1, 1]} : vector<56x128xf32> to vector<1x128xf32>
    %cst_111 = arith.constant dense<0.000000e+00> : vector<32xf32>
    %303 = vector.multi_reduction <add>, %293, %cst_111 [1] : vector<32x32xf32> to vector<32xf32>
    %304 = vector.shape_cast %303 : vector<32xf32> to vector<32x1xf32>
    %cst_112 = arith.constant 3.200000e+01 : f32
    %305 = vector.broadcast %cst_112 : f32 to vector<32x1xf32>
    %306 = arith.divf %304, %305 : vector<32x1xf32>
    %307 = vector.broadcast %306 : vector<32x1xf32> to vector<32x32xf32>
    %308 = arith.subf %293, %307 : vector<32x32xf32>
    %309 = arith.mulf %308, %308 : vector<32x32xf32>
    %cst_113 = arith.constant dense<0.000000e+00> : vector<32xf32>
    %310 = vector.multi_reduction <add>, %309, %cst_113 [1] : vector<32x32xf32> to vector<32xf32>
    %311 = vector.shape_cast %310 : vector<32xf32> to vector<32x1xf32>
    %cst_114 = arith.constant 3.200000e+01 : f32
    %312 = vector.broadcast %cst_114 : f32 to vector<32x1xf32>
    %313 = arith.divf %311, %312 : vector<32x1xf32>
    %314 = vector.broadcast %306 : vector<32x1xf32> to vector<32x32xf32>
    %315 = arith.subf %293, %314 : vector<32x32xf32>
    %cst_115 = arith.constant 9.99999974E-6 : f32
    %316 = vector.broadcast %cst_115 : f32 to vector<32x1xf32>
    %317 = arith.addf %313, %316 : vector<32x1xf32>
    %318 = math.rsqrt %317 : vector<32x1xf32>
    %319 = vector.broadcast %318 : vector<32x1xf32> to vector<32x32xf32>
    %320 = arith.mulf %315, %319 : vector<32x32xf32>
    %321 = vector.broadcast %296 : vector<1x32xf32> to vector<32x32xf32>
    %322 = arith.mulf %320, %321 : vector<32x32xf32>
    %323 = vector.broadcast %297 : vector<1x32xf32> to vector<32x32xf32>
    %324 = arith.addf %322, %323 : vector<32x32xf32>
    %c3_116 = arith.constant 3 : index
    %c0_117 = arith.constant 0 : index
    %c0_118 = arith.constant 0 : index
    %325 = vector.load %arg5[%c3_116, %c0_117, %c0_118] : memref<6x32x144xf32, #tpu.memory_space<vmem>>, vector<1x32x144xf32>
    %326 = vector.shape_cast %325 : vector<1x32x144xf32> to vector<32x144xf32>
    %cst_119 = arith.constant dense<0.000000e+00> : vector<32x144xf32>
    %327 = tpu.matmul %324, %326, %cst_119 {dimension_numbers = #tpu.dot_dimension_numbers<[1], [0], [0], [1], [0, 0, 1, 1], [], []>} : vector<32x32xf32>, vector<32x144xf32>, vector<32x144xf32> -> vector<32x144xf32>
    %328 = vector.extract_strided_slice %327 {offsets = [0, 0], sizes = [32, 48], strides = [1, 1]} : vector<32x144xf32> to vector<32x48xf32>
    %329 = vector.extract_strided_slice %327 {offsets = [0, 48], sizes = [32, 48], strides = [1, 1]} : vector<32x144xf32> to vector<32x48xf32>
    %330 = vector.extract_strided_slice %327 {offsets = [0, 96], sizes = [32, 48], strides = [1, 1]} : vector<32x144xf32> to vector<32x48xf32>
    %331 = tpu.concatenate %329, %329, %329, %329, %329, %329 in 0 : vector<32x48xf32>, vector<32x48xf32>, vector<32x48xf32>, vector<32x48xf32>, vector<32x48xf32>, vector<32x48xf32> -> vector<192x48xf32>
    %332 = arith.mulf %331, %14 : vector<192x48xf32>
    %333 = tpu.concatenate %330, %330, %330, %330, %330, %330 in 0 : vector<32x48xf32>, vector<32x48xf32>, vector<32x48xf32>, vector<32x48xf32>, vector<32x48xf32>, vector<32x48xf32> -> vector<192x48xf32>
    %334 = arith.mulf %333, %14 : vector<192x48xf32>
    %cst_120 = arith.constant dense<0.000000e+00> : vector<32x192xf32>
    %335 = tpu.matmul %328, %332, %cst_120 {dimension_numbers = #tpu.dot_dimension_numbers<[1], [1], [0], [0], [0, 0, 1, 0], [], []>} : vector<32x48xf32>, vector<192x48xf32>, vector<32x192xf32> -> vector<32x192xf32>
    %336 = arith.addf %335, %13 : vector<32x192xf32>
    %cst_121 = arith.constant dense<0xFF800000> : vector<32xf32>
    %337 = vector.multi_reduction <maximumf>, %336, %cst_121 [1] : vector<32x192xf32> to vector<32xf32>
    %338 = vector.shape_cast %337 : vector<32xf32> to vector<32x1xf32>
    %339 = vector.broadcast %338 : vector<32x1xf32> to vector<32x192xf32>
    %340 = arith.subf %336, %339 : vector<32x192xf32>
    %341 = math.exp %340 : vector<32x192xf32>
    %cst_122 = arith.constant dense<0.000000e+00> : vector<32x48xf32>
    %342 = tpu.matmul %341, %14, %cst_122 {dimension_numbers = #tpu.dot_dimension_numbers<[1], [0], [0], [1], [0, 0, 1, 1], [], []>} : vector<32x192xf32>, vector<192x48xf32>, vector<32x48xf32> -> vector<32x48xf32>
    %cst_123 = arith.constant dense<0.000000e+00> : vector<32x48xf32>
    %343 = tpu.matmul %341, %334, %cst_123 {dimension_numbers = #tpu.dot_dimension_numbers<[1], [0], [0], [1], [0, 0, 1, 1], [], []>} : vector<32x192xf32>, vector<192x48xf32>, vector<32x48xf32> -> vector<32x48xf32>
    %344 = tpu.reciprocal %342 {approx = true} : vector<32x48xf32> -> vector<32x48xf32>
    %345 = arith.mulf %343, %344 : vector<32x48xf32>
    %c3_124 = arith.constant 3 : index
    %c0_125 = arith.constant 0 : index
    %c0_126 = arith.constant 0 : index
    %346 = vector.load %arg6[%c3_124, %c0_125, %c0_126] : memref<6x48x32xf32, #tpu.memory_space<vmem>>, vector<1x48x32xf32>
    %347 = vector.shape_cast %346 : vector<1x48x32xf32> to vector<48x32xf32>
    %cst_127 = arith.constant dense<0.000000e+00> : vector<32x32xf32>
    %348 = tpu.matmul %345, %347, %cst_127 {dimension_numbers = #tpu.dot_dimension_numbers<[1], [0], [0], [1], [0, 0, 1, 1], [], []>} : vector<32x48xf32>, vector<48x32xf32>, vector<32x32xf32> -> vector<32x32xf32>
    %349 = vector.broadcast %300 : vector<1x32xf32> to vector<32x32xf32>
    %350 = arith.addf %348, %349 : vector<32x32xf32>
    %351 = arith.addf %293, %350 : vector<32x32xf32>
    %cst_128 = arith.constant dense<0.000000e+00> : vector<32xf32>
    %352 = vector.multi_reduction <add>, %351, %cst_128 [1] : vector<32x32xf32> to vector<32xf32>
    %353 = vector.shape_cast %352 : vector<32xf32> to vector<32x1xf32>
    %cst_129 = arith.constant 3.200000e+01 : f32
    %354 = vector.broadcast %cst_129 : f32 to vector<32x1xf32>
    %355 = arith.divf %353, %354 : vector<32x1xf32>
    %356 = vector.broadcast %355 : vector<32x1xf32> to vector<32x32xf32>
    %357 = arith.subf %351, %356 : vector<32x32xf32>
    %358 = arith.mulf %357, %357 : vector<32x32xf32>
    %cst_130 = arith.constant dense<0.000000e+00> : vector<32xf32>
    %359 = vector.multi_reduction <add>, %358, %cst_130 [1] : vector<32x32xf32> to vector<32xf32>
    %360 = vector.shape_cast %359 : vector<32xf32> to vector<32x1xf32>
    %cst_131 = arith.constant 3.200000e+01 : f32
    %361 = vector.broadcast %cst_131 : f32 to vector<32x1xf32>
    %362 = arith.divf %360, %361 : vector<32x1xf32>
    %363 = vector.broadcast %355 : vector<32x1xf32> to vector<32x32xf32>
    %364 = arith.subf %351, %363 : vector<32x32xf32>
    %cst_132 = arith.constant 9.99999974E-6 : f32
    %365 = vector.broadcast %cst_132 : f32 to vector<32x1xf32>
    %366 = arith.addf %362, %365 : vector<32x1xf32>
    %367 = math.rsqrt %366 : vector<32x1xf32>
    %368 = vector.broadcast %367 : vector<32x1xf32> to vector<32x32xf32>
    %369 = arith.mulf %364, %368 : vector<32x32xf32>
    %370 = vector.broadcast %298 : vector<1x32xf32> to vector<32x32xf32>
    %371 = arith.mulf %369, %370 : vector<32x32xf32>
    %372 = vector.broadcast %299 : vector<1x32xf32> to vector<32x32xf32>
    %373 = arith.addf %371, %372 : vector<32x32xf32>
    %c3_133 = arith.constant 3 : index
    %c0_134 = arith.constant 0 : index
    %c0_135 = arith.constant 0 : index
    %374 = vector.load %arg7[%c3_133, %c0_134, %c0_135] : memref<6x32x128xf32, #tpu.memory_space<vmem>>, vector<1x32x128xf32>
    %375 = vector.shape_cast %374 : vector<1x32x128xf32> to vector<32x128xf32>
    %cst_136 = arith.constant dense<0.000000e+00> : vector<32x128xf32>
    %376 = tpu.matmul %373, %375, %cst_136 {dimension_numbers = #tpu.dot_dimension_numbers<[1], [0], [0], [1], [0, 0, 1, 1], [], []>} : vector<32x32xf32>, vector<32x128xf32>, vector<32x128xf32> -> vector<32x128xf32>
    %377 = vector.broadcast %302 : vector<1x128xf32> to vector<32x128xf32>
    %378 = arith.addf %376, %377 : vector<32x128xf32>
    %cst_137 = arith.constant 0.000000e+00 : f32
    %379 = vector.broadcast %cst_137 : f32 to vector<32x128xf32>
    %380 = arith.maximumf %378, %379 : vector<32x128xf32>
    %c3_138 = arith.constant 3 : index
    %c0_139 = arith.constant 0 : index
    %c0_140 = arith.constant 0 : index
    %381 = vector.load %arg8[%c3_138, %c0_139, %c0_140] : memref<6x128x32xf32, #tpu.memory_space<vmem>>, vector<1x128x32xf32>
    %382 = vector.shape_cast %381 : vector<1x128x32xf32> to vector<128x32xf32>
    %cst_141 = arith.constant dense<0.000000e+00> : vector<32x32xf32>
    %383 = tpu.matmul %380, %382, %cst_141 {dimension_numbers = #tpu.dot_dimension_numbers<[1], [0], [0], [1], [0, 0, 1, 1], [], []>} : vector<32x128xf32>, vector<128x32xf32>, vector<32x32xf32> -> vector<32x32xf32>
    %384 = arith.addf %351, %383 : vector<32x32xf32>
    %385 = vector.broadcast %301 : vector<1x32xf32> to vector<32x32xf32>
    %386 = arith.addf %384, %385 : vector<32x32xf32>
    %c4 = arith.constant 4 : index
    %c0_142 = arith.constant 0 : index
    %c0_143 = arith.constant 0 : index
    %387 = vector.load %arg9[%c4, %c0_142, %c0_143] : memref<6x56x128xf32, #tpu.memory_space<vmem>>, vector<1x56x128xf32>
    %388 = vector.shape_cast %387 : vector<1x56x128xf32> to vector<56x128xf32>
    %389 = vector.extract_strided_slice %388 {offsets = [0, 0], sizes = [1, 32], strides = [1, 1]} : vector<56x128xf32> to vector<1x32xf32>
    %390 = vector.extract_strided_slice %388 {offsets = [8, 0], sizes = [1, 32], strides = [1, 1]} : vector<56x128xf32> to vector<1x32xf32>
    %391 = vector.extract_strided_slice %388 {offsets = [16, 0], sizes = [1, 32], strides = [1, 1]} : vector<56x128xf32> to vector<1x32xf32>
    %392 = vector.extract_strided_slice %388 {offsets = [24, 0], sizes = [1, 32], strides = [1, 1]} : vector<56x128xf32> to vector<1x32xf32>
    %393 = vector.extract_strided_slice %388 {offsets = [32, 0], sizes = [1, 32], strides = [1, 1]} : vector<56x128xf32> to vector<1x32xf32>
    %394 = vector.extract_strided_slice %388 {offsets = [40, 0], sizes = [1, 32], strides = [1, 1]} : vector<56x128xf32> to vector<1x32xf32>
    %395 = vector.extract_strided_slice %388 {offsets = [48, 0], sizes = [1, 128], strides = [1, 1]} : vector<56x128xf32> to vector<1x128xf32>
    %cst_144 = arith.constant dense<0.000000e+00> : vector<32xf32>
    %396 = vector.multi_reduction <add>, %386, %cst_144 [1] : vector<32x32xf32> to vector<32xf32>
    %397 = vector.shape_cast %396 : vector<32xf32> to vector<32x1xf32>
    %cst_145 = arith.constant 3.200000e+01 : f32
    %398 = vector.broadcast %cst_145 : f32 to vector<32x1xf32>
    %399 = arith.divf %397, %398 : vector<32x1xf32>
    %400 = vector.broadcast %399 : vector<32x1xf32> to vector<32x32xf32>
    %401 = arith.subf %386, %400 : vector<32x32xf32>
    %402 = arith.mulf %401, %401 : vector<32x32xf32>
    %cst_146 = arith.constant dense<0.000000e+00> : vector<32xf32>
    %403 = vector.multi_reduction <add>, %402, %cst_146 [1] : vector<32x32xf32> to vector<32xf32>
    %404 = vector.shape_cast %403 : vector<32xf32> to vector<32x1xf32>
    %cst_147 = arith.constant 3.200000e+01 : f32
    %405 = vector.broadcast %cst_147 : f32 to vector<32x1xf32>
    %406 = arith.divf %404, %405 : vector<32x1xf32>
    %407 = vector.broadcast %399 : vector<32x1xf32> to vector<32x32xf32>
    %408 = arith.subf %386, %407 : vector<32x32xf32>
    %cst_148 = arith.constant 9.99999974E-6 : f32
    %409 = vector.broadcast %cst_148 : f32 to vector<32x1xf32>
    %410 = arith.addf %406, %409 : vector<32x1xf32>
    %411 = math.rsqrt %410 : vector<32x1xf32>
    %412 = vector.broadcast %411 : vector<32x1xf32> to vector<32x32xf32>
    %413 = arith.mulf %408, %412 : vector<32x32xf32>
    %414 = vector.broadcast %389 : vector<1x32xf32> to vector<32x32xf32>
    %415 = arith.mulf %413, %414 : vector<32x32xf32>
    %416 = vector.broadcast %390 : vector<1x32xf32> to vector<32x32xf32>
    %417 = arith.addf %415, %416 : vector<32x32xf32>
    %c4_149 = arith.constant 4 : index
    %c0_150 = arith.constant 0 : index
    %c0_151 = arith.constant 0 : index
    %418 = vector.load %arg5[%c4_149, %c0_150, %c0_151] : memref<6x32x144xf32, #tpu.memory_space<vmem>>, vector<1x32x144xf32>
    %419 = vector.shape_cast %418 : vector<1x32x144xf32> to vector<32x144xf32>
    %cst_152 = arith.constant dense<0.000000e+00> : vector<32x144xf32>
    %420 = tpu.matmul %417, %419, %cst_152 {dimension_numbers = #tpu.dot_dimension_numbers<[1], [0], [0], [1], [0, 0, 1, 1], [], []>} : vector<32x32xf32>, vector<32x144xf32>, vector<32x144xf32> -> vector<32x144xf32>
    %421 = vector.extract_strided_slice %420 {offsets = [0, 0], sizes = [32, 48], strides = [1, 1]} : vector<32x144xf32> to vector<32x48xf32>
    %422 = vector.extract_strided_slice %420 {offsets = [0, 48], sizes = [32, 48], strides = [1, 1]} : vector<32x144xf32> to vector<32x48xf32>
    %423 = vector.extract_strided_slice %420 {offsets = [0, 96], sizes = [32, 48], strides = [1, 1]} : vector<32x144xf32> to vector<32x48xf32>
    %424 = tpu.concatenate %422, %422, %422, %422, %422, %422 in 0 : vector<32x48xf32>, vector<32x48xf32>, vector<32x48xf32>, vector<32x48xf32>, vector<32x48xf32>, vector<32x48xf32> -> vector<192x48xf32>
    %425 = arith.mulf %424, %14 : vector<192x48xf32>
    %426 = tpu.concatenate %423, %423, %423, %423, %423, %423 in 0 : vector<32x48xf32>, vector<32x48xf32>, vector<32x48xf32>, vector<32x48xf32>, vector<32x48xf32>, vector<32x48xf32> -> vector<192x48xf32>
    %427 = arith.mulf %426, %14 : vector<192x48xf32>
    %cst_153 = arith.constant dense<0.000000e+00> : vector<32x192xf32>
    %428 = tpu.matmul %421, %425, %cst_153 {dimension_numbers = #tpu.dot_dimension_numbers<[1], [1], [0], [0], [0, 0, 1, 0], [], []>} : vector<32x48xf32>, vector<192x48xf32>, vector<32x192xf32> -> vector<32x192xf32>
    %429 = arith.addf %428, %13 : vector<32x192xf32>
    %cst_154 = arith.constant dense<0xFF800000> : vector<32xf32>
    %430 = vector.multi_reduction <maximumf>, %429, %cst_154 [1] : vector<32x192xf32> to vector<32xf32>
    %431 = vector.shape_cast %430 : vector<32xf32> to vector<32x1xf32>
    %432 = vector.broadcast %431 : vector<32x1xf32> to vector<32x192xf32>
    %433 = arith.subf %429, %432 : vector<32x192xf32>
    %434 = math.exp %433 : vector<32x192xf32>
    %cst_155 = arith.constant dense<0.000000e+00> : vector<32x48xf32>
    %435 = tpu.matmul %434, %14, %cst_155 {dimension_numbers = #tpu.dot_dimension_numbers<[1], [0], [0], [1], [0, 0, 1, 1], [], []>} : vector<32x192xf32>, vector<192x48xf32>, vector<32x48xf32> -> vector<32x48xf32>
    %cst_156 = arith.constant dense<0.000000e+00> : vector<32x48xf32>
    %436 = tpu.matmul %434, %427, %cst_156 {dimension_numbers = #tpu.dot_dimension_numbers<[1], [0], [0], [1], [0, 0, 1, 1], [], []>} : vector<32x192xf32>, vector<192x48xf32>, vector<32x48xf32> -> vector<32x48xf32>
    %437 = tpu.reciprocal %435 {approx = true} : vector<32x48xf32> -> vector<32x48xf32>
    %438 = arith.mulf %436, %437 : vector<32x48xf32>
    %c4_157 = arith.constant 4 : index
    %c0_158 = arith.constant 0 : index
    %c0_159 = arith.constant 0 : index
    %439 = vector.load %arg6[%c4_157, %c0_158, %c0_159] : memref<6x48x32xf32, #tpu.memory_space<vmem>>, vector<1x48x32xf32>
    %440 = vector.shape_cast %439 : vector<1x48x32xf32> to vector<48x32xf32>
    %cst_160 = arith.constant dense<0.000000e+00> : vector<32x32xf32>
    %441 = tpu.matmul %438, %440, %cst_160 {dimension_numbers = #tpu.dot_dimension_numbers<[1], [0], [0], [1], [0, 0, 1, 1], [], []>} : vector<32x48xf32>, vector<48x32xf32>, vector<32x32xf32> -> vector<32x32xf32>
    %442 = vector.broadcast %393 : vector<1x32xf32> to vector<32x32xf32>
    %443 = arith.addf %441, %442 : vector<32x32xf32>
    %444 = arith.addf %386, %443 : vector<32x32xf32>
    %cst_161 = arith.constant dense<0.000000e+00> : vector<32xf32>
    %445 = vector.multi_reduction <add>, %444, %cst_161 [1] : vector<32x32xf32> to vector<32xf32>
    %446 = vector.shape_cast %445 : vector<32xf32> to vector<32x1xf32>
    %cst_162 = arith.constant 3.200000e+01 : f32
    %447 = vector.broadcast %cst_162 : f32 to vector<32x1xf32>
    %448 = arith.divf %446, %447 : vector<32x1xf32>
    %449 = vector.broadcast %448 : vector<32x1xf32> to vector<32x32xf32>
    %450 = arith.subf %444, %449 : vector<32x32xf32>
    %451 = arith.mulf %450, %450 : vector<32x32xf32>
    %cst_163 = arith.constant dense<0.000000e+00> : vector<32xf32>
    %452 = vector.multi_reduction <add>, %451, %cst_163 [1] : vector<32x32xf32> to vector<32xf32>
    %453 = vector.shape_cast %452 : vector<32xf32> to vector<32x1xf32>
    %cst_164 = arith.constant 3.200000e+01 : f32
    %454 = vector.broadcast %cst_164 : f32 to vector<32x1xf32>
    %455 = arith.divf %453, %454 : vector<32x1xf32>
    %456 = vector.broadcast %448 : vector<32x1xf32> to vector<32x32xf32>
    %457 = arith.subf %444, %456 : vector<32x32xf32>
    %cst_165 = arith.constant 9.99999974E-6 : f32
    %458 = vector.broadcast %cst_165 : f32 to vector<32x1xf32>
    %459 = arith.addf %455, %458 : vector<32x1xf32>
    %460 = math.rsqrt %459 : vector<32x1xf32>
    %461 = vector.broadcast %460 : vector<32x1xf32> to vector<32x32xf32>
    %462 = arith.mulf %457, %461 : vector<32x32xf32>
    %463 = vector.broadcast %391 : vector<1x32xf32> to vector<32x32xf32>
    %464 = arith.mulf %462, %463 : vector<32x32xf32>
    %465 = vector.broadcast %392 : vector<1x32xf32> to vector<32x32xf32>
    %466 = arith.addf %464, %465 : vector<32x32xf32>
    %c4_166 = arith.constant 4 : index
    %c0_167 = arith.constant 0 : index
    %c0_168 = arith.constant 0 : index
    %467 = vector.load %arg7[%c4_166, %c0_167, %c0_168] : memref<6x32x128xf32, #tpu.memory_space<vmem>>, vector<1x32x128xf32>
    %468 = vector.shape_cast %467 : vector<1x32x128xf32> to vector<32x128xf32>
    %cst_169 = arith.constant dense<0.000000e+00> : vector<32x128xf32>
    %469 = tpu.matmul %466, %468, %cst_169 {dimension_numbers = #tpu.dot_dimension_numbers<[1], [0], [0], [1], [0, 0, 1, 1], [], []>} : vector<32x32xf32>, vector<32x128xf32>, vector<32x128xf32> -> vector<32x128xf32>
    %470 = vector.broadcast %395 : vector<1x128xf32> to vector<32x128xf32>
    %471 = arith.addf %469, %470 : vector<32x128xf32>
    %cst_170 = arith.constant 0.000000e+00 : f32
    %472 = vector.broadcast %cst_170 : f32 to vector<32x128xf32>
    %473 = arith.maximumf %471, %472 : vector<32x128xf32>
    %c4_171 = arith.constant 4 : index
    %c0_172 = arith.constant 0 : index
    %c0_173 = arith.constant 0 : index
    %474 = vector.load %arg8[%c4_171, %c0_172, %c0_173] : memref<6x128x32xf32, #tpu.memory_space<vmem>>, vector<1x128x32xf32>
    %475 = vector.shape_cast %474 : vector<1x128x32xf32> to vector<128x32xf32>
    %cst_174 = arith.constant dense<0.000000e+00> : vector<32x32xf32>
    %476 = tpu.matmul %473, %475, %cst_174 {dimension_numbers = #tpu.dot_dimension_numbers<[1], [0], [0], [1], [0, 0, 1, 1], [], []>} : vector<32x128xf32>, vector<128x32xf32>, vector<32x32xf32> -> vector<32x32xf32>
    %477 = arith.addf %444, %476 : vector<32x32xf32>
    %478 = vector.broadcast %394 : vector<1x32xf32> to vector<32x32xf32>
    %479 = arith.addf %477, %478 : vector<32x32xf32>
    %c5 = arith.constant 5 : index
    %c0_175 = arith.constant 0 : index
    %c0_176 = arith.constant 0 : index
    %480 = vector.load %arg9[%c5, %c0_175, %c0_176] : memref<6x56x128xf32, #tpu.memory_space<vmem>>, vector<1x56x128xf32>
    %481 = vector.shape_cast %480 : vector<1x56x128xf32> to vector<56x128xf32>
    %482 = vector.extract_strided_slice %481 {offsets = [0, 0], sizes = [1, 32], strides = [1, 1]} : vector<56x128xf32> to vector<1x32xf32>
    %483 = vector.extract_strided_slice %481 {offsets = [8, 0], sizes = [1, 32], strides = [1, 1]} : vector<56x128xf32> to vector<1x32xf32>
    %484 = vector.extract_strided_slice %481 {offsets = [16, 0], sizes = [1, 32], strides = [1, 1]} : vector<56x128xf32> to vector<1x32xf32>
    %485 = vector.extract_strided_slice %481 {offsets = [24, 0], sizes = [1, 32], strides = [1, 1]} : vector<56x128xf32> to vector<1x32xf32>
    %486 = vector.extract_strided_slice %481 {offsets = [32, 0], sizes = [1, 32], strides = [1, 1]} : vector<56x128xf32> to vector<1x32xf32>
    %487 = vector.extract_strided_slice %481 {offsets = [40, 0], sizes = [1, 32], strides = [1, 1]} : vector<56x128xf32> to vector<1x32xf32>
    %488 = vector.extract_strided_slice %481 {offsets = [48, 0], sizes = [1, 128], strides = [1, 1]} : vector<56x128xf32> to vector<1x128xf32>
    %cst_177 = arith.constant dense<0.000000e+00> : vector<32xf32>
    %489 = vector.multi_reduction <add>, %479, %cst_177 [1] : vector<32x32xf32> to vector<32xf32>
    %490 = vector.shape_cast %489 : vector<32xf32> to vector<32x1xf32>
    %cst_178 = arith.constant 3.200000e+01 : f32
    %491 = vector.broadcast %cst_178 : f32 to vector<32x1xf32>
    %492 = arith.divf %490, %491 : vector<32x1xf32>
    %493 = vector.broadcast %492 : vector<32x1xf32> to vector<32x32xf32>
    %494 = arith.subf %479, %493 : vector<32x32xf32>
    %495 = arith.mulf %494, %494 : vector<32x32xf32>
    %cst_179 = arith.constant dense<0.000000e+00> : vector<32xf32>
    %496 = vector.multi_reduction <add>, %495, %cst_179 [1] : vector<32x32xf32> to vector<32xf32>
    %497 = vector.shape_cast %496 : vector<32xf32> to vector<32x1xf32>
    %cst_180 = arith.constant 3.200000e+01 : f32
    %498 = vector.broadcast %cst_180 : f32 to vector<32x1xf32>
    %499 = arith.divf %497, %498 : vector<32x1xf32>
    %500 = vector.broadcast %492 : vector<32x1xf32> to vector<32x32xf32>
    %501 = arith.subf %479, %500 : vector<32x32xf32>
    %cst_181 = arith.constant 9.99999974E-6 : f32
    %502 = vector.broadcast %cst_181 : f32 to vector<32x1xf32>
    %503 = arith.addf %499, %502 : vector<32x1xf32>
    %504 = math.rsqrt %503 : vector<32x1xf32>
    %505 = vector.broadcast %504 : vector<32x1xf32> to vector<32x32xf32>
    %506 = arith.mulf %501, %505 : vector<32x32xf32>
    %507 = vector.broadcast %482 : vector<1x32xf32> to vector<32x32xf32>
    %508 = arith.mulf %506, %507 : vector<32x32xf32>
    %509 = vector.broadcast %483 : vector<1x32xf32> to vector<32x32xf32>
    %510 = arith.addf %508, %509 : vector<32x32xf32>
    %c5_182 = arith.constant 5 : index
    %c0_183 = arith.constant 0 : index
    %c0_184 = arith.constant 0 : index
    %511 = vector.load %arg5[%c5_182, %c0_183, %c0_184] : memref<6x32x144xf32, #tpu.memory_space<vmem>>, vector<1x32x144xf32>
    %512 = vector.shape_cast %511 : vector<1x32x144xf32> to vector<32x144xf32>
    %cst_185 = arith.constant dense<0.000000e+00> : vector<32x144xf32>
    %513 = tpu.matmul %510, %512, %cst_185 {dimension_numbers = #tpu.dot_dimension_numbers<[1], [0], [0], [1], [0, 0, 1, 1], [], []>} : vector<32x32xf32>, vector<32x144xf32>, vector<32x144xf32> -> vector<32x144xf32>
    %514 = vector.extract_strided_slice %513 {offsets = [0, 0], sizes = [32, 48], strides = [1, 1]} : vector<32x144xf32> to vector<32x48xf32>
    %515 = vector.extract_strided_slice %513 {offsets = [0, 48], sizes = [32, 48], strides = [1, 1]} : vector<32x144xf32> to vector<32x48xf32>
    %516 = vector.extract_strided_slice %513 {offsets = [0, 96], sizes = [32, 48], strides = [1, 1]} : vector<32x144xf32> to vector<32x48xf32>
    %517 = tpu.concatenate %515, %515, %515, %515, %515, %515 in 0 : vector<32x48xf32>, vector<32x48xf32>, vector<32x48xf32>, vector<32x48xf32>, vector<32x48xf32>, vector<32x48xf32> -> vector<192x48xf32>
    %518 = arith.mulf %517, %14 : vector<192x48xf32>
    %519 = tpu.concatenate %516, %516, %516, %516, %516, %516 in 0 : vector<32x48xf32>, vector<32x48xf32>, vector<32x48xf32>, vector<32x48xf32>, vector<32x48xf32>, vector<32x48xf32> -> vector<192x48xf32>
    %520 = arith.mulf %519, %14 : vector<192x48xf32>
    %cst_186 = arith.constant dense<0.000000e+00> : vector<32x192xf32>
    %521 = tpu.matmul %514, %518, %cst_186 {dimension_numbers = #tpu.dot_dimension_numbers<[1], [1], [0], [0], [0, 0, 1, 0], [], []>} : vector<32x48xf32>, vector<192x48xf32>, vector<32x192xf32> -> vector<32x192xf32>
    %522 = arith.addf %521, %13 : vector<32x192xf32>
    %cst_187 = arith.constant dense<0xFF800000> : vector<32xf32>
    %523 = vector.multi_reduction <maximumf>, %522, %cst_187 [1] : vector<32x192xf32> to vector<32xf32>
    %524 = vector.shape_cast %523 : vector<32xf32> to vector<32x1xf32>
    %525 = vector.broadcast %524 : vector<32x1xf32> to vector<32x192xf32>
    %526 = arith.subf %522, %525 : vector<32x192xf32>
    %527 = math.exp %526 : vector<32x192xf32>
    %cst_188 = arith.constant dense<0.000000e+00> : vector<32x48xf32>
    %528 = tpu.matmul %527, %14, %cst_188 {dimension_numbers = #tpu.dot_dimension_numbers<[1], [0], [0], [1], [0, 0, 1, 1], [], []>} : vector<32x192xf32>, vector<192x48xf32>, vector<32x48xf32> -> vector<32x48xf32>
    %cst_189 = arith.constant dense<0.000000e+00> : vector<32x48xf32>
    %529 = tpu.matmul %527, %520, %cst_189 {dimension_numbers = #tpu.dot_dimension_numbers<[1], [0], [0], [1], [0, 0, 1, 1], [], []>} : vector<32x192xf32>, vector<192x48xf32>, vector<32x48xf32> -> vector<32x48xf32>
    %530 = tpu.reciprocal %528 {approx = true} : vector<32x48xf32> -> vector<32x48xf32>
    %531 = arith.mulf %529, %530 : vector<32x48xf32>
    %c5_190 = arith.constant 5 : index
    %c0_191 = arith.constant 0 : index
    %c0_192 = arith.constant 0 : index
    %532 = vector.load %arg6[%c5_190, %c0_191, %c0_192] : memref<6x48x32xf32, #tpu.memory_space<vmem>>, vector<1x48x32xf32>
    %533 = vector.shape_cast %532 : vector<1x48x32xf32> to vector<48x32xf32>
    %cst_193 = arith.constant dense<0.000000e+00> : vector<32x32xf32>
    %534 = tpu.matmul %531, %533, %cst_193 {dimension_numbers = #tpu.dot_dimension_numbers<[1], [0], [0], [1], [0, 0, 1, 1], [], []>} : vector<32x48xf32>, vector<48x32xf32>, vector<32x32xf32> -> vector<32x32xf32>
    %535 = vector.broadcast %486 : vector<1x32xf32> to vector<32x32xf32>
    %536 = arith.addf %534, %535 : vector<32x32xf32>
    %537 = arith.addf %479, %536 : vector<32x32xf32>
    %cst_194 = arith.constant dense<0.000000e+00> : vector<32xf32>
    %538 = vector.multi_reduction <add>, %537, %cst_194 [1] : vector<32x32xf32> to vector<32xf32>
    %539 = vector.shape_cast %538 : vector<32xf32> to vector<32x1xf32>
    %cst_195 = arith.constant 3.200000e+01 : f32
    %540 = vector.broadcast %cst_195 : f32 to vector<32x1xf32>
    %541 = arith.divf %539, %540 : vector<32x1xf32>
    %542 = vector.broadcast %541 : vector<32x1xf32> to vector<32x32xf32>
    %543 = arith.subf %537, %542 : vector<32x32xf32>
    %544 = arith.mulf %543, %543 : vector<32x32xf32>
    %cst_196 = arith.constant dense<0.000000e+00> : vector<32xf32>
    %545 = vector.multi_reduction <add>, %544, %cst_196 [1] : vector<32x32xf32> to vector<32xf32>
    %546 = vector.shape_cast %545 : vector<32xf32> to vector<32x1xf32>
    %cst_197 = arith.constant 3.200000e+01 : f32
    %547 = vector.broadcast %cst_197 : f32 to vector<32x1xf32>
    %548 = arith.divf %546, %547 : vector<32x1xf32>
    %549 = vector.broadcast %541 : vector<32x1xf32> to vector<32x32xf32>
    %550 = arith.subf %537, %549 : vector<32x32xf32>
    %cst_198 = arith.constant 9.99999974E-6 : f32
    %551 = vector.broadcast %cst_198 : f32 to vector<32x1xf32>
    %552 = arith.addf %548, %551 : vector<32x1xf32>
    %553 = math.rsqrt %552 : vector<32x1xf32>
    %554 = vector.broadcast %553 : vector<32x1xf32> to vector<32x32xf32>
    %555 = arith.mulf %550, %554 : vector<32x32xf32>
    %556 = vector.broadcast %484 : vector<1x32xf32> to vector<32x32xf32>
    %557 = arith.mulf %555, %556 : vector<32x32xf32>
    %558 = vector.broadcast %485 : vector<1x32xf32> to vector<32x32xf32>
    %559 = arith.addf %557, %558 : vector<32x32xf32>
    %c5_199 = arith.constant 5 : index
    %c0_200 = arith.constant 0 : index
    %c0_201 = arith.constant 0 : index
    %560 = vector.load %arg7[%c5_199, %c0_200, %c0_201] : memref<6x32x128xf32, #tpu.memory_space<vmem>>, vector<1x32x128xf32>
    %561 = vector.shape_cast %560 : vector<1x32x128xf32> to vector<32x128xf32>
    %cst_202 = arith.constant dense<0.000000e+00> : vector<32x128xf32>
    %562 = tpu.matmul %559, %561, %cst_202 {dimension_numbers = #tpu.dot_dimension_numbers<[1], [0], [0], [1], [0, 0, 1, 1], [], []>} : vector<32x32xf32>, vector<32x128xf32>, vector<32x128xf32> -> vector<32x128xf32>
    %563 = vector.broadcast %488 : vector<1x128xf32> to vector<32x128xf32>
    %564 = arith.addf %562, %563 : vector<32x128xf32>
    %cst_203 = arith.constant 0.000000e+00 : f32
    %565 = vector.broadcast %cst_203 : f32 to vector<32x128xf32>
    %566 = arith.maximumf %564, %565 : vector<32x128xf32>
    %c5_204 = arith.constant 5 : index
    %c0_205 = arith.constant 0 : index
    %c0_206 = arith.constant 0 : index
    %567 = vector.load %arg8[%c5_204, %c0_205, %c0_206] : memref<6x128x32xf32, #tpu.memory_space<vmem>>, vector<1x128x32xf32>
    %568 = vector.shape_cast %567 : vector<1x128x32xf32> to vector<128x32xf32>
    %cst_207 = arith.constant dense<0.000000e+00> : vector<32x32xf32>
    %569 = tpu.matmul %566, %568, %cst_207 {dimension_numbers = #tpu.dot_dimension_numbers<[1], [0], [0], [1], [0, 0, 1, 1], [], []>} : vector<32x128xf32>, vector<128x32xf32>, vector<32x32xf32> -> vector<32x32xf32>
    %570 = arith.addf %537, %569 : vector<32x32xf32>
    %571 = vector.broadcast %487 : vector<1x32xf32> to vector<32x32xf32>
    %572 = arith.addf %570, %571 : vector<32x32xf32>
    %cst_208 = arith.constant dense<0.000000e+00> : vector<32xf32>
    %573 = vector.multi_reduction <add>, %572, %cst_208 [1] : vector<32x32xf32> to vector<32xf32>
    %574 = vector.shape_cast %573 : vector<32xf32> to vector<32x1xf32>
    %cst_209 = arith.constant 3.200000e+01 : f32
    %575 = vector.broadcast %cst_209 : f32 to vector<32x1xf32>
    %576 = arith.divf %574, %575 : vector<32x1xf32>
    %577 = vector.broadcast %576 : vector<32x1xf32> to vector<32x32xf32>
    %578 = arith.subf %572, %577 : vector<32x32xf32>
    %579 = arith.mulf %578, %578 : vector<32x32xf32>
    %cst_210 = arith.constant dense<0.000000e+00> : vector<32xf32>
    %580 = vector.multi_reduction <add>, %579, %cst_210 [1] : vector<32x32xf32> to vector<32xf32>
    %581 = vector.shape_cast %580 : vector<32xf32> to vector<32x1xf32>
    %cst_211 = arith.constant 3.200000e+01 : f32
    %582 = vector.broadcast %cst_211 : f32 to vector<32x1xf32>
    %583 = arith.divf %581, %582 : vector<32x1xf32>
    %584 = vector.broadcast %576 : vector<32x1xf32> to vector<32x32xf32>
    %585 = arith.subf %572, %584 : vector<32x32xf32>
    %cst_212 = arith.constant 9.99999974E-6 : f32
    %586 = vector.broadcast %cst_212 : f32 to vector<32x1xf32>
    %587 = arith.addf %583, %586 : vector<32x1xf32>
    %588 = math.rsqrt %587 : vector<32x1xf32>
    %589 = vector.broadcast %588 : vector<32x1xf32> to vector<32x32xf32>
    %590 = arith.mulf %585, %589 : vector<32x32xf32>
    %591 = vector.broadcast %3 : vector<1x32xf32> to vector<32x32xf32>
    %592 = arith.mulf %590, %591 : vector<32x32xf32>
    %593 = vector.broadcast %4 : vector<1x32xf32> to vector<32x32xf32>
    %594 = arith.addf %592, %593 : vector<32x32xf32>
    %cst_213 = arith.constant dense<0.000000e+00> : vector<32x32xf32>
    %595 = tpu.matmul %594, %6, %cst_213 {dimension_numbers = #tpu.dot_dimension_numbers<[1], [0], [0], [1], [0, 0, 1, 1], [], []>} : vector<32x32xf32>, vector<32x32xf32>, vector<32x32xf32> -> vector<32x32xf32>
    %596 = vector.broadcast %5 : vector<1x32xf32> to vector<32x32xf32>
    %597 = arith.addf %595, %596 : vector<32x32xf32>
    %c0_214 = arith.constant 0 : index
    %c0_215 = arith.constant 0 : index
    %598 = vector.load %arg11[%c0_214, %c0_215] : memref<32x32xf32, #tpu.memory_space<vmem>>, vector<32x32xf32>
    tpu.vector_store %arg11[%c0_214, %c0_215], %597 {strides = array<i32>} : memref<32x32xf32, #tpu.memory_space<vmem>>, vector<32x32xf32>,
    return
  }
  func.func @transform_0(%arg0: i32) -> (i32, i32) {
    %c0_i32 = arith.constant 0 : i32
    %c0_i32_0 = arith.constant 0 : i32
    return %arg0, %c0_i32 : i32, i32
  }
  func.func @transform_1(%arg0: i32) -> (i32, i32) {
    %c0_i32 = arith.constant 0 : i32
    %c0_i32_0 = arith.constant 0 : i32
    return %arg0, %c0_i32 : i32, i32
  }
  func.func @transform_2(%arg0: i32) -> (i32, i32) {
    %c0_i32 = arith.constant 0 : i32
    %c0_i32_0 = arith.constant 0 : i32
    %c0_i32_1 = arith.constant 0 : i32
    return %c0_i32, %c0_i32_0 : i32, i32
  }
  func.func @transform_3(%arg0: i32) -> (i32, i32) {
    %c0_i32 = arith.constant 0 : i32
    %c0_i32_0 = arith.constant 0 : i32
    %c0_i32_1 = arith.constant 0 : i32
    return %c0_i32, %c0_i32_0 : i32, i32
  }
  func.func @transform_4(%arg0: i32) -> (i32, i32, i32) {
    %c0_i32 = arith.constant 0 : i32
    %c0_i32_0 = arith.constant 0 : i32
    %c0_i32_1 = arith.constant 0 : i32
    %c0_i32_2 = arith.constant 0 : i32
    return %c0_i32, %c0_i32_0, %c0_i32_1 : i32, i32, i32
  }
  func.func @transform_5(%arg0: i32) -> (i32, i32, i32) {
    %c0_i32 = arith.constant 0 : i32
    %c0_i32_0 = arith.constant 0 : i32
    %c0_i32_1 = arith.constant 0 : i32
    %c0_i32_2 = arith.constant 0 : i32
    return %c0_i32, %c0_i32_0, %c0_i32_1 : i32, i32, i32
  }
  func.func @transform_6(%arg0: i32) -> (i32, i32, i32) {
    %c0_i32 = arith.constant 0 : i32
    %c0_i32_0 = arith.constant 0 : i32
    %c0_i32_1 = arith.constant 0 : i32
    %c0_i32_2 = arith.constant 0 : i32
    return %c0_i32, %c0_i32_0, %c0_i32_1 : i32, i32, i32
  }
  func.func @transform_7(%arg0: i32) -> (i32, i32, i32) {
    %c0_i32 = arith.constant 0 : i32
    %c0_i32_0 = arith.constant 0 : i32
    %c0_i32_1 = arith.constant 0 : i32
    %c0_i32_2 = arith.constant 0 : i32
    return %c0_i32, %c0_i32_0, %c0_i32_1 : i32, i32, i32
  }
  func.func @transform_8(%arg0: i32) -> (i32, i32, i32) {
    %c0_i32 = arith.constant 0 : i32
    %c0_i32_0 = arith.constant 0 : i32
    %c0_i32_1 = arith.constant 0 : i32
    %c0_i32_2 = arith.constant 0 : i32
    return %c0_i32, %c0_i32_0, %c0_i32_1 : i32, i32, i32
  }
  func.func @transform_9(%arg0: i32) -> (i32, i32) {
    %c0_i32 = arith.constant 0 : i32
    %c0_i32_0 = arith.constant 0 : i32
    %c0_i32_1 = arith.constant 0 : i32
    return %c0_i32, %c0_i32_0 : i32, i32
  }
  func.func @transform_10(%arg0: i32) -> (i32, i32) {
    %c0_i32 = arith.constant 0 : i32
    %c0_i32_0 = arith.constant 0 : i32
    return %arg0, %c0_i32 : i32, i32
  }
}

</mosaic_0001>

<bundles_post_ra>
// kernel: tpu_custom_call.1
= control target key start
LH: loop header
LB: loop body
LE: loop exit
PB: predicated region body
PF: predicated region fallthrough
CT: control target
= control target key end

     0   :  { %vm50_vm0 = vcmask 64512   ;;  %s13109_s0 = inlined_call_operand.vmem [shape: f32[32,32], index: 0, kind: input, shape index: {}]   ;;  %s13110_s1 = inlined_call_operand.vmem [shape: f32[32,8], index: 1, kind: input, shape index: {}]   ;;  %s13111_s2 = inlined_call_operand.vmem [shape: f32[32,192], index: 2, kind: input, shape index: {}]   ;;  %s13112_s3 = inlined_call_operand.vmem [shape: f32[192,48], index: 3, kind: input, shape index: {}]   ;;  %s13113_s4 = inlined_call_operand.vmem [shape: f32[6,32,144], index: 4, kind: input, shape index: {}]   ;;  %s13114_s5 = inlined_call_operand.vmem [shape: f32[6,48,32], index: 5, kind: input, shape index: {}]   ;;  %s13115_s6 = inlined_call_operand.vmem [shape: f32[6,32,128], index: 6, kind: input, shape index: {}]   ;;  %s13116_s7 = inlined_call_operand.vmem [shape: f32[6,128,32], index: 7, kind: input, shape index: {}]   ;;  %s13117_s8 = inlined_call_operand.vmem [shape: f32[6,56,128], index: 8, kind: input, shape index: {}]   ;;  %s13118_s9 = inlined_call_operand.vmem [shape: f32[72,32], index: 9, kind: input, shape index: {}]   ;;  %s13119_s10 = inlined_call_operand.hbm [shape: f32[32,32], index: 10, kind: output, shape index: {}]  }
   0x1   :  { %v36_v0 = vld [vmem:[%s13118_s9] sm:$0xff] }
   0x2   :  { %v45_v1 = vld [vmem:[%s13110_s1] sm:$0xff]  ;;  %78 = vmatpush.msra.mxu0 %v36_v0 }
   0x3   :  { %6899 = vmatmul.msk.f32.vlgmr.msra.gmra.mxu0 %vm50_vm0, %v45_v1 }
   0x4   :  { %15 = vsyncpa [#allocation3], 0  ;;  %v46_v2 = vld [vmem:[%s13110_s1 + $0x8] sm:$0xff]  ;;  %v47_v3 = vld [vmem:[%s13110_s1 + $0x10] sm:$0xff]  ;;  %vm139_vm1 = vcmask 261120   ;;  %v8628_v27 = vmov 32.0  }
   0x5   :  { %v48_v4 = vld [vmem:[%s13110_s1 + $0x18] sm:$0xff]  ;;  %v37_v5 = vld [vmem:[%s13118_s9 + $0x8] sm:$0xff]  ;;  %v92_v8 = vld [vmem:[%s13109_s0] sm:$0xff]  ;;  %8192 = vrcp.f32 %v8628_v27  ;;  %s8629_s13 = smov 48   ;;  %s8631_s17 = smov 96   ;;  %vm635_vm15 = vcmask 392192  }
   0x6   :  { %v49_v6 = vperm.slane %v37_v5, 0  ;;  %v93_v13 = vld [vmem:[%s13109_s0 + $0x8] sm:$0xff]  ;;  %v94_v18 = vld [vmem:[%s13109_s0 + $0x10] sm:$0xff]  ;;  %v95_v23 = vld [vmem:[%s13109_s0 + $0x18] sm:$0xff]  ;;  %s8632_s18 = smov 32   ;;  %s8633_s12 = smov [#allocation2]  }
   0x7   :  { %v8770_v54 = vld [vmem:[%s13112_s3 + $0x78] sm:$0xff]  ;;  %v8777_v55 = vld [vmem:[%s13112_s3 + $0x60] sm:$0xff]  ;;  %v8784_v56 = vld [vmem:[%s13112_s3 + $0x68] sm:$0xff]  ;;  %s6885_s14 = sshll.u32 %s8633_s12, 4  ;;  %s6887_s16 = sshll.u32 %s13119_s10, 4  ;;  %s6886_s14 = int_to_ptr.vmem [resolvable:$true] %s6885_s14  ;;  %s6888_s16 = int_to_ptr.hbm [resolvable:$true] %s6887_s16 }
   0x8   :  { %v8791_v57 = vld [vmem:[%s13112_s3 + $0x48] sm:$0xff]  ;;  %v8798_v58 = vld [vmem:[%s13112_s3 + $0x30] sm:$0xff]  ;;  %v8817_v61 = vld [vmem:[%s13112_s3 + $0x38] sm:$0xff] }
   0x9   :  { %v8805_v59 = vld [vmem:[%s13112_s3 + $0x50] sm:$0xff]  ;;  %v8826_v62 = vld [vmem:[%s13112_s3 + $0xa8] sm:$0xff]  ;;  %v252_v1 = vld [vmem:[%s13113_s4 + $0x38] sm:$0xff] }
   0xa   :  { %v8812_v60 = vld [vmem:[%s13112_s3 + $0xb0] sm:$0xff]  ;;  %v8831_v63 = vld [vmem:[%s13112_s3 + $0x28] sm:$0xff]  ;;  %306 = vmatpush.msra.mxu2 %v252_v1 }
   0xb   :  { %6900 = vmatmul.msk.f32.gmra.mxu0 %vm50_vm0, %v46_v2  ;;  %v8193_v28 = vpop.eup %8192  ;;  %v251_v0 = vld [vmem:[%s13113_s4 + $0x30] sm:$0xff]  ;;  %v249_v2 = vld [vmem:[%s13113_s4 + $0x20] sm:$0xff] }
   0xc   :  { %v153_v29 = vmul.f32 32.0, %v8193_v28  ;;  %vm157_vm2 = vweird.f32 %v8193_v28  ;;  %277 = vmatpush.msra.mxu1 %v251_v0  ;;  %v8857_v5 = vld [vmem:[%s13112_s3 + $0x70] sm:$0xff] }
   0xe   :  { %v154_v30 = vsub.f32 1.0, %v153_v29  ;;  %278 = vmatpush.msra.mxu1 %v249_v2 }
  0x10   :  { %v155_v31 = vmul.f32 %v8193_v28, %v154_v30  ;;  %v8944_v30 = vld [vmem:[%s13112_s3 + $0x88] sm:$0xff] }
  0x12   :  { %v156_v32 = vadd.f32 %v8193_v28, %v155_v31  ;;  %v8950_v31 = vld [vmem:[%s13112_s3 + $0x8] sm:$0xff] }
  0x13   :  { %6901 = vmatmul.msk.f32.gmra.mxu0 %vm50_vm0, %v47_v3  ;;  %v250_v3 = vld [vmem:[%s13113_s4 + $0x28] sm:$0xff] }
  0x14   :  { %v8737_v33 = vsel %vm157_vm2, %v8193_v28, %v156_v32  ;;  %307 = vmatpush.msra.mxu2 %v250_v3 }
  0x1b   :  { %6902 = vmatmul.msk.f32.gmra.mxu0 %vm50_vm0, %v48_v4  ;;  %v8852_v4 = vld [vmem:[%s13112_s3 + $0xa0] sm:$0xff]  ;;  %vm754_vm0 = vcmask 523264  }
  0x80   :  { %v80_v7 = vpop.f32.mrf.mxu0 }
  0x81   :  { %v81_v9 = vadd.f32 %v80_v7, %v49_v6  ;;  %v247_v7 = vld [vmem:[%s13113_s4 + $0x10] sm:$0xff] }
  0x82   :  { %279 = vmatpush.msra.mxu1 %v247_v7 }
  0x83   :  { %v8712_v10 = vadd.f32 %v92_v8, %v81_v9  ;;  %v248_v8 = vld [vmem:[%s13113_s4 + $0x18] sm:$0xff]  ;;  %v245_v9 = vld [vmem:[%s13113_s4] sm:$0xff] }
  0x84   :  { %308 = vmatpush.msra.mxu2 %v248_v8  ;;  %280 = vmatpush.msra.mxu1 %v245_v9 }
  0x85   :  { %v140_v11 = vsel %vm139_vm1, %v8712_v10, 0.0 }
  0x86   :  { %141 = vadd.xlane.f32.xlu0 %v140_v11  ;;  %v246_v11 = vld [vmem:[%s13113_s4 + $0x8] sm:$0xff]  ;;  %807 = vmatpush.msrb.mxu1 %v8770_v54 }
  0x87   :  { %309 = vmatpush.msra.mxu2 %v246_v11 }
  0x88   :  { %v83_v12 = vpop.f32.mrf.mxu0  ;;  %808 = vmatpush.msrb.mxu1 %v8857_v5 }
  0x89   :  { %v84_v14 = vadd.f32 %v83_v12, %v49_v6  ;;  %7448 = vmatpush.msrb.mxu2 %v8770_v54  ;;  %v8887_v12 = vld [vmem:[%s13112_s3 + $0x98] sm:$0xff] }
  0x8a   :  { %809 = vmatpush.msrb.mxu1 %v8784_v56 }
  0x8b   :  { %v8719_v15 = vadd.f32 %v93_v13, %v84_v14  ;;  %v8892_v13 = vld [vmem:[%s13112_s3 + $0x58] sm:$0xff]  ;;  %7449 = vmatpush.msrb.mxu2 %v8857_v5 }
  0x8c   :  { %v8897_v14 = vld [vmem:[%s13112_s3 + $0x18] sm:$0xff]  ;;  %810 = vmatpush.msrb.mxu1 %v8777_v55 }
  0x8d   :  { %v143_v16 = vsel %vm139_vm1, %v8719_v15, 0.0  ;;  %7450 = vmatpush.msrb.mxu2 %v8784_v56 }
  0x8e   :  { %144 = vadd.xlane.f32.xlu0 %v143_v16  ;;  %811 = vmatpush.msrb.mxu1 %v8892_v13 }
  0x8f   :  { %7451 = vmatpush.msrb.mxu2 %v8777_v55 }
  0x90   :  { %v86_v17 = vpop.f32.mrf.mxu0  ;;  %812 = vmatpush.msrb.mxu1 %v8805_v59 }
  0x91   :  { %v87_v19 = vadd.f32 %v86_v17, %v49_v6  ;;  %7452 = vmatpush.msrb.mxu2 %v8892_v13 }
  0x92   :  { %813 = vmatpush.msrb.mxu1 %v8791_v57 }
  0x93   :  { %v8726_v20 = vadd.f32 %v94_v18, %v87_v19  ;;  %v8916_v19 = vld [vmem:[%s13112_s3 + $0x90] sm:$0xff]  ;;  %7453 = vmatpush.msrb.mxu2 %v8805_v59 }
  0x95   :  { %v146_v21 = vsel %vm139_vm1, %v8726_v20, 0.0  ;;  %7454 = vmatpush.msrb.mxu2 %v8791_v57 }
  0x96   :  { %147 = vadd.xlane.f32.xlu1 %v146_v21  ;;  %v8921_v21 = vld [vmem:[%s13112_s3 + $0x40] sm:$0xff] }
  0x97   :  { %814 = vmatpush.msrb.mxu1 %v8921_v21  ;;  %7455 = vmatpush.msrb.mxu2 %v8921_v21 }
  0x98   :  { %v89_v22 = vpop.f32.mrf.mxu0 }
  0x99   :  { %v90_v24 = vadd.f32 %v89_v22, %v49_v6  ;;  %v8862_v6 = vld [vmem:[%s13112_s3 + $0x20] sm:$0xff]  ;;  %v8926_v22 = vld [vmem:[%s13112_s3 + $0x10] sm:$0xff]  ;;  %815 = vmatpush.msrb.mxu1 %v8817_v61  ;;  %7456 = vmatpush.msrb.mxu2 %v8817_v61 }
  0x9b   :  { %v8733_v25 = vadd.f32 %v95_v23, %v90_v24  ;;  %816 = vmatpush.msrb.mxu1 %v8798_v58  ;;  %7457 = vmatpush.msrb.mxu2 %v8798_v58 }
  0x9d   :  { %v149_v26 = vsel %vm139_vm1, %v8733_v25, 0.0  ;;  %817 = vmatpush.msrb.mxu1 %v8831_v63  ;;  %7458 = vmatpush.msrb.mxu2 %v8831_v63 }
  0x9e   :  { %150 = vadd.xlane.f32.xlu1 %v149_v26 }
  0x9f   :  { %818 = vmatpush.msrb.mxu1 %v8862_v6  ;;  %7459 = vmatpush.msrb.mxu2 %v8862_v6 }
  0xa1   :  { %819 = vmatpush.msrb.mxu1 %v8897_v14  ;;  %7460 = vmatpush.msrb.mxu2 %v8897_v14 }
  0xa3   :  { %820 = vmatpush.msrb.mxu1 %v8926_v22  ;;  %7461 = vmatpush.msrb.mxu2 %v8926_v22 }
  0xa5   :  { %821 = vmatpush.msrb.mxu1 %v8950_v31  ;;  %7462 = vmatpush.msrb.mxu2 %v8950_v31 }
  0xf9   :  { %v142_v34 = vpop.xlane.xlu0 %141 }
  0xfa   :  { %v159_v35 = vmul.f32 %v8737_v33, %v142_v34 }
  0xfc   :  { %v8741_v36 = vsub.f32 %v8712_v10, %v159_v35 }
  0xfe   :  { %v167_v37 = vmul.f32 %v8741_v36, %v8741_v36 }
 0x100   :  { %v171_v38 = vsel %vm139_vm1, %v167_v37, 0.0 }
 0x101   :  { %172 = vadd.xlane.f32.xlu2 %v171_v38  ;;  %v145_v39 = vpop.xlane.xlu0 %144  ;;  %v132_v38 = vld [vmem:[%s13117_s8] sm:$0xff] }
 0x102   :  { %v160_v40 = vmul.f32 %v8737_v33, %v145_v39 }
 0x104   :  { %v8748_v41 = vsub.f32 %v8719_v15, %v160_v40 }
 0x106   :  { %v168_v42 = vmul.f32 %v8748_v41, %v8748_v41 }
 0x108   :  { %v174_v43 = vsel %vm139_vm1, %v168_v42, 0.0 }
 0x109   :  { %v148_v44 = vpop.xlane.xlu1 %147  ;;  %175 = vadd.xlane.f32.xlu2 %v174_v43 }
 0x10a   :  { %v161_v45 = vmul.f32 %v8737_v33, %v148_v44  ;;  %v133_v44 = vld [vmem:[%s13117_s8 + $0x8] sm:$0xff] }
 0x10c   :  { %v8755_v46 = vsub.f32 %v8726_v20, %v161_v45  ;;  %v8969_v45 = vperm.slane %v132_v38, 0 }
 0x10e   :  { %v169_v47 = vmul.f32 %v8755_v46, %v8755_v46 }
 0x110   :  { %v177_v48 = vsel %vm139_vm1, %v169_v47, 0.0  ;;  %v8974_v47 = vld [vmem:[%s13112_s3 + $0xb8] sm:$0xff] }
 0x111   :  { %v151_v49 = vpop.xlane.xlu1 %150  ;;  %178 = vadd.xlane.f32.xlu0 %v177_v48 }
 0x112   :  { %v162_v50 = vmul.f32 %v8737_v33, %v151_v49 }
 0x114   :  { %v8762_v51 = vsub.f32 %v8733_v25, %v162_v50 }
 0x116   :  { %v170_v52 = vmul.f32 %v8762_v51, %v8762_v51 }
 0x118   :  { %v180_v53 = vsel %vm139_vm1, %v170_v52, 0.0  ;;  %v8981_v52 = vperm.slane %v133_v44, 0 }
 0x119   :  { %181 = vadd.xlane.f32.xlu1 %v180_v53  ;;  %v8986_v53 = vld [vmem:[%s13112_s3] sm:$0xff] }
 0x11a   :  { %822 = vmatpush.msrb.mxu1 %v8986_v53  ;;  %7463 = vmatpush.msrb.mxu2 %v8986_v53 }
 0x121   :  { %377 = vrot.lane.b32.xlu2 %v8770_v54, %s8629_s13 }
 0x125   :  { %375 = vrot.lane.b32.xlu0 %v8857_v5, %s8629_s13 }
 0x129   :  { %371 = vrot.lane.b32.xlu2 %v8777_v55, %s8629_s13 }
 0x12d   :  { %369 = vrot.lane.b32.xlu0 %v8892_v13, %s8629_s13 }
 0x131   :  { %367 = vrot.lane.b32.xlu2 %v8805_v59, %s8629_s13 }
 0x132   :  { %373 = vrot.lane.b32.xlu1 %v8784_v56, %s8629_s13 }
 0x135   :  { %363 = vrot.lane.b32.xlu0 %v8921_v21, %s8629_s13 }
 0x139   :  { %361 = vrot.lane.b32.xlu2 %v8817_v61, %s8629_s13 }
 0x13a   :  { %365 = vrot.lane.b32.xlu1 %v8791_v57, %s8629_s13 }
 0x13d   :  { %393 = vrot.lane.b32.xlu0 %v8974_v47, %s8629_s13 }
 0x141   :  { %357 = vrot.lane.b32.xlu2 %v8831_v63, %s8629_s13 }
 0x142   :  { %359 = vrot.lane.b32.xlu1 %v8798_v58, %s8629_s13 }
 0x149   :  { %355 = vrot.lane.b32.xlu2 %v8862_v6, %s8629_s13 }
 0x14a   :  { %391 = vrot.lane.b32.xlu1 %v8812_v60, %s8629_s13 }
 0x151   :  { %353 = vrot.lane.b32.xlu2 %v8897_v14, %s8629_s13 }
 0x152   :  { %389 = vrot.lane.b32.xlu1 %v8826_v62, %s8629_s13 }
 0x159   :  { %351 = vrot.lane.b32.xlu2 %v8926_v22, %s8629_s13 }
 0x15a   :  { %387 = vrot.lane.b32.xlu1 %v8852_v4, %s8629_s13 }
 0x161   :  { %349 = vrot.lane.b32.xlu2 %v8950_v31, %s8629_s13 }
 0x162   :  { %385 = vrot.lane.b32.xlu1 %v8887_v12, %s8629_s13 }
 0x169   :  { %347 = vrot.lane.b32.xlu2 %v8986_v53, %s8629_s13 }
 0x16a   :  { %383 = vrot.lane.b32.xlu1 %v8916_v19, %s8629_s13 }
 0x172   :  { %381 = vrot.lane.b32.xlu1 %v8944_v30, %s8629_s13 }
 0x174   :  { %v173_v16 = vpop.xlane.xlu2 %172 }
 0x175   :  { %v183_v17 = vmul.f32 %v173_v16, %v8737_v33 }
 0x177   :  { %v187_v18 = vadd.f32 1e-05, %v183_v17 }
 0x179   :  { %8194 = vrsqrt.f32 %v187_v18  ;;  %vm197_vm4 = vweird.f32 %v187_v18 }
 0x17c   :  { %v176_v23 = vpop.xlane.xlu2 %175 }
 0x17d   :  { %v184_v24 = vmul.f32 %v176_v23, %v8737_v33 }
 0x17f   :  { %v8195_v26 = vpop.eup %8194  ;;  %v188_v27 = vadd.f32 1e-05, %v184_v24  ;;  %v9006_v24 = vld [vmem:[%s13112_s3 + $0x80] sm:$0xff] }
 0x180   :  { %v192_v28 = vmul.f32 %v8195_v26, %v187_v18  ;;  %vm198_vm3 = vweird.f32 %v8195_v26  ;;  %379 = vrot.lane.b32.xlu2 %v9006_v24, %s8629_s13  ;;  %s8630_s13 = smov 80  }
 0x181   :  { %8196 = vrsqrt.f32 %v188_v27  ;;  %vm199_vm5 = vmor %vm197_vm4, %vm198_vm3  ;;  %vm207_vm7 = vweird.f32 %v188_v27 }
 0x182   :  { %v193_v29 = vmul.f32 %v8195_v26, %v192_v28 }
 0x184   :  { %v194_v32 = vmul.f32 0.5, %v193_v29  ;;  %v179_v34 = vpop.xlane.xlu0 %178 }
 0x185   :  { %v185_v35 = vmul.f32 %v179_v34, %v8737_v33 }
 0x186   :  { %v195_v37 = vsub.f32 1.5, %v194_v32 }
 0x187   :  { %v8197_v39 = vpop.eup %8196  ;;  %v189_v40 = vadd.f32 1e-05, %v185_v35 }
 0x188   :  { %v196_v42 = vmul.f32 %v8195_v26, %v195_v37  ;;  %v202_v43 = vmul.f32 %v8197_v39, %v188_v27  ;;  %vm208_vm6 = vweird.f32 %v8197_v39 }
 0x189   :  { %8198 = vrsqrt.f32 %v189_v40  ;;  %vm209_vm8 = vmor %vm207_vm7, %vm208_vm6  ;;  %vm217_vm10 = vweird.f32 %v189_v40 }
 0x18a   :  { %v203_v48 = vmul.f32 %v8197_v39, %v202_v43  ;;  %v200_v49 = vsel %vm199_vm5, %v8195_v26, %v196_v42 }
 0x18b   :  { %v231_v50 = vmul.f32 %v200_v49, %v8741_v36 }
 0x18c   :  { %v204_v0 = vmul.f32 0.5, %v203_v48  ;;  %v182_v1 = vpop.xlane.xlu1 %181 }
 0x18d   :  { %v186_v2 = vmul.f32 %v182_v1, %v8737_v33  ;;  %v236_v3 = vmul.f32 %v8969_v45, %v231_v50 }
 0x18e   :  { %v205_v36 = vsub.f32 1.5, %v204_v0  ;;  %v9033_v0 = vpop.permute.xlu2 %377 }
 0x18f   :  { %v8199_v7 = vpop.eup %8198  ;;  %v190_v8 = vadd.f32 1e-05, %v186_v2  ;;  %v241_v9 = vadd.f32 %v8981_v52, %v236_v3 }
 0x190   :  { %v206_v11 = vmul.f32 %v8197_v39, %v205_v36  ;;  %v212_v16 = vmul.f32 %v8199_v7, %v189_v40  ;;  %vm218_vm9 = vweird.f32 %v8199_v7 }
 0x191   :  { %8200 = vrsqrt.f32 %v190_v8  ;;  %6903 = vmatmul.msk.f32.vlgmr.msra.gmra.mxu1 %vm139_vm1, %v241_v9  ;;  %6907 = vmatmul.msk.f32.vlgmr.msra.gmra.mxu2 %vm139_vm1, %v241_v9  ;;  %vm219_vm11 = vmor %vm217_vm10, %vm218_vm9  ;;  %vm227_vm13 = vweird.f32 %v190_v8 }
 0x192   :  { %v213_v17 = vmul.f32 %v8199_v7, %v212_v16  ;;  %v210_v18 = vsel %vm209_vm8, %v8197_v39, %v206_v11  ;;  %844 = vmatpush.msra.mxu2 %v8974_v47 }
 0x193   :  { %v232_v23 = vmul.f32 %v210_v18, %v8748_v41 }
 0x194   :  { %v214_v26 = vmul.f32 0.5, %v213_v17  ;;  %845 = vmatpush.msra.mxu2 %v8812_v60 }
 0x195   :  { %v237_v27 = vmul.f32 %v8969_v45, %v232_v23 }
 0x196   :  { %v215_v28 = vsub.f32 1.5, %v214_v26  ;;  %846 = vmatpush.msra.mxu2 %v8826_v62  ;;  %v9035_v1 = vpop.permute.xlu2 %371 }
 0x197   :  { %v8201_v29 = vpop.eup %8200  ;;  %v242_v41 = vadd.f32 %v8981_v52, %v237_v27  ;;  %v9066_v23 = vpop.permute.xlu0 %375 }
 0x198   :  { %v216_v32 = vmul.f32 %v8199_v7, %v215_v28  ;;  %v222_v34 = vmul.f32 %v8201_v29, %v190_v8  ;;  %847 = vmatpush.msra.mxu2 %v8852_v4  ;;  %vm228_vm12 = vweird.f32 %v8201_v29 }
 0x199   :  { %6904 = vmatmul.msk.f32.gmra.mxu1 %vm139_vm1, %v242_v41  ;;  %6908 = vmatmul.msk.f32.gmra.mxu2 %vm139_vm1, %v242_v41  ;;  %vm229_vm14 = vmor %vm227_vm13, %vm228_vm12 }
 0x19a   :  { %v223_v35 = vmul.f32 %v8201_v29, %v222_v34  ;;  %v220_v37 = vsel %vm219_vm11, %v8199_v7, %v216_v32  ;;  %848 = vmatpush.msra.mxu2 %v8887_v12 }
 0x19b   :  { %v233_v38 = vmul.f32 %v220_v37, %v8755_v46 }
 0x19c   :  { %v224_v39 = vmul.f32 0.5, %v223_v35  ;;  %849 = vmatpush.msra.mxu2 %v8916_v19 }
 0x19d   :  { %v238_v42 = vmul.f32 %v8969_v45, %v233_v38 }
 0x19e   :  { %v225_v43 = vsub.f32 1.5, %v224_v39  ;;  %850 = vmatpush.msra.mxu2 %v8944_v30  ;;  %v9037_v2 = vpop.permute.xlu2 %367 }
 0x19f   :  { %v243_v40 = vadd.f32 %v8981_v52, %v238_v42 }
 0x1a0   :  { %v226_v44 = vmul.f32 %v8201_v29, %v225_v43  ;;  %851 = vmatpush.msra.mxu2 %v9006_v24 }
 0x1a1   :  { %6905 = vmatmul.msk.f32.gmra.mxu1 %vm139_vm1, %v243_v40  ;;  %6909 = vmatmul.msk.f32.gmra.mxu2 %vm139_vm1, %v243_v40 }
 0x1a2   :  { %v230_v46 = vsel %vm229_vm14, %v8201_v29, %v226_v44  ;;  %v9104_v44 = vpop.permute.xlu0 %369 }
 0x1a3   :  { %v234_v48 = vmul.f32 %v230_v46, %v8762_v51 }
 0x1a4   :  { %v9039_v3 = vpop.permute.xlu1 %373 }
 0x1a5   :  { %v239_v49 = vmul.f32 %v8969_v45, %v234_v48 }
 0x1a6   :  { %v9041_v36 = vpop.permute.xlu2 %361 }
 0x1a7   :  { %v244_v50 = vadd.f32 %v8981_v52, %v239_v49 }
 0x1a9   :  { %6906 = vmatmul.msk.f32.gmra.mxu1 %vm139_vm1, %v244_v50  ;;  %6910 = vmatmul.msk.f32.gmra.mxu2 %vm139_vm1, %v244_v50 }
 0x1ac   :  { %v9043_v51 = vpop.permute.xlu1 %365 }
 0x1ae   :  { %v9045_v7 = vpop.permute.xlu2 %357 }
 0x1b4   :  { %v9047_v45 = vpop.permute.xlu1 %359 }
 0x1b6   :  { %v9054_v9 = vpop.permute.xlu2 %355 }
 0x1bc   :  { %v9062_v18 = vpop.permute.xlu1 %391 }
 0x1be   :  { %v9074_v29 = vpop.permute.xlu2 %353 }
 0x1c4   :  { %v9078_v41 = vpop.permute.xlu1 %389 }
 0x1c6   :  { %v9090_v38 = vpop.permute.xlu2 %351 }
 0x1c7   :  { %13263 = vst [vmem:[#allocation5_spill] sm:$0xff] %v9090_v38 }
 0x1cc   :  { %v9093_v39 = vpop.permute.xlu1 %387 }
 0x1cd   :  { %13264 = vst [vmem:[#allocation6_spill] sm:$0xff] %v9093_v39 }
 0x1ce   :  { %v9106_v46 = vpop.permute.xlu2 %349 }
 0x1cf   :  { %13265 = vst [vmem:[#allocation7_spill] sm:$0xff] %v9106_v46 }
 0x1d4   :  { %v9108_v48 = vpop.permute.xlu1 %385 }
 0x1d5   :  { %13266 = vst [vmem:[#allocation8_spill] sm:$0xff] %v9108_v48 }
 0x20e   :  { %v9049_v52 = vpop.f32.mrf.mxu1 }
 0x20f   :  { %v431_v8 = vmul.f32 %v9035_v1, %v9049_v52 }
 0x211   :  { %611 = vrot.lane.b32.xlu0 %v431_v8, %s8630_s13 }
 0x216   :  { %v9056_v11 = vpop.f32.mrf.mxu1 }
 0x217   :  { %v428_v16 = vmul.f32 %v9043_v51, %v9056_v11  ;;  %v432_v17 = vmul.f32 %v9039_v3, %v9056_v11  ;;  %v424_v42 = vmul.f32 %v9045_v7, %v9056_v11  ;;  %v440_v49 = vmul.f32 %v9078_v41, %v9056_v11 }
 0x219   :  { %605 = vrot.lane.b32.xlu1 %v428_v16, %s8630_s13  ;;  %613 = vrot.lane.b32.xlu0 %v432_v17, %s8630_s13  ;;  %v9119_v16 = vpop.permute.xlu0 %363  ;;  %v9121_v17 = vpop.permute.xlu2 %347 }
 0x21a   :  { %13267 = vst [vmem:[#allocation9_spill] sm:$0xff] %v9121_v17 }
 0x21e   :  { %v9068_v26 = vpop.f32.mrf.mxu1 }
 0x21f   :  { %v425_v27 = vmul.f32 %v9047_v45, %v9068_v26  ;;  %v433_v28 = vmul.f32 %v9066_v23, %v9068_v26  ;;  %v441_v34 = vmul.f32 %v9062_v18, %v9068_v26  ;;  %v429_v40 = vmul.f32 %v9037_v2, %v9068_v26 }
 0x221   :  { %599 = vrot.lane.b32.xlu1 %v425_v27, %s8630_s13  ;;  %615 = vrot.lane.b32.xlu0 %v433_v28, %s8630_s13  ;;  %v421_v27 = vmul.f32 %v9090_v38, %v9068_v26  ;;  %v419_v28 = vmul.f32 %v9121_v17, %v9049_v52 }
 0x226   :  { %v9080_v32 = vpop.f32.mrf.mxu1 }
 0x227   :  { %v426_v35 = vmul.f32 %v9041_v36, %v9080_v32  ;;  %v434_v37 = vmul.f32 %v9033_v0, %v9080_v32  ;;  %v422_v43 = vmul.f32 %v9074_v29, %v9080_v32  ;;  %v438_v50 = vmul.f32 %v9108_v48, %v9080_v32 }
 0x228   :  { %v430_v8 = vmul.f32 %v9104_v44, %v9080_v32 }
 0x229   :  { %631 = vrot.lane.b32.xlu1 %v441_v34, %s8630_s13  ;;  %601 = vrot.lane.b32.xlu2 %v426_v35, %s8630_s13  ;;  %v427_v34 = vmul.f32 %v9119_v16, %v9049_v52  ;;  %v9132_v35 = vpop.permute.xlu1 %383 }
 0x22a   :  { %617 = vrot.lane.b32.xlu0 %v434_v37, %s8630_s13  ;;  %13268 = vst [vmem:[#allocation10_spill] sm:$0xff] %v9132_v35  ;;  %v437_v37 = vmul.f32 %v9132_v35, %v9068_v26 }
 0x231   :  { %597 = vrot.lane.b32.xlu2 %v424_v42, %s8630_s13  ;;  %593 = vrot.lane.b32.xlu1 %v422_v43, %s8630_s13  ;;  %v423_v42 = vmul.f32 %v9054_v9, %v9049_v52  ;;  %v9142_v43 = vpop.permute.xlu2 %379 }
 0x232   :  { %607 = vrot.lane.b32.xlu0 %v429_v40, %s8630_s13  ;;  %13269 = vst [vmem:[#allocation11_spill] sm:$0xff] %v9142_v43  ;;  %v9144_v40 = vpop.permute.xlu0 %393 }
 0x233   :  { %13270 = vst [vmem:[#allocation12_spill] sm:$0xff] %v9144_v40 }
 0x239   :  { %629 = vrot.lane.b32.xlu2 %v440_v49, %s8630_s13  ;;  %625 = vrot.lane.b32.xlu1 %v438_v50, %s8630_s13  ;;  %v435_v49 = vmul.f32 %v9142_v43, %v9049_v52  ;;  %v442_v50 = vmul.f32 %v9144_v40, %v9080_v32 }
 0x23a   :  { %609 = vrot.lane.b32.xlu0 %v430_v8, %s8630_s13  ;;  %v420_v8 = vmul.f32 %v9106_v46, %v9056_v11 }
 0x241   :  { %591 = vrot.lane.b32.xlu2 %v421_v27, %s8630_s13  ;;  %587 = vrot.lane.b32.xlu1 %v419_v28, %s8630_s13 }
 0x242   :  { %603 = vrot.lane.b32.xlu0 %v427_v34, %s8630_s13 }
 0x249   :  { %623 = vrot.lane.b32.xlu2 %v437_v37, %s8630_s13  ;;  %473 = vrot.lane.b32.xlu1 %v8770_v54, %s8631_s17  ;;  %v439_v54 = vmul.f32 %v9093_v39, %v9049_v52 }
 0x24a   :  { %595 = vrot.lane.b32.xlu0 %v423_v42, %s8630_s13 }
 0x251   :  { %619 = vrot.lane.b32.xlu2 %v435_v49, %s8630_s13  ;;  %467 = vrot.lane.b32.xlu1 %v8777_v55, %s8631_s17  ;;  %v9168_v55 = vpop.permute.xlu1 %381 }
 0x252   :  { %633 = vrot.lane.b32.xlu0 %v442_v50, %s8630_s13  ;;  %13271 = vst [vmem:[#allocation13_spill] sm:$0xff] %v9168_v55 }
 0x259   :  { %469 = vrot.lane.b32.xlu2 %v8784_v56, %s8631_s17  ;;  %461 = vrot.lane.b32.xlu1 %v8791_v57, %s8631_s17  ;;  %v436_v56 = vmul.f32 %v9168_v55, %v9056_v11 }
 0x25a   :  { %627 = vrot.lane.b32.xlu0 %v439_v54, %s8630_s13 }
 0x261   :  { %463 = vrot.lane.b32.xlu2 %v8805_v59, %s8631_s17  ;;  %489 = vrot.lane.b32.xlu1 %v8974_v47, %s8631_s17 }
 0x262   :  { %589 = vrot.lane.b32.xlu0 %v420_v8, %s8630_s13 }
 0x269   :  { %457 = vrot.lane.b32.xlu2 %v8817_v61, %s8631_s17  ;;  %453 = vrot.lane.b32.xlu1 %v8831_v63, %s8631_s17 }
 0x26a   :  { %621 = vrot.lane.b32.xlu0 %v436_v56, %s8630_s13 }
 0x271   :  { %487 = vrot.lane.b32.xlu2 %v8812_v60, %s8631_s17  ;;  %483 = vrot.lane.b32.xlu1 %v8852_v4, %s8631_s17 }
 0x272   :  { %471 = vrot.lane.b32.xlu0 %v8857_v5, %s8631_s17 }
 0x279   :  { %451 = vrot.lane.b32.xlu2 %v8862_v6, %s8631_s17  ;;  %447 = vrot.lane.b32.xlu1 %v8926_v22, %s8631_s17 }
 0x27a   :  { %465 = vrot.lane.b32.xlu0 %v8892_v13, %s8631_s17 }
 0x281   :  { %481 = vrot.lane.b32.xlu2 %v8887_v12, %s8631_s17  ;;  %477 = vrot.lane.b32.xlu1 %v8944_v30, %s8631_s17  ;;  %v9212_v30 = vpop.f32.mrf.mxu2 }
 0x282   :  { %459 = vrot.lane.b32.xlu0 %v8921_v21, %s8631_s17 }
 0x283   :  { %v602_v57 = vpop.permute.xlu2 %601  ;;  %v612_v59 = vpop.permute.xlu0 %611 }
 0x289   :  { %445 = vrot.lane.b32.xlu2 %v8950_v31, %s8631_s17 }
 0x28a   :  { %455 = vrot.lane.b32.xlu0 %v8798_v58, %s8631_s17 }
 0x28b   :  { %v606_v60 = vpop.permute.xlu1 %605  ;;  %v598_v61 = vpop.permute.xlu2 %597 }
 0x28c   :  { %v614_v63 = vpop.permute.xlu0 %613 }
 0x291   :  { %475 = vrot.lane.b32.xlu2 %v9006_v24, %s8631_s17 }
 0x292   :  { %485 = vrot.lane.b32.xlu0 %v8826_v62, %s8631_s17 }
 0x293   :  { %v600_v4 = vpop.permute.xlu1 %599  ;;  %v630_v5 = vpop.permute.xlu2 %629 }
 0x294   :  { %v616_v6 = vpop.permute.xlu0 %615 }
 0x29a   :  { %449 = vrot.lane.b32.xlu0 %v8897_v14, %s8631_s17 }
 0x29b   :  { %v632_v12 = vpop.permute.xlu1 %631  ;;  %v592_v13 = vpop.permute.xlu2 %591 }
 0x29c   :  { %v618_v21 = vpop.permute.xlu0 %617 }
 0x29d   :  { %6911 = vmatpush.xpose.msk.msra.mxu3 %vm635_vm15, %v618_v21 }
 0x2a1   :  { %6912 = vmatpush.xpose.msk.msra.mxu3 %vm635_vm15, %v616_v6 }
 0x2a2   :  { %479 = vrot.lane.b32.xlu0 %v8916_v19, %s8631_s17  ;;  %v9219_v19 = vpop.f32.mrf.mxu2 }
 0x2a3   :  { %v9209_v58 = vpop.permute.xlu2 %623  ;;  %v594_v62 = vpop.permute.xlu1 %593 }
 0x2a4   :  { %v608_v22 = vpop.permute.xlu0 %607 }
 0x2a5   :  { %6913 = vmatpush.xpose.msk.msra.mxu3 %vm635_vm15, %v614_v63 }
 0x2a9   :  { %6914 = vmatpush.xpose.msk.msra.mxu3 %vm635_vm15, %v612_v59 }
 0x2aa   :  { %443 = vrot.lane.b32.xlu0 %v8986_v53, %s8631_s17  ;;  %s8635_s17 = smov 8  }
 0x2ab   :  { %v620_v14 = vpop.permute.xlu2 %619  ;;  %v626_v31 = vpop.permute.xlu1 %625 }
 0x2ac   :  { %v610_v47 = vpop.permute.xlu0 %609 }
 0x2ad   :  { %6915 = vmatpush.xpose.msk.msra.mxu3 %vm635_vm15, %v610_v47 }
 0x2b1   :  { %6916 = vmatpush.xpose.msk.msra.mxu3 %vm635_vm15, %v608_v22 }
 0x2b3   :  { %v9221_v24 = vpop.permute.xlu2 %469  ;;  %v588_v27 = vpop.permute.xlu1 %587 }
 0x2b4   :  { %13272 = vst [vmem:[#allocation14_spill] sm:$0xff] %v9221_v24  ;;  %v604_v28 = vpop.permute.xlu0 %603  ;;  %v541_v34 = vmul.f32 %v9221_v24, %v9056_v11  ;;  %v542_v37 = vmul.f32 %v9221_v24, %v9219_v19 }
 0x2b5   :  { %6917 = vmatpush.xpose.msk.msra.mxu3 %vm635_vm15, %v606_v60 }
 0x2b6   :  { %v7477_v53 = vpack.i.bf16 %v542_v37, %v541_v34 }
 0x2b8   :  { %7478 = vrot.lane.b32.xlu1 %v7477_v53, %s8632_s18 }
 0x2b9   :  { %6918 = vmatpush.xpose.msk.msra.mxu3 %vm635_vm15, %v604_v28 }
 0x2bb   :  { %v9230_v42 = vpop.permute.xlu2 %463  ;;  %v9232_v49 = vpop.permute.xlu1 %473 }
 0x2bc   :  { %13273 = vst [vmem:[#allocation15_spill] sm:$0xff] %v9230_v42  ;;  %v596_v50 = vpop.permute.xlu0 %595 }
 0x2bd   :  { %13274 = vst [vmem:[#allocation16_spill] sm:$0xff] %v9232_v49  ;;  %6919 = vmatpush.xpose.msk.msra.mxu3 %vm635_vm15, %v602_v57  ;;  %v9247_v57 = vpop.f32.mrf.mxu2 }
 0x2be   :  { %v536_v6 = vmul.f32 %v9230_v42, %v9247_v57 }
 0x2c1   :  { %6920 = vmatpush.xpose.msk.msra.mxu3 %vm635_vm15, %v600_v4  ;;  %v535_v4 = vmul.f32 %v9230_v42, %v9068_v26  ;;  %v107_v42 = vld [vmem:[%s13111_s2 + $0x38] sm:$0xff] }
 0x2c3   :  { %v9236_v54 = vpop.permute.xlu2 %457  ;;  %v9238_v8 = vpop.permute.xlu1 %467  ;;  %v7487_v22 = vpack.i.bf16 %v536_v6, %v535_v4 }
 0x2c4   :  { %13275 = vst [vmem:[#allocation17_spill] sm:$0xff] %v9236_v54  ;;  %v634_v56 = vpop.permute.xlu0 %633  ;;  %v539_v59 = vmul.f32 %v9238_v8, %v9049_v52  ;;  %v540_v60 = vmul.f32 %v9238_v8, %v9212_v30 }
 0x2c5   :  { %13276 = vst [vmem:[#allocation18_spill] sm:$0xff] %v9238_v8  ;;  %6921 = vmatpush.xpose.msk.msra.mxu3 %vm635_vm15, %v598_v61  ;;  %6931 = vmatpush.xpose.msk.msrb.mxu0 %vm635_vm15, %v634_v56 }
 0x2c6   :  { %v7482_v63 = vpack.i.bf16 %v540_v60, %v539_v59 }
 0x2c8   :  { %7483 = vrot.lane.b32.xlu0 %v7482_v63, %s8632_s18 }
 0x2c9   :  { %6922 = vmatpush.xpose.msk.msra.mxu3 %vm635_vm15, %v596_v50  ;;  %6932 = vmatpush.xpose.msk.msrb.mxu0 %vm635_vm15, %v632_v12 }
 0x2cb   :  { %v9255_v21 = vpop.permute.xlu2 %487  ;;  %v9259_v47 = vpop.permute.xlu1 %461 }
 0x2cc   :  { %13277 = vst [vmem:[#allocation19_spill] sm:$0xff] %v9255_v21  ;;  %v628_v61 = vpop.permute.xlu0 %627  ;;  %v533_v12 = vmul.f32 %v9259_v47, %v9056_v11  ;;  %v534_v28 = vmul.f32 %v9259_v47, %v9219_v19 }
 0x2cd   :  { %6923 = vmatpush.xpose.msk.msra.mxu3 %vm635_vm15, %v594_v62  ;;  %6933 = vmatpush.xpose.msk.msrb.mxu0 %vm635_vm15, %v630_v5  ;;  %13278 = vst [vmem:[#allocation20_spill] sm:$0xff] %v9259_v47 }
 0x2ce   :  { %v7492_v53 = vpack.i.bf16 %v534_v28, %v533_v12  ;;  %v560_v12 = vmul.f32 %v9255_v21, %v9247_v57 }
 0x2d0   :  { %7488 = vrot.lane.b32.xlu0 %v7487_v22, %s8632_s18  ;;  %v559_v22 = vmul.f32 %v9255_v21, %v9068_v26 }
 0x2d1   :  { %6924 = vmatpush.xpose.msk.msra.mxu3 %vm635_vm15, %v592_v13  ;;  %6934 = vmatpush.xpose.msk.msrb.mxu0 %vm635_vm15, %v628_v61 }
 0x2d3   :  { %v9268_v34 = vpop.permute.xlu2 %451  ;;  %v9296_v59 = vpop.permute.xlu1 %489 }
 0x2d4   :  { %13279 = vst [vmem:[#allocation21_spill] sm:$0xff] %v9268_v34  ;;  %v590_v62 = vpop.permute.xlu0 %589  ;;  %v523_v5 = vmul.f32 %v9268_v34, %v9049_v52  ;;  %v524_v37 = vmul.f32 %v9268_v34, %v9212_v30 }
 0x2d5   :  { %6925 = vmatpush.xpose.msk.msra.mxu3 %vm635_vm15, %v590_v62  ;;  %6935 = vmatpush.xpose.msk.msrb.mxu0 %vm635_vm15, %v626_v31  ;;  %13281 = vst [vmem:[#allocation23_spill] sm:$0xff] %v9296_v59 }
 0x2d6   :  { %v7522_v13 = vpack.i.bf16 %v524_v37, %v523_v5 }
 0x2d8   :  { %7523 = vrot.lane.b32.xlu1 %v7522_v13, %s8632_s18  ;;  %7493 = vrot.lane.b32.xlu0 %v7492_v53, %s8632_s18  ;;  %v7507_v13 = vpack.i.bf16 %v560_v12, %v559_v22 }
 0x2d9   :  { %6926 = vmatpush.xpose.msk.msra.mxu3 %vm635_vm15, %v588_v27  ;;  %6936 = vmatpush.xpose.msk.msrb.mxu0 %vm635_vm15, %v9209_v58 }
 0x2db   :  { %v9304_v60 = vpop.permute.xlu1 %453 }
 0x2dc   :  { %6927 = vmatmul.msk.f32.vlgmr.msra.gmra.mxu3 %vm635_vm15, %v9049_v52  ;;  %v622_v50 = vpop.permute.xlu0 %621  ;;  %13283 = vst [vmem:[#allocation25_spill] sm:$0xff] %v9304_v60 }
 0x2dd   :  { %6937 = vmatpush.xpose.msk.msrb.mxu0 %vm635_vm15, %v622_v50  ;;  %v525_v50 = vmul.f32 %v9304_v60, %v9056_v11 }
 0x2e1   :  { %6938 = vmatpush.xpose.msk.msrb.mxu0 %vm635_vm15, %v620_v14 }
 0x2e3   :  { %v9329_v37 = vpop.permute.xlu1 %483 }
 0x2e4   :  { %6928 = vmatmul.msk.f32.gmra.mxu3 %vm635_vm15, %v9056_v11  ;;  %6939 = vmatmul.msk.f32.vlgmr.msrb.gmra.mxu0 %vm635_vm15, %v9049_v52  ;;  %v9289_v31 = vpop.permute.xlu0 %471  ;;  %13286 = vst [vmem:[#allocation28_spill] sm:$0xff] %v9329_v37 }
 0x2e5   :  { %13280 = vst [vmem:[#allocation22_spill] sm:$0xff] %v9289_v31  ;;  %v543_v27 = vmul.f32 %v9289_v31, %v9068_v26  ;;  %v544_v58 = vmul.f32 %v9289_v31, %v9247_v57 }
 0x2e7   :  { %v7472_v56 = vpack.i.bf16 %v544_v58, %v543_v27  ;;  %v526_v27 = vmul.f32 %v9304_v60, %v9219_v19 }
 0x2e9   :  { %7473 = vrot.lane.b32.xlu2 %v7472_v56, %s8632_s18 }
 0x2eb   :  { %v9345_v12 = vpop.permute.xlu1 %447 }
 0x2ec   :  { %6929 = vmatmul.msk.f32.gmra.mxu3 %vm635_vm15, %v9068_v26  ;;  %6940 = vmatmul.msk.f32.gmra.mxu0 %vm635_vm15, %v9056_v11  ;;  %v9302_v14 = vpop.permute.xlu0 %465  ;;  %13289 = vst [vmem:[#allocation31_spill] sm:$0xff] %v9345_v12 }
 0x2ed   :  { %13282 = vst [vmem:[#allocation24_spill] sm:$0xff] %v9302_v14 }
 0x2f3   :  { %v9451_v34 = vpop.permute.xlu1 %477 }
 0x2f4   :  { %6930 = vmatmul.msk.f32.gmra.mxu3 %vm635_vm15, %v9080_v32  ;;  %6941 = vmatmul.msk.f32.gmra.mxu0 %vm635_vm15, %v9068_v26  ;;  %v9310_v63 = vpop.permute.xlu0 %459 }
 0x2f5   :  { %13284 = vst [vmem:[#allocation26_spill] sm:$0xff] %v9310_v63  ;;  %v531_v4 = vmul.f32 %v9310_v63, %v9049_v52  ;;  %v532_v6 = vmul.f32 %v9310_v63, %v9212_v30 }
 0x2f7   :  { %v7497_v61 = vpack.i.bf16 %v532_v6, %v531_v4  ;;  %v9343_v6 = vpop.permute.xlu2 %481 }
 0x2f8   :  { %13288 = vst [vmem:[#allocation30_spill] sm:$0xff] %v9343_v6 }
 0x2f9   :  { %7498 = vrot.lane.b32.xlu0 %v7497_v61, %s8632_s18  ;;  %v7512_v61 = vpack.i.bf16 %v526_v27, %v525_v50 }
 0x2fc   :  { %6942 = vmatmul.msk.f32.gmra.mxu0 %vm635_vm15, %v9080_v32  ;;  %v9323_v28 = vpop.permute.xlu0 %455 }
 0x2fd   :  { %13285 = vst [vmem:[#allocation27_spill] sm:$0xff] %v9323_v28  ;;  %v527_v62 = vmul.f32 %v9323_v28, %v9068_v26  ;;  %v528_v5 = vmul.f32 %v9323_v28, %v9247_v57 }
 0x2ff   :  { %v7502_v53 = vpack.i.bf16 %v528_v5, %v527_v62  ;;  %v555_v62 = vmul.f32 %v9329_v37, %v9049_v52  ;;  %v556_v5 = vmul.f32 %v9329_v37, %v9212_v30 }
 0x301   :  { %7508 = vrot.lane.b32.xlu0 %v7507_v13, %s8632_s18  ;;  %7503 = vrot.lane.b32.xlu2 %v7502_v53, %s8632_s18  ;;  %v519_v13 = vmul.f32 %v9345_v12, %v9068_v26  ;;  %v520_v53 = vmul.f32 %v9345_v12, %v9247_v57  ;;  %v7527_v27 = vpack.i.bf16 %v556_v5, %v555_v62 }
 0x304   :  { %v9337_v58 = vpop.permute.xlu0 %485 }
 0x305   :  { %13287 = vst [vmem:[#allocation29_spill] sm:$0xff] %v9337_v58  ;;  %v557_v56 = vmul.f32 %v9337_v58, %v9056_v11  ;;  %v558_v4 = vmul.f32 %v9337_v58, %v9219_v19 }
 0x307   :  { %v7517_v22 = vpack.i.bf16 %v558_v4, %v557_v56  ;;  %v7532_v56 = vpack.i.bf16 %v520_v53, %v519_v13  ;;  %v9359_v4 = vpop.permute.xlu2 %445  ;;  %v320_v53 = vpop.f32.mrf.mxu2 }
 0x308   :  { %13291 = vst [vmem:[#allocation33_spill] sm:$0xff] %v9359_v4 }
 0x309   :  { %7513 = vrot.lane.b32.xlu2 %v7512_v61, %s8632_s18  ;;  %7518 = vrot.lane.b32.xlu0 %v7517_v22, %s8632_s18  ;;  %v517_v61 = vmul.f32 %v9359_v4, %v9056_v11  ;;  %v518_v22 = vmul.f32 %v9359_v4, %v9219_v19  ;;  %v545_v4 = vmul.f32 %v9232_v49, %v9080_v32 }
 0x30b   :  { %v7542_v5 = vpack.i.bf16 %v518_v22, %v517_v61  ;;  %v537_v61 = vmul.f32 %v9302_v14, %v9080_v32  ;;  %v538_v22 = vmul.f32 %v9302_v14, %v320_v53 }
 0x30c   :  { %v9357_v50 = vpop.permute.xlu0 %449 }
 0x30d   :  { %13290 = vst [vmem:[#allocation32_spill] sm:$0xff] %v9357_v50 }
 0x311   :  { %7528 = vrot.lane.b32.xlu2 %v7527_v27, %s8632_s18  ;;  %7533 = vrot.lane.b32.xlu0 %v7532_v56, %s8632_s18  ;;  %v561_v27 = vmul.f32 %v9296_v59, %v9080_v32  ;;  %v562_v56 = vmul.f32 %v9296_v59, %v320_v53 }
 0x313   :  { %v7562_v21 = vpack.i.bf16 %v562_v56, %v561_v27  ;;  %v554_v27 = vmul.f32 %v9343_v6, %v320_v53 }
 0x314   :  { %v9367_v58 = vpop.permute.xlu0 %479 }
 0x315   :  { %13292 = vst [vmem:[#allocation34_spill] sm:$0xff] %v9367_v58  ;;  %v551_v12 = vmul.f32 %v9367_v58, %v9068_v26  ;;  %v552_v62 = vmul.f32 %v9367_v58, %v9247_v57  ;;  %v546_v26 = vmul.f32 %v9232_v49, %v320_v53  ;;  %v521_v57 = vmul.f32 %v9357_v50, %v9080_v32  ;;  %v105_v58 = vld [vmem:[%s13111_s2 + $0x28] sm:$0xff] }
 0x317   :  { %v7537_v13 = vpack.i.bf16 %v552_v62, %v551_v12  ;;  %v7547_v63 = vpack.i.bf16 %v546_v26, %v545_v4  ;;  %v522_v12 = vmul.f32 %v9357_v50, %v320_v53 }
 0x319   :  { %7543 = vrot.lane.b32.xlu0 %v7542_v5, %s8632_s18  ;;  %7538 = vrot.lane.b32.xlu2 %v7537_v13, %s8632_s18  ;;  %v7567_v62 = vpack.i.bf16 %v522_v12, %v521_v57  ;;  %v7552_v5 = vpack.i.bf16 %v538_v22, %v537_v61  ;;  %v553_v13 = vmul.f32 %v9343_v6, %v9080_v32  ;;  %v9401_v57 = vpop.permute.xlu2 %475  ;;  %v103_v6 = vld [vmem:[%s13111_s2 + $0x18] sm:$0xff] }
 0x31b   :  { %v7572_v56 = vpack.i.bf16 %v554_v27, %v553_v13 }
 0x31c   :  { %v9399_v26 = vpop.permute.xlu0 %443 }
 0x31d   :  { %13293 = vst [vmem:[#allocation35_spill] sm:$0xff] %v9399_v26 }
 0x321   :  { %7563 = vrot.lane.b32.xlu0 %v7562_v21, %s8632_s18  ;;  %7548 = vrot.lane.b32.xlu2 %v7547_v63, %s8632_s18  ;;  %v529_v21 = vmul.f32 %v9236_v54, %v9080_v32  ;;  %v530_v63 = vmul.f32 %v9236_v54, %v320_v53  ;;  %v101_v32 = vld [vmem:[%s13111_s2 + $0x8] sm:$0xff]  ;;  %v100_v53 = vld [vmem:[%s13111_s2] sm:$0xff] }
 0x323   :  { %v7557_v4 = vpack.i.bf16 %v530_v63, %v529_v21 }
 0x329   :  { %7568 = vrot.lane.b32.xlu0 %v7567_v62, %s8632_s18  ;;  %7553 = vrot.lane.b32.xlu2 %v7552_v5, %s8632_s18 }
 0x32a   :  { %v7479_v24 = vpop.permute.xlu1 %7478 }
 0x32b   :  { %v7481_v8 = vunpack.i.h.bf16 %v7479_v24 }
 0x331   :  { %7558 = vrot.lane.b32.xlu2 %v7557_v4, %s8632_s18 }
 0x339   :  { %7573 = vrot.lane.b32.xlu2 %v7572_v56, %s8632_s18 }
 0x33a   :  { %v9403_v12 = vpop.permute.xlu0 %7483 }
 0x33b   :  { %v7486_v40 = vunpack.i.h.bf16 %v9403_v12  ;;  %v7485_v17 = vunpack.i.l.bf16 %v9403_v12 }
 0x342   :  { %v9407_v22 = vpop.permute.xlu0 %7488 }
 0x343   :  { %v9405_v61 = vpop.permute.xlu2 %7473 }
 0x34a   :  { %v9419_v4 = vpop.permute.xlu0 %7493 }
 0x35b   :  { %v9409_v62 = vpop.permute.xlu2 %7503 }
 0x35f   :  { %v713_v5 = vpop.f32.mrf.mxu3 }
 0x360   :  { %v9421_v13 = vadd.f32 %v713_v5, %v100_v53 }
 0x361   :  { %v742_v21 = vpop.f32.mrf.mxu0 }
 0x362   :  { %v9417_v63 = vadd.f32 %v742_v21, %v101_v32  ;;  %v102_v32 = vld [vmem:[%s13111_s2 + $0x10] sm:$0xff] }
 0x363   :  { %v9423_v27 = vpop.permute.xlu2 %7513 }
 0x364   :  { %v755_v56 = vsel %vm754_vm0, %v9417_v63, -inf }
 0x365   :  { %v756_v50 = vmax.f32 %v9421_v13, %v755_v56 }
 0x367   :  { %v716_v59 = vpop.f32.mrf.mxu3  ;;  %757 = vmax.xlane.f32.xlu2 %v756_v50 }
 0x368   :  { %v9440_v14 = vadd.f32 %v716_v59, %v102_v32 }
 0x369   :  { %v745_v21 = vpop.f32.mrf.mxu0 }
 0x36a   :  { %v9434_v5 = vadd.f32 %v745_v21, %v103_v6  ;;  %v104_v6 = vld [vmem:[%s13111_s2 + $0x20] sm:$0xff] }
 0x36b   :  { %v9436_v53 = vpop.permute.xlu2 %7528  ;;  %v9438_v54 = vpop.permute.xlu0 %7498 }
 0x36c   :  { %v759_v50 = vsel %vm754_vm0, %v9434_v5, -inf }
 0x36d   :  { %v760_v56 = vmax.f32 %v9440_v14, %v759_v50 }
 0x36f   :  { %v719_v49 = vpop.f32.mrf.mxu3  ;;  %761 = vmax.xlane.f32.xlu1 %v760_v56 }
 0x370   :  { %v9459_v50 = vadd.f32 %v719_v49, %v104_v6  ;;  %v515_v49 = vmul.f32 %v9399_v26, %v9049_v52  ;;  %v516_v6 = vmul.f32 %v9399_v26, %v9212_v30  ;;  %v7480_v26 = vunpack.i.l.bf16 %v7479_v24 }
 0x371   :  { %v748_v21 = vpop.f32.mrf.mxu0 }
 0x372   :  { %v9453_v59 = vadd.f32 %v748_v21, %v105_v58  ;;  %v106_v58 = vld [vmem:[%s13111_s2 + $0x30] sm:$0xff]  ;;  %v7582_v38 = vpack.i.bf16 %v516_v6, %v515_v49  ;;  %v7495_v49 = vunpack.i.l.bf16 %v9419_v4 }
 0x373   :  { %v9455_v32 = vpop.permute.xlu2 %7538  ;;  %v9457_v47 = vpop.permute.xlu0 %7508 }
 0x374   :  { %v763_v60 = vsel %vm754_vm0, %v9453_v59, -inf }
 0x375   :  { %v764_v56 = vmax.f32 %v9459_v50, %v763_v60  ;;  %v7476_v60 = vunpack.i.h.bf16 %v9405_v61 }
 0x377   :  { %765 = vmax.xlane.f32.xlu1 %v764_v56  ;;  %v722_v21 = vpop.f32.mrf.mxu3  ;;  %v7475_v56 = vunpack.i.l.bf16 %v9405_v61  ;;  %v1022_v61 = vsel %vm139_vm1, %v7480_v26, %v7481_v8  ;;  %v7501_v8 = vunpack.i.h.bf16 %v9438_v54  ;;  %v7500_v26 = vunpack.i.l.bf16 %v9438_v54 }
 0x378   :  { %v9480_v46 = vadd.f32 %v722_v21, %v106_v58  ;;  %v7505_v54 = vunpack.i.l.bf16 %v9409_v62 }
 0x379   :  { %v751_v28 = vpop.f32.mrf.mxu0 }
 0x37a   :  { %v9474_v31 = vadd.f32 %v751_v28, %v107_v42 }
 0x37b   :  { %v7549_v55 = vpop.permute.xlu2 %7548  ;;  %v9477_v43 = vpop.permute.xlu0 %7518 }
 0x37c   :  { %v7551_v35 = vunpack.i.h.bf16 %v7549_v55  ;;  %v7550_v37 = vunpack.i.l.bf16 %v7549_v55  ;;  %v767_v39 = vsel %vm754_vm0, %v9474_v31, -inf  ;;  %v1023_v55 = vsel %vm139_vm1, %v7475_v56, %v7476_v60 }
 0x37d   :  { %v768_v42 = vmax.f32 %v9480_v46, %v767_v39  ;;  %v1021_v39 = vsel %vm139_vm1, %v7485_v17, %v7486_v40 }
 0x37e   :  { %v1024_v28 = vsel %vm139_vm1, %v7550_v37, %v7551_v35  ;;  %v7491_v35 = vunpack.i.h.bf16 %v9407_v22  ;;  %v7490_v37 = vunpack.i.l.bf16 %v9407_v22  ;;  %v7506_v22 = vunpack.i.h.bf16 %v9409_v62 }
 0x37f   :  { %1057 = vmatpush.msra.mxu0 %v1024_v28  ;;  %7583 = vrot.lane.b32.xlu2 %v7582_v38, %s8632_s18  ;;  %v7496_v38 = vunpack.i.h.bf16 %v9419_v4  ;;  %v549_v4 = vmul.f32 %v9451_v34, %v9056_v11  ;;  %v7524_v28 = vpop.permute.xlu1 %7523 }
 0x380   :  { %769 = vmax.xlane.f32.xlu0 %v768_v42  ;;  %v1019_v17 = vsel %vm139_vm1, %v7490_v37, %v7491_v35  ;;  %v550_v42 = vmul.f32 %v9451_v34, %v9219_v19  ;;  %v7516_v35 = vunpack.i.h.bf16 %v9423_v27  ;;  %v7515_v37 = vunpack.i.l.bf16 %v9423_v27 }
 0x381   :  { %1058 = vmatpush.msra.mxu0 %v1023_v55  ;;  %v1018_v40 = vsel %vm139_vm1, %v7495_v49, %v7496_v38  ;;  %v548_v19 = vmul.f32 %v9401_v57, %v9212_v30  ;;  %v1015_v38 = vsel %vm139_vm1, %v7505_v54, %v7506_v22  ;;  %v7510_v30 = vunpack.i.l.bf16 %v9457_v47 }
 0x382   :  { %v7577_v62 = vpack.i.bf16 %v550_v42, %v549_v4  ;;  %v7520_v22 = vunpack.i.l.bf16 %v9477_v43  ;;  %v7531_v4 = vunpack.i.h.bf16 %v9436_v53  ;;  %v7530_v42 = vunpack.i.l.bf16 %v9436_v53 }
 0x383   :  { %v7554_v58 = vpop.permute.xlu2 %7553  ;;  %1059 = vmatpush.msra.mxu0 %v1022_v61  ;;  %v9491_v24 = vpop.permute.xlu0 %7533 }
 0x384   :  { %v7556_v12 = vunpack.i.h.bf16 %v7554_v58  ;;  %v7555_v21 = vunpack.i.l.bf16 %v7554_v58  ;;  %v1017_v58 = vsel %vm139_vm1, %v7500_v26, %v7501_v8  ;;  %v7511_v8 = vunpack.i.h.bf16 %v9457_v47 }
 0x385   :  { %1060 = vmatpush.msra.mxu0 %v1021_v39  ;;  %v547_v39 = vmul.f32 %v9401_v57, %v9049_v52  ;;  %v1014_v52 = vsel %vm139_vm1, %v7515_v37, %v7516_v35  ;;  %v1029_v35 = vsel %vm139_vm1, %v7530_v42, %v7531_v4  ;;  %v7536_v37 = vunpack.i.h.bf16 %v9491_v24 }
 0x386   :  { %v1020_v6 = vsel %vm139_vm1, %v7555_v21, %v7556_v12  ;;  %v7526_v12 = vunpack.i.h.bf16 %v7524_v28  ;;  %v7525_v21 = vunpack.i.l.bf16 %v7524_v28  ;;  %v1031_v54 = vsel %vm139_vm1, %v7510_v30, %v7511_v8 }
 0x387   :  { %1061 = vmatpush.msra.mxu0 %v1020_v6  ;;  %v7587_v49 = vpack.i.bf16 %v548_v19, %v547_v39  ;;  %v7540_v39 = vunpack.i.l.bf16 %v9455_v32  ;;  %v7535_v53 = vunpack.i.l.bf16 %v9491_v24 }
 0x388   :  { %v1013_v27 = vsel %vm139_vm1, %v7525_v21, %v7526_v12 }
 0x389   :  { %1062 = vmatpush.msra.mxu0 %v1019_v17 }
 0x38b   :  { %v7559_v60 = vpop.permute.xlu2 %7558  ;;  %v9504_v56 = vpop.permute.xlu0 %7543  ;;  %1063 = vmatpush.msra.mxu0 %v1018_v40  ;;  %v7521_v40 = vunpack.i.h.bf16 %v9477_v43 }
 0x38c   :  { %v7561_v55 = vunpack.i.h.bf16 %v7559_v60  ;;  %v7560_v61 = vunpack.i.l.bf16 %v7559_v60  ;;  %v7546_v12 = vunpack.i.h.bf16 %v9504_v56  ;;  %v7545_v21 = vunpack.i.l.bf16 %v9504_v56 }
 0x38d   :  { %1064 = vmatpush.msra.mxu0 %v1017_v58  ;;  %v7541_v58 = vunpack.i.h.bf16 %v9455_v32  ;;  %v1011_v32 = vsel %vm139_vm1, %v7535_v53, %v7536_v37 }
 0x38e   :  { %v1016_v11 = vsel %vm139_vm1, %v7560_v61, %v7561_v55  ;;  %v1030_v61 = vsel %vm139_vm1, %v7520_v22, %v7521_v40  ;;  %v1010_v24 = vsel %vm139_vm1, %v7545_v21, %v7546_v12 }
 0x38f   :  { %1065 = vmatpush.msra.mxu0 %v1016_v11 }
 0x390   :  { %7578 = vrot.lane.b32.xlu1 %v7577_v62, %s8632_s18 }
 0x391   :  { %1066 = vmatpush.msra.mxu0 %v1015_v38 }
 0x393   :  { %v7564_v6 = vpop.permute.xlu0 %7563  ;;  %1067 = vmatpush.msra.mxu0 %v1014_v52  ;;  %v7574_v28 = vpop.permute.xlu2 %7573 }
 0x394   :  { %7588 = vrot.lane.b32.xlu0 %v7587_v49, %s8632_s18  ;;  %v7566_v26 = vunpack.i.h.bf16 %v7564_v6  ;;  %v7565_v17 = vunpack.i.l.bf16 %v7564_v6  ;;  %v7576_v47 = vunpack.i.h.bf16 %v7574_v28  ;;  %v7575_v55 = vunpack.i.l.bf16 %v7574_v28 }
 0x395   :  { %1068 = vmatpush.msra.mxu0 %v1013_v27  ;;  %v1027_v49 = vsel %vm139_vm1, %v7540_v39, %v7541_v58 }
 0x396   :  { %v1032_v60 = vsel %vm139_vm1, %v7565_v17, %v7566_v26  ;;  %v1028_v38 = vsel %vm139_vm1, %v7575_v55, %v7576_v47 }
 0x397   :  { %1094 = vmatpush.msra.mxu1 %v1032_v60 }
 0x399   :  { %1095 = vmatpush.msra.mxu1 %v1031_v54 }
 0x39b   :  { %v7569_v43 = vpop.permute.xlu0 %7568  ;;  %1096 = vmatpush.msra.mxu1 %v1030_v61 }
 0x39c   :  { %v7571_v11 = vunpack.i.h.bf16 %v7569_v43  ;;  %v7570_v19 = vunpack.i.l.bf16 %v7569_v43 }
 0x39d   :  { %1097 = vmatpush.msra.mxu1 %v1029_v35 }
 0x39e   :  { %v1012_v62 = vsel %vm139_vm1, %v7570_v19, %v7571_v11 }
 0x39f   :  { %1069 = vmatpush.msra.mxu0 %v1012_v62  ;;  %1098 = vmatpush.msra.mxu1 %v1028_v38 }
 0x3a1   :  { %1070 = vmatpush.msra.mxu0 %v1011_v32  ;;  %1099 = vmatpush.msra.mxu1 %v1027_v49 }
 0x3a3   :  { %1071 = vmatpush.msra.mxu0 %v1010_v24 }
 0x3da   :  { %v758_v52 = vpop.xlane.xlu2 %757 }
 0x3db   :  { %v771_v6 = vsub.f32 %v9421_v13, %v758_v52  ;;  %v772_v61 = vsub.f32 %v9417_v63, %v758_v52  ;;  %v1128_v52 = vld [vmem:[%s13114_s5 + $0x28] sm:$0xff] }
 0x3dd   :  { %v779_v27 = vmul.f32 1.442695, %v771_v6  ;;  %v781_v58 = vmul.f32 1.442695, %v772_v61  ;;  %v1126_v6 = vld [vmem:[%s13114_s5 + $0x18] sm:$0xff] }
 0x3df   :  { %8202 = vpow2.f32 %v779_v27  ;;  %v1125_v27 = vld [vmem:[%s13114_s5 + $0x10] sm:$0xff] }
 0x3e2   :  { %v7584_v56 = vpop.permute.xlu2 %7583  ;;  %v762_v8 = vpop.xlane.xlu1 %761 }
 0x3e3   :  { %v7586_v30 = vunpack.i.h.bf16 %v7584_v56  ;;  %v7585_v26 = vunpack.i.l.bf16 %v7584_v56  ;;  %v773_v17 = vsub.f32 %v9440_v14, %v762_v8  ;;  %v1124_v56 = vld [vmem:[%s13114_s5 + $0x8] sm:$0xff] }
 0x3e5   :  { %v8203_v40 = vpop.eup %8202  ;;  %v1009_v22 = vsel %vm139_vm1, %v7585_v26, %v7586_v30  ;;  %v783_v60 = vmul.f32 1.442695, %v773_v17 }
 0x3e6   :  { %823 = vmatmul.f32.vlgmr.msrb.gmra.mxu1 %v8203_v40  ;;  %1072 = vmatpush.msra.mxu0 %v1009_v22 }
 0x3e7   :  { %1073 = vmatmul.f32.vlgmr.msra.gmra.mxu0 %v8203_v40  ;;  %8204 = vpow2.f32 %v783_v60 }
 0x3ea   :  { %v766_v4 = vpop.xlane.xlu1 %765 }
 0x3eb   :  { %v775_v42 = vsub.f32 %v9459_v50, %v766_v4  ;;  %v774_v50 = vsub.f32 %v9434_v5, %v762_v8  ;;  %v776_v63 = vsub.f32 %v9453_v59, %v766_v4  ;;  %v1123_v8 = vld [vmem:[%s13114_s5] sm:$0xff] }
 0x3ed   :  { %v8205_v13 = vpop.eup %8204  ;;  %v787_v28 = vmul.f32 1.442695, %v775_v42  ;;  %v785_v35 = vmul.f32 1.442695, %v774_v50  ;;  %v789_v5 = vmul.f32 1.442695, %v776_v63 }
 0x3ee   :  { %826 = vmatmul.f32.gmra.mxu1 %v8205_v13 }
 0x3ef   :  { %1076 = vmatmul.f32.gmra.mxu0 %v8205_v13  ;;  %8206 = vpow2.f32 %v787_v28 }
 0x3f3   :  { %v770_v54 = vpop.xlane.xlu0 %769 }
 0x3f4   :  { %v777_v47 = vsub.f32 %v9480_v46, %v770_v54  ;;  %v778_v32 = vsub.f32 %v9474_v31, %v770_v54  ;;  %v1127_v31 = vld [vmem:[%s13114_s5 + $0x20] sm:$0xff] }
 0x3f5   :  { %v8207_v14 = vpop.eup %8206 }
 0x3f6   :  { %v791_v55 = vmul.f32 1.442695, %v777_v47  ;;  %829 = vmatmul.f32.vlgmr.msrb.gmra.mxu2 %v8207_v14  ;;  %v793_v49 = vmul.f32 1.442695, %v778_v32 }
 0x3f7   :  { %1079 = vmatmul.f32.gmra.mxu0 %v8207_v14  ;;  %1152 = vmatpush.msrb.mxu2 %v1128_v52 }
 0x3f8   :  { %8208 = vpow2.f32 %v791_v55 }
 0x3f9   :  { %8210 = vpow2.f32 %v781_v58  ;;  %1153 = vmatpush.msrb.mxu2 %v1127_v31 }
 0x3fa   :  { %8212 = vpow2.f32 %v785_v35 }
 0x3fb   :  { %8214 = vpow2.f32 %v789_v5  ;;  %1154 = vmatpush.msrb.mxu2 %v1126_v6 }
 0x3fc   :  { %8216 = vpow2.f32 %v793_v49  ;;  %v136_v49 = vld [vmem:[%s13117_s8 + $0x20] sm:$0xff] }
 0x3fd   :  { %1155 = vmatpush.msrb.mxu2 %v1125_v27 }
 0x3fe   :  { %v8209_v39 = vpop.eup %8208 }
 0x3ff   :  { %832 = vmatmul.f32.gmra.mxu2 %v8209_v39  ;;  %1082 = vmatmul.f32.gmra.mxu0 %v8209_v39  ;;  %v8211_v11 = vpop.eup %8210 }
 0x400   :  { %v8213_v38 = vpop.eup %8212  ;;  %1156 = vmatpush.msrb.mxu2 %v1124_v56 }
 0x401   :  { %v8215_v24 = vpop.eup %8214 }
 0x402   :  { %v7579_v43 = vpop.permute.xlu1 %7578  ;;  %v8217_v59 = vpop.eup %8216  ;;  %1157 = vmatpush.msrb.mxu2 %v1123_v8 }
 0x403   :  { %v7581_v37 = vunpack.i.h.bf16 %v7579_v43  ;;  %v7580_v53 = vunpack.i.l.bf16 %v7579_v43 }
 0x405   :  { %v1026_v19 = vsel %vm139_vm1, %v7580_v53, %v7581_v37 }
 0x406   :  { %v7589_v46 = vpop.permute.xlu0 %7588  ;;  %1100 = vmatpush.msra.mxu1 %v1026_v19 }
 0x407   :  { %v7591_v12 = vunpack.i.h.bf16 %v7589_v46  ;;  %v7590_v21 = vunpack.i.l.bf16 %v7589_v46  ;;  %6943 = vmatmul.msk.f32.vlgmr.msra.gmra.mxu2 %vm754_vm0, %v8211_v11 }
 0x409   :  { %v1025_v62 = vsel %vm139_vm1, %v7590_v21, %v7591_v12 }
 0x40a   :  { %1101 = vmatpush.msra.mxu1 %v1025_v62 }
 0x40b   :  { %6947 = vmatmul.msk.f32.vlgmr.msra.gmra.mxu1 %vm754_vm0, %v8211_v11 }
 0x40f   :  { %6944 = vmatmul.msk.f32.gmra.mxu2 %vm754_vm0, %v8213_v38 }
 0x413   :  { %6948 = vmatmul.msk.f32.gmra.mxu1 %vm754_vm0, %v8213_v38 }
 0x417   :  { %6945 = vmatmul.msk.f32.gmra.mxu2 %vm754_vm0, %v8215_v24 }
 0x41b   :  { %6949 = vmatmul.msk.f32.gmra.mxu1 %vm754_vm0, %v8215_v24  ;;  %v1129_v24 = vperm.slane %v136_v49, 0 }
 0x41f   :  { %6946 = vmatmul.msk.f32.gmra.mxu2 %vm754_vm0, %v8217_v59 }
 0x423   :  { %6950 = vmatmul.msk.f32.gmra.mxu1 %vm754_vm0, %v8217_v59 }
 0x463   :  { %v824_v30 = vpop.f32.mrf.mxu1 }
 0x464   :  { %v1074_v4 = vpop.f32.mrf.mxu0 }
 0x46b   :  { %v827_v17 = vpop.f32.mrf.mxu1 }
 0x46c   :  { %v1077_v61 = vpop.f32.mrf.mxu0 }
 0x474   :  { %v1080_v53 = vpop.f32.mrf.mxu0 }
 0x479   :  { %v830_v26 = vpop.f32.mrf.mxu2 }
 0x47c   :  { %v1083_v62 = vpop.f32.mrf.mxu0 }
 0x482   :  { %v833_v40 = vpop.f32.mrf.mxu2 }
 0x488   :  { %v1103_v22 = vpop.f32.mrf.mxu1 }
 0x489   :  { %v1104_v13 = vadd.f32 %v1103_v22, %v1074_v4 }
 0x48a   :  { %v853_v60 = vpop.f32.mrf.mxu2 }
 0x48b   :  { %v854_v42 = vadd.f32 %v853_v60, %v824_v30 }
 0x48d   :  { %8218 = vrcp.f32 %v854_v42 }
 0x490   :  { %v1106_v47 = vpop.f32.mrf.mxu1 }
 0x491   :  { %v1107_v58 = vadd.f32 %v1106_v47, %v1077_v61 }
 0x492   :  { %v856_v28 = vpop.f32.mrf.mxu2 }
 0x493   :  { %v8219_v54 = vpop.eup %8218  ;;  %v857_v14 = vadd.f32 %v856_v28, %v827_v17 }
 0x494   :  { %v1119_v55 = vmul.f32 %v8219_v54, %v1104_v13 }
 0x495   :  { %8220 = vrcp.f32 %v857_v14 }
 0x496   :  { %6951 = vmatmul.msk.f32.vlgmr.msrb.gmra.mxu2 %vm635_vm15, %v1119_v55 }
 0x498   :  { %v1109_v37 = vpop.f32.mrf.mxu1 }
 0x499   :  { %v1110_v11 = vadd.f32 %v1109_v37, %v1080_v53 }
 0x49a   :  { %v859_v39 = vpop.f32.mrf.mxu2 }
 0x49b   :  { %v8221_v50 = vpop.eup %8220  ;;  %v860_v43 = vadd.f32 %v859_v39, %v830_v26 }
 0x49c   :  { %v1120_v35 = vmul.f32 %v8221_v50, %v1107_v58 }
 0x49d   :  { %8222 = vrcp.f32 %v860_v43 }
 0x49e   :  { %6952 = vmatmul.msk.f32.gmra.mxu2 %vm635_vm15, %v1120_v35 }
 0x4a0   :  { %v1112_v63 = vpop.f32.mrf.mxu1 }
 0x4a1   :  { %v1113_v5 = vadd.f32 %v1112_v63, %v1083_v62  ;;  %v1274_v63 = vld [vmem:[%s13115_s6 + $0x8] sm:$0xff]  ;;  %v1273_v62 = vld [vmem:[%s13115_s6] sm:$0xff] }
 0x4a2   :  { %v862_v46 = vpop.f32.mrf.mxu2 }
 0x4a3   :  { %v8223_v19 = vpop.eup %8222  ;;  %v863_v12 = vadd.f32 %v862_v46, %v833_v40 }
 0x4a4   :  { %v1121_v21 = vmul.f32 %v8223_v19, %v1110_v11 }
 0x4a5   :  { %8224 = vrcp.f32 %v863_v12  ;;  %v1276_v12 = vld [vmem:[%s13115_s6 + $0x18] sm:$0xff] }
 0x4a6   :  { %6953 = vmatmul.msk.f32.gmra.mxu2 %vm635_vm15, %v1121_v21  ;;  %1302 = vmatpush.msrb.mxu3 %v1276_v12  ;;  %v1275_v21 = vld [vmem:[%s13115_s6 + $0x10] sm:$0xff] }
 0x4a8   :  { %1303 = vmatpush.msrb.mxu3 %v1275_v21 }
 0x4aa   :  { %1304 = vmatpush.msrb.mxu3 %v1274_v63  ;;  %v1334_v63 = vld [vmem:[%s13116_s7 + $0x58] sm:$0xff] }
 0x4ab   :  { %v8225_v38 = vpop.eup %8224 }
 0x4ac   :  { %v1122_v32 = vmul.f32 %v8225_v38, %v1113_v5  ;;  %1305 = vmatpush.msrb.mxu3 %v1273_v62 }
 0x4ae   :  { %6954 = vmatmul.msk.f32.gmra.mxu2 %vm635_vm15, %v1122_v32 }
 0x519   :  { %v1159_v59 = vpop.f32.mrf.mxu2 }
 0x51a   :  { %v1160_v52 = vadd.f32 %v1159_v59, %v1129_v24 }
 0x51c   :  { %v9590_v31 = vadd.f32 %v1160_v52, %v8712_v10 }
 0x51e   :  { %v1175_v6 = vsel %vm139_vm1, %v9590_v31, 0.0 }
 0x51f   :  { %1176 = vadd.xlane.f32.xlu1 %v1175_v6 }
 0x521   :  { %v1162_v27 = vpop.f32.mrf.mxu2 }
 0x522   :  { %v1163_v56 = vadd.f32 %v1162_v27, %v1129_v24 }
 0x524   :  { %v9595_v8 = vadd.f32 %v1163_v56, %v8719_v15 }
 0x526   :  { %v1178_v30 = vsel %vm139_vm1, %v9595_v8, 0.0 }
 0x527   :  { %1179 = vadd.xlane.f32.xlu2 %v1178_v30 }
 0x529   :  { %v1165_v26 = vpop.f32.mrf.mxu2 }
 0x52a   :  { %v1166_v17 = vadd.f32 %v1165_v26, %v1129_v24 }
 0x52c   :  { %v9600_v40 = vadd.f32 %v1166_v17, %v8726_v20 }
 0x52e   :  { %v1181_v10 = vsel %vm139_vm1, %v9600_v40, 0.0 }
 0x52f   :  { %1182 = vadd.xlane.f32.xlu0 %v1181_v10  ;;  %v134_v10 = vld [vmem:[%s13117_s8 + $0x10] sm:$0xff] }
 0x531   :  { %v1168_v22 = vpop.f32.mrf.mxu2 }
 0x532   :  { %v1169_v60 = vadd.f32 %v1168_v22, %v1129_v24 }
 0x534   :  { %v9605_v4 = vadd.f32 %v1169_v60, %v8733_v25 }
 0x536   :  { %v1184_v15 = vsel %vm139_vm1, %v9605_v4, 0.0 }
 0x537   :  { %1185 = vadd.xlane.f32.xlu1 %v1184_v15 }
 0x592   :  { %v1177_v42 = vpop.xlane.xlu1 %1176 }
 0x593   :  { %v1187_v13 = vmul.f32 %v1177_v42, %v8737_v33 }
 0x595   :  { %v1191_v28 = vsub.f32 %v9590_v31, %v1187_v13  ;;  %v135_v13 = vld [vmem:[%s13117_s8 + $0x18] sm:$0xff] }
 0x597   :  { %v1195_v20 = vmul.f32 %v1191_v28, %v1191_v28 }
 0x599   :  { %v1199_v54 = vsel %vm139_vm1, %v1195_v20, 0.0  ;;  %v9654_v20 = vperm.slane %v134_v10, 0 }
 0x59a   :  { %1200 = vadd.xlane.f32.xlu2 %v1199_v54  ;;  %v1180_v47 = vpop.xlane.xlu2 %1179  ;;  %v1338_v54 = vld [vmem:[%s13116_s7 + $0x78] sm:$0xff] }
 0x59b   :  { %v1188_v14 = vmul.f32 %v1180_v47, %v8737_v33  ;;  %v1337_v47 = vld [vmem:[%s13116_s7 + $0x70] sm:$0xff]  ;;  %1339 = vmatpush.msrb.mxu0 %v1338_v54  ;;  %v1328_v54 = vld [vmem:[%s13116_s7 + $0x28] sm:$0xff] }
 0x59d   :  { %v9614_v55 = vsub.f32 %v9595_v8, %v1188_v14  ;;  %1340 = vmatpush.msrb.mxu0 %v1337_v47 }
 0x59f   :  { %v1196_v25 = vmul.f32 %v9614_v55, %v9614_v55 }
 0x5a1   :  { %v1202_v61 = vsel %vm139_vm1, %v1196_v25, 0.0 }
 0x5a2   :  { %1203 = vadd.xlane.f32.xlu0 %v1202_v61  ;;  %v1183_v58 = vpop.xlane.xlu0 %1182 }
 0x5a3   :  { %v1189_v39 = vmul.f32 %v1183_v58, %v8737_v33  ;;  %v9662_v58 = vperm.slane %v135_v13, 0 }
 0x5a5   :  { %v9621_v50 = vsub.f32 %v9600_v40, %v1189_v39  ;;  %v1336_v39 = vld [vmem:[%s13116_s7 + $0x68] sm:$0xff] }
 0x5a6   :  { %1341 = vmatpush.msrb.mxu0 %v1336_v39 }
 0x5a7   :  { %v1197_v43 = vmul.f32 %v9621_v50, %v9621_v50 }
 0x5a9   :  { %v1205_v35 = vsel %vm139_vm1, %v1197_v43, 0.0 }
 0x5aa   :  { %1206 = vadd.xlane.f32.xlu1 %v1205_v35  ;;  %v1186_v37 = vpop.xlane.xlu1 %1185 }
 0x5ab   :  { %v1190_v53 = vmul.f32 %v1186_v37, %v8737_v33 }
 0x5ad   :  { %v9628_v11 = vsub.f32 %v9605_v4, %v1190_v53 }
 0x5af   :  { %v1198_v46 = vmul.f32 %v9628_v11, %v9628_v11 }
 0x5b1   :  { %v1208_v19 = vsel %vm139_vm1, %v1198_v46, 0.0  ;;  %v1335_v46 = vld [vmem:[%s13116_s7 + $0x60] sm:$0xff] }
 0x5b2   :  { %1209 = vadd.xlane.f32.xlu2 %v1208_v19  ;;  %1342 = vmatpush.msrb.mxu0 %v1335_v46  ;;  %v1325_v46 = vld [vmem:[%s13116_s7 + $0x10] sm:$0xff] }
 0x5b4   :  { %1343 = vmatpush.msrb.mxu0 %v1334_v63 }
 0x60d   :  { %v1201_v5 = vpop.xlane.xlu2 %1200 }
 0x60e   :  { %v1211_v38 = vmul.f32 %v1201_v5, %v8737_v33 }
 0x610   :  { %v1215_v32 = vadd.f32 1e-05, %v1211_v38  ;;  %v1333_v38 = vld [vmem:[%s13116_s7 + $0x50] sm:$0xff] }
 0x611   :  { %1344 = vmatpush.msrb.mxu0 %v1333_v38 }
 0x612   :  { %8226 = vrsqrt.f32 %v1215_v32  ;;  %vm1225_vm3 = vweird.f32 %v1215_v32 }
 0x615   :  { %v1204_v49 = vpop.xlane.xlu0 %1203 }
 0x616   :  { %v1212_v24 = vmul.f32 %v1204_v49, %v8737_v33 }
 0x618   :  { %v8227_v59 = vpop.eup %8226  ;;  %v1216_v52 = vadd.f32 1e-05, %v1212_v24 }
 0x619   :  { %v1220_v6 = vmul.f32 %v8227_v59, %v1215_v32  ;;  %vm1226_vm2 = vweird.f32 %v8227_v59 }
 0x61a   :  { %8228 = vrsqrt.f32 %v1216_v52  ;;  %vm1227_vm4 = vmor %vm1225_vm3, %vm1226_vm2  ;;  %vm1235_vm6 = vweird.f32 %v1216_v52 }
 0x61b   :  { %v1221_v27 = vmul.f32 %v8227_v59, %v1220_v6 }
 0x61d   :  { %v1222_v56 = vmul.f32 0.5, %v1221_v27  ;;  %v1207_v30 = vpop.xlane.xlu1 %1206  ;;  %v1331_v27 = vld [vmem:[%s13116_s7 + $0x40] sm:$0xff] }
 0x61e   :  { %v1213_v26 = vmul.f32 %v1207_v30, %v8737_v33 }
 0x61f   :  { %v1223_v17 = vsub.f32 1.5, %v1222_v56 }
 0x620   :  { %v8229_v22 = vpop.eup %8228  ;;  %v1217_v60 = vadd.f32 1e-05, %v1213_v26 }
 0x621   :  { %v1224_v15 = vmul.f32 %v8227_v59, %v1223_v17  ;;  %v1230_v42 = vmul.f32 %v8229_v22, %v1216_v52  ;;  %vm1236_vm5 = vweird.f32 %v8229_v22 }
 0x622   :  { %8230 = vrsqrt.f32 %v1217_v60  ;;  %vm1237_vm7 = vmor %vm1235_vm6, %vm1236_vm5  ;;  %vm1245_vm9 = vweird.f32 %v1217_v60 }
 0x623   :  { %v1228_v14 = vsel %vm1227_vm4, %v8227_v59, %v1224_v15  ;;  %v1231_v25 = vmul.f32 %v8229_v22, %v1230_v42  ;;  %v1332_v59 = vld [vmem:[%s13116_s7 + $0x48] sm:$0xff] }
 0x624   :  { %v1259_v61 = vmul.f32 %v1228_v14, %v1191_v28  ;;  %1345 = vmatpush.msrb.mxu0 %v1332_v59  ;;  %v1327_v14 = vld [vmem:[%s13116_s7 + $0x20] sm:$0xff] }
 0x625   :  { %v1232_v43 = vmul.f32 0.5, %v1231_v25  ;;  %v1210_v35 = vpop.xlane.xlu2 %1209 }
 0x626   :  { %v1214_v37 = vmul.f32 %v1210_v35, %v8737_v33  ;;  %v1264_v53 = vmul.f32 %v9654_v20, %v1259_v61  ;;  %1346 = vmatpush.msrb.mxu0 %v1331_v27 }
 0x627   :  { %v1233_v19 = vsub.f32 1.5, %v1232_v43 }
 0x628   :  { %v8231_v28 = vpop.eup %8230  ;;  %v1218_v12 = vadd.f32 1e-05, %v1214_v37  ;;  %v1269_v21 = vadd.f32 %v9662_v58, %v1264_v53 }
 0x629   :  { %v1234_v62 = vmul.f32 %v8229_v22, %v1233_v19  ;;  %v1240_v5 = vmul.f32 %v8231_v28, %v1217_v60  ;;  %vm1246_vm8 = vweird.f32 %v8231_v28  ;;  %v1324_v19 = vld [vmem:[%s13116_s7 + $0x8] sm:$0xff] }
 0x62a   :  { %8232 = vrsqrt.f32 %v1218_v12  ;;  %6955 = vmatmul.msk.f32.vlgmr.msrb.gmra.mxu3 %vm139_vm1, %v1269_v21  ;;  %vm1247_vm10 = vmor %vm1245_vm9, %vm1246_vm8  ;;  %vm1255_vm12 = vweird.f32 %v1218_v12 }
 0x62b   :  { %v1241_v32 = vmul.f32 %v8231_v28, %v1240_v5  ;;  %v1238_v49 = vsel %vm1237_vm7, %v8229_v22, %v1234_v62  ;;  %v1329_v22 = vld [vmem:[%s13116_s7 + $0x30] sm:$0xff] }
 0x62c   :  { %v1260_v24 = vmul.f32 %v1238_v49, %v9614_v55  ;;  %v1330_v55 = vld [vmem:[%s13116_s7 + $0x38] sm:$0xff] }
 0x62d   :  { %v1242_v52 = vmul.f32 0.5, %v1241_v32  ;;  %1347 = vmatpush.msrb.mxu0 %v1330_v55 }
 0x62e   :  { %v1265_v6 = vmul.f32 %v9654_v20, %v1260_v24 }
 0x62f   :  { %v1243_v56 = vsub.f32 1.5, %v1242_v52  ;;  %1348 = vmatpush.msrb.mxu0 %v1329_v22 }
 0x630   :  { %v8233_v30 = vpop.eup %8232  ;;  %v1270_v26 = vadd.f32 %v9662_v58, %v1265_v6  ;;  %v137_v6 = vld [vmem:[%s13117_s8 + $0x28] sm:$0xff] }
 0x631   :  { %v1244_v17 = vmul.f32 %v8231_v28, %v1243_v56  ;;  %v1250_v10 = vmul.f32 %v8233_v30, %v1218_v12  ;;  %vm1256_vm11 = vweird.f32 %v8233_v30  ;;  %1349 = vmatpush.msrb.mxu0 %v1328_v54  ;;  %v1372_v27 = vperm.slane %v137_v6, 0  ;;  %v6967_v6 = vld [vmem:[%s13113_s4 + $0x48] sm:$0xff] }
 0x632   :  { %6956 = vmatmul.msk.f32.gmra.mxu3 %vm139_vm1, %v1270_v26  ;;  %vm1257_vm13 = vmor %vm1255_vm12, %vm1256_vm11 }
 0x633   :  { %v1251_v15 = vmul.f32 %v8233_v30, %v1250_v10  ;;  %v1248_v42 = vsel %vm1247_vm10, %v8231_v28, %v1244_v17  ;;  %1350 = vmatpush.msrb.mxu0 %v1327_v14 }
 0x634   :  { %v1261_v13 = vmul.f32 %v1248_v42, %v9621_v50  ;;  %v1326_v50 = vld [vmem:[%s13116_s7 + $0x18] sm:$0xff] }
 0x635   :  { %v1252_v47 = vmul.f32 0.5, %v1251_v15  ;;  %1351 = vmatpush.msrb.mxu0 %v1326_v50 }
 0x636   :  { %v1266_v60 = vmul.f32 %v9654_v20, %v1261_v13 }
 0x637   :  { %v1253_v25 = vsub.f32 1.5, %v1252_v47  ;;  %1352 = vmatpush.msrb.mxu0 %v1325_v46 }
 0x638   :  { %v1271_v61 = vadd.f32 %v9662_v58, %v1266_v60 }
 0x639   :  { %v1254_v39 = vmul.f32 %v8233_v30, %v1253_v25  ;;  %1353 = vmatpush.msrb.mxu0 %v1324_v19 }
 0x63a   :  { %6957 = vmatmul.msk.f32.gmra.mxu3 %vm139_vm1, %v1271_v61 }
 0x63b   :  { %v1258_v43 = vsel %vm1257_vm13, %v8233_v30, %v1254_v39 }
 0x63c   :  { %v1262_v35 = vmul.f32 %v1258_v43, %v9628_v11  ;;  %v1323_v11 = vld [vmem:[%s13116_s7] sm:$0xff] }
 0x63d   :  { %1354 = vmatpush.msrb.mxu0 %v1323_v11 }
 0x63e   :  { %v1267_v37 = vmul.f32 %v9654_v20, %v1262_v35  ;;  %v138_v20 = vld [vmem:[%s13117_s8 + $0x30] sm:$0xff] }
 0x640   :  { %v1272_v53 = vadd.f32 %v9662_v58, %v1267_v37  ;;  %v1277_v58 = vperm.slane %v138_v20, 0 }
 0x642   :  { %6958 = vmatmul.msk.f32.gmra.mxu3 %vm139_vm1, %v1272_v53 }
 0x6ad   :  { %v1307_v28 = vpop.f32.mrf.mxu3 }
 0x6ae   :  { %v1308_v12 = vadd.f32 %v1307_v28, %v1277_v58 }
 0x6b0   :  { %v1319_v21 = vmax.f32 %v1308_v12, 0.0 }
 0x6b2   :  { %1355 = vmatmul.f32.vlgmr.msrb.gmra.mxu0 %v1319_v21 }
 0x6b5   :  { %v1310_v63 = vpop.f32.mrf.mxu3 }
 0x6b6   :  { %v1311_v62 = vadd.f32 %v1310_v63, %v1277_v58 }
 0x6b8   :  { %v1320_v5 = vmax.f32 %v1311_v62, 0.0 }
 0x6ba   :  { %1358 = vmatmul.f32.gmra.mxu0 %v1320_v5  ;;  %v6972_v5 = vld [vmem:[%s13113_s4 + $0x70] sm:$0xff] }
 0x6bb   :  { %1516 = vmatpush.msrb.mxu1 %v6972_v5 }
 0x6bd   :  { %v1313_v38 = vpop.f32.mrf.mxu3 }
 0x6be   :  { %v1314_v32 = vadd.f32 %v1313_v38, %v1277_v58  ;;  %v6973_v38 = vld [vmem:[%s13113_s4 + $0x78] sm:$0xff] }
 0x6bf   :  { %1545 = vmatpush.msra.mxu2 %v6973_v38  ;;  %v6959_v38 = vld [vmem:[%s13117_s8 + $0x38] sm:$0xff] }
 0x6c0   :  { %v1321_v49 = vmax.f32 %v1314_v32, 0.0  ;;  %v6970_v32 = vld [vmem:[%s13113_s4 + $0x60] sm:$0xff] }
 0x6c1   :  { %1517 = vmatpush.msrb.mxu1 %v6970_v32 }
 0x6c2   :  { %1361 = vmatmul.f32.gmra.mxu0 %v1321_v49  ;;  %v6971_v49 = vld [vmem:[%s13113_s4 + $0x68] sm:$0xff] }
 0x6c3   :  { %1546 = vmatpush.msra.mxu2 %v6971_v49  ;;  %v8460_v49 = vld [vmem:[%s13112_s3 + $0x28] sm:$0xff] }
 0x6c5   :  { %v1316_v24 = vpop.f32.mrf.mxu3 }
 0x6c6   :  { %v1317_v59 = vadd.f32 %v1316_v24, %v1277_v58  ;;  %v6968_v24 = vld [vmem:[%s13113_s4 + $0x50] sm:$0xff] }
 0x6c7   :  { %1518 = vmatpush.msrb.mxu1 %v6968_v24 }
 0x6c8   :  { %v1322_v52 = vmax.f32 %v1317_v59, 0.0  ;;  %v6969_v59 = vld [vmem:[%s13113_s4 + $0x58] sm:$0xff] }
 0x6c9   :  { %1547 = vmatpush.msra.mxu2 %v6969_v59 }
 0x6ca   :  { %1364 = vmatmul.f32.gmra.mxu0 %v1322_v52  ;;  %v6966_v52 = vld [vmem:[%s13113_s4 + $0x40] sm:$0xff] }
 0x6cb   :  { %1519 = vmatpush.msrb.mxu1 %v6966_v52  ;;  %1548 = vmatpush.msra.mxu2 %v6967_v6 }
 0x72f   :  { %v1356_v56 = vpop.f32.mrf.mxu0 }
 0x730   :  { %v1368_v30 = vadd.f32 %v1356_v56, %v9590_v31  ;;  %v8443_v56 = vld [vmem:[%s13112_s3 + $0xb8] sm:$0xff] }
 0x731   :  { %1913 = vmatpush.msrb.mxu2 %v8443_v56  ;;  %v8461_v56 = vld [vmem:[%s13112_s3 + $0x20] sm:$0xff] }
 0x732   :  { %v9729_v26 = vadd.f32 %v1372_v27, %v1368_v30 }
 0x734   :  { %v1385_v55 = vsel %vm139_vm1, %v9729_v26, 0.0 }
 0x735   :  { %1386 = vadd.xlane.f32.xlu0 %v1385_v55  ;;  %v8444_v55 = vld [vmem:[%s13112_s3 + $0x70] sm:$0xff] }
 0x737   :  { %v1359_v17 = vpop.f32.mrf.mxu0 }
 0x738   :  { %v1369_v10 = vadd.f32 %v1359_v17, %v9595_v8  ;;  %v8445_v17 = vld [vmem:[%s13112_s3 + $0xb0] sm:$0xff] }
 0x739   :  { %1914 = vmatpush.msrb.mxu2 %v8445_v17 }
 0x73a   :  { %v9734_v22 = vadd.f32 %v1372_v27, %v1369_v10 }
 0x73c   :  { %v1388_v15 = vsel %vm139_vm1, %v9734_v22, 0.0 }
 0x73d   :  { %1389 = vadd.xlane.f32.xlu1 %v1388_v15  ;;  %v8446_v15 = vld [vmem:[%s13112_s3 + $0x68] sm:$0xff] }
 0x73f   :  { %v1362_v42 = vpop.f32.mrf.mxu0 }
 0x740   :  { %v1370_v13 = vadd.f32 %v1362_v42, %v9600_v40  ;;  %v8447_v42 = vld [vmem:[%s13112_s3 + $0xa8] sm:$0xff] }
 0x741   :  { %1915 = vmatpush.msrb.mxu2 %v8447_v42 }
 0x742   :  { %v9739_v54 = vadd.f32 %v1372_v27, %v1370_v13 }
 0x744   :  { %v1391_v31 = vsel %vm139_vm1, %v9739_v54, 0.0 }
 0x745   :  { %1392 = vadd.xlane.f32.xlu2 %v1391_v31  ;;  %v8448_v31 = vld [vmem:[%s13112_s3 + $0x60] sm:$0xff] }
 0x747   :  { %v1365_v47 = vpop.f32.mrf.mxu0 }
 0x748   :  { %v1371_v60 = vadd.f32 %v1365_v47, %v9605_v4  ;;  %v8449_v47 = vld [vmem:[%s13112_s3 + $0xa0] sm:$0xff] }
 0x749   :  { %1916 = vmatpush.msrb.mxu2 %v8449_v47  ;;  %v8463_v47 = vld [vmem:[%s13112_s3 + $0x10] sm:$0xff] }
 0x74a   :  { %v9744_v14 = vadd.f32 %v1372_v27, %v1371_v60  ;;  %v8442_v27 = vld [vmem:[%s13112_s3 + $0x78] sm:$0xff] }
 0x74b   :  { %1876 = vmatpush.msra.mxu1 %v8442_v27  ;;  %v8450_v60 = vld [vmem:[%s13112_s3 + $0x58] sm:$0xff]  ;;  %v6960_v27 = vld [vmem:[%s13117_s8 + $0x40] sm:$0xff] }
 0x74c   :  { %v1394_v8 = vsel %vm139_vm1, %v9744_v14, 0.0  ;;  %v1478_v42 = vperm.slane %v6960_v27, 0 }
 0x74d   :  { %1395 = vadd.xlane.f32.xlu0 %v1394_v8  ;;  %1877 = vmatpush.msra.mxu1 %v8444_v55  ;;  %v8451_v8 = vld [vmem:[%s13112_s3 + $0x98] sm:$0xff] }
 0x74e   :  { %1917 = vmatpush.msrb.mxu2 %v8451_v8 }
 0x74f   :  { %1878 = vmatpush.msra.mxu1 %v8446_v15 }
 0x751   :  { %1879 = vmatpush.msra.mxu1 %v8448_v31 }
 0x753   :  { %1880 = vmatpush.msra.mxu1 %v8450_v60 }
 0x7a8   :  { %v1387_v25 = vpop.xlane.xlu0 %1386 }
 0x7a9   :  { %v1397_v61 = vmul.f32 %v1387_v25, %v8737_v33 }
 0x7ab   :  { %v9750_v40 = vsub.f32 %v9729_v26, %v1397_v61  ;;  %v8452_v61 = vld [vmem:[%s13112_s3 + $0x50] sm:$0xff] }
 0x7ac   :  { %1881 = vmatpush.msra.mxu1 %v8452_v61  ;;  %v8464_v61 = vld [vmem:[%s13112_s3 + $0x8] sm:$0xff] }
 0x7ad   :  { %v1405_v50 = vmul.f32 %v9750_v40, %v9750_v40 }
 0x7af   :  { %v1409_v39 = vsel %vm139_vm1, %v1405_v50, 0.0  ;;  %v8453_v50 = vld [vmem:[%s13112_s3 + $0x90] sm:$0xff] }
 0x7b0   :  { %1410 = vadd.xlane.f32.xlu1 %v1409_v39  ;;  %v1390_v43 = vpop.xlane.xlu1 %1389  ;;  %1918 = vmatpush.msrb.mxu2 %v8453_v50 }
 0x7b1   :  { %v1398_v4 = vmul.f32 %v1390_v43, %v8737_v33  ;;  %v8454_v43 = vld [vmem:[%s13112_s3 + $0x48] sm:$0xff] }
 0x7b2   :  { %1882 = vmatpush.msra.mxu1 %v8454_v43 }
 0x7b3   :  { %v9757_v35 = vsub.f32 %v9734_v22, %v1398_v4  ;;  %v8455_v4 = vld [vmem:[%s13112_s3 + $0x88] sm:$0xff] }
 0x7b4   :  { %1919 = vmatpush.msrb.mxu2 %v8455_v4 }
 0x7b5   :  { %v1406_v37 = vmul.f32 %v9757_v35, %v9757_v35 }
 0x7b7   :  { %v1412_v53 = vsel %vm139_vm1, %v1406_v37, 0.0 }
 0x7b8   :  { %v1393_v46 = vpop.xlane.xlu2 %1392  ;;  %1413 = vadd.xlane.f32.xlu2 %v1412_v53 }
 0x7b9   :  { %v1399_v19 = vmul.f32 %v1393_v46, %v8737_v33 }
 0x7bb   :  { %v9764_v11 = vsub.f32 %v9739_v54, %v1399_v19  ;;  %v8456_v19 = vld [vmem:[%s13112_s3 + $0x40] sm:$0xff] }
 0x7bc   :  { %1883 = vmatpush.msra.mxu1 %v8456_v19 }
 0x7bd   :  { %v1407_v20 = vmul.f32 %v9764_v11, %v9764_v11 }
 0x7bf   :  { %v1415_v58 = vsel %vm139_vm1, %v1407_v20, 0.0  ;;  %v8457_v20 = vld [vmem:[%s13112_s3 + $0x80] sm:$0xff] }
 0x7c0   :  { %1416 = vadd.xlane.f32.xlu0 %v1415_v58  ;;  %v1396_v28 = vpop.xlane.xlu0 %1395  ;;  %1920 = vmatpush.msrb.mxu2 %v8457_v20 }
 0x7c1   :  { %v1400_v12 = vmul.f32 %v1396_v28, %v8737_v33  ;;  %v8458_v28 = vld [vmem:[%s13112_s3 + $0x38] sm:$0xff] }
 0x7c2   :  { %1884 = vmatpush.msra.mxu1 %v8458_v28 }
 0x7c3   :  { %v9771_v21 = vsub.f32 %v9744_v14, %v1400_v12 }
 0x7c5   :  { %v1408_v63 = vmul.f32 %v9771_v21, %v9771_v21 }
 0x7c7   :  { %v1418_v62 = vsel %vm139_vm1, %v1408_v63, 0.0 }
 0x7c8   :  { %1419 = vadd.xlane.f32.xlu1 %v1418_v62  ;;  %v8459_v62 = vld [vmem:[%s13112_s3 + $0x30] sm:$0xff] }
 0x7c9   :  { %1885 = vmatpush.msra.mxu1 %v8459_v62 }
 0x7cb   :  { %1886 = vmatpush.msra.mxu1 %v8460_v49 }
 0x7cd   :  { %1887 = vmatpush.msra.mxu1 %v8461_v56 }
 0x823   :  { %v1411_v30 = vpop.xlane.xlu1 %1410 }
 0x824   :  { %v1421_v10 = vmul.f32 %v1411_v30, %v8737_v33  ;;  %v1473_v30 = vperm.slane %v6959_v38, 0 }
 0x826   :  { %v1425_v13 = vadd.f32 1e-05, %v1421_v10  ;;  %v8462_v10 = vld [vmem:[%s13112_s3 + $0x18] sm:$0xff] }
 0x827   :  { %1888 = vmatpush.msra.mxu1 %v8462_v10 }
 0x828   :  { %8234 = vrsqrt.f32 %v1425_v13  ;;  %vm1435_vm2 = vweird.f32 %v1425_v13 }
 0x829   :  { %1889 = vmatpush.msra.mxu1 %v8463_v47 }
 0x82b   :  { %v1414_v25 = vpop.xlane.xlu2 %1413  ;;  %1890 = vmatpush.msra.mxu1 %v8464_v61 }
 0x82c   :  { %v1422_v39 = vmul.f32 %v1414_v25, %v8737_v33 }
 0x82e   :  { %v8235_v37 = vpop.eup %8234  ;;  %v1426_v53 = vadd.f32 1e-05, %v1422_v39 }
 0x82f   :  { %v1430_v46 = vmul.f32 %v8235_v37, %v1425_v13  ;;  %vm1436_vm14 = vweird.f32 %v8235_v37 }
 0x830   :  { %8236 = vrsqrt.f32 %v1426_v53  ;;  %vm1437_vm3 = vmor %vm1435_vm2, %vm1436_vm14  ;;  %vm1445_vm5 = vweird.f32 %v1426_v53 }
 0x831   :  { %v1431_v58 = vmul.f32 %v8235_v37, %v1430_v46 }
 0x833   :  { %v1432_v12 = vmul.f32 0.5, %v1431_v58  ;;  %v1417_v63 = vpop.xlane.xlu0 %1416 }
 0x834   :  { %v1423_v5 = vmul.f32 %v1417_v63, %v8737_v33 }
 0x835   :  { %v1433_v32 = vsub.f32 1.5, %v1432_v12 }
 0x836   :  { %v8237_v24 = vpop.eup %8236  ;;  %v1427_v59 = vadd.f32 1e-05, %v1423_v5 }
 0x837   :  { %v1434_v52 = vmul.f32 %v8235_v37, %v1433_v32  ;;  %v1440_v6 = vmul.f32 %v8237_v24, %v1426_v53  ;;  %vm1446_vm4 = vweird.f32 %v8237_v24 }
 0x838   :  { %8238 = vrsqrt.f32 %v1427_v59  ;;  %vm1447_vm6 = vmor %vm1445_vm5, %vm1446_vm4  ;;  %vm1455_vm8 = vweird.f32 %v1427_v59 }
 0x839   :  { %v1438_v55 = vsel %vm1437_vm3, %v8235_v37, %v1434_v52  ;;  %v1441_v17 = vmul.f32 %v8237_v24, %v1440_v6  ;;  %v8465_v37 = vld [vmem:[%s13112_s3] sm:$0xff] }
 0x83a   :  { %v1469_v15 = vmul.f32 %v1438_v55, %v9750_v40  ;;  %1891 = vmatpush.msra.mxu1 %v8465_v37 }
 0x83b   :  { %v1442_v13 = vmul.f32 0.5, %v1441_v17  ;;  %v1420_v31 = vpop.xlane.xlu1 %1419 }
 0x83c   :  { %v1474_v60 = vmul.f32 %v1473_v30, %v1469_v15  ;;  %v1424_v8 = vmul.f32 %v1420_v31, %v8737_v33 }
 0x83d   :  { %v1443_v25 = vsub.f32 1.5, %v1442_v13 }
 0x83e   :  { %v8239_v50 = vpop.eup %8238  ;;  %v1428_v40 = vadd.f32 1e-05, %v1424_v8  ;;  %v1479_v39 = vadd.f32 %v1478_v42, %v1474_v60 }
 0x83f   :  { %v1444_v43 = vmul.f32 %v8237_v24, %v1443_v25  ;;  %v1450_v4 = vmul.f32 %v8239_v50, %v1427_v59  ;;  %vm1456_vm7 = vweird.f32 %v8239_v50 }
 0x840   :  { %8240 = vrsqrt.f32 %v1428_v40  ;;  %6974 = vmatmul.msk.f32.vlgmr.msrb.gmra.mxu1 %vm139_vm1, %v1479_v39  ;;  %6978 = vmatmul.msk.f32.vlgmr.msra.gmra.mxu2 %vm139_vm1, %v1479_v39  ;;  %vm1457_vm9 = vmor %vm1455_vm8, %vm1456_vm7  ;;  %vm1465_vm11 = vweird.f32 %v1428_v40 }
 0x841   :  { %v1451_v46 = vmul.f32 %v8239_v50, %v1450_v4  ;;  %v1448_v19 = vsel %vm1447_vm6, %v8237_v24, %v1444_v43 }
 0x842   :  { %v1470_v20 = vmul.f32 %v1448_v19, %v9757_v35  ;;  %v13294_v19 = vld [vmem:[#allocation9_spill] sm:$0xff] }
 0x843   :  { %v1452_v58 = vmul.f32 0.5, %v1451_v46 }
 0x844   :  { %v1475_v28 = vmul.f32 %v1473_v30, %v1470_v20 }
 0x845   :  { %v1453_v12 = vsub.f32 1.5, %v1452_v58 }
 0x846   :  { %v8241_v53 = vpop.eup %8240  ;;  %v1480_v63 = vadd.f32 %v1478_v42, %v1475_v28  ;;  %v13295_v28 = vld [vmem:[#allocation12_spill] sm:$0xff] }
 0x847   :  { %v1454_v62 = vmul.f32 %v8239_v50, %v1453_v12  ;;  %v1460_v5 = vmul.f32 %v8241_v53, %v1428_v40  ;;  %vm1466_vm10 = vweird.f32 %v8241_v53 }
 0x848   :  { %6975 = vmatmul.msk.f32.gmra.mxu1 %vm139_vm1, %v1480_v63  ;;  %6979 = vmatmul.msk.f32.gmra.mxu2 %vm139_vm1, %v1480_v63  ;;  %vm1467_vm12 = vmor %vm1465_vm11, %vm1466_vm10 }
 0x849   :  { %v1461_v38 = vmul.f32 %v8241_v53, %v1460_v5  ;;  %v1458_v32 = vsel %vm1457_vm9, %v8239_v50, %v1454_v62  ;;  %v13297_v5 = vld [vmem:[#allocation5_spill] sm:$0xff] }
 0x84a   :  { %v1471_v49 = vmul.f32 %v1458_v32, %v9764_v11 }
 0x84b   :  { %v1462_v24 = vmul.f32 0.5, %v1461_v38 }
 0x84c   :  { %v1476_v35 = vmul.f32 %v1473_v30, %v1471_v49  ;;  %v13298_v49 = vld [vmem:[#allocation6_spill] sm:$0xff] }
 0x84d   :  { %v1463_v52 = vsub.f32 1.5, %v1462_v24 }
 0x84e   :  { %v1481_v6 = vadd.f32 %v1478_v42, %v1476_v35  ;;  %v13299_v35 = vld [vmem:[#allocation28_spill] sm:$0xff] }
 0x84f   :  { %v1464_v27 = vmul.f32 %v8241_v53, %v1463_v52 }
 0x850   :  { %6976 = vmatmul.msk.f32.gmra.mxu1 %vm139_vm1, %v1481_v6  ;;  %6980 = vmatmul.msk.f32.gmra.mxu2 %vm139_vm1, %v1481_v6 }
 0x851   :  { %v1468_v59 = vsel %vm1467_vm12, %v8241_v53, %v1464_v27  ;;  %v13296_v53 = vld [vmem:[#allocation18_spill] sm:$0xff] }
 0x852   :  { %v1472_v56 = vmul.f32 %v1468_v59, %v9771_v21  ;;  %v13300_v59 = vld [vmem:[#allocation10_spill] sm:$0xff] }
 0x854   :  { %v1477_v55 = vmul.f32 %v1473_v30, %v1472_v56 }
 0x856   :  { %v1482_v17 = vadd.f32 %v1478_v42, %v1477_v55 }
 0x858   :  { %6977 = vmatmul.msk.f32.gmra.mxu1 %vm139_vm1, %v1482_v17  ;;  %6981 = vmatmul.msk.f32.gmra.mxu2 %vm139_vm1, %v1482_v17  ;;  %v13301_v17 = vld [vmem:[#allocation7_spill] sm:$0xff] }
 0x8bd   :  { %v9894_v11 = vpop.f32.mrf.mxu1 }
 0x8be   :  { %v1574_v31 = vmul.f32 %v9894_v11, %v9035_v1  ;;  %v1570_v39 = vmul.f32 %v9894_v11, %v9119_v16  ;;  %v1566_v37 = vmul.f32 %v9894_v11, %v9054_v9  ;;  %v1562_v20 = vmul.f32 %v9894_v11, %v13294_v19 }
 0x8bf   :  { %v1610_v62 = vmul.f32 %v9894_v11, %v13296_v53  ;;  %v1582_v24 = vmul.f32 %v9894_v11, %v13298_v49  ;;  %v1626_v6 = vmul.f32 %v9894_v11, %v13299_v35 }
 0x8c3   :  { %v9951_v58 = vpop.f32.mrf.mxu2 }
 0x8c4   :  { %v1611_v63 = vmul.f32 %v9951_v58, %v13296_v53  ;;  %v1627_v52 = vmul.f32 %v9951_v58, %v13299_v35 }
 0x8c5   :  { %v9896_v10 = vpop.f32.mrf.mxu1 }
 0x8c6   :  { %v1575_v15 = vmul.f32 %v9896_v10, %v9039_v3  ;;  %v1571_v21 = vmul.f32 %v9896_v10, %v9043_v51  ;;  %v1567_v43 = vmul.f32 %v9896_v10, %v9045_v7  ;;  %v1583_v46 = vmul.f32 %v9896_v10, %v9078_v41 }
 0x8c7   :  { %v7602_v32 = vpack.i.bf16 %v1611_v63, %v1610_v62  ;;  %v7647_v55 = vpack.i.bf16 %v1627_v52, %v1626_v6  ;;  %v13309_v6 = vld [vmem:[#allocation20_spill] sm:$0xff] }
 0x8c8   :  { %1684 = vrot.lane.b32.xlu1 %v1575_v15, %s8630_s13  ;;  %v1563_v15 = vmul.f32 %v9896_v10, %v13301_v17 }
 0x8cb   :  { %v9973_v27 = vpop.f32.mrf.mxu2 }
 0x8cd   :  { %v9901_v13 = vpop.f32.mrf.mxu1 }
 0x8ce   :  { %v1576_v30 = vmul.f32 %v9901_v13, %v9066_v23  ;;  %v1568_v47 = vmul.f32 %v9901_v13, %v9047_v45  ;;  %v1572_v8 = vmul.f32 %v9901_v13, %v9037_v2  ;;  %v1584_v25 = vmul.f32 %v9901_v13, %v9062_v18 }
 0x8cf   :  { %v1564_v38 = vmul.f32 %v9901_v13, %v13297_v5  ;;  %v1580_v56 = vmul.f32 %v9901_v13, %v13300_v59 }
 0x8d0   :  { %1676 = vrot.lane.b32.xlu1 %v1571_v21, %s8630_s13  ;;  %1686 = vrot.lane.b32.xlu0 %v1576_v30, %s8630_s13  ;;  %v13302_v21 = vld [vmem:[#allocation11_spill] sm:$0xff] }
 0x8d1   :  { %v1578_v30 = vmul.f32 %v9894_v11, %v13302_v21 }
 0x8d5   :  { %v9909_v42 = vpop.f32.mrf.mxu1 }
 0x8d6   :  { %v1577_v60 = vmul.f32 %v9909_v42, %v9033_v0  ;;  %v1573_v61 = vmul.f32 %v9909_v42, %v9104_v44  ;;  %v1569_v50 = vmul.f32 %v9909_v42, %v9041_v36  ;;  %v1565_v40 = vmul.f32 %v9909_v42, %v9074_v29 }
 0x8d7   :  { %v1581_v4 = vmul.f32 %v9909_v42, %v9108_v48  ;;  %v1585_v12 = vmul.f32 %v9909_v42, %v13295_v28 }
 0x8d8   :  { %1682 = vrot.lane.b32.xlu0 %v1574_v31, %s8630_s13  ;;  %1670 = vrot.lane.b32.xlu1 %v1568_v47, %s8630_s13  ;;  %v1556_v31 = vpop.f32.mrf.mxu2  ;;  %v13303_v47 = vld [vmem:[#allocation13_spill] sm:$0xff] }
 0x8d9   :  { %1688 = vrot.lane.b32.xlu2 %v1577_v60, %s8630_s13  ;;  %v1579_v60 = vmul.f32 %v9896_v10, %v13303_v47 }
 0x8e0   :  { %1678 = vrot.lane.b32.xlu0 %v1572_v8, %s8630_s13  ;;  %1702 = vrot.lane.b32.xlu1 %v1584_v25, %s8630_s13  ;;  %v13304_v8 = vld [vmem:[#allocation22_spill] sm:$0xff] }
 0x8e1   :  { %1680 = vrot.lane.b32.xlu2 %v1573_v61, %s8630_s13  ;;  %v1615_v25 = vmul.f32 %v1556_v31, %v13304_v8  ;;  %v13305_v61 = vld [vmem:[#allocation14_spill] sm:$0xff] }
 0x8e8   :  { %1672 = vrot.lane.b32.xlu0 %v1569_v50, %s8630_s13  ;;  %1664 = vrot.lane.b32.xlu1 %v1565_v40, %s8630_s13  ;;  %v1613_v50 = vmul.f32 %v9973_v27, %v13305_v61  ;;  %v1614_v40 = vmul.f32 %v9901_v13, %v13304_v8 }
 0x8e9   :  { %1674 = vrot.lane.b32.xlu2 %v1570_v39, %s8630_s13  ;;  %v1612_v39 = vmul.f32 %v9896_v10, %v13305_v61 }
 0x8f0   :  { %1668 = vrot.lane.b32.xlu0 %v1567_v43, %s8630_s13  ;;  %1696 = vrot.lane.b32.xlu1 %v1581_v4, %s8630_s13  ;;  %v7592_v43 = vpack.i.bf16 %v1615_v25, %v1614_v40  ;;  %v7597_v4 = vpack.i.bf16 %v1613_v50, %v1612_v39  ;;  %v13310_v25 = vld [vmem:[#allocation21_spill] sm:$0xff]  ;;  %v13311_v40 = vld [vmem:[#allocation26_spill] sm:$0xff] }
 0x8f1   :  { %1666 = vrot.lane.b32.xlu2 %v1566_v37, %s8630_s13  ;;  %v13306_v37 = vld [vmem:[#allocation27_spill] sm:$0xff]  ;;  %v1595_v50 = vmul.f32 %v9951_v58, %v13310_v25  ;;  %v1603_v39 = vmul.f32 %v9951_v58, %v13311_v40 }
 0x8f2   :  { %v1598_v63 = vmul.f32 %v9901_v13, %v13306_v37 }
 0x8f8   :  { %1700 = vrot.lane.b32.xlu0 %v1583_v46, %s8630_s13  ;;  %1658 = vrot.lane.b32.xlu1 %v1562_v20, %s8630_s13  ;;  %v1599_v46 = vmul.f32 %v1556_v31, %v13306_v37  ;;  %v13307_v20 = vld [vmem:[#allocation15_spill] sm:$0xff] }
 0x8f9   :  { %1704 = vrot.lane.b32.xlu2 %v1585_v12, %s8630_s13  ;;  %v1607_v12 = vmul.f32 %v1556_v31, %v13307_v20  ;;  %v1606_v62 = vmul.f32 %v9901_v13, %v13307_v20 }
 0x900   :  { %1662 = vrot.lane.b32.xlu0 %v1564_v38, %s8630_s13  ;;  %7603 = vrot.lane.b32.xlu1 %v7602_v32, %s8632_s18  ;;  %v7622_v38 = vpack.i.bf16 %v1599_v46, %v1598_v63  ;;  %v7607_v32 = vpack.i.bf16 %v1607_v12, %v1606_v62  ;;  %v13312_v63 = vld [vmem:[#allocation34_spill] sm:$0xff] }
 0x901   :  { %1698 = vrot.lane.b32.xlu2 %v1582_v24, %s8630_s13  ;;  %v13308_v24 = vld [vmem:[#allocation25_spill] sm:$0xff]  ;;  %v1623_v62 = vmul.f32 %v1556_v31, %v13312_v63 }
 0x902   :  { %v1597_v52 = vmul.f32 %v9973_v27, %v13308_v24 }
 0x908   :  { %1694 = vrot.lane.b32.xlu0 %v1580_v56, %s8630_s13  ;;  %7648 = vrot.lane.b32.xlu1 %v7647_v55, %s8632_s18  ;;  %v1605_v56 = vmul.f32 %v9973_v27, %v13309_v6  ;;  %v1596_v55 = vmul.f32 %v9896_v10, %v13308_v24 }
 0x909   :  { %1660 = vrot.lane.b32.xlu2 %v1563_v15, %s8630_s13  ;;  %v1604_v15 = vmul.f32 %v9896_v10, %v13309_v6 }
 0x910   :  { %1690 = vrot.lane.b32.xlu0 %v1578_v30, %s8630_s13  ;;  %v7632_v30 = vpack.i.bf16 %v1597_v52, %v1596_v55 }
 0x911   :  { %1692 = vrot.lane.b32.xlu2 %v1579_v60, %s8630_s13  ;;  %v7612_v60 = vpack.i.bf16 %v1605_v56, %v1604_v15  ;;  %v1622_v56 = vmul.f32 %v9901_v13, %v13312_v63 }
 0x913   :  { %v7657_v15 = vpack.i.bf16 %v1623_v62, %v1622_v56 }
 0x918   :  { %7593 = vrot.lane.b32.xlu0 %v7592_v43, %s8632_s18  ;;  %v1594_v43 = vmul.f32 %v9894_v11, %v13310_v25 }
 0x919   :  { %7598 = vrot.lane.b32.xlu2 %v7597_v4, %s8632_s18  ;;  %v1602_v4 = vmul.f32 %v9894_v11, %v13311_v40  ;;  %v13317_v40 = vld [vmem:[#allocation31_spill] sm:$0xff] }
 0x91a   :  { %v7642_v46 = vpack.i.bf16 %v1595_v50, %v1594_v43  ;;  %v1591_v25 = vmul.f32 %v1556_v31, %v13317_v40 }
 0x91b   :  { %v7617_v12 = vpack.i.bf16 %v1603_v39, %v1602_v4  ;;  %v13314_v39 = vld [vmem:[#allocation16_spill] sm:$0xff] }
 0x920   :  { %7623 = vrot.lane.b32.xlu0 %v7622_v38, %s8632_s18 }
 0x921   :  { %7608 = vrot.lane.b32.xlu2 %v7607_v32, %s8632_s18  ;;  %v13313_v32 = vld [vmem:[#allocation19_spill] sm:$0xff] }
 0x922   :  { %v1631_v52 = vmul.f32 %v1556_v31, %v13313_v32  ;;  %v1630_v55 = vmul.f32 %v9901_v13, %v13313_v32  ;;  %v13319_v31 = vld [vmem:[#allocation33_spill] sm:$0xff] }
 0x928   :  { %7633 = vrot.lane.b32.xlu0 %v7632_v30, %s8632_s18  ;;  %v1559_v30 = vpop.f32.mrf.mxu2 }
 0x929   :  { %7613 = vrot.lane.b32.xlu2 %v7612_v60, %s8632_s18  ;;  %v7627_v60 = vpack.i.bf16 %v1631_v52, %v1630_v55  ;;  %v1617_v43 = vmul.f32 %v1559_v30, %v13314_v39  ;;  %v13316_v55 = vld [vmem:[#allocation24_spill] sm:$0xff] }
 0x930   :  { %7643 = vrot.lane.b32.xlu0 %v7642_v46, %s8632_s18  ;;  %v13315_v46 = vld [vmem:[#allocation29_spill] sm:$0xff] }
 0x931   :  { %7618 = vrot.lane.b32.xlu2 %v7617_v12, %s8632_s18  ;;  %v1629_v12 = vmul.f32 %v9973_v27, %v13315_v46  ;;  %v1628_v32 = vmul.f32 %v9896_v10, %v13315_v46  ;;  %v13321_v46 = vld [vmem:[#allocation23_spill] sm:$0xff] }
 0x933   :  { %v1689_v38 = vpop.permute.xlu2 %1688  ;;  %v7637_v56 = vpack.i.bf16 %v1629_v12, %v1628_v32 }
 0x934   :  { %6982 = vmatpush.xpose.msk.msra.mxu3 %vm635_vm15, %v1689_v38  ;;  %v1616_v38 = vmul.f32 %v9909_v42, %v13314_v39  ;;  %v1608_v39 = vmul.f32 %v9909_v42, %v13316_v55 }
 0x936   :  { %v7667_v62 = vpack.i.bf16 %v1617_v43, %v1616_v38  ;;  %v1590_v43 = vmul.f32 %v9901_v13, %v13317_v40 }
 0x938   :  { %7658 = vrot.lane.b32.xlu0 %v7657_v15, %s8632_s18  ;;  %v1609_v15 = vmul.f32 %v1559_v30, %v13316_v55  ;;  %v7652_v12 = vpack.i.bf16 %v1591_v25, %v1590_v43  ;;  %v1589_v55 = vmul.f32 %v9973_v27, %v13319_v31  ;;  %v1588_v25 = vmul.f32 %v9896_v10, %v13319_v31 }
 0x939   :  { %7628 = vrot.lane.b32.xlu2 %v7627_v60, %s8632_s18 }
 0x93a   :  { %v1685_v50 = vpop.permute.xlu1 %1684  ;;  %v7672_v32 = vpack.i.bf16 %v1609_v15, %v1608_v39  ;;  %v7662_v15 = vpack.i.bf16 %v1589_v55, %v1588_v25 }
 0x93b   :  { %v1681_v4 = vpop.permute.xlu2 %1680 }
 0x940   :  { %7668 = vrot.lane.b32.xlu0 %v7667_v62, %s8632_s18  ;;  %v13318_v62 = vld [vmem:[#allocation17_spill] sm:$0xff] }
 0x941   :  { %7638 = vrot.lane.b32.xlu2 %v7637_v56, %s8632_s18  ;;  %v1601_v56 = vmul.f32 %v1559_v30, %v13318_v62  ;;  %v1600_v40 = vmul.f32 %v9909_v42, %v13318_v62  ;;  %v1633_v62 = vmul.f32 %v1559_v30, %v13321_v46 }
 0x942   :  { %v1687_v52 = vpop.permute.xlu0 %1686  ;;  %v1677_v63 = vpop.permute.xlu1 %1676 }
 0x943   :  { %v1675_v60 = vpop.permute.xlu2 %1674  ;;  %6983 = vmatpush.xpose.msk.msra.mxu3 %vm635_vm15, %v1687_v52 }
 0x947   :  { %6984 = vmatpush.xpose.msk.msra.mxu3 %vm635_vm15, %v1685_v50  ;;  %v7677_v50 = vpack.i.bf16 %v1601_v56, %v1600_v40 }
 0x948   :  { %7673 = vrot.lane.b32.xlu0 %v7672_v32, %s8632_s18  ;;  %v13320_v32 = vld [vmem:[#allocation30_spill] sm:$0xff] }
 0x949   :  { %7653 = vrot.lane.b32.xlu2 %v7652_v12, %s8632_s18  ;;  %v1625_v12 = vmul.f32 %v1559_v30, %v13320_v32  ;;  %v1624_v40 = vmul.f32 %v9909_v42, %v13320_v32 }
 0x94a   :  { %v1683_v38 = vpop.permute.xlu0 %1682  ;;  %v1671_v39 = vpop.permute.xlu1 %1670 }
 0x94b   :  { %v1667_v52 = vpop.permute.xlu2 %1666  ;;  %6985 = vmatpush.xpose.msk.msra.mxu3 %vm635_vm15, %v1683_v38  ;;  %v7692_v55 = vpack.i.bf16 %v1625_v12, %v1624_v40 }
 0x94f   :  { %6986 = vmatpush.xpose.msk.msra.mxu3 %vm635_vm15, %v1681_v4  ;;  %v1632_v4 = vmul.f32 %v9909_v42, %v13321_v46 }
 0x950   :  { %7678 = vrot.lane.b32.xlu0 %v7677_v50, %s8632_s18 }
 0x951   :  { %7663 = vrot.lane.b32.xlu2 %v7662_v15, %s8632_s18  ;;  %v7682_v25 = vpack.i.bf16 %v1633_v62, %v1632_v4 }
 0x952   :  { %v1679_v43 = vpop.permute.xlu0 %1678  ;;  %v1703_v56 = vpop.permute.xlu1 %1702 }
 0x953   :  { %v1705_v38 = vpop.permute.xlu2 %1704  ;;  %6987 = vmatpush.xpose.msk.msra.mxu3 %vm635_vm15, %v1679_v43  ;;  %v13322_v43 = vld [vmem:[#allocation32_spill] sm:$0xff] }
 0x954   :  { %7002 = vmatpush.xpose.msk.msra.mxu0 %vm635_vm15, %v1705_v38  ;;  %v1593_v38 = vmul.f32 %v1559_v30, %v13322_v43  ;;  %v1592_v46 = vmul.f32 %v9909_v42, %v13322_v43 }
 0x956   :  { %v7687_v12 = vpack.i.bf16 %v1593_v38, %v1592_v46 }
 0x957   :  { %6988 = vmatpush.xpose.msk.msra.mxu3 %vm635_vm15, %v1677_v63 }
 0x958   :  { %7003 = vmatpush.xpose.msk.msra.mxu0 %vm635_vm15, %v1703_v56  ;;  %7693 = vrot.lane.b32.xlu0 %v7692_v55, %s8632_s18 }
 0x959   :  { %7683 = vrot.lane.b32.xlu2 %v7682_v25, %s8632_s18 }
 0x95a   :  { %v1673_v50 = vpop.permute.xlu0 %1672  ;;  %v1665_v40 = vpop.permute.xlu1 %1664 }
 0x95b   :  { %v1699_v15 = vpop.permute.xlu2 %1698  ;;  %6989 = vmatpush.xpose.msk.msra.mxu3 %vm635_vm15, %v1675_v60 }
 0x95f   :  { %6990 = vmatpush.xpose.msk.msra.mxu3 %vm635_vm15, %v1673_v50 }
 0x961   :  { %7688 = vrot.lane.b32.xlu2 %v7687_v12, %s8632_s18 }
 0x962   :  { %v1669_v63 = vpop.permute.xlu0 %1668  ;;  %v1697_v30 = vpop.permute.xlu1 %1696 }
 0x963   :  { %v1661_v62 = vpop.permute.xlu2 %1660  ;;  %6991 = vmatpush.xpose.msk.msra.mxu3 %vm635_vm15, %v1671_v39 }
 0x967   :  { %6992 = vmatpush.xpose.msk.msra.mxu3 %vm635_vm15, %v1669_v63 }
 0x96a   :  { %v1701_v4 = vpop.permute.xlu0 %1700  ;;  %v1659_v39 = vpop.permute.xlu1 %1658 }
 0x96b   :  { %v1693_v55 = vpop.permute.xlu2 %1692  ;;  %6993 = vmatpush.xpose.msk.msra.mxu3 %vm635_vm15, %v1667_v52  ;;  %7004 = vmatpush.xpose.msk.msra.mxu0 %vm635_vm15, %v1701_v4 }
 0x96f   :  { %6994 = vmatpush.xpose.msk.msra.mxu3 %vm635_vm15, %v1665_v40  ;;  %7005 = vmatpush.xpose.msk.msra.mxu0 %vm635_vm15, %v1699_v15 }
 0x972   :  { %v1663_v46 = vpop.permute.xlu0 %1662 }
 0x973   :  { %v7599_v60 = vpop.permute.xlu2 %7598  ;;  %6995 = vmatpush.xpose.msk.msra.mxu3 %vm635_vm15, %v1663_v46  ;;  %7006 = vmatpush.xpose.msk.msra.mxu0 %vm635_vm15, %v1697_v30  ;;  %v7604_v46 = vpop.permute.xlu1 %7603 }
 0x974   :  { %v7600_v61 = vunpack.i.l.bf16 %v7599_v60  ;;  %v7606_v37 = vunpack.i.h.bf16 %v7604_v46  ;;  %v7605_v8 = vunpack.i.l.bf16 %v7604_v46 }
 0x977   :  { %6996 = vmatpush.xpose.msk.msra.mxu3 %vm635_vm15, %v1661_v62 }
 0x97a   :  { %v1695_v56 = vpop.permute.xlu0 %1694 }
 0x97b   :  { %v10091_v25 = vpop.permute.xlu2 %7608  ;;  %6997 = vmatpush.xpose.msk.msra.mxu3 %vm635_vm15, %v1659_v39  ;;  %7007 = vmatpush.xpose.msk.msra.mxu0 %vm635_vm15, %v1695_v56  ;;  %v7649_v19 = vpop.permute.xlu1 %7648 }
 0x97c   :  { %v7650_v17 = vunpack.i.l.bf16 %v7649_v19 }
 0x97e   :  { %6998 = vmatmul.msk.f32.vlgmr.msra.gmra.mxu3 %vm635_vm15, %v9894_v11 }
 0x97f   :  { %7008 = vmatpush.xpose.msk.msra.mxu0 %vm635_vm15, %v1693_v55 }
 0x982   :  { %v1691_v52 = vpop.permute.xlu0 %1690 }
 0x983   :  { %v10098_v50 = vpop.permute.xlu2 %7613  ;;  %7009 = vmatpush.xpose.msk.msra.mxu0 %vm635_vm15, %v1691_v52 }
 0x986   :  { %6999 = vmatmul.msk.f32.gmra.mxu3 %vm635_vm15, %v9896_v10  ;;  %7010 = vmatmul.msk.f32.vlgmr.msra.gmra.mxu0 %vm635_vm15, %v9894_v11 }
 0x98a   :  { %v7594_v15 = vpop.permute.xlu0 %7593 }
 0x98b   :  { %v10105_v38 = vpop.permute.xlu2 %7618  ;;  %v7596_v52 = vunpack.i.h.bf16 %v7594_v15  ;;  %v7595_v43 = vunpack.i.l.bf16 %v7594_v15 }
 0x98d   :  { %v2092_v15 = vsel %vm139_vm1, %v7595_v43, %v7596_v52 }
 0x98e   :  { %7000 = vmatmul.msk.f32.gmra.mxu3 %vm635_vm15, %v9901_v13  ;;  %7011 = vmatmul.msk.f32.gmra.mxu0 %vm635_vm15, %v9896_v10 }
 0x992   :  { %v10111_v12 = vpop.permute.xlu0 %7623 }
 0x993   :  { %v7629_v63 = vpop.permute.xlu2 %7628 }
 0x994   :  { %v7631_v6 = vunpack.i.h.bf16 %v7629_v63  ;;  %v7630_v35 = vunpack.i.l.bf16 %v7629_v63 }
 0x996   :  { %7001 = vmatmul.msk.f32.gmra.mxu3 %vm635_vm15, %v9909_v42  ;;  %7012 = vmatmul.msk.f32.gmra.mxu0 %vm635_vm15, %v9901_v13 }
 0x99a   :  { %v10117_v62 = vpop.permute.xlu0 %7633 }
 0x99b   :  { %v7639_v40 = vpop.permute.xlu2 %7638 }
 0x99c   :  { %v7641_v47 = vunpack.i.h.bf16 %v7639_v40  ;;  %v7640_v48 = vunpack.i.l.bf16 %v7639_v40  ;;  %v2090_v40 = vsel %vm139_vm1, %v7605_v8, %v7606_v37  ;;  %v7620_v8 = vunpack.i.l.bf16 %v10105_v38 }
 0x99e   :  { %7013 = vmatmul.msk.f32.gmra.mxu0 %vm635_vm15, %v9909_v42  ;;  %v7601_v42 = vunpack.i.h.bf16 %v7599_v60  ;;  %v2099_v63 = vsel %vm139_vm1, %v7640_v48, %v7641_v47  ;;  %v7621_v47 = vunpack.i.h.bf16 %v10105_v38  ;;  %v7635_v38 = vunpack.i.l.bf16 %v10117_v62 }
 0x9a0   :  { %v2091_v60 = vsel %vm139_vm1, %v7600_v61, %v7601_v42  ;;  %v7615_v61 = vunpack.i.l.bf16 %v10098_v50 }
 0x9a2   :  { %v10121_v4 = vpop.permute.xlu0 %7643 }
 0x9a3   :  { %v10123_v55 = vpop.permute.xlu2 %7653 }
 0x9aa   :  { %v10125_v30 = vpop.permute.xlu0 %7658 }
 0x9ab   :  { %v10127_v39 = vpop.permute.xlu2 %7663 }
 0x9b2   :  { %v7669_v56 = vpop.permute.xlu0 %7668 }
 0x9b3   :  { %v7684_v32 = vpop.permute.xlu2 %7683  ;;  %v7671_v13 = vunpack.i.h.bf16 %v7669_v56  ;;  %v7670_v31 = vunpack.i.l.bf16 %v7669_v56  ;;  %v7651_v56 = vunpack.i.h.bf16 %v7649_v19 }
 0x9b4   :  { %v7686_v24 = vunpack.i.h.bf16 %v7684_v32  ;;  %v7685_v20 = vunpack.i.l.bf16 %v7684_v32  ;;  %v2100_v32 = vsel %vm139_vm1, %v7630_v35, %v7631_v6  ;;  %v7616_v35 = vunpack.i.h.bf16 %v10098_v50 }
 0x9b5   :  { %v2093_v53 = vsel %vm139_vm1, %v7670_v31, %v7671_v13  ;;  %v2098_v19 = vsel %vm139_vm1, %v7650_v17, %v7651_v56  ;;  %v2086_v17 = vsel %vm139_vm1, %v7620_v8, %v7621_v47  ;;  %v7625_v50 = vunpack.i.l.bf16 %v10111_v12 }
 0x9b6   :  { %2126 = vmatpush.msrb.mxu0 %v2093_v53  ;;  %v2101_v21 = vsel %vm139_vm1, %v7685_v20, %v7686_v24  ;;  %v7611_v53 = vunpack.i.h.bf16 %v10091_v25  ;;  %v2087_v6 = vsel %vm139_vm1, %v7615_v61, %v7616_v35  ;;  %v7636_v13 = vunpack.i.h.bf16 %v10117_v62 }
 0x9b7   :  { %2163 = vmatpush.msrb.mxu1 %v2101_v21  ;;  %v7610_v21 = vunpack.i.l.bf16 %v10091_v25  ;;  %v7626_v25 = vunpack.i.h.bf16 %v10111_v12  ;;  %v7645_v56 = vunpack.i.l.bf16 %v10121_v4  ;;  %v7666_v35 = vunpack.i.h.bf16 %v10127_v39 }
 0x9b8   :  { %2127 = vmatpush.msrb.mxu0 %v2092_v15  ;;  %v7646_v15 = vunpack.i.h.bf16 %v10121_v4  ;;  %v7660_v4 = vunpack.i.l.bf16 %v10125_v30  ;;  %v7665_v61 = vunpack.i.l.bf16 %v10127_v39  ;;  %v8466_v39 = vld [vmem:[%s13111_s2 + $0x8] sm:$0xff] }
 0x9b9   :  { %2164 = vmatpush.msrb.mxu1 %v2100_v32  ;;  %v2088_v37 = vsel %vm139_vm1, %v7610_v21, %v7611_v53  ;;  %v7655_v53 = vunpack.i.l.bf16 %v10123_v55 }
 0x9ba   :  { %v7674_v31 = vpop.permute.xlu0 %7673  ;;  %2128 = vmatpush.msrb.mxu0 %v2091_v60  ;;  %v2084_v60 = vsel %vm139_vm1, %v7625_v50, %v7626_v25  ;;  %v2082_v21 = vsel %vm139_vm1, %v7645_v56, %v7646_v15  ;;  %v8469_v15 = vld [vmem:[%s13111_s2 + $0x10] sm:$0xff] }
 0x9bb   :  { %2165 = vmatpush.msrb.mxu1 %v2099_v63  ;;  %v7676_v20 = vunpack.i.h.bf16 %v7674_v31  ;;  %v7675_v24 = vunpack.i.l.bf16 %v7674_v31  ;;  %v7689_v32 = vpop.permute.xlu2 %7688  ;;  %v2083_v31 = vsel %vm139_vm1, %v7635_v38, %v7636_v13  ;;  %v8468_v38 = vld [vmem:[%s13111_s2 + $0x18] sm:$0xff] }
 0x9bc   :  { %2129 = vmatpush.msrb.mxu0 %v2090_v40  ;;  %v7691_v63 = vunpack.i.h.bf16 %v7689_v32  ;;  %v7690_v12 = vunpack.i.l.bf16 %v7689_v32  ;;  %v7656_v40 = vunpack.i.h.bf16 %v10123_v55 }
 0x9bd   :  { %2166 = vmatpush.msrb.mxu1 %v2098_v19  ;;  %v2089_v48 = vsel %vm139_vm1, %v7675_v24, %v7676_v20  ;;  %v7661_v20 = vunpack.i.h.bf16 %v10125_v30  ;;  %v2079_v30 = vsel %vm139_vm1, %v7665_v61, %v7666_v35  ;;  %v8473_v61 = vld [vmem:[%s13111_s2 + $0x30] sm:$0xff] }
 0x9be   :  { %2130 = vmatpush.msrb.mxu0 %v2089_v48  ;;  %v2081_v48 = vsel %vm139_vm1, %v7690_v12, %v7691_v63  ;;  %v2080_v55 = vsel %vm139_vm1, %v7655_v53, %v7656_v40  ;;  %v8471_v53 = vld [vmem:[%s13111_s2 + $0x20] sm:$0xff] }
 0x9bf   :  { %v2096_v8 = vsel %vm139_vm1, %v7660_v4, %v7661_v20 }
 0x9c0   :  { %2131 = vmatpush.msrb.mxu0 %v2088_v37 }
 0x9c2   :  { %v7679_v43 = vpop.permute.xlu0 %7678  ;;  %2132 = vmatpush.msrb.mxu0 %v2087_v6 }
 0x9c3   :  { %v7681_v46 = vunpack.i.h.bf16 %v7679_v43  ;;  %v7680_v52 = vunpack.i.l.bf16 %v7679_v43 }
 0x9c4   :  { %2133 = vmatpush.msrb.mxu0 %v2086_v17  ;;  %v8467_v17 = vld [vmem:[%s13111_s2] sm:$0xff] }
 0x9c5   :  { %v2085_v42 = vsel %vm139_vm1, %v7680_v52, %v7681_v46 }
 0x9c6   :  { %2134 = vmatpush.msrb.mxu0 %v2085_v42 }
 0x9c8   :  { %2135 = vmatpush.msrb.mxu0 %v2084_v60 }
 0x9ca   :  { %v7694_v62 = vpop.permute.xlu0 %7693  ;;  %2136 = vmatpush.msrb.mxu0 %v2083_v31  ;;  %v8470_v31 = vld [vmem:[%s13111_s2 + $0x28] sm:$0xff] }
 0x9cb   :  { %v7696_v24 = vunpack.i.h.bf16 %v7694_v62  ;;  %v7695_v19 = vunpack.i.l.bf16 %v7694_v62 }
 0x9cc   :  { %2137 = vmatpush.msrb.mxu0 %v2082_v21 }
 0x9cd   :  { %v2097_v47 = vsel %vm139_vm1, %v7695_v19, %v7696_v24  ;;  %v8472_v19 = vld [vmem:[%s13111_s2 + $0x38] sm:$0xff] }
 0x9ce   :  { %2138 = vmatpush.msrb.mxu0 %v2081_v48  ;;  %2167 = vmatpush.msrb.mxu1 %v2097_v47 }
 0x9d0   :  { %2139 = vmatpush.msrb.mxu0 %v2080_v55  ;;  %2168 = vmatpush.msrb.mxu1 %v2096_v8  ;;  %v1619_v8 = vmul.f32 %v9951_v58, %v9401_v57 }
 0x9d2   :  { %2140 = vmatpush.msrb.mxu0 %v2079_v30  ;;  %v1618_v30 = vmul.f32 %v9894_v11, %v9401_v57 }
 0xa01   :  { %v1783_v37 = vpop.f32.mrf.mxu3 }
 0xa02   :  { %v1784_v25 = vadd.f32 %v8467_v17, %v1783_v37  ;;  %v7707_v37 = vpack.i.bf16 %v1619_v8, %v1618_v30 }
 0xa03   :  { %v1812_v6 = vpop.f32.mrf.mxu0 }
 0xa04   :  { %v1813_v43 = vadd.f32 %v8466_v39, %v1812_v6  ;;  %v1621_v6 = vmul.f32 %v9973_v27, %v9451_v34  ;;  %v1620_v39 = vmul.f32 %v9896_v10, %v9451_v34 }
 0xa06   :  { %v1824_v50 = vsel %vm754_vm0, %v1813_v43, -inf  ;;  %v7697_v17 = vpack.i.bf16 %v1621_v6, %v1620_v39 }
 0xa07   :  { %v1825_v46 = vmax.f32 %v1784_v25, %v1824_v50  ;;  %v13323_v50 = vld [vmem:[#allocation35_spill] sm:$0xff] }
 0xa09   :  { %v1786_v52 = vpop.f32.mrf.mxu3  ;;  %1826 = vmax.xlane.f32.xlu1 %v1825_v46  ;;  %v1587_v46 = vmul.f32 %v9951_v58, %v13323_v50 }
 0xa0a   :  { %v1787_v56 = vadd.f32 %v8469_v15, %v1786_v52  ;;  %v1586_v52 = vmul.f32 %v9894_v11, %v13323_v50 }
 0xa0b   :  { %v1815_v13 = vpop.f32.mrf.mxu0 }
 0xa0c   :  { %v1816_v42 = vadd.f32 %v8468_v38, %v1815_v13  ;;  %v7702_v13 = vpack.i.bf16 %v1587_v46, %v1586_v52 }
 0xa0e   :  { %v1828_v32 = vsel %vm754_vm0, %v1816_v42, -inf }
 0xa0f   :  { %v1829_v60 = vmax.f32 %v1787_v56, %v1828_v32 }
 0xa11   :  { %v1789_v63 = vpop.f32.mrf.mxu3  ;;  %1830 = vmax.xlane.f32.xlu2 %v1829_v60 }
 0xa12   :  { %v1790_v62 = vadd.f32 %v8471_v53, %v1789_v63 }
 0xa13   :  { %v1818_v12 = vpop.f32.mrf.mxu0 }
 0xa14   :  { %v1819_v40 = vadd.f32 %v8470_v31, %v1818_v12 }
 0xa16   :  { %v1832_v21 = vsel %vm754_vm0, %v1819_v40, -inf }
 0xa17   :  { %v1833_v20 = vmax.f32 %v1790_v62, %v1832_v21 }
 0xa19   :  { %1834 = vmax.xlane.f32.xlu0 %v1833_v20  ;;  %v1792_v4 = vpop.f32.mrf.mxu3 }
 0xa1a   :  { %v1793_v48 = vadd.f32 %v8473_v61, %v1792_v4 }
 0xa1b   :  { %v1821_v24 = vpop.f32.mrf.mxu0 }
 0xa1c   :  { %v1822_v35 = vadd.f32 %v8472_v19, %v1821_v24 }
 0xa1e   :  { %v1836_v47 = vsel %vm754_vm0, %v1822_v35, -inf }
 0xa1f   :  { %v1837_v55 = vmax.f32 %v1793_v48, %v1836_v47 }
 0xa21   :  { %1838 = vmax.xlane.f32.xlu1 %v1837_v55 }
 0xa29   :  { %7708 = vrot.lane.b32.xlu2 %v7707_v37, %s8632_s18 }
 0xa2d   :  { %7698 = vrot.lane.b32.xlu0 %v7697_v17, %s8632_s18 }
 0xa3a   :  { %7703 = vrot.lane.b32.xlu1 %v7702_v13, %s8632_s18 }
 0xa7c   :  { %v1827_v38 = vpop.xlane.xlu1 %1826 }
 0xa7d   :  { %v1840_v15 = vsub.f32 %v1784_v25, %v1827_v38  ;;  %v1841_v27 = vsub.f32 %v1813_v43, %v1827_v38 }
 0xa7f   :  { %v1848_v32 = vmul.f32 1.442695, %v1840_v15  ;;  %v1850_v60 = vmul.f32 1.442695, %v1841_v27 }
 0xa81   :  { %8242 = vpow2.f32 %v1848_v32  ;;  %v7027_v32 = vld [vmem:[%s13114_s5 + $0x58] sm:$0xff] }
 0xa82   :  { %8244 = vpow2.f32 %v1850_v60  ;;  %2222 = vmatpush.msra.mxu2 %v7027_v32  ;;  %v7026_v60 = vld [vmem:[%s13114_s5 + $0x50] sm:$0xff] }
 0xa84   :  { %v1831_v10 = vpop.xlane.xlu2 %1830  ;;  %2223 = vmatpush.msra.mxu2 %v7026_v60  ;;  %v6963_v60 = vld [vmem:[%s13117_s8 + $0x58] sm:$0xff] }
 0xa85   :  { %v1842_v63 = vsub.f32 %v1787_v56, %v1831_v10  ;;  %v1843_v12 = vsub.f32 %v1816_v42, %v1831_v10 }
 0xa87   :  { %v8243_v31 = vpop.eup %8242  ;;  %v1852_v53 = vmul.f32 1.442695, %v1842_v63  ;;  %v1854_v21 = vmul.f32 1.442695, %v1843_v12  ;;  %v7025_v63 = vld [vmem:[%s13114_s5 + $0x48] sm:$0xff]  ;;  %v7024_v12 = vld [vmem:[%s13114_s5 + $0x40] sm:$0xff] }
 0xa88   :  { %v8245_v58 = vpop.eup %8244  ;;  %1892 = vmatmul.f32.vlgmr.msra.gmra.mxu1 %v8243_v31  ;;  %2224 = vmatpush.msra.mxu2 %v7025_v63 }
 0xa89   :  { %8246 = vpow2.f32 %v1852_v53  ;;  %7014 = vmatmul.msk.f32.vlgmr.msrb.gmra.mxu2 %vm754_vm0, %v8245_v58  ;;  %v7023_v53 = vld [vmem:[%s13114_s5 + $0x38] sm:$0xff] }
 0xa8a   :  { %8248 = vpow2.f32 %v1854_v21  ;;  %2225 = vmatpush.msra.mxu2 %v7024_v12  ;;  %v7022_v21 = vld [vmem:[%s13114_s5 + $0x30] sm:$0xff] }
 0xa8c   :  { %v1835_v11 = vpop.xlane.xlu0 %1834  ;;  %2226 = vmatpush.msra.mxu2 %v7023_v53 }
 0xa8d   :  { %v1844_v20 = vsub.f32 %v1790_v62, %v1835_v11  ;;  %v1845_v25 = vsub.f32 %v1819_v40, %v1835_v11  ;;  %v7709_v40 = vpop.permute.xlu2 %7708 }
 0xa8e   :  { %v7711_v39 = vunpack.i.h.bf16 %v7709_v40  ;;  %v7710_v17 = vunpack.i.l.bf16 %v7709_v40  ;;  %2227 = vmatpush.msra.mxu2 %v7022_v21 }
 0xa8f   :  { %v8247_v43 = vpop.eup %8246  ;;  %v1856_v4 = vmul.f32 1.442695, %v1844_v20  ;;  %v1858_v24 = vmul.f32 1.442695, %v1845_v25 }
 0xa90   :  { %v8249_v19 = vpop.eup %8248  ;;  %1895 = vmatmul.f32.gmra.mxu1 %v8247_v43 }
 0xa91   :  { %8250 = vpow2.f32 %v1856_v4  ;;  %7015 = vmatmul.msk.f32.gmra.mxu2 %vm754_vm0, %v8249_v19 }
 0xa92   :  { %8252 = vpow2.f32 %v1858_v24 }
 0xa94   :  { %v1839_v42 = vpop.xlane.xlu1 %1838 }
 0xa95   :  { %v1846_v56 = vsub.f32 %v1793_v48, %v1839_v42  ;;  %v1847_v61 = vsub.f32 %v1822_v35, %v1839_v42  ;;  %v2094_v48 = vsel %vm139_vm1, %v7710_v17, %v7711_v39 }
 0xa97   :  { %v8251_v47 = vpop.eup %8250  ;;  %v1860_v55 = vmul.f32 1.442695, %v1846_v56  ;;  %v1862_v8 = vmul.f32 1.442695, %v1847_v61 }
 0xa98   :  { %v8253_v30 = vpop.eup %8252  ;;  %1898 = vmatmul.f32.gmra.mxu1 %v8251_v47 }
 0xa99   :  { %8254 = vpow2.f32 %v1860_v55  ;;  %7016 = vmatmul.msk.f32.gmra.mxu2 %vm754_vm0, %v8253_v30 }
 0xa9a   :  { %8256 = vpow2.f32 %v1862_v8 }
 0xa9f   :  { %v8255_v62 = vpop.eup %8254  ;;  %v7699_v37 = vpop.permute.xlu0 %7698 }
 0xaa0   :  { %v8257_v6 = vpop.eup %8256  ;;  %v7701_v46 = vunpack.i.h.bf16 %v7699_v37  ;;  %v7700_v52 = vunpack.i.l.bf16 %v7699_v37  ;;  %1901 = vmatmul.f32.gmra.mxu1 %v8255_v62 }
 0xaa1   :  { %7017 = vmatmul.msk.f32.gmra.mxu2 %vm754_vm0, %v8257_v6 }
 0xaa2   :  { %v2095_v35 = vsel %vm139_vm1, %v7700_v52, %v7701_v46 }
 0xaa3   :  { %2169 = vmatpush.msrb.mxu1 %v2095_v35 }
 0xaa5   :  { %2170 = vmatpush.msrb.mxu1 %v2094_v48 }
 0xaa8   :  { %7018 = vmatmul.msk.f32.vlgmr.msrb.gmra.mxu1 %vm754_vm0, %v8245_v58 }
 0xaac   :  { %v7704_v13 = vpop.permute.xlu1 %7703 }
 0xaad   :  { %v7706_v38 = vunpack.i.h.bf16 %v7704_v13  ;;  %v7705_v15 = vunpack.i.l.bf16 %v7704_v13 }
 0xaaf   :  { %v2078_v27 = vsel %vm139_vm1, %v7705_v15, %v7706_v38 }
 0xab0   :  { %2141 = vmatpush.msrb.mxu0 %v2078_v27  ;;  %7019 = vmatmul.msk.f32.gmra.mxu1 %vm754_vm0, %v8249_v19 }
 0xab1   :  { %2142 = vmatmul.f32.vlgmr.msrb.gmra.mxu0 %v8243_v31 }
 0xab8   :  { %7020 = vmatmul.msk.f32.gmra.mxu1 %vm754_vm0, %v8253_v30 }
 0xab9   :  { %2145 = vmatmul.f32.gmra.mxu0 %v8247_v43 }
 0xac0   :  { %7021 = vmatmul.msk.f32.gmra.mxu1 %vm754_vm0, %v8257_v6 }
 0xac1   :  { %2148 = vmatmul.f32.gmra.mxu0 %v8251_v47 }
 0xac9   :  { %2151 = vmatmul.f32.gmra.mxu0 %v8255_v62 }
 0xb05   :  { %v1893_v10 = vpop.f32.mrf.mxu1 }
 0xb0c   :  { %v1922_v11 = vpop.f32.mrf.mxu2 }
 0xb0d   :  { %v1896_v31 = vpop.f32.mrf.mxu1  ;;  %v1923_v25 = vadd.f32 %v1922_v11, %v1893_v10  ;;  %v2199_v10 = vperm.slane %v6963_v60, 0  ;;  %v7032_v60 = vld [vmem:[%s13115_s6 + $0x20] sm:$0xff] }
 0xb0f   :  { %8258 = vrcp.f32 %v1923_v25 }
 0xb14   :  { %v1925_v43 = vpop.f32.mrf.mxu2 }
 0xb15   :  { %v1899_v58 = vpop.f32.mrf.mxu1  ;;  %v1926_v24 = vadd.f32 %v1925_v43, %v1896_v31  ;;  %v8259_v56 = vpop.eup %8258 }
 0xb17   :  { %8260 = vrcp.f32 %v1926_v24 }
 0xb1c   :  { %v1928_v61 = vpop.f32.mrf.mxu2 }
 0xb1d   :  { %v1902_v20 = vpop.f32.mrf.mxu1  ;;  %v1929_v8 = vadd.f32 %v1928_v61, %v1899_v58  ;;  %v8261_v62 = vpop.eup %8260 }
 0xb1f   :  { %8262 = vrcp.f32 %v1929_v8 }
 0xb24   :  { %v1931_v6 = vpop.f32.mrf.mxu2 }
 0xb25   :  { %v2172_v4 = vpop.f32.mrf.mxu1  ;;  %v1932_v17 = vadd.f32 %v1931_v6, %v1902_v20  ;;  %v8263_v35 = vpop.eup %8262 }
 0xb27   :  { %8264 = vrcp.f32 %v1932_v17 }
 0xb2d   :  { %v2175_v55 = vpop.f32.mrf.mxu1  ;;  %v8265_v27 = vpop.eup %8264 }
 0xb2e   :  { %v2143_v19 = vpop.f32.mrf.mxu0 }
 0xb2f   :  { %v2173_v42 = vadd.f32 %v2172_v4, %v2143_v19 }
 0xb31   :  { %v2188_v47 = vmul.f32 %v8259_v56, %v2173_v42 }
 0xb33   :  { %7028 = vmatmul.msk.f32.vlgmr.msra.gmra.mxu2 %vm635_vm15, %v2188_v47 }
 0xb35   :  { %v2178_v39 = vpop.f32.mrf.mxu1 }
 0xb36   :  { %v2146_v30 = vpop.f32.mrf.mxu0 }
 0xb37   :  { %v2176_v40 = vadd.f32 %v2175_v55, %v2146_v30 }
 0xb39   :  { %v2189_v37 = vmul.f32 %v8261_v62, %v2176_v40 }
 0xb3b   :  { %7029 = vmatmul.msk.f32.gmra.mxu2 %vm635_vm15, %v2189_v37 }
 0xb3d   :  { %v2181_v13 = vpop.f32.mrf.mxu1 }
 0xb3e   :  { %v2149_v46 = vpop.f32.mrf.mxu0 }
 0xb3f   :  { %v2179_v52 = vadd.f32 %v2178_v39, %v2149_v46 }
 0xb41   :  { %v2190_v48 = vmul.f32 %v8263_v35, %v2179_v52 }
 0xb43   :  { %7030 = vmatmul.msk.f32.gmra.mxu2 %vm635_vm15, %v2190_v48 }
 0xb46   :  { %v2152_v38 = vpop.f32.mrf.mxu0 }
 0xb47   :  { %v2182_v15 = vadd.f32 %v2181_v13, %v2152_v38 }
 0xb49   :  { %v2191_v32 = vmul.f32 %v8265_v27, %v2182_v15  ;;  %v7035_v15 = vld [vmem:[%s13115_s6 + $0x38] sm:$0xff]  ;;  %v7034_v27 = vld [vmem:[%s13115_s6 + $0x30] sm:$0xff] }
 0xb4a   :  { %2373 = vmatpush.msrb.mxu3 %v7035_v15 }
 0xb4b   :  { %7031 = vmatmul.msk.f32.gmra.mxu2 %vm635_vm15, %v2191_v32  ;;  %v7033_v32 = vld [vmem:[%s13115_s6 + $0x28] sm:$0xff] }
 0xb4c   :  { %2374 = vmatpush.msrb.mxu3 %v7034_v27 }
 0xb4e   :  { %2375 = vmatpush.msrb.mxu3 %v7033_v32  ;;  %v7052_v32 = vld [vmem:[%s13116_s7 + $0xe0] sm:$0xff] }
 0xb50   :  { %2376 = vmatpush.msrb.mxu3 %v7032_v60 }
 0xbb6   :  { %v2229_v63 = vpop.f32.mrf.mxu2 }
 0xbb7   :  { %v2230_v12 = vadd.f32 %v2229_v63, %v2199_v10 }
 0xbb9   :  { %v10248_v31 = vadd.f32 %v2230_v12, %v9729_v26 }
 0xbbb   :  { %v2245_v53 = vsel %vm139_vm1, %v10248_v31, 0.0 }
 0xbbc   :  { %2246 = vadd.xlane.f32.xlu0 %v2245_v53 }
 0xbbe   :  { %v2232_v21 = vpop.f32.mrf.mxu2 }
 0xbbf   :  { %v2233_v58 = vadd.f32 %v2232_v21, %v2199_v10 }
 0xbc1   :  { %v10253_v11 = vadd.f32 %v2233_v58, %v9734_v22 }
 0xbc3   :  { %v2248_v20 = vsel %vm139_vm1, %v10253_v11, 0.0 }
 0xbc4   :  { %2249 = vadd.xlane.f32.xlu1 %v2248_v20 }
 0xbc6   :  { %v2235_v25 = vpop.f32.mrf.mxu2 }
 0xbc7   :  { %v2236_v43 = vadd.f32 %v2235_v25, %v2199_v10 }
 0xbc9   :  { %v10258_v4 = vadd.f32 %v2236_v43, %v9739_v54 }
 0xbcb   :  { %v2251_v26 = vsel %vm139_vm1, %v10258_v4, 0.0 }
 0xbcc   :  { %2252 = vadd.xlane.f32.xlu2 %v2251_v26 }
 0xbce   :  { %v2238_v24 = vpop.f32.mrf.mxu2 }
 0xbcf   :  { %v2239_v19 = vadd.f32 %v2238_v24, %v2199_v10 }
 0xbd1   :  { %v10263_v42 = vadd.f32 %v2239_v19, %v9744_v14 }
 0xbd3   :  { %v2254_v22 = vsel %vm139_vm1, %v10263_v42, 0.0 }
 0xbd4   :  { %2255 = vadd.xlane.f32.xlu0 %v2254_v22  ;;  %v6961_v22 = vld [vmem:[%s13117_s8 + $0x48] sm:$0xff] }
 0xc2f   :  { %v2247_v56 = vpop.xlane.xlu0 %2246 }
 0xc30   :  { %v2257_v61 = vmul.f32 %v2247_v56, %v8737_v33 }
 0xc32   :  { %v2261_v47 = vsub.f32 %v10248_v31, %v2257_v61 }
 0xc34   :  { %v2265_v54 = vmul.f32 %v2261_v47, %v2261_v47 }
 0xc36   :  { %v2269_v55 = vsel %vm139_vm1, %v2265_v54, 0.0 }
 0xc37   :  { %2270 = vadd.xlane.f32.xlu1 %v2269_v55  ;;  %v2250_v8 = vpop.xlane.xlu1 %2249 }
 0xc38   :  { %v2258_v30 = vmul.f32 %v2250_v8, %v8737_v33 }
 0xc3a   :  { %v10272_v40 = vsub.f32 %v10253_v11, %v2258_v30  ;;  %v6962_v30 = vld [vmem:[%s13117_s8 + $0x50] sm:$0xff] }
 0xc3c   :  { %v2266_v14 = vmul.f32 %v10272_v40, %v10272_v40 }
 0xc3e   :  { %v2272_v62 = vsel %vm139_vm1, %v2266_v14, 0.0  ;;  %v10312_v14 = vperm.slane %v6961_v22, 0  ;;  %v7048_v22 = vld [vmem:[%s13116_s7 + $0xc0] sm:$0xff] }
 0xc3f   :  { %2273 = vadd.xlane.f32.xlu2 %v2272_v62  ;;  %v2253_v37 = vpop.xlane.xlu2 %2252  ;;  %v7055_v62 = vld [vmem:[%s13116_s7 + $0xf8] sm:$0xff] }
 0xc40   :  { %v2259_v6 = vmul.f32 %v2253_v37, %v8737_v33  ;;  %v7054_v37 = vld [vmem:[%s13116_s7 + $0xf0] sm:$0xff]  ;;  %2411 = vmatpush.msra.mxu0 %v7055_v62 }
 0xc41   :  { %v7046_v62 = vld [vmem:[%s13116_s7 + $0xb0] sm:$0xff] }
 0xc42   :  { %v10279_v39 = vsub.f32 %v10258_v4, %v2259_v6  ;;  %2412 = vmatpush.msra.mxu0 %v7054_v37 }
 0xc44   :  { %v2267_v17 = vmul.f32 %v10279_v39, %v10279_v39 }
 0xc46   :  { %v2275_v46 = vsel %vm139_vm1, %v2267_v17, 0.0 }
 0xc47   :  { %2276 = vadd.xlane.f32.xlu0 %v2275_v46  ;;  %v2256_v52 = vpop.xlane.xlu0 %2255 }
 0xc48   :  { %v2260_v35 = vmul.f32 %v2256_v52, %v8737_v33  ;;  %v10320_v52 = vperm.slane %v6962_v30, 0 }
 0xc4a   :  { %v10286_v48 = vsub.f32 %v10263_v42, %v2260_v35  ;;  %v7053_v35 = vld [vmem:[%s13116_s7 + $0xe8] sm:$0xff] }
 0xc4b   :  { %2413 = vmatpush.msra.mxu0 %v7053_v35 }
 0xc4c   :  { %v2268_v13 = vmul.f32 %v10286_v48, %v10286_v48 }
 0xc4d   :  { %2414 = vmatpush.msra.mxu0 %v7052_v32 }
 0xc4e   :  { %v2278_v38 = vsel %vm139_vm1, %v2268_v13, 0.0 }
 0xc4f   :  { %2279 = vadd.xlane.f32.xlu1 %v2278_v38 }
 0xcaa   :  { %v2271_v10 = vpop.xlane.xlu1 %2270 }
 0xcab   :  { %v2281_v63 = vmul.f32 %v2271_v10, %v8737_v33 }
 0xcad   :  { %v2285_v12 = vadd.f32 1e-05, %v2281_v63 }
 0xcaf   :  { %8266 = vrsqrt.f32 %v2285_v12  ;;  %vm2295_vm14 = vweird.f32 %v2285_v12 }
 0xcb2   :  { %v2274_v53 = vpop.xlane.xlu2 %2273 }
 0xcb3   :  { %v2282_v21 = vmul.f32 %v2274_v53, %v8737_v33 }
 0xcb5   :  { %v8267_v58 = vpop.eup %8266  ;;  %v2286_v20 = vadd.f32 1e-05, %v2282_v21 }
 0xcb6   :  { %v2290_v25 = vmul.f32 %v8267_v58, %v2285_v12  ;;  %vm2296_vm13 = vweird.f32 %v8267_v58  ;;  %v7051_v12 = vld [vmem:[%s13116_s7 + $0xd8] sm:$0xff] }
 0xcb7   :  { %8268 = vrsqrt.f32 %v2286_v20  ;;  %vm2297_vm2 = vmor %vm2295_vm14, %vm2296_vm13  ;;  %vm2305_vm4 = vweird.f32 %v2286_v20  ;;  %2415 = vmatpush.msra.mxu0 %v7051_v12  ;;  %v7042_v12 = vld [vmem:[%s13116_s7 + $0x90] sm:$0xff] }
 0xcb8   :  { %v2291_v43 = vmul.f32 %v8267_v58, %v2290_v25 }
 0xcba   :  { %v2292_v26 = vmul.f32 0.5, %v2291_v43  ;;  %v2277_v24 = vpop.xlane.xlu0 %2276 }
 0xcbb   :  { %v2283_v19 = vmul.f32 %v2277_v24, %v8737_v33  ;;  %v7049_v24 = vld [vmem:[%s13116_s7 + $0xc8] sm:$0xff] }
 0xcbc   :  { %v2293_v56 = vsub.f32 1.5, %v2292_v26 }
 0xcbd   :  { %v8269_v61 = vpop.eup %8268  ;;  %v2287_v54 = vadd.f32 1e-05, %v2283_v19 }
 0xcbe   :  { %v2294_v55 = vmul.f32 %v8267_v58, %v2293_v56  ;;  %v2300_v8 = vmul.f32 %v8269_v61, %v2286_v20  ;;  %vm2306_vm3 = vweird.f32 %v8269_v61 }
 0xcbf   :  { %8270 = vrsqrt.f32 %v2287_v54  ;;  %vm2307_vm5 = vmor %vm2305_vm4, %vm2306_vm3  ;;  %vm2315_vm7 = vweird.f32 %v2287_v54 }
 0xcc0   :  { %v2298_v6 = vsel %vm2297_vm2, %v8267_v58, %v2294_v55  ;;  %v2301_v17 = vmul.f32 %v8269_v61, %v2300_v8  ;;  %v7050_v58 = vld [vmem:[%s13116_s7 + $0xd0] sm:$0xff] }
 0xcc1   :  { %v2329_v46 = vmul.f32 %v2298_v6, %v2261_v47  ;;  %2416 = vmatpush.msra.mxu0 %v7050_v58 }
 0xcc2   :  { %v2302_v13 = vmul.f32 0.5, %v2301_v17  ;;  %v2280_v38 = vpop.xlane.xlu1 %2279 }
 0xcc3   :  { %v2334_v15 = vmul.f32 %v10312_v14, %v2329_v46  ;;  %v2284_v27 = vmul.f32 %v2280_v38, %v8737_v33  ;;  %2417 = vmatpush.msra.mxu0 %v7049_v24  ;;  %v7045_v46 = vld [vmem:[%s13116_s7 + $0xa8] sm:$0xff] }
 0xcc4   :  { %v2303_v60 = vsub.f32 1.5, %v2302_v13  ;;  %v7044_v13 = vld [vmem:[%s13116_s7 + $0xa0] sm:$0xff] }
 0xcc5   :  { %v8271_v47 = vpop.eup %8270  ;;  %v2288_v10 = vadd.f32 1e-05, %v2284_v27  ;;  %v2339_v63 = vadd.f32 %v10320_v52, %v2334_v15  ;;  %2418 = vmatpush.msra.mxu0 %v7048_v22 }
 0xcc6   :  { %v2304_v53 = vmul.f32 %v8269_v61, %v2303_v60  ;;  %v2310_v21 = vmul.f32 %v8271_v47, %v2287_v54  ;;  %vm2316_vm6 = vweird.f32 %v8271_v47 }
 0xcc7   :  { %8272 = vrsqrt.f32 %v2288_v10  ;;  %7036 = vmatmul.msk.f32.vlgmr.msrb.gmra.mxu3 %vm139_vm1, %v2339_v63  ;;  %vm2317_vm8 = vmor %vm2315_vm7, %vm2316_vm6  ;;  %vm2325_vm10 = vweird.f32 %v2288_v10 }
 0xcc8   :  { %v2311_v25 = vmul.f32 %v8271_v47, %v2310_v21  ;;  %v2308_v43 = vsel %vm2307_vm5, %v8269_v61, %v2304_v53  ;;  %v7040_v53 = vld [vmem:[%s13116_s7 + $0x80] sm:$0xff] }
 0xcc9   :  { %v2330_v26 = vmul.f32 %v2308_v43, %v10272_v40  ;;  %v7047_v40 = vld [vmem:[%s13116_s7 + $0xb8] sm:$0xff] }
 0xcca   :  { %v2312_v20 = vmul.f32 0.5, %v2311_v25  ;;  %2419 = vmatpush.msra.mxu0 %v7047_v40 }
 0xccb   :  { %v2335_v19 = vmul.f32 %v10312_v14, %v2330_v26 }
 0xccc   :  { %v2313_v56 = vsub.f32 1.5, %v2312_v20  ;;  %2420 = vmatpush.msra.mxu0 %v7046_v62 }
 0xccd   :  { %v8273_v55 = vpop.eup %8272  ;;  %v2340_v61 = vadd.f32 %v10320_v52, %v2335_v19 }
 0xcce   :  { %v2314_v8 = vmul.f32 %v8271_v47, %v2313_v56  ;;  %v2320_v30 = vmul.f32 %v8273_v55, %v2288_v10  ;;  %vm2326_vm9 = vweird.f32 %v8273_v55  ;;  %2421 = vmatpush.msra.mxu0 %v7045_v46  ;;  %v7041_v10 = vld [vmem:[%s13116_s7 + $0x88] sm:$0xff] }
 0xccf   :  { %7037 = vmatmul.msk.f32.gmra.mxu3 %vm139_vm1, %v2340_v61  ;;  %vm2327_vm11 = vmor %vm2325_vm10, %vm2326_vm9  ;;  %v6964_v61 = vld [vmem:[%s13117_s8 + $0x60] sm:$0xff] }
 0xcd0   :  { %v2321_v37 = vmul.f32 %v8273_v55, %v2320_v30  ;;  %v2318_v6 = vsel %vm2317_vm8, %v8271_v47, %v2314_v8  ;;  %2422 = vmatpush.msra.mxu0 %v7044_v13  ;;  %v2444_v40 = vperm.slane %v6964_v61, 0  ;;  %v7068_v61 = vld [vmem:[%s13113_s4 + $0xa8] sm:$0xff] }
 0xcd1   :  { %v2331_v17 = vmul.f32 %v2318_v6, %v10279_v39  ;;  %v7043_v39 = vld [vmem:[%s13116_s7 + $0x98] sm:$0xff] }
 0xcd2   :  { %v2322_v35 = vmul.f32 0.5, %v2321_v37  ;;  %2423 = vmatpush.msra.mxu0 %v7043_v39 }
 0xcd3   :  { %v2336_v54 = vmul.f32 %v10312_v14, %v2331_v17 }
 0xcd4   :  { %v2323_v38 = vsub.f32 1.5, %v2322_v35  ;;  %2424 = vmatpush.msra.mxu0 %v7042_v12 }
 0xcd5   :  { %v2341_v15 = vadd.f32 %v10320_v52, %v2336_v54 }
 0xcd6   :  { %v2324_v27 = vmul.f32 %v8273_v55, %v2323_v38  ;;  %2425 = vmatpush.msra.mxu0 %v7041_v10 }
 0xcd7   :  { %7038 = vmatmul.msk.f32.gmra.mxu3 %vm139_vm1, %v2341_v15 }
 0xcd8   :  { %v2328_v32 = vsel %vm2327_vm11, %v8273_v55, %v2324_v27  ;;  %2426 = vmatpush.msra.mxu0 %v7040_v53 }
 0xcd9   :  { %v2332_v60 = vmul.f32 %v2328_v32, %v10286_v48  ;;  %v6965_v48 = vld [vmem:[%s13117_s8 + $0x68] sm:$0xff] }
 0xcdb   :  { %v2337_v47 = vmul.f32 %v10312_v14, %v2332_v60  ;;  %v2348_v14 = vperm.slane %v6965_v48, 0 }
 0xcdd   :  { %v2342_v63 = vadd.f32 %v10320_v52, %v2337_v47 }
 0xcdf   :  { %7039 = vmatmul.msk.f32.gmra.mxu3 %vm139_vm1, %v2342_v63 }
 0xd4a   :  { %v2378_v52 = vpop.f32.mrf.mxu3 }
 0xd4b   :  { %v2379_v21 = vadd.f32 %v2378_v52, %v2348_v14 }
 0xd4d   :  { %v2390_v58 = vmax.f32 %v2379_v21, 0.0 }
 0xd4f   :  { %2427 = vmatmul.f32.vlgmr.msra.gmra.mxu0 %v2390_v58 }
 0xd52   :  { %v2381_v25 = vpop.f32.mrf.mxu3 }
 0xd53   :  { %v2382_v43 = vadd.f32 %v2381_v25, %v2348_v14 }
 0xd55   :  { %v2391_v26 = vmax.f32 %v2382_v43, 0.0 }
 0xd57   :  { %2430 = vmatmul.f32.gmra.mxu0 %v2391_v26 }
 0xd5a   :  { %v2384_v24 = vpop.f32.mrf.mxu3 }
 0xd5b   :  { %v2385_v20 = vadd.f32 %v2384_v24, %v2348_v14 }
 0xd5d   :  { %v2392_v19 = vmax.f32 %v2385_v20, 0.0 }
 0xd5f   :  { %2433 = vmatmul.f32.gmra.mxu0 %v2392_v19 }
 0xd62   :  { %v2387_v22 = vpop.f32.mrf.mxu3 }
 0xd63   :  { %v2388_v56 = vadd.f32 %v2387_v22, %v2348_v14  ;;  %v7069_v22 = vld [vmem:[%s13113_s4 + $0xb0] sm:$0xff] }
 0xd64   :  { %2588 = vmatpush.msra.mxu1 %v7069_v22 }
 0xd65   :  { %v2393_v55 = vmax.f32 %v2388_v56, 0.0  ;;  %v7070_v56 = vld [vmem:[%s13113_s4 + $0xb8] sm:$0xff] }
 0xd66   :  { %2617 = vmatpush.msrb.mxu2 %v7070_v56 }
 0xd67   :  { %2436 = vmatmul.f32.gmra.mxu0 %v2393_v55  ;;  %v7067_v55 = vld [vmem:[%s13113_s4 + $0xa0] sm:$0xff] }
 0xd68   :  { %2589 = vmatpush.msra.mxu1 %v7067_v55  ;;  %2618 = vmatpush.msrb.mxu2 %v7068_v61  ;;  %v8490_v61 = vld [vmem:[%s13112_s3 + $0x38] sm:$0xff] }
 0xdcc   :  { %v2428_v8 = vpop.f32.mrf.mxu0 }
 0xdcd   :  { %v2440_v30 = vadd.f32 %v2428_v8, %v10248_v31  ;;  %v7066_v8 = vld [vmem:[%s13113_s4 + $0x98] sm:$0xff] }
 0xdce   :  { %2619 = vmatpush.msrb.mxu2 %v7066_v8 }
 0xdcf   :  { %v10387_v62 = vadd.f32 %v2444_v40, %v2440_v30  ;;  %v7063_v30 = vld [vmem:[%s13113_s4 + $0x80] sm:$0xff] }
 0xdd1   :  { %v2457_v37 = vsel %vm139_vm1, %v10387_v62, 0.0 }
 0xdd2   :  { %2458 = vadd.xlane.f32.xlu2 %v2457_v37  ;;  %v7064_v37 = vld [vmem:[%s13113_s4 + $0x88] sm:$0xff] }
 0xdd3   :  { %2620 = vmatpush.msrb.mxu2 %v7064_v37 }
 0xdd4   :  { %v2431_v6 = vpop.f32.mrf.mxu0 }
 0xdd5   :  { %v2441_v17 = vadd.f32 %v2431_v6, %v10253_v11 }
 0xdd7   :  { %v10392_v46 = vadd.f32 %v2444_v40, %v2441_v17 }
 0xdd9   :  { %v2460_v35 = vsel %vm139_vm1, %v10392_v46, 0.0 }
 0xdda   :  { %2461 = vadd.xlane.f32.xlu0 %v2460_v35  ;;  %v8474_v35 = vld [vmem:[%s13112_s3 + $0x78] sm:$0xff] }
 0xddc   :  { %v2434_v54 = vpop.f32.mrf.mxu0 }
 0xddd   :  { %v2442_v13 = vadd.f32 %v2434_v54, %v10258_v4  ;;  %v8475_v54 = vld [vmem:[%s13112_s3 + $0xb8] sm:$0xff] }
 0xdde   :  { %2985 = vmatpush.msra.mxu2 %v8475_v54  ;;  %v7057_v54 = vld [vmem:[%s13117_s8 + $0x78] sm:$0xff] }
 0xddf   :  { %v10397_v38 = vadd.f32 %v2444_v40, %v2442_v13 }
 0xde1   :  { %v2463_v31 = vsel %vm139_vm1, %v10397_v38, 0.0 }
 0xde2   :  { %2464 = vadd.xlane.f32.xlu1 %v2463_v31  ;;  %v8476_v31 = vld [vmem:[%s13112_s3 + $0x70] sm:$0xff] }
 0xde4   :  { %v2437_v15 = vpop.f32.mrf.mxu0 }
 0xde5   :  { %v2443_v39 = vadd.f32 %v2437_v15, %v10263_v42  ;;  %v8477_v15 = vld [vmem:[%s13112_s3 + $0xb0] sm:$0xff] }
 0xde6   :  { %2986 = vmatpush.msra.mxu2 %v8477_v15  ;;  %v8492_v15 = vld [vmem:[%s13112_s3 + $0x28] sm:$0xff] }
 0xde7   :  { %v10402_v27 = vadd.f32 %v2444_v40, %v2443_v39  ;;  %v7065_v40 = vld [vmem:[%s13113_s4 + $0x90] sm:$0xff]  ;;  %v8478_v39 = vld [vmem:[%s13112_s3 + $0x68] sm:$0xff] }
 0xde8   :  { %2590 = vmatpush.msra.mxu1 %v7065_v40  ;;  %v7056_v40 = vld [vmem:[%s13117_s8 + $0x70] sm:$0xff] }
 0xde9   :  { %v2466_v11 = vsel %vm139_vm1, %v10402_v27, 0.0 }
 0xdea   :  { %2467 = vadd.xlane.f32.xlu2 %v2466_v11  ;;  %2591 = vmatpush.msra.mxu1 %v7063_v30  ;;  %v8479_v11 = vld [vmem:[%s13112_s3 + $0xa8] sm:$0xff] }
 0xdeb   :  { %2987 = vmatpush.msra.mxu2 %v8479_v11 }
 0xdec   :  { %2948 = vmatpush.msrb.mxu1 %v8474_v35 }
 0xdee   :  { %2949 = vmatpush.msrb.mxu1 %v8476_v31  ;;  %v10521_v31 = vperm.slane %v7056_v40, 0 }
 0xdf0   :  { %2950 = vmatpush.msrb.mxu1 %v8478_v39 }
 0xe45   :  { %v2459_v32 = vpop.xlane.xlu2 %2458 }
 0xe46   :  { %v2469_v60 = vmul.f32 %v2459_v32, %v8737_v33  ;;  %v8480_v32 = vld [vmem:[%s13112_s3 + $0x60] sm:$0xff] }
 0xe47   :  { %2951 = vmatpush.msrb.mxu1 %v8480_v32 }
 0xe48   :  { %v10408_v4 = vsub.f32 %v10387_v62, %v2469_v60  ;;  %v8481_v60 = vld [vmem:[%s13112_s3 + $0xa0] sm:$0xff] }
 0xe49   :  { %2988 = vmatpush.msra.mxu2 %v8481_v60  ;;  %v2550_v60 = vperm.slane %v7057_v54, 0 }
 0xe4a   :  { %v2477_v47 = vmul.f32 %v10408_v4, %v10408_v4 }
 0xe4c   :  { %v2481_v63 = vsel %vm139_vm1, %v2477_v47, 0.0 }
 0xe4d   :  { %2482 = vadd.xlane.f32.xlu0 %v2481_v63  ;;  %v2462_v12 = vpop.xlane.xlu0 %2461 }
 0xe4e   :  { %v2470_v42 = vmul.f32 %v2462_v12, %v8737_v33  ;;  %v8482_v12 = vld [vmem:[%s13112_s3 + $0x58] sm:$0xff] }
 0xe4f   :  { %2952 = vmatpush.msrb.mxu1 %v8482_v12 }
 0xe50   :  { %v10415_v10 = vsub.f32 %v10392_v46, %v2470_v42  ;;  %v8483_v42 = vld [vmem:[%s13112_s3 + $0x98] sm:$0xff] }
 0xe51   :  { %2989 = vmatpush.msra.mxu2 %v8483_v42 }
 0xe52   :  { %v2478_v53 = vmul.f32 %v10415_v10, %v10415_v10 }
 0xe54   :  { %v2484_v48 = vsel %vm139_vm1, %v2478_v53, 0.0 }
 0xe55   :  { %v2465_v14 = vpop.xlane.xlu1 %2464  ;;  %2485 = vadd.xlane.f32.xlu1 %v2484_v48 }
 0xe56   :  { %v2471_v52 = vmul.f32 %v2465_v14, %v8737_v33  ;;  %v8484_v14 = vld [vmem:[%s13112_s3 + $0x50] sm:$0xff] }
 0xe57   :  { %2953 = vmatpush.msrb.mxu1 %v8484_v14  ;;  %v8494_v14 = vld [vmem:[%s13112_s3 + $0x18] sm:$0xff] }
 0xe58   :  { %v10422_v21 = vsub.f32 %v10397_v38, %v2471_v52  ;;  %v8485_v52 = vld [vmem:[%s13112_s3 + $0x90] sm:$0xff] }
 0xe59   :  { %2990 = vmatpush.msra.mxu2 %v8485_v52 }
 0xe5a   :  { %v2479_v58 = vmul.f32 %v10422_v21, %v10422_v21 }
 0xe5c   :  { %v2487_v25 = vsel %vm139_vm1, %v2479_v58, 0.0 }
 0xe5d   :  { %2488 = vadd.xlane.f32.xlu2 %v2487_v25  ;;  %v2468_v43 = vpop.xlane.xlu2 %2467  ;;  %v8486_v25 = vld [vmem:[%s13112_s3 + $0x48] sm:$0xff] }
 0xe5e   :  { %v2472_v26 = vmul.f32 %v2468_v43, %v8737_v33  ;;  %2954 = vmatpush.msrb.mxu1 %v8486_v25  ;;  %v8487_v43 = vld [vmem:[%s13112_s3 + $0x88] sm:$0xff]  ;;  %v8495_v25 = vld [vmem:[%s13112_s3 + $0x10] sm:$0xff] }
 0xe5f   :  { %2991 = vmatpush.msra.mxu2 %v8487_v43 }
 0xe60   :  { %v10429_v24 = vsub.f32 %v10402_v27, %v2472_v26 }
 0xe62   :  { %v2480_v20 = vmul.f32 %v10429_v24, %v10429_v24 }
 0xe64   :  { %v2490_v19 = vsel %vm139_vm1, %v2480_v20, 0.0  ;;  %v8488_v20 = vld [vmem:[%s13112_s3 + $0x40] sm:$0xff] }
 0xe65   :  { %2491 = vadd.xlane.f32.xlu0 %v2490_v19  ;;  %2955 = vmatpush.msrb.mxu1 %v8488_v20  ;;  %v8489_v19 = vld [vmem:[%s13112_s3 + $0x80] sm:$0xff] }
 0xe66   :  { %2992 = vmatpush.msra.mxu2 %v8489_v19 }
 0xe67   :  { %2956 = vmatpush.msrb.mxu1 %v8490_v61 }
 0xec0   :  { %v2483_v6 = vpop.xlane.xlu0 %2482 }
 0xec1   :  { %v2493_v17 = vmul.f32 %v2483_v6, %v8737_v33  ;;  %v8491_v6 = vld [vmem:[%s13112_s3 + $0x30] sm:$0xff] }
 0xec2   :  { %2957 = vmatpush.msrb.mxu1 %v8491_v6 }
 0xec3   :  { %v2497_v13 = vadd.f32 1e-05, %v2493_v17 }
 0xec4   :  { %2958 = vmatpush.msrb.mxu1 %v8492_v15 }
 0xec5   :  { %8274 = vrsqrt.f32 %v2497_v13  ;;  %vm2507_vm13 = vweird.f32 %v2497_v13 }
 0xec8   :  { %v2486_v47 = vpop.xlane.xlu1 %2485 }
 0xec9   :  { %v2494_v63 = vmul.f32 %v2486_v47, %v8737_v33 }
 0xecb   :  { %v8275_v53 = vpop.eup %8274  ;;  %v2498_v48 = vadd.f32 1e-05, %v2494_v63 }
 0xecc   :  { %v2502_v58 = vmul.f32 %v8275_v53, %v2497_v13  ;;  %vm2508_vm12 = vweird.f32 %v8275_v53  ;;  %v8493_v13 = vld [vmem:[%s13112_s3 + $0x20] sm:$0xff] }
 0xecd   :  { %8276 = vrsqrt.f32 %v2498_v48  ;;  %vm2509_vm14 = vmor %vm2507_vm13, %vm2508_vm12  ;;  %2959 = vmatpush.msrb.mxu1 %v8493_v13  ;;  %vm2517_vm3 = vweird.f32 %v2498_v48 }
 0xece   :  { %v2503_v26 = vmul.f32 %v8275_v53, %v2502_v58 }
 0xecf   :  { %2960 = vmatpush.msrb.mxu1 %v8494_v14 }
 0xed0   :  { %v2504_v22 = vmul.f32 0.5, %v2503_v26  ;;  %v2489_v56 = vpop.xlane.xlu2 %2488 }
 0xed1   :  { %v2495_v55 = vmul.f32 %v2489_v56, %v8737_v33  ;;  %2961 = vmatpush.msrb.mxu1 %v8495_v25 }
 0xed2   :  { %v2505_v8 = vsub.f32 1.5, %v2504_v22  ;;  %v8496_v22 = vld [vmem:[%s13112_s3 + $0x8] sm:$0xff] }
 0xed3   :  { %v8277_v30 = vpop.eup %8276  ;;  %v2499_v37 = vadd.f32 1e-05, %v2495_v55  ;;  %2962 = vmatpush.msrb.mxu1 %v8496_v22 }
 0xed4   :  { %v2506_v17 = vmul.f32 %v8275_v53, %v2505_v8  ;;  %v2512_v35 = vmul.f32 %v8277_v30, %v2498_v48  ;;  %vm2518_vm2 = vweird.f32 %v8277_v30  ;;  %v8497_v48 = vld [vmem:[%s13112_s3] sm:$0xff] }
 0xed5   :  { %8278 = vrsqrt.f32 %v2499_v37  ;;  %vm2519_vm4 = vmor %vm2517_vm3, %vm2518_vm2  ;;  %2963 = vmatpush.msrb.mxu1 %v8497_v48  ;;  %vm2527_vm6 = vweird.f32 %v2499_v37 }
 0xed6   :  { %v2510_v39 = vsel %vm2509_vm14, %v8275_v53, %v2506_v17  ;;  %v2513_v11 = vmul.f32 %v8277_v30, %v2512_v35 }
 0xed7   :  { %v2541_v32 = vmul.f32 %v2510_v39, %v10408_v4 }
 0xed8   :  { %v2514_v47 = vmul.f32 0.5, %v2513_v11  ;;  %v2492_v63 = vpop.xlane.xlu0 %2491 }
 0xed9   :  { %v2546_v12 = vmul.f32 %v10521_v31, %v2541_v32  ;;  %v2496_v42 = vmul.f32 %v2492_v63, %v8737_v33 }
 0xeda   :  { %v2515_v53 = vsub.f32 1.5, %v2514_v47 }
 0xedb   :  { %v8279_v4 = vpop.eup %8278  ;;  %v2500_v52 = vadd.f32 1e-05, %v2496_v42  ;;  %v2551_v58 = vadd.f32 %v2550_v60, %v2546_v12 }
 0xedc   :  { %v2516_v43 = vmul.f32 %v8277_v30, %v2515_v53  ;;  %v2522_v26 = vmul.f32 %v8279_v4, %v2499_v37  ;;  %vm2528_vm5 = vweird.f32 %v8279_v4 }
 0xedd   :  { %8280 = vrsqrt.f32 %v2500_v52  ;;  %7071 = vmatmul.msk.f32.vlgmr.msra.gmra.mxu1 %vm139_vm1, %v2551_v58  ;;  %7075 = vmatmul.msk.f32.vlgmr.msrb.gmra.mxu2 %vm139_vm1, %v2551_v58  ;;  %vm2529_vm7 = vmor %vm2527_vm6, %vm2528_vm5  ;;  %vm2537_vm9 = vweird.f32 %v2500_v52 }
 0xede   :  { %v2523_v20 = vmul.f32 %v8279_v4, %v2522_v26  ;;  %v2520_v19 = vsel %vm2519_vm4, %v8277_v30, %v2516_v43 }
 0xedf   :  { %v2542_v56 = vmul.f32 %v2520_v19, %v10415_v10 }
 0xee0   :  { %v2524_v55 = vmul.f32 0.5, %v2523_v20 }
 0xee1   :  { %v2547_v61 = vmul.f32 %v10521_v31, %v2542_v56 }
 0xee2   :  { %v2525_v40 = vsub.f32 1.5, %v2524_v55 }
 0xee3   :  { %v8281_v8 = vpop.eup %8280  ;;  %v2552_v6 = vadd.f32 %v2550_v60, %v2547_v61 }
 0xee4   :  { %v2526_v30 = vmul.f32 %v8279_v4, %v2525_v40  ;;  %v2532_v17 = vmul.f32 %v8281_v8, %v2500_v52  ;;  %vm2538_vm8 = vweird.f32 %v8281_v8 }
 0xee5   :  { %7072 = vmatmul.msk.f32.gmra.mxu1 %vm139_vm1, %v2552_v6  ;;  %7076 = vmatmul.msk.f32.gmra.mxu2 %vm139_vm1, %v2552_v6  ;;  %vm2539_vm10 = vmor %vm2537_vm9, %vm2538_vm8 }
 0xee6   :  { %v2530_v10 = vsel %vm2529_vm7, %v8279_v4, %v2526_v30  ;;  %v2533_v35 = vmul.f32 %v8281_v8, %v2532_v17 }
 0xee7   :  { %v2543_v54 = vmul.f32 %v2530_v10, %v10422_v21  ;;  %v13324_v10 = vld [vmem:[#allocation7_spill] sm:$0xff] }
 0xee8   :  { %v2534_v15 = vmul.f32 0.5, %v2533_v35 }
 0xee9   :  { %v2548_v39 = vmul.f32 %v10521_v31, %v2543_v54  ;;  %v13325_v54 = vld [vmem:[#allocation11_spill] sm:$0xff] }
 0xeea   :  { %v2535_v11 = vsub.f32 1.5, %v2534_v15 }
 0xeeb   :  { %v2553_v32 = vadd.f32 %v2550_v60, %v2548_v39  ;;  %v13326_v39 = vld [vmem:[#allocation8_spill] sm:$0xff] }
 0xeec   :  { %v2536_v13 = vmul.f32 %v8281_v8, %v2535_v11 }
 0xeed   :  { %7073 = vmatmul.msk.f32.gmra.mxu1 %vm139_vm1, %v2553_v32  ;;  %7077 = vmatmul.msk.f32.gmra.mxu2 %vm139_vm1, %v2553_v32 }
 0xeee   :  { %v2540_v37 = vsel %vm2539_vm10, %v8281_v8, %v2536_v13  ;;  %v13327_v13 = vld [vmem:[#allocation13_spill] sm:$0xff] }
 0xeef   :  { %v2544_v47 = vmul.f32 %v2540_v37, %v10429_v24 }
 0xef1   :  { %v2549_v63 = vmul.f32 %v10521_v31, %v2544_v47  ;;  %v13328_v47 = vld [vmem:[#allocation22_spill] sm:$0xff] }
 0xef3   :  { %v2554_v12 = vadd.f32 %v2550_v60, %v2549_v63 }
 0xef5   :  { %7074 = vmatmul.msk.f32.gmra.mxu1 %vm139_vm1, %v2554_v12  ;;  %7078 = vmatmul.msk.f32.gmra.mxu2 %vm139_vm1, %v2554_v12  ;;  %v13329_v12 = vld [vmem:[#allocation18_spill] sm:$0xff] }
 0xf5a   :  { %v10558_v21 = vpop.f32.mrf.mxu1 }
 0xf5b   :  { %v2646_v58 = vmul.f32 %v10558_v21, %v9035_v1  ;;  %v2642_v43 = vmul.f32 %v10558_v21, %v9119_v16  ;;  %v2638_v19 = vmul.f32 %v10558_v21, %v9054_v9  ;;  %v2654_v8 = vmul.f32 %v10558_v21, %v13298_v49 }
 0xf5c   :  { %v2650_v15 = vmul.f32 %v10558_v21, %v13325_v54 }
 0xf60   :  { %v10608_v48 = vpop.f32.mrf.mxu2 }
 0xf62   :  { %v10560_v42 = vpop.f32.mrf.mxu1 }
 0xf63   :  { %v2647_v14 = vmul.f32 %v10560_v42, %v9039_v3  ;;  %v2643_v26 = vmul.f32 %v10560_v42, %v9043_v51  ;;  %v2639_v20 = vmul.f32 %v10560_v42, %v9045_v7  ;;  %v2655_v56 = vmul.f32 %v10560_v42, %v9078_v41 }
 0xf64   :  { %v2635_v35 = vmul.f32 %v10560_v42, %v13324_v10  ;;  %v2651_v37 = vmul.f32 %v10560_v42, %v13327_v13 }
 0xf65   :  { %2756 = vrot.lane.b32.xlu0 %v2647_v14, %s8630_s13  ;;  %v2683_v14 = vmul.f32 %v10608_v48, %v13329_v12 }
 0xf68   :  { %v10619_v6 = vpop.f32.mrf.mxu2 }
 0xf6a   :  { %v10565_v53 = vpop.f32.mrf.mxu1 }
 0xf6b   :  { %v2648_v24 = vmul.f32 %v10565_v53, %v9066_v23  ;;  %v2644_v60 = vmul.f32 %v10565_v53, %v9037_v2  ;;  %v2640_v22 = vmul.f32 %v10565_v53, %v9047_v45  ;;  %v2656_v61 = vmul.f32 %v10565_v53, %v9062_v18 }
 0xf6c   :  { %v2636_v40 = vmul.f32 %v10565_v53, %v13297_v5  ;;  %v2652_v30 = vmul.f32 %v10565_v53, %v13300_v59 }
 0xf6d   :  { %2758 = vrot.lane.b32.xlu2 %v2648_v24, %s8630_s13  ;;  %v2686_v24 = vmul.f32 %v10565_v53, %v13328_v47 }
 0xf70   :  { %v10634_v32 = vpop.f32.mrf.mxu2 }
 0xf71   :  { %v2687_v63 = vmul.f32 %v10634_v32, %v13328_v47 }
 0xf72   :  { %v10570_v31 = vpop.f32.mrf.mxu1 }
 0xf73   :  { %v2649_v4 = vmul.f32 %v10570_v31, %v9033_v0  ;;  %v2645_v52 = vmul.f32 %v10570_v31, %v9104_v44  ;;  %v2641_v25 = vmul.f32 %v10570_v31, %v9041_v36  ;;  %v2657_v55 = vmul.f32 %v10570_v31, %v13295_v28 }
 0xf74   :  { %v2637_v17 = vmul.f32 %v10570_v31, %v9074_v29  ;;  %v2653_v11 = vmul.f32 %v10570_v31, %v13326_v39 }
 0xf75   :  { %2750 = vrot.lane.b32.xlu2 %v2644_v60, %s8630_s13  ;;  %2760 = vrot.lane.b32.xlu1 %v2649_v4, %s8630_s13  ;;  %v2682_v60 = vmul.f32 %v10558_v21, %v13329_v12  ;;  %v7712_v4 = vpack.i.bf16 %v2687_v63, %v2686_v24  ;;  %v13336_v63 = vld [vmem:[#allocation20_spill] sm:$0xff] }
 0xf76   :  { %2752 = vrot.lane.b32.xlu0 %v2645_v52, %s8630_s13  ;;  %v13330_v52 = vld [vmem:[#allocation9_spill] sm:$0xff] }
 0xf7d   :  { %2754 = vrot.lane.b32.xlu1 %v2646_v58, %s8630_s13  ;;  %2744 = vrot.lane.b32.xlu2 %v2641_v25, %s8630_s13  ;;  %v2634_v58 = vmul.f32 %v10558_v21, %v13330_v52  ;;  %v7722_v25 = vpack.i.bf16 %v2683_v14, %v2682_v60  ;;  %v2677_v14 = vmul.f32 %v10619_v6, %v13336_v63 }
 0xf7e   :  { %2746 = vrot.lane.b32.xlu0 %v2642_v43, %s8630_s13  ;;  %v13331_v43 = vld [vmem:[#allocation27_spill] sm:$0xff] }
 0xf85   :  { %2748 = vrot.lane.b32.xlu1 %v2643_v26, %s8630_s13  ;;  %2740 = vrot.lane.b32.xlu2 %v2639_v20, %s8630_s13  ;;  %v2671_v26 = vmul.f32 %v10634_v32, %v13331_v43  ;;  %v13332_v20 = vld [vmem:[#allocation14_spill] sm:$0xff] }
 0xf86   :  { %2738 = vrot.lane.b32.xlu0 %v2638_v19, %s8630_s13  ;;  %v2685_v19 = vmul.f32 %v10619_v6, %v13332_v20 }
 0xf8d   :  { %2742 = vrot.lane.b32.xlu1 %v2640_v22, %s8630_s13  ;;  %2772 = vrot.lane.b32.xlu2 %v2655_v56, %s8630_s13  ;;  %v13333_v22 = vld [vmem:[#allocation15_spill] sm:$0xff] }
 0xf8e   :  { %2776 = vrot.lane.b32.xlu0 %v2657_v55, %s8630_s13  ;;  %v2679_v56 = vmul.f32 %v10634_v32, %v13333_v22  ;;  %v2670_v55 = vmul.f32 %v10565_v53, %v13331_v43 }
 0xf95   :  { %2774 = vrot.lane.b32.xlu1 %v2656_v61, %s8630_s13  ;;  %2734 = vrot.lane.b32.xlu2 %v2636_v40, %s8630_s13  ;;  %v2684_v61 = vmul.f32 %v10560_v42, %v13332_v20  ;;  %v2678_v40 = vmul.f32 %v10565_v53, %v13333_v22 }
 0xf96   :  { %2770 = vrot.lane.b32.xlu0 %v2654_v8, %s8630_s13  ;;  %v7742_v8 = vpack.i.bf16 %v2671_v26, %v2670_v55  ;;  %v13338_v55 = vld [vmem:[#allocation26_spill] sm:$0xff] }
 0xf9d   :  { %2766 = vrot.lane.b32.xlu2 %v2652_v30, %s8630_s13  ;;  %2736 = vrot.lane.b32.xlu1 %v2637_v17, %s8630_s13  ;;  %v7717_v30 = vpack.i.bf16 %v2685_v19, %v2684_v61  ;;  %v7727_v17 = vpack.i.bf16 %v2679_v56, %v2678_v40  ;;  %v13337_v19 = vld [vmem:[#allocation21_spill] sm:$0xff]  ;;  %v2675_v61 = vmul.f32 %v10608_v48, %v13338_v55 }
 0xf9e   :  { %2732 = vrot.lane.b32.xlu0 %v2635_v35, %s8630_s13  ;;  %v13334_v35 = vld [vmem:[#allocation25_spill] sm:$0xff]  ;;  %v2667_v56 = vmul.f32 %v10608_v48, %v13337_v19  ;;  %v2666_v40 = vmul.f32 %v10558_v21, %v13337_v19 }
 0xf9f   :  { %v2668_v24 = vmul.f32 %v10560_v42, %v13334_v35 }
 0xfa5   :  { %2762 = vrot.lane.b32.xlu2 %v2650_v15, %s8630_s13  ;;  %2768 = vrot.lane.b32.xlu1 %v2653_v11, %s8630_s13  ;;  %v2669_v15 = vmul.f32 %v10619_v6, %v13334_v35  ;;  %v13335_v11 = vld [vmem:[#allocation28_spill] sm:$0xff] }
 0xfa6   :  { %2764 = vrot.lane.b32.xlu0 %v2651_v37, %s8630_s13  ;;  %v2699_v37 = vmul.f32 %v10608_v48, %v13335_v11  ;;  %v2698_v60 = vmul.f32 %v10558_v21, %v13335_v11 }
 0xfad   :  { %7713 = vrot.lane.b32.xlu2 %v7712_v4, %s8632_s18  ;;  %2730 = vrot.lane.b32.xlu1 %v2634_v58, %s8630_s13  ;;  %v2676_v4 = vmul.f32 %v10560_v42, %v13336_v63  ;;  %v7752_v58 = vpack.i.bf16 %v2669_v15, %v2668_v24  ;;  %v13340_v24 = vld [vmem:[#allocation19_spill] sm:$0xff] }
 0xfae   :  { %7723 = vrot.lane.b32.xlu0 %v7722_v25, %s8632_s18  ;;  %v7767_v25 = vpack.i.bf16 %v2699_v37, %v2698_v60  ;;  %v13339_v37 = vld [vmem:[#allocation34_spill] sm:$0xff]  ;;  %v2703_v60 = vmul.f32 %v10634_v32, %v13340_v24  ;;  %v13348_v63 = vld [vmem:[#allocation23_spill] sm:$0xff] }
 0xfaf   :  { %v7732_v26 = vpack.i.bf16 %v2677_v14, %v2676_v4  ;;  %v2695_v14 = vmul.f32 %v10634_v32, %v13339_v37  ;;  %v2694_v4 = vmul.f32 %v10565_v53, %v13339_v37 }
 0xfb5   :  { %7743 = vrot.lane.b32.xlu2 %v7742_v8, %s8632_s18  ;;  %7718 = vrot.lane.b32.xlu1 %v7717_v30, %s8632_s18  ;;  %v2674_v8 = vmul.f32 %v10558_v21, %v13338_v55  ;;  %v7762_v30 = vpack.i.bf16 %v2667_v56, %v2666_v40  ;;  %v13341_v40 = vld [vmem:[#allocation16_spill] sm:$0xff] }
 0xfb6   :  { %7728 = vrot.lane.b32.xlu0 %v7727_v17, %s8632_s18  ;;  %v2688_v19 = vmul.f32 %v10570_v31, %v13341_v40 }
 0xfb7   :  { %v7737_v17 = vpack.i.bf16 %v2675_v61, %v2674_v8 }
 0xfbd   :  { %7753 = vrot.lane.b32.xlu2 %v7752_v58, %s8632_s18  ;;  %7768 = vrot.lane.b32.xlu1 %v7767_v25, %s8632_s18  ;;  %v2702_v58 = vmul.f32 %v10565_v53, %v13340_v24  ;;  %v7777_v25 = vpack.i.bf16 %v2695_v14, %v2694_v4  ;;  %v13343_v4 = vld [vmem:[#allocation24_spill] sm:$0xff] }
 0xfbe   :  { %7733 = vrot.lane.b32.xlu0 %v7732_v26, %s8632_s18  ;;  %v2631_v26 = vpop.f32.mrf.mxu2  ;;  %v2680_v43 = vmul.f32 %v10570_v31, %v13343_v4 }
 0xfbf   :  { %v7747_v56 = vpack.i.bf16 %v2703_v60, %v2702_v58  ;;  %v2689_v8 = vmul.f32 %v2631_v26, %v13341_v40  ;;  %v2681_v58 = vmul.f32 %v2631_v26, %v13343_v4  ;;  %v2705_v24 = vmul.f32 %v2631_v26, %v13348_v63 }
 0xfc1   :  { %v7787_v35 = vpack.i.bf16 %v2689_v8, %v2688_v19  ;;  %v7792_v11 = vpack.i.bf16 %v2681_v58, %v2680_v43  ;;  %v13345_v19 = vld [vmem:[#allocation17_spill] sm:$0xff] }
 0xfc5   :  { %7763 = vrot.lane.b32.xlu2 %v7762_v30, %s8632_s18  ;;  %v13342_v30 = vld [vmem:[#allocation29_spill] sm:$0xff] }
 0xfc6   :  { %7738 = vrot.lane.b32.xlu0 %v7737_v17, %s8632_s18  ;;  %v2701_v17 = vmul.f32 %v10619_v6, %v13342_v30  ;;  %v2700_v37 = vmul.f32 %v10560_v42, %v13342_v30 }
 0xfc7   :  { %v2759_v15 = vpop.permute.xlu2 %2758 }
 0xfc8   :  { %v7757_v14 = vpack.i.bf16 %v2701_v17, %v2700_v37  ;;  %v2673_v37 = vmul.f32 %v2631_v26, %v13345_v19  ;;  %v13346_v17 = vld [vmem:[#allocation33_spill] sm:$0xff] }
 0xfc9   :  { %v2660_v30 = vmul.f32 %v10560_v42, %v13346_v17 }
 0xfcd   :  { %7778 = vrot.lane.b32.xlu2 %v7777_v25, %s8632_s18  ;;  %v13344_v25 = vld [vmem:[#allocation31_spill] sm:$0xff] }
 0xfce   :  { %7748 = vrot.lane.b32.xlu0 %v7747_v56, %s8632_s18  ;;  %v2663_v56 = vmul.f32 %v10634_v32, %v13344_v25  ;;  %v2662_v40 = vmul.f32 %v10565_v53, %v13344_v25  ;;  %v2672_v32 = vmul.f32 %v10570_v31, %v13345_v19 }
 0xfcf   :  { %v2751_v61 = vpop.permute.xlu2 %2750 }
 0xfd0   :  { %v7772_v55 = vpack.i.bf16 %v2663_v56, %v2662_v40  ;;  %v7797_v25 = vpack.i.bf16 %v2673_v37, %v2672_v32  ;;  %v13347_v40 = vld [vmem:[#allocation30_spill] sm:$0xff]  ;;  %v2704_v37 = vmul.f32 %v10570_v31, %v13348_v63 }
 0xfd1   :  { %v2697_v58 = vmul.f32 %v2631_v26, %v13347_v40  ;;  %v2696_v19 = vmul.f32 %v10570_v31, %v13347_v40 }
 0xfd5   :  { %7788 = vrot.lane.b32.xlu2 %v7787_v35, %s8632_s18 }
 0xfd6   :  { %7758 = vrot.lane.b32.xlu0 %v7757_v14, %s8632_s18  ;;  %v2661_v14 = vmul.f32 %v10619_v6, %v13346_v17 }
 0xfd7   :  { %v2745_v60 = vpop.permute.xlu2 %2744  ;;  %v2757_v8 = vpop.permute.xlu0 %2756 }
 0xfd8   :  { %v7782_v43 = vpack.i.bf16 %v2661_v14, %v2660_v30  ;;  %v7812_v30 = vpack.i.bf16 %v2697_v58, %v2696_v19 }
 0xfdd   :  { %7793 = vrot.lane.b32.xlu2 %v7792_v11, %s8632_s18 }
 0xfde   :  { %7773 = vrot.lane.b32.xlu0 %v7772_v55, %s8632_s18 }
 0xfdf   :  { %v2741_v35 = vpop.permute.xlu2 %2740 }
 0xfe5   :  { %7798 = vrot.lane.b32.xlu2 %v7797_v25, %s8632_s18  ;;  %v7802_v25 = vpack.i.bf16 %v2705_v24, %v2704_v37 }
 0xfe6   :  { %7783 = vrot.lane.b32.xlu0 %v7782_v43, %s8632_s18 }
 0xfe7   :  { %v2761_v11 = vpop.permute.xlu1 %2760  ;;  %v2773_v55 = vpop.permute.xlu2 %2772 }
 0xfe8   :  { %v2753_v56 = vpop.permute.xlu0 %2752  ;;  %7079 = vmatpush.xpose.msk.msra.mxu3 %vm635_vm15, %v2761_v11  ;;  %v13349_v11 = vld [vmem:[#allocation32_spill] sm:$0xff] }
 0xfe9   :  { %v2665_v17 = vmul.f32 %v2631_v26, %v13349_v11  ;;  %v2664_v40 = vmul.f32 %v10570_v31, %v13349_v11 }
 0xfeb   :  { %v7807_v19 = vpack.i.bf16 %v2665_v17, %v2664_v40 }
 0xfec   :  { %7080 = vmatpush.xpose.msk.msra.mxu3 %vm635_vm15, %v2759_v15 }
 0xfed   :  { %7813 = vrot.lane.b32.xlu2 %v7812_v30, %s8632_s18 }
 0xfee   :  { %7803 = vrot.lane.b32.xlu0 %v7802_v25, %s8632_s18 }
 0xfef   :  { %v2755_v14 = vpop.permute.xlu1 %2754  ;;  %v2735_v32 = vpop.permute.xlu2 %2734 }
 0xff0   :  { %v2747_v43 = vpop.permute.xlu0 %2746  ;;  %7081 = vmatpush.xpose.msk.msra.mxu3 %vm635_vm15, %v2757_v8 }
 0xff4   :  { %7082 = vmatpush.xpose.msk.msra.mxu3 %vm635_vm15, %v2755_v14 }
 0xff6   :  { %7808 = vrot.lane.b32.xlu0 %v7807_v19, %s8632_s18 }
 0xff7   :  { %v2749_v15 = vpop.permute.xlu1 %2748  ;;  %v2767_v24 = vpop.permute.xlu2 %2766 }
 0xff8   :  { %v2739_v58 = vpop.permute.xlu0 %2738  ;;  %7083 = vmatpush.xpose.msk.msra.mxu3 %vm635_vm15, %v2753_v56 }
 0xffc   :  { %7084 = vmatpush.xpose.msk.msra.mxu3 %vm635_vm15, %v2751_v61 }
 0xfff   :  { %v2743_v37 = vpop.permute.xlu1 %2742  ;;  %v2763_v30 = vpop.permute.xlu2 %2762 }
0x1000   :  { %v2777_v8 = vpop.permute.xlu0 %2776  ;;  %7085 = vmatpush.xpose.msk.msra.mxu3 %vm635_vm15, %v2749_v15 }
0x1001   :  { %7099 = vmatpush.xpose.msk.msrb.mxu0 %vm635_vm15, %v2777_v8 }
0x1004   :  { %7086 = vmatpush.xpose.msk.msra.mxu3 %vm635_vm15, %v2747_v43 }
0x1007   :  { %v2775_v26 = vpop.permute.xlu1 %2774  ;;  %v7714_v17 = vpop.permute.xlu2 %7713 }
0x1008   :  { %v2771_v40 = vpop.permute.xlu0 %2770  ;;  %7087 = vmatpush.xpose.msk.msra.mxu3 %vm635_vm15, %v2745_v60  ;;  %7100 = vmatpush.xpose.msk.msrb.mxu0 %vm635_vm15, %v2775_v26 }
0x100c   :  { %7088 = vmatpush.xpose.msk.msra.mxu3 %vm635_vm15, %v2743_v37  ;;  %7101 = vmatpush.xpose.msk.msrb.mxu0 %vm635_vm15, %v2773_v55  ;;  %v7715_v37 = vunpack.i.l.bf16 %v7714_v17 }
0x100f   :  { %v10756_v61 = vpop.permute.xlu2 %7743  ;;  %v2737_v56 = vpop.permute.xlu1 %2736 }
0x1010   :  { %v2733_v25 = vpop.permute.xlu0 %2732  ;;  %7089 = vmatpush.xpose.msk.msra.mxu3 %vm635_vm15, %v2741_v35  ;;  %7102 = vmatpush.xpose.msk.msrb.mxu0 %vm635_vm15, %v2771_v40 }
0x1014   :  { %7090 = vmatpush.xpose.msk.msra.mxu3 %vm635_vm15, %v2739_v58  ;;  %v7716_v58 = vunpack.i.h.bf16 %v7714_v17 }
0x1017   :  { %v10761_v14 = vpop.permute.xlu2 %7753  ;;  %v2769_v43 = vpop.permute.xlu1 %2768 }
0x1018   :  { %v2765_v60 = vpop.permute.xlu0 %2764  ;;  %7091 = vmatpush.xpose.msk.msra.mxu3 %vm635_vm15, %v2737_v56  ;;  %7103 = vmatpush.xpose.msk.msrb.mxu0 %vm635_vm15, %v2769_v43 }
0x101c   :  { %7092 = vmatpush.xpose.msk.msra.mxu3 %vm635_vm15, %v2735_v32  ;;  %7104 = vmatpush.xpose.msk.msrb.mxu0 %vm635_vm15, %v2767_v24 }
0x101f   :  { %v10767_v55 = vpop.permute.xlu2 %7763  ;;  %v2731_v35 = vpop.permute.xlu1 %2730 }
0x1020   :  { %v7724_v19 = vpop.permute.xlu0 %7723  ;;  %7093 = vmatpush.xpose.msk.msra.mxu3 %vm635_vm15, %v2733_v25  ;;  %7105 = vmatpush.xpose.msk.msrb.mxu0 %vm635_vm15, %v2765_v60  ;;  %v3164_v60 = vsel %vm139_vm1, %v7715_v37, %v7716_v58 }
0x1021   :  { %v7725_v63 = vunpack.i.l.bf16 %v7724_v19 }
0x1024   :  { %7094 = vmatpush.xpose.msk.msra.mxu3 %vm635_vm15, %v2731_v35  ;;  %7106 = vmatpush.xpose.msk.msrb.mxu0 %vm635_vm15, %v2763_v30  ;;  %v7726_v35 = vunpack.i.h.bf16 %v7724_v19 }
0x1026   :  { %v3162_v58 = vsel %vm139_vm1, %v7725_v63, %v7726_v35 }
0x1027   :  { %v10773_v15 = vpop.permute.xlu2 %7778  ;;  %7095 = vmatmul.msk.f32.vlgmr.msra.gmra.mxu3 %vm635_vm15, %v10558_v21  ;;  %7107 = vmatmul.msk.f32.vlgmr.msrb.gmra.mxu0 %vm635_vm15, %v10558_v21  ;;  %v7719_v8 = vpop.permute.xlu1 %7718 }
0x1028   :  { %v7729_v32 = vpop.permute.xlu0 %7728  ;;  %v7721_v25 = vunpack.i.h.bf16 %v7719_v8  ;;  %v7720_v43 = vunpack.i.l.bf16 %v7719_v8 }
0x1029   :  { %v7731_v8 = vunpack.i.h.bf16 %v7729_v32 }
0x102a   :  { %v3163_v17 = vsel %vm139_vm1, %v7720_v43, %v7721_v25  ;;  %v7745_v43 = vunpack.i.l.bf16 %v10756_v61 }
0x102f   :  { %v7789_v24 = vpop.permute.xlu2 %7788  ;;  %7096 = vmatmul.msk.f32.gmra.mxu3 %vm635_vm15, %v10560_v42  ;;  %7108 = vmatmul.msk.f32.gmra.mxu0 %vm635_vm15, %v10560_v42 }
0x1030   :  { %v7791_v30 = vunpack.i.h.bf16 %v7789_v24  ;;  %v7790_v26 = vunpack.i.l.bf16 %v7789_v24  ;;  %v7734_v40 = vpop.permute.xlu0 %7733 }
0x1031   :  { %v7736_v37 = vunpack.i.h.bf16 %v7734_v40 }
0x1032   :  { %v3165_v56 = vsel %vm139_vm1, %v7790_v26, %v7791_v30  ;;  %v7730_v26 = vunpack.i.l.bf16 %v7729_v32 }
0x1033   :  { %3198 = vmatpush.msra.mxu0 %v3165_v56  ;;  %v7735_v56 = vunpack.i.l.bf16 %v7734_v40  ;;  %v7746_v40 = vunpack.i.h.bf16 %v10756_v61 }
0x1035   :  { %3199 = vmatpush.msra.mxu0 %v3164_v60  ;;  %v3159_v63 = vsel %vm139_vm1, %v7735_v56, %v7736_v37 }
0x1037   :  { %v7794_v11 = vpop.permute.xlu2 %7793  ;;  %7097 = vmatmul.msk.f32.gmra.mxu3 %vm635_vm15, %v10565_v53  ;;  %7109 = vmatmul.msk.f32.gmra.mxu0 %vm635_vm15, %v10565_v53  ;;  %v3160_v53 = vsel %vm139_vm1, %v7730_v26, %v7731_v8  ;;  %v7765_v8 = vunpack.i.l.bf16 %v10767_v55  ;;  %v3156_v26 = vsel %vm139_vm1, %v7745_v43, %v7746_v40 }
0x1038   :  { %v7796_v24 = vunpack.i.h.bf16 %v7794_v11  ;;  %v7795_v4 = vunpack.i.l.bf16 %v7794_v11  ;;  %3200 = vmatpush.msra.mxu0 %v3163_v17  ;;  %v7739_v30 = vpop.permute.xlu0 %7738 }
0x1039   :  { %v7741_v60 = vunpack.i.h.bf16 %v7739_v30  ;;  %v7740_v12 = vunpack.i.l.bf16 %v7739_v30  ;;  %v7755_v30 = vunpack.i.l.bf16 %v10761_v14 }
0x103a   :  { %3201 = vmatpush.msra.mxu0 %v3162_v58  ;;  %v3161_v19 = vsel %vm139_vm1, %v7795_v4, %v7796_v24  ;;  %v7756_v24 = vunpack.i.h.bf16 %v10761_v14 }
0x103b   :  { %v3158_v35 = vsel %vm139_vm1, %v7740_v12, %v7741_v60  ;;  %v7769_v60 = vpop.permute.xlu1 %7768 }
0x103c   :  { %3202 = vmatpush.msra.mxu0 %v3161_v19  ;;  %v3155_v58 = vsel %vm139_vm1, %v7755_v30, %v7756_v24  ;;  %v7771_v40 = vunpack.i.h.bf16 %v7769_v60  ;;  %v7770_v43 = vunpack.i.l.bf16 %v7769_v60 }
0x103e   :  { %3203 = vmatpush.msra.mxu0 %v3160_v53 }
0x103f   :  { %v7799_v25 = vpop.permute.xlu2 %7798  ;;  %7098 = vmatmul.msk.f32.gmra.mxu3 %vm635_vm15, %v10570_v31  ;;  %7110 = vmatmul.msk.f32.gmra.mxu0 %vm635_vm15, %v10570_v31  ;;  %v7766_v31 = vunpack.i.h.bf16 %v10767_v55 }
0x1040   :  { %v7801_v11 = vunpack.i.h.bf16 %v7799_v25  ;;  %v7800_v32 = vunpack.i.l.bf16 %v7799_v25  ;;  %v7749_v4 = vpop.permute.xlu0 %7748  ;;  %3204 = vmatpush.msra.mxu0 %v3159_v63 }
0x1041   :  { %v3154_v12 = vsel %vm139_vm1, %v7765_v8, %v7766_v31  ;;  %v7751_v14 = vunpack.i.h.bf16 %v7749_v4  ;;  %v7750_v53 = vunpack.i.l.bf16 %v7749_v4  ;;  %v7781_v8 = vunpack.i.h.bf16 %v10773_v15 }
0x1042   :  { %3205 = vmatpush.msra.mxu0 %v3158_v35  ;;  %v3157_v17 = vsel %vm139_vm1, %v7800_v32, %v7801_v11  ;;  %v7780_v4 = vunpack.i.l.bf16 %v10773_v15 }
0x1044   :  { %3206 = vmatpush.msra.mxu0 %v3157_v17  ;;  %v3172_v17 = vsel %vm139_vm1, %v7750_v53, %v7751_v14  ;;  %v3168_v15 = vsel %vm139_vm1, %v7780_v4, %v7781_v8 }
0x1046   :  { %3207 = vmatpush.msra.mxu0 %v3156_v26 }
0x1047   :  { %v7814_v35 = vpop.permute.xlu2 %7813 }
0x1048   :  { %v7759_v61 = vpop.permute.xlu0 %7758  ;;  %3208 = vmatpush.msra.mxu0 %v3155_v58  ;;  %v7816_v24 = vunpack.i.h.bf16 %v7814_v35  ;;  %v7815_v30 = vunpack.i.l.bf16 %v7814_v35  ;;  %v3170_v58 = vsel %vm139_vm1, %v7770_v43, %v7771_v40  ;;  %v8499_v43 = vld [vmem:[%s13111_s2] sm:$0xff] }
0x1049   :  { %v7761_v11 = vunpack.i.h.bf16 %v7759_v61  ;;  %v7760_v55 = vunpack.i.l.bf16 %v7759_v61 }
0x104a   :  { %3209 = vmatpush.msra.mxu0 %v3154_v12 }
0x104b   :  { %v3171_v31 = vsel %vm139_vm1, %v7760_v55, %v7761_v11 }
0x1050   :  { %v7774_v19 = vpop.permute.xlu0 %7773 }
0x1051   :  { %v7776_v61 = vunpack.i.h.bf16 %v7774_v19  ;;  %v7775_v12 = vunpack.i.l.bf16 %v7774_v19 }
0x1053   :  { %v3152_v11 = vsel %vm139_vm1, %v7775_v12, %v7776_v61 }
0x1058   :  { %v7784_v37 = vpop.permute.xlu0 %7783 }
0x1059   :  { %v7785_v14 = vunpack.i.l.bf16 %v7784_v37 }
0x1060   :  { %v7804_v56 = vpop.permute.xlu0 %7803 }
0x1061   :  { %v7806_v25 = vunpack.i.h.bf16 %v7804_v56  ;;  %v7805_v63 = vunpack.i.l.bf16 %v7804_v56 }
0x1063   :  { %v3173_v32 = vsel %vm139_vm1, %v7805_v63, %v7806_v25  ;;  %v7786_v25 = vunpack.i.h.bf16 %v7784_v37  ;;  %v3169_v63 = vsel %vm139_vm1, %v7815_v30, %v7816_v24  ;;  %v8498_v37 = vld [vmem:[%s13111_s2 + $0x8] sm:$0xff] }
0x1064   :  { %3235 = vmatpush.msra.mxu1 %v3173_v32 }
0x1065   :  { %v3151_v55 = vsel %vm139_vm1, %v7785_v14, %v7786_v25 }
0x1066   :  { %3236 = vmatpush.msra.mxu1 %v3172_v17 }
0x1068   :  { %v7809_v26 = vpop.permute.xlu0 %7808  ;;  %3237 = vmatpush.msra.mxu1 %v3171_v31  ;;  %v8500_v31 = vld [vmem:[%s13111_s2 + $0x18] sm:$0xff] }
0x1069   :  { %v7811_v56 = vunpack.i.h.bf16 %v7809_v26  ;;  %v7810_v60 = vunpack.i.l.bf16 %v7809_v26  ;;  %v8501_v26 = vld [vmem:[%s13111_s2 + $0x10] sm:$0xff] }
0x106a   :  { %3238 = vmatpush.msra.mxu1 %v3170_v58 }
0x106b   :  { %v3153_v53 = vsel %vm139_vm1, %v7810_v60, %v7811_v56  ;;  %v8502_v60 = vld [vmem:[%s13111_s2 + $0x28] sm:$0xff] }
0x106c   :  { %3210 = vmatpush.msra.mxu0 %v3153_v53  ;;  %3239 = vmatpush.msra.mxu1 %v3169_v63  ;;  %v8503_v53 = vld [vmem:[%s13111_s2 + $0x20] sm:$0xff] }
0x106e   :  { %3211 = vmatpush.msra.mxu0 %v3152_v11  ;;  %3240 = vmatpush.msra.mxu1 %v3168_v15 }
0x1070   :  { %3212 = vmatpush.msra.mxu0 %v3151_v55 }
0x10a4   :  { %v2884_v19 = vpop.f32.mrf.mxu0 }
0x10a5   :  { %v2885_v32 = vadd.f32 %v8498_v37, %v2884_v19  ;;  %v8504_v19 = vld [vmem:[%s13111_s2 + $0x38] sm:$0xff] }
0x10a7   :  { %v2896_v17 = vsel %vm754_vm0, %v2885_v32, -inf }
0x10aa   :  { %v2855_v40 = vpop.f32.mrf.mxu3 }
0x10ab   :  { %v2856_v35 = vadd.f32 %v8499_v43, %v2855_v40  ;;  %v8505_v43 = vld [vmem:[%s13111_s2 + $0x30] sm:$0xff] }
0x10ac   :  { %v2887_v24 = vpop.f32.mrf.mxu0 }
0x10ad   :  { %v2897_v30 = vmax.f32 %v2856_v35, %v2896_v17  ;;  %v2888_v8 = vadd.f32 %v8500_v31, %v2887_v24  ;;  %v2691_v31 = vmul.f32 %v10608_v48, %v9401_v57 }
0x10af   :  { %2898 = vmax.xlane.f32.xlu1 %v2897_v30  ;;  %v2900_v61 = vsel %vm754_vm0, %v2888_v8, -inf }
0x10b2   :  { %v2858_v4 = vpop.f32.mrf.mxu3 }
0x10b3   :  { %v2859_v58 = vadd.f32 %v8501_v26, %v2858_v4  ;;  %v2690_v4 = vmul.f32 %v10558_v21, %v9401_v57 }
0x10b4   :  { %v2890_v12 = vpop.f32.mrf.mxu0 }
0x10b5   :  { %v2901_v56 = vmax.f32 %v2859_v58, %v2900_v61  ;;  %v2891_v25 = vadd.f32 %v8502_v60, %v2890_v12  ;;  %v7827_v26 = vpack.i.bf16 %v2691_v31, %v2690_v4  ;;  %v2693_v61 = vmul.f32 %v10619_v6, %v9451_v34 }
0x10b6   :  { %v2692_v12 = vmul.f32 %v10560_v42, %v9451_v34  ;;  %v2659_v60 = vmul.f32 %v10608_v48, %v13323_v50 }
0x10b7   :  { %2902 = vmax.xlane.f32.xlu0 %v2901_v56  ;;  %v2904_v11 = vsel %vm754_vm0, %v2891_v25, -inf }
0x10b8   :  { %v7817_v56 = vpack.i.bf16 %v2693_v61, %v2692_v12 }
0x10ba   :  { %v2861_v14 = vpop.f32.mrf.mxu3 }
0x10bb   :  { %v2862_v63 = vadd.f32 %v8503_v53, %v2861_v14  ;;  %v2658_v14 = vmul.f32 %v10558_v21, %v13323_v50 }
0x10bc   :  { %v2893_v55 = vpop.f32.mrf.mxu0 }
0x10bd   :  { %v2905_v15 = vmax.f32 %v2862_v63, %v2904_v11  ;;  %v2894_v37 = vadd.f32 %v8504_v19, %v2893_v55  ;;  %v7822_v53 = vpack.i.bf16 %v2659_v60, %v2658_v14 }
0x10bf   :  { %2906 = vmax.xlane.f32.xlu2 %v2905_v15  ;;  %v2908_v24 = vsel %vm754_vm0, %v2894_v37, -inf }
0x10c2   :  { %v2864_v40 = vpop.f32.mrf.mxu3 }
0x10c3   :  { %v2865_v17 = vadd.f32 %v8505_v43, %v2864_v40 }
0x10c5   :  { %v2909_v30 = vmax.f32 %v2865_v17, %v2908_v24 }
0x10c7   :  { %2910 = vmax.xlane.f32.xlu1 %v2909_v30 }
0x10cb   :  { %7828 = vrot.lane.b32.xlu0 %v7827_v26, %s8632_s18 }
0x10d7   :  { %7818 = vrot.lane.b32.xlu2 %v7817_v56, %s8632_s18 }
0x10e0   :  { %7823 = vrot.lane.b32.xlu1 %v7822_v53, %s8632_s18 }
0x1122   :  { %v2899_v11 = vpop.xlane.xlu1 %2898 }
0x1123   :  { %v2912_v15 = vsub.f32 %v2856_v35, %v2899_v11  ;;  %v2913_v55 = vsub.f32 %v2885_v32, %v2899_v11 }
0x1125   :  { %v2920_v19 = vmul.f32 1.442695, %v2912_v15  ;;  %v2922_v6 = vmul.f32 1.442695, %v2913_v55 }
0x1127   :  { %8282 = vpow2.f32 %v2920_v19 }
0x1128   :  { %8284 = vpow2.f32 %v2922_v6 }
0x112a   :  { %v2903_v42 = vpop.xlane.xlu0 %2902 }
0x112b   :  { %v2914_v40 = vsub.f32 %v2859_v58, %v2903_v42  ;;  %v2915_v43 = vsub.f32 %v2888_v8, %v2903_v42 }
0x112d   :  { %v8283_v24 = vpop.eup %8282  ;;  %v2924_v30 = vmul.f32 1.442695, %v2914_v40  ;;  %v2926_v31 = vmul.f32 1.442695, %v2915_v43 }
0x112e   :  { %v8285_v48 = vpop.eup %8284  ;;  %2964 = vmatmul.f32.vlgmr.msrb.gmra.mxu1 %v8283_v24 }
0x112f   :  { %8286 = vpow2.f32 %v2924_v30  ;;  %7111 = vmatmul.msk.f32.vlgmr.msra.gmra.mxu2 %vm754_vm0, %v8285_v48 }
0x1130   :  { %8288 = vpow2.f32 %v2926_v31 }
0x1132   :  { %v2907_v21 = vpop.xlane.xlu2 %2906 }
0x1133   :  { %v2916_v4 = vsub.f32 %v2862_v63, %v2907_v21  ;;  %v2917_v35 = vsub.f32 %v2891_v25, %v2907_v21 }
0x1135   :  { %v8287_v32 = vpop.eup %8286  ;;  %v2928_v26 = vmul.f32 1.442695, %v2916_v4  ;;  %v2930_v61 = vmul.f32 1.442695, %v2917_v35  ;;  %v7123_v4 = vld [vmem:[%s13114_s5 + $0x80] sm:$0xff] }
0x1136   :  { %v8289_v12 = vpop.eup %8288  ;;  %2967 = vmatmul.f32.gmra.mxu1 %v8287_v32 }
0x1137   :  { %8290 = vpow2.f32 %v2928_v26  ;;  %7112 = vmatmul.msk.f32.gmra.mxu2 %vm754_vm0, %v8289_v12 }
0x1138   :  { %8292 = vpow2.f32 %v2930_v61  ;;  %v7120_v61 = vld [vmem:[%s13114_s5 + $0x68] sm:$0xff] }
0x113a   :  { %v7819_v8 = vpop.permute.xlu2 %7818  ;;  %v2911_v58 = vpop.xlane.xlu1 %2910 }
0x113b   :  { %v7821_v56 = vunpack.i.h.bf16 %v7819_v8  ;;  %v7820_v60 = vunpack.i.l.bf16 %v7819_v8  ;;  %v2918_v14 = vsub.f32 %v2865_v17, %v2911_v58  ;;  %v2919_v53 = vsub.f32 %v2894_v37, %v2911_v58 }
0x113d   :  { %v8291_v11 = vpop.eup %8290  ;;  %v2932_v15 = vmul.f32 1.442695, %v2918_v14  ;;  %v2934_v55 = vmul.f32 1.442695, %v2919_v53  ;;  %v7829_v63 = vpop.permute.xlu0 %7828  ;;  %v3167_v25 = vsel %vm139_vm1, %v7820_v60, %v7821_v56 }
0x113e   :  { %v8293_v19 = vpop.eup %8292  ;;  %v7831_v6 = vunpack.i.h.bf16 %v7829_v63  ;;  %v7830_v42 = vunpack.i.l.bf16 %v7829_v63  ;;  %2970 = vmatmul.f32.gmra.mxu1 %v8291_v11 }
0x113f   :  { %8294 = vpow2.f32 %v2932_v15  ;;  %7113 = vmatmul.msk.f32.gmra.mxu2 %vm754_vm0, %v8293_v19  ;;  %3241 = vmatpush.msra.mxu1 %v3167_v25 }
0x1140   :  { %8296 = vpow2.f32 %v2934_v55  ;;  %v3166_v40 = vsel %vm139_vm1, %v7830_v42, %v7831_v6 }
0x1141   :  { %3242 = vmatpush.msra.mxu1 %v3166_v40 }
0x1145   :  { %v8295_v17 = vpop.eup %8294 }
0x1146   :  { %v8297_v37 = vpop.eup %8296  ;;  %2973 = vmatmul.f32.gmra.mxu1 %v8295_v17 }
0x1147   :  { %7114 = vmatmul.msk.f32.gmra.mxu2 %vm754_vm0, %v8297_v37 }
0x114e   :  { %7115 = vmatmul.msk.f32.vlgmr.msra.gmra.mxu1 %vm754_vm0, %v8285_v48  ;;  %v7124_v48 = vld [vmem:[%s13114_s5 + $0x88] sm:$0xff] }
0x114f   :  { %3294 = vmatpush.msrb.mxu2 %v7124_v48 }
0x1151   :  { %3295 = vmatpush.msrb.mxu2 %v7123_v4 }
0x1152   :  { %v7824_v43 = vpop.permute.xlu1 %7823 }
0x1153   :  { %v7826_v30 = vunpack.i.h.bf16 %v7824_v43  ;;  %v7825_v31 = vunpack.i.l.bf16 %v7824_v43 }
0x1155   :  { %v3150_v21 = vsel %vm139_vm1, %v7825_v31, %v7826_v30 }
0x1156   :  { %3213 = vmatpush.msra.mxu0 %v3150_v21  ;;  %7116 = vmatmul.msk.f32.gmra.mxu1 %vm754_vm0, %v8289_v12  ;;  %v7119_v12 = vld [vmem:[%s13114_s5 + $0x60] sm:$0xff] }
0x1157   :  { %3214 = vmatmul.f32.vlgmr.msra.gmra.mxu0 %v8283_v24  ;;  %v7122_v24 = vld [vmem:[%s13114_s5 + $0x78] sm:$0xff] }
0x1158   :  { %3296 = vmatpush.msrb.mxu2 %v7122_v24 }
0x115e   :  { %7117 = vmatmul.msk.f32.gmra.mxu1 %vm754_vm0, %v8293_v19 }
0x115f   :  { %3217 = vmatmul.f32.gmra.mxu0 %v8287_v32  ;;  %v7121_v32 = vld [vmem:[%s13114_s5 + $0x70] sm:$0xff] }
0x1160   :  { %3297 = vmatpush.msrb.mxu2 %v7121_v32 }
0x1162   :  { %3298 = vmatpush.msrb.mxu2 %v7120_v61 }
0x1164   :  { %3299 = vmatpush.msrb.mxu2 %v7119_v12 }
0x1166   :  { %7118 = vmatmul.msk.f32.gmra.mxu1 %vm754_vm0, %v8297_v37 }
0x1167   :  { %3220 = vmatmul.f32.gmra.mxu0 %v8291_v11 }
0x116f   :  { %3223 = vmatmul.f32.gmra.mxu0 %v8295_v17 }
0x11ab   :  { %v2965_v35 = vpop.f32.mrf.mxu1 }
0x11b2   :  { %v2994_v58 = vpop.f32.mrf.mxu2 }
0x11b3   :  { %v2968_v26 = vpop.f32.mrf.mxu1  ;;  %v2995_v60 = vadd.f32 %v2994_v58, %v2965_v35  ;;  %v7060_v58 = vld [vmem:[%s13117_s8 + $0x90] sm:$0xff] }
0x11b5   :  { %8298 = vrcp.f32 %v2995_v60  ;;  %v3271_v60 = vperm.slane %v7060_v58, 0 }
0x11ba   :  { %v2997_v14 = vpop.f32.mrf.mxu2 }
0x11bb   :  { %v2971_v8 = vpop.f32.mrf.mxu1  ;;  %v2998_v11 = vadd.f32 %v2997_v14, %v2968_v26  ;;  %v8299_v63 = vpop.eup %8298 }
0x11bd   :  { %8300 = vrcp.f32 %v2998_v11 }
0x11c2   :  { %v3000_v25 = vpop.f32.mrf.mxu2 }
0x11c3   :  { %v2974_v56 = vpop.f32.mrf.mxu1  ;;  %v3001_v42 = vadd.f32 %v3000_v25, %v2971_v8  ;;  %v8301_v37 = vpop.eup %8300 }
0x11c5   :  { %8302 = vrcp.f32 %v3001_v42 }
0x11ca   :  { %v3003_v30 = vpop.f32.mrf.mxu2 }
0x11cb   :  { %v3244_v53 = vpop.f32.mrf.mxu1  ;;  %v3004_v21 = vadd.f32 %v3003_v30, %v2974_v56  ;;  %v8303_v35 = vpop.eup %8302 }
0x11cd   :  { %8304 = vrcp.f32 %v3004_v21 }
0x11d3   :  { %v3247_v6 = vpop.f32.mrf.mxu1  ;;  %v8305_v12 = vpop.eup %8304 }
0x11d4   :  { %v3215_v15 = vpop.f32.mrf.mxu0 }
0x11d5   :  { %v3245_v55 = vadd.f32 %v3244_v53, %v3215_v15 }
0x11d7   :  { %v3260_v19 = vmul.f32 %v8299_v63, %v3245_v55 }
0x11d9   :  { %7125 = vmatmul.msk.f32.vlgmr.msrb.gmra.mxu2 %vm635_vm15, %v3260_v19 }
0x11db   :  { %v3250_v31 = vpop.f32.mrf.mxu1 }
0x11dc   :  { %v3218_v40 = vpop.f32.mrf.mxu0 }
0x11dd   :  { %v3248_v17 = vadd.f32 %v3247_v6, %v3218_v40 }
0x11df   :  { %v3261_v43 = vmul.f32 %v8301_v37, %v3248_v17 }
0x11e1   :  { %7126 = vmatmul.msk.f32.gmra.mxu2 %vm635_vm15, %v3261_v43 }
0x11e3   :  { %v3253_v32 = vpop.f32.mrf.mxu1 }
0x11e4   :  { %v3221_v48 = vpop.f32.mrf.mxu0 }
0x11e5   :  { %v3251_v4 = vadd.f32 %v3250_v31, %v3221_v48 }
0x11e7   :  { %v3262_v24 = vmul.f32 %v8303_v35, %v3251_v4 }
0x11e9   :  { %7127 = vmatmul.msk.f32.gmra.mxu2 %vm635_vm15, %v3262_v24 }
0x11ec   :  { %v3224_v26 = vpop.f32.mrf.mxu0 }
0x11ed   :  { %v3254_v61 = vadd.f32 %v3253_v32, %v3224_v26 }
0x11ef   :  { %v3263_v8 = vmul.f32 %v8305_v12, %v3254_v61 }
0x11f1   :  { %7128 = vmatmul.msk.f32.gmra.mxu2 %vm635_vm15, %v3263_v8 }
0x125c   :  { %v3301_v56 = vpop.f32.mrf.mxu2 }
0x125d   :  { %v3302_v14 = vadd.f32 %v3301_v56, %v3271_v60 }
0x125f   :  { %v10900_v53 = vadd.f32 %v3302_v14, %v10387_v62 }
0x1261   :  { %v3317_v11 = vsel %vm139_vm1, %v10900_v53, 0.0 }
0x1262   :  { %3318 = vadd.xlane.f32.xlu2 %v3317_v11 }
0x1264   :  { %v3304_v15 = vpop.f32.mrf.mxu2 }
0x1265   :  { %v3305_v55 = vadd.f32 %v3304_v15, %v3271_v60  ;;  %v7132_v15 = vld [vmem:[%s13115_s6 + $0x58] sm:$0xff] }
0x1266   :  { %3445 = vmatpush.msrb.mxu3 %v7132_v15  ;;  %v7151_v15 = vld [vmem:[%s13116_s7 + $0x170] sm:$0xff] }
0x1267   :  { %v10905_v63 = vadd.f32 %v3305_v55, %v10392_v46  ;;  %v7131_v55 = vld [vmem:[%s13115_s6 + $0x50] sm:$0xff] }
0x1268   :  { %3446 = vmatpush.msrb.mxu3 %v7131_v55 }
0x1269   :  { %v3320_v25 = vsel %vm139_vm1, %v10905_v63, 0.0 }
0x126a   :  { %3321 = vadd.xlane.f32.xlu1 %v3320_v25  ;;  %v7130_v25 = vld [vmem:[%s13115_s6 + $0x48] sm:$0xff] }
0x126b   :  { %3447 = vmatpush.msrb.mxu3 %v7130_v25 }
0x126c   :  { %v3307_v19 = vpop.f32.mrf.mxu2 }
0x126d   :  { %v3308_v6 = vadd.f32 %v3307_v19, %v3271_v60  ;;  %v7129_v19 = vld [vmem:[%s13115_s6 + $0x40] sm:$0xff] }
0x126e   :  { %3448 = vmatpush.msrb.mxu3 %v7129_v19 }
0x126f   :  { %v10910_v42 = vadd.f32 %v3308_v6, %v10397_v38 }
0x1271   :  { %v3323_v62 = vsel %vm139_vm1, %v10910_v42, 0.0 }
0x1272   :  { %3324 = vadd.xlane.f32.xlu0 %v3323_v62 }
0x1274   :  { %v3310_v40 = vpop.f32.mrf.mxu2 }
0x1275   :  { %v3311_v17 = vadd.f32 %v3310_v40, %v3271_v60 }
0x1277   :  { %v10915_v37 = vadd.f32 %v3311_v17, %v10402_v27 }
0x1279   :  { %v3326_v46 = vsel %vm139_vm1, %v10915_v37, 0.0 }
0x127a   :  { %3327 = vadd.xlane.f32.xlu2 %v3326_v46 }
0x12d5   :  { %v3319_v43 = vpop.xlane.xlu2 %3318 }
0x12d6   :  { %v3329_v30 = vmul.f32 %v3319_v43, %v8737_v33 }
0x12d8   :  { %v3333_v31 = vsub.f32 %v10900_v53, %v3329_v30 }
0x12da   :  { %v3337_v38 = vmul.f32 %v3333_v31, %v3333_v31 }
0x12dc   :  { %v3341_v21 = vsel %vm139_vm1, %v3337_v38, 0.0 }
0x12dd   :  { %3342 = vadd.xlane.f32.xlu1 %v3341_v21  ;;  %v3322_v48 = vpop.xlane.xlu1 %3321 }
0x12de   :  { %v3330_v4 = vmul.f32 %v3322_v48, %v8737_v33 }
0x12e0   :  { %v10924_v35 = vsub.f32 %v10905_v63, %v3330_v4 }
0x12e2   :  { %v3338_v27 = vmul.f32 %v10924_v35, %v10924_v35 }
0x12e4   :  { %v3344_v24 = vsel %vm139_vm1, %v3338_v27, 0.0 }
0x12e5   :  { %3345 = vadd.xlane.f32.xlu0 %v3344_v24  ;;  %v3325_v32 = vpop.xlane.xlu0 %3324  ;;  %v7058_v24 = vld [vmem:[%s13117_s8 + $0x80] sm:$0xff] }
0x12e6   :  { %v3331_v26 = vmul.f32 %v3325_v32, %v8737_v33 }
0x12e8   :  { %v10931_v61 = vsub.f32 %v10910_v42, %v3331_v26 }
0x12ea   :  { %v3339_v12 = vmul.f32 %v10931_v61, %v10931_v61 }
0x12ec   :  { %v3347_v8 = vsel %vm139_vm1, %v3339_v12, 0.0 }
0x12ed   :  { %3348 = vadd.xlane.f32.xlu2 %v3347_v8  ;;  %v3328_v58 = vpop.xlane.xlu2 %3327 }
0x12ee   :  { %v3332_v60 = vmul.f32 %v3328_v58, %v8737_v33 }
0x12f0   :  { %v10938_v56 = vsub.f32 %v10915_v37, %v3332_v60  ;;  %v7059_v60 = vld [vmem:[%s13117_s8 + $0x88] sm:$0xff] }
0x12f2   :  { %v3340_v14 = vmul.f32 %v10938_v56, %v10938_v56 }
0x12f4   :  { %v3350_v11 = vsel %vm139_vm1, %v3340_v14, 0.0  ;;  %v10964_v14 = vperm.slane %v7058_v24, 0 }
0x12f5   :  { %3351 = vadd.xlane.f32.xlu1 %v3350_v11  ;;  %v7152_v11 = vld [vmem:[%s13116_s7 + $0x178] sm:$0xff] }
0x12f6   :  { %3483 = vmatpush.msrb.mxu0 %v7152_v11 }
0x12f8   :  { %3484 = vmatpush.msrb.mxu0 %v7151_v15  ;;  %v7146_v15 = vld [vmem:[%s13116_s7 + $0x148] sm:$0xff] }
0x1350   :  { %v3343_v6 = vpop.xlane.xlu1 %3342 }
0x1351   :  { %v3353_v62 = vmul.f32 %v3343_v6, %v8737_v33  ;;  %v10972_v6 = vperm.slane %v7059_v60, 0 }
0x1353   :  { %v3357_v40 = vadd.f32 1e-05, %v3353_v62  ;;  %v7150_v62 = vld [vmem:[%s13116_s7 + $0x168] sm:$0xff] }
0x1354   :  { %3485 = vmatpush.msrb.mxu0 %v7150_v62 }
0x1355   :  { %8306 = vrsqrt.f32 %v3357_v40  ;;  %vm3367_vm12 = vweird.f32 %v3357_v40 }
0x1358   :  { %v3346_v17 = vpop.xlane.xlu0 %3345 }
0x1359   :  { %v3354_v46 = vmul.f32 %v3346_v17, %v8737_v33 }
0x135b   :  { %v8307_v43 = vpop.eup %8306  ;;  %v3358_v30 = vadd.f32 1e-05, %v3354_v46 }
0x135c   :  { %v3362_v38 = vmul.f32 %v8307_v43, %v3357_v40  ;;  %vm3368_vm11 = vweird.f32 %v8307_v43 }
0x135d   :  { %8308 = vrsqrt.f32 %v3358_v30  ;;  %vm3369_vm13 = vmor %vm3367_vm12, %vm3368_vm11  ;;  %vm3377_vm2 = vweird.f32 %v3358_v30 }
0x135e   :  { %v3363_v21 = vmul.f32 %v8307_v43, %v3362_v38 }
0x1360   :  { %v3364_v48 = vmul.f32 0.5, %v3363_v21  ;;  %v3349_v4 = vpop.xlane.xlu2 %3348 }
0x1361   :  { %v3355_v27 = vmul.f32 %v3349_v4, %v8737_v33 }
0x1362   :  { %v3365_v32 = vsub.f32 1.5, %v3364_v48 }
0x1363   :  { %v8309_v26 = vpop.eup %8308  ;;  %v3359_v12 = vadd.f32 1e-05, %v3355_v27  ;;  %v7148_v27 = vld [vmem:[%s13116_s7 + $0x158] sm:$0xff] }
0x1364   :  { %v3366_v8 = vmul.f32 %v8307_v43, %v3365_v32  ;;  %v3372_v58 = vmul.f32 %v8309_v26, %v3358_v30  ;;  %vm3378_vm14 = vweird.f32 %v8309_v26 }
0x1365   :  { %8310 = vrsqrt.f32 %v3359_v12  ;;  %vm3379_vm3 = vmor %vm3377_vm2, %vm3378_vm14  ;;  %vm3387_vm5 = vweird.f32 %v3359_v12 }
0x1366   :  { %v3370_v55 = vsel %vm3369_vm13, %v8307_v43, %v3366_v8  ;;  %v3373_v25 = vmul.f32 %v8309_v26, %v3372_v58  ;;  %v7149_v43 = vld [vmem:[%s13116_s7 + $0x160] sm:$0xff]  ;;  %v7147_v8 = vld [vmem:[%s13116_s7 + $0x150] sm:$0xff] }
0x1367   :  { %v3401_v19 = vmul.f32 %v3370_v55, %v3333_v31  ;;  %3486 = vmatpush.msrb.mxu0 %v7149_v43 }
0x1368   :  { %v3374_v40 = vmul.f32 0.5, %v3373_v25  ;;  %v3352_v17 = vpop.xlane.xlu1 %3351  ;;  %v7145_v25 = vld [vmem:[%s13116_s7 + $0x140] sm:$0xff] }
0x1369   :  { %v3406_v46 = vmul.f32 %v10964_v14, %v3401_v19  ;;  %v3356_v38 = vmul.f32 %v3352_v17, %v8737_v33  ;;  %3487 = vmatpush.msrb.mxu0 %v7148_v27 }
0x136a   :  { %v3375_v21 = vsub.f32 1.5, %v3374_v40 }
0x136b   :  { %v8311_v31 = vpop.eup %8310  ;;  %v3360_v48 = vadd.f32 1e-05, %v3356_v38  ;;  %v3411_v4 = vadd.f32 %v10972_v6, %v3406_v46  ;;  %3488 = vmatpush.msrb.mxu0 %v7147_v8  ;;  %v7143_v46 = vld [vmem:[%s13116_s7 + $0x130] sm:$0xff] }
0x136c   :  { %v3376_v24 = vmul.f32 %v8309_v26, %v3375_v21  ;;  %v3382_v32 = vmul.f32 %v8311_v31, %v3359_v12  ;;  %vm3388_vm4 = vweird.f32 %v8311_v31 }
0x136d   :  { %8312 = vrsqrt.f32 %v3360_v48  ;;  %7133 = vmatmul.msk.f32.vlgmr.msrb.gmra.mxu3 %vm139_vm1, %v3411_v4  ;;  %3489 = vmatpush.msrb.mxu0 %v7146_v15  ;;  %vm3389_vm6 = vmor %vm3387_vm5, %vm3388_vm4  ;;  %v7142_v4 = vld [vmem:[%s13116_s7 + $0x128] sm:$0xff]  ;;  %vm3397_vm8 = vweird.f32 %v3360_v48 }
0x136e   :  { %v3383_v58 = vmul.f32 %v8311_v31, %v3382_v32  ;;  %v3380_v60 = vsel %vm3379_vm3, %v8309_v26, %v3376_v24  ;;  %v7141_v24 = vld [vmem:[%s13116_s7 + $0x120] sm:$0xff] }
0x136f   :  { %v3402_v11 = vmul.f32 %v3380_v60, %v10924_v35  ;;  %v7144_v35 = vld [vmem:[%s13116_s7 + $0x138] sm:$0xff]  ;;  %3490 = vmatpush.msrb.mxu0 %v7145_v25 }
0x1370   :  { %v3384_v30 = vmul.f32 0.5, %v3383_v58 }
0x1371   :  { %v3407_v55 = vmul.f32 %v10964_v14, %v3402_v11  ;;  %3491 = vmatpush.msrb.mxu0 %v7144_v35 }
0x1372   :  { %v3385_v19 = vsub.f32 1.5, %v3384_v30  ;;  %v7139_v30 = vld [vmem:[%s13116_s7 + $0x110] sm:$0xff] }
0x1373   :  { %v8313_v62 = vpop.eup %8312  ;;  %v3412_v26 = vadd.f32 %v10972_v6, %v3407_v55  ;;  %3492 = vmatpush.msrb.mxu0 %v7143_v46  ;;  %v7137_v55 = vld [vmem:[%s13116_s7 + $0x100] sm:$0xff] }
0x1374   :  { %v3386_v40 = vmul.f32 %v8311_v31, %v3385_v19  ;;  %v3392_v17 = vmul.f32 %v8313_v62, %v3360_v48  ;;  %vm3398_vm7 = vweird.f32 %v8313_v62  ;;  %v7138_v48 = vld [vmem:[%s13116_s7 + $0x108] sm:$0xff] }
0x1375   :  { %7134 = vmatmul.msk.f32.gmra.mxu3 %vm139_vm1, %v3412_v26  ;;  %3493 = vmatpush.msrb.mxu0 %v7142_v4  ;;  %vm3399_vm9 = vmor %vm3397_vm8, %vm3398_vm7  ;;  %v7061_v4 = vld [vmem:[%s13117_s8 + $0x98] sm:$0xff] }
0x1376   :  { %v3393_v38 = vmul.f32 %v8313_v62, %v3392_v17  ;;  %v3390_v43 = vsel %vm3389_vm6, %v8311_v31, %v3386_v40 }
0x1377   :  { %v3403_v21 = vmul.f32 %v3390_v43, %v10931_v61  ;;  %v7140_v61 = vld [vmem:[%s13116_s7 + $0x118] sm:$0xff]  ;;  %3494 = vmatpush.msrb.mxu0 %v7141_v24 }
0x1378   :  { %v3394_v27 = vmul.f32 0.5, %v3393_v38 }
0x1379   :  { %v3408_v12 = vmul.f32 %v10964_v14, %v3403_v21  ;;  %3495 = vmatpush.msrb.mxu0 %v7140_v61 }
0x137a   :  { %v3395_v32 = vsub.f32 1.5, %v3394_v27  ;;  %v3516_v27 = vperm.slane %v7061_v4, 0 }
0x137b   :  { %v3413_v31 = vadd.f32 %v10972_v6, %v3408_v12  ;;  %3496 = vmatpush.msrb.mxu0 %v7139_v30 }
0x137c   :  { %v3396_v8 = vmul.f32 %v8313_v62, %v3395_v32 }
0x137d   :  { %7135 = vmatmul.msk.f32.gmra.mxu3 %vm139_vm1, %v3413_v31  ;;  %3497 = vmatpush.msrb.mxu0 %v7138_v48 }
0x137e   :  { %v3400_v58 = vsel %vm3399_vm9, %v8313_v62, %v3396_v8 }
0x137f   :  { %v3404_v60 = vmul.f32 %v3400_v58, %v10938_v56  ;;  %3498 = vmatpush.msrb.mxu0 %v7137_v55  ;;  %v7062_v56 = vld [vmem:[%s13117_s8 + $0xa0] sm:$0xff] }
0x1381   :  { %v3409_v11 = vmul.f32 %v10964_v14, %v3404_v60  ;;  %v3420_v14 = vperm.slane %v7062_v56, 0 }
0x1383   :  { %v3414_v15 = vadd.f32 %v10972_v6, %v3409_v11 }
0x1385   :  { %7136 = vmatmul.msk.f32.gmra.mxu3 %vm139_vm1, %v3414_v15 }
0x13f0   :  { %v3450_v6 = vpop.f32.mrf.mxu3 }
0x13f1   :  { %v3451_v25 = vadd.f32 %v3450_v6, %v3420_v14 }
0x13f3   :  { %v3462_v19 = vmax.f32 %v3451_v25, 0.0 }
0x13f5   :  { %3499 = vmatmul.f32.vlgmr.msrb.gmra.mxu0 %v3462_v19 }
0x13f8   :  { %v3453_v62 = vpop.f32.mrf.mxu3 }
0x13f9   :  { %v3454_v26 = vadd.f32 %v3453_v62, %v3420_v14 }
0x13fb   :  { %v3463_v35 = vmax.f32 %v3454_v26, 0.0 }
0x13fd   :  { %3502 = vmatmul.f32.gmra.mxu0 %v3463_v35 }
0x1400   :  { %v3456_v40 = vpop.f32.mrf.mxu3 }
0x1401   :  { %v3457_v17 = vadd.f32 %v3456_v40, %v3420_v14 }
0x1403   :  { %v3464_v46 = vmax.f32 %v3457_v17, 0.0 }
0x1405   :  { %3505 = vmatmul.f32.gmra.mxu0 %v3464_v46 }
0x1408   :  { %v3459_v38 = vpop.f32.mrf.mxu3 }
0x1409   :  { %v3460_v43 = vadd.f32 %v3459_v38, %v3420_v14 }
0x140b   :  { %v3465_v21 = vmax.f32 %v3460_v43, 0.0 }
0x140d   :  { %3508 = vmatmul.f32.gmra.mxu0 %v3465_v21 }
0x1472   :  { %v3500_v12 = vpop.f32.mrf.mxu0 }
0x1473   :  { %v3512_v24 = vadd.f32 %v3500_v12, %v10900_v53 }
0x1475   :  { %v11039_v32 = vadd.f32 %v3516_v27, %v3512_v24 }
0x1477   :  { %v3529_v31 = vsel %vm139_vm1, %v11039_v32, 0.0 }
0x1478   :  { %3530 = vadd.xlane.f32.xlu0 %v3529_v31 }
0x147a   :  { %v3503_v61 = vpop.f32.mrf.mxu0 }
0x147b   :  { %v3513_v8 = vadd.f32 %v3503_v61, %v10905_v63  ;;  %v7166_v61 = vld [vmem:[%s13113_s4 + $0xf0] sm:$0xff] }
0x147c   :  { %3660 = vmatpush.msrb.mxu1 %v7166_v61  ;;  %v8516_v61 = vld [vmem:[%s13112_s3 + $0x50] sm:$0xff] }
0x147d   :  { %v11044_v58 = vadd.f32 %v3516_v27, %v3513_v8  ;;  %v7167_v8 = vld [vmem:[%s13113_s4 + $0xf8] sm:$0xff] }
0x147e   :  { %3689 = vmatpush.msra.mxu2 %v7167_v8  ;;  %v8517_v8 = vld [vmem:[%s13112_s3 + $0x90] sm:$0xff] }
0x147f   :  { %v3532_v60 = vsel %vm139_vm1, %v11044_v58, 0.0 }
0x1480   :  { %3533 = vadd.xlane.f32.xlu2 %v3532_v60  ;;  %v7164_v60 = vld [vmem:[%s13113_s4 + $0xe0] sm:$0xff] }
0x1481   :  { %3661 = vmatpush.msrb.mxu1 %v7164_v60 }
0x1482   :  { %v3506_v11 = vpop.f32.mrf.mxu0 }
0x1483   :  { %v3514_v15 = vadd.f32 %v3506_v11, %v10910_v42  ;;  %v7165_v11 = vld [vmem:[%s13113_s4 + $0xe8] sm:$0xff] }
0x1484   :  { %3690 = vmatpush.msra.mxu2 %v7165_v11  ;;  %v8518_v11 = vld [vmem:[%s13112_s3 + $0x48] sm:$0xff] }
0x1485   :  { %v11049_v30 = vadd.f32 %v3516_v27, %v3514_v15  ;;  %v7162_v15 = vld [vmem:[%s13113_s4 + $0xd0] sm:$0xff] }
0x1486   :  { %3662 = vmatpush.msrb.mxu1 %v7162_v15  ;;  %v8519_v15 = vld [vmem:[%s13112_s3 + $0x88] sm:$0xff] }
0x1487   :  { %v3535_v53 = vsel %vm139_vm1, %v11049_v30, 0.0 }
0x1488   :  { %3536 = vadd.xlane.f32.xlu1 %v3535_v53  ;;  %v7163_v53 = vld [vmem:[%s13113_s4 + $0xd8] sm:$0xff] }
0x1489   :  { %3691 = vmatpush.msra.mxu2 %v7163_v53 }
0x148a   :  { %v3509_v48 = vpop.f32.mrf.mxu0 }
0x148b   :  { %v3515_v55 = vadd.f32 %v3509_v48, %v10915_v37  ;;  %v7160_v48 = vld [vmem:[%s13113_s4 + $0xc0] sm:$0xff] }
0x148c   :  { %3663 = vmatpush.msrb.mxu1 %v7160_v48  ;;  %v8520_v48 = vld [vmem:[%s13112_s3 + $0x40] sm:$0xff] }
0x148d   :  { %v11054_v56 = vadd.f32 %v3516_v27, %v3515_v55  ;;  %v7161_v55 = vld [vmem:[%s13113_s4 + $0xc8] sm:$0xff] }
0x148e   :  { %3692 = vmatpush.msra.mxu2 %v7161_v55  ;;  %v8521_v55 = vld [vmem:[%s13112_s3 + $0x80] sm:$0xff] }
0x148f   :  { %v3538_v63 = vsel %vm139_vm1, %v11054_v56, 0.0 }
0x1490   :  { %3539 = vadd.xlane.f32.xlu0 %v3538_v63 }
0x14eb   :  { %v3531_v14 = vpop.xlane.xlu0 %3530 }
0x14ec   :  { %v3541_v6 = vmul.f32 %v3531_v14, %v8737_v33 }
0x14ee   :  { %v11060_v42 = vsub.f32 %v11039_v32, %v3541_v6  ;;  %v8506_v6 = vld [vmem:[%s13112_s3 + $0x78] sm:$0xff] }
0x14ef   :  { %4020 = vmatpush.msra.mxu1 %v8506_v6 }
0x14f0   :  { %v3549_v25 = vmul.f32 %v11060_v42, %v11060_v42 }
0x14f2   :  { %v3553_v19 = vsel %vm139_vm1, %v3549_v25, 0.0  ;;  %v8507_v25 = vld [vmem:[%s13112_s3 + $0xb8] sm:$0xff] }
0x14f3   :  { %3554 = vadd.xlane.f32.xlu2 %v3553_v19  ;;  %v3534_v62 = vpop.xlane.xlu2 %3533  ;;  %4057 = vmatpush.msrb.mxu2 %v8507_v25  ;;  %v8522_v25 = vld [vmem:[%s13112_s3 + $0x38] sm:$0xff] }
0x14f4   :  { %v3542_v37 = vmul.f32 %v3534_v62, %v8737_v33  ;;  %v8508_v62 = vld [vmem:[%s13112_s3 + $0x70] sm:$0xff] }
0x14f5   :  { %4021 = vmatpush.msra.mxu1 %v8508_v62  ;;  %v7153_v62 = vld [vmem:[%s13117_s8 + $0xa8] sm:$0xff] }
0x14f6   :  { %v11067_v26 = vsub.f32 %v11044_v58, %v3542_v37  ;;  %v8509_v37 = vld [vmem:[%s13112_s3 + $0xb0] sm:$0xff] }
0x14f7   :  { %4058 = vmatpush.msrb.mxu2 %v8509_v37 }
0x14f8   :  { %v3550_v35 = vmul.f32 %v11067_v26, %v11067_v26 }
0x14fa   :  { %v3556_v40 = vsel %vm139_vm1, %v3550_v35, 0.0  ;;  %v8510_v35 = vld [vmem:[%s13112_s3 + $0x68] sm:$0xff] }
0x14fb   :  { %v3537_v17 = vpop.xlane.xlu1 %3536  ;;  %3557 = vadd.xlane.f32.xlu1 %v3556_v40  ;;  %4022 = vmatpush.msra.mxu1 %v8510_v35  ;;  %v8511_v40 = vld [vmem:[%s13112_s3 + $0xa8] sm:$0xff] }
0x14fc   :  { %v3543_v46 = vmul.f32 %v3537_v17, %v8737_v33  ;;  %4059 = vmatpush.msrb.mxu2 %v8511_v40  ;;  %v8512_v17 = vld [vmem:[%s13112_s3 + $0x60] sm:$0xff] }
0x14fd   :  { %4023 = vmatpush.msra.mxu1 %v8512_v17  ;;  %v8523_v17 = vld [vmem:[%s13112_s3 + $0x30] sm:$0xff] }
0x14fe   :  { %v11074_v38 = vsub.f32 %v11049_v30, %v3543_v46  ;;  %v8513_v46 = vld [vmem:[%s13112_s3 + $0xa0] sm:$0xff] }
0x14ff   :  { %4060 = vmatpush.msrb.mxu2 %v8513_v46  ;;  %v7154_v46 = vld [vmem:[%s13117_s8 + $0xb0] sm:$0xff] }
0x1500   :  { %v3551_v43 = vmul.f32 %v11074_v38, %v11074_v38 }
0x1502   :  { %v3559_v21 = vsel %vm139_vm1, %v3551_v43, 0.0 }
0x1503   :  { %3560 = vadd.xlane.f32.xlu0 %v3559_v21  ;;  %v3540_v4 = vpop.xlane.xlu0 %3539 }
0x1504   :  { %v3544_v27 = vmul.f32 %v3540_v4, %v8737_v33  ;;  %v8514_v4 = vld [vmem:[%s13112_s3 + $0x58] sm:$0xff] }
0x1505   :  { %4024 = vmatpush.msra.mxu1 %v8514_v4  ;;  %v11173_v4 = vperm.slane %v7153_v62, 0 }
0x1506   :  { %v11081_v12 = vsub.f32 %v11054_v56, %v3544_v27  ;;  %v8515_v27 = vld [vmem:[%s13112_s3 + $0x98] sm:$0xff] }
0x1507   :  { %4061 = vmatpush.msrb.mxu2 %v8515_v27  ;;  %4025 = vmatpush.msra.mxu1 %v8516_v61  ;;  %v8524_v27 = vld [vmem:[%s13112_s3 + $0x28] sm:$0xff] }
0x1508   :  { %v3552_v24 = vmul.f32 %v11081_v12, %v11081_v12 }
0x1509   :  { %4062 = vmatpush.msrb.mxu2 %v8517_v8  ;;  %4026 = vmatpush.msra.mxu1 %v8518_v11 }
0x150a   :  { %v3562_v31 = vsel %vm139_vm1, %v3552_v24, 0.0 }
0x150b   :  { %3563 = vadd.xlane.f32.xlu2 %v3562_v31  ;;  %4063 = vmatpush.msrb.mxu2 %v8519_v15  ;;  %v8525_v15 = vld [vmem:[%s13112_s3 + $0x20] sm:$0xff] }
0x150c   :  { %4027 = vmatpush.msra.mxu1 %v8520_v48 }
0x150d   :  { %4064 = vmatpush.msrb.mxu2 %v8521_v55 }
0x150e   :  { %4028 = vmatpush.msra.mxu1 %v8522_v25  ;;  %v8527_v25 = vld [vmem:[%s13112_s3 + $0x10] sm:$0xff] }
0x1510   :  { %4029 = vmatpush.msra.mxu1 %v8523_v17 }
0x1512   :  { %4030 = vmatpush.msra.mxu1 %v8524_v27 }
0x1514   :  { %4031 = vmatpush.msra.mxu1 %v8525_v15 }
0x1566   :  { %v3555_v63 = vpop.xlane.xlu2 %3554 }
0x1567   :  { %v3565_v14 = vmul.f32 %v3555_v63, %v8737_v33 }
0x1569   :  { %v3569_v19 = vadd.f32 1e-05, %v3565_v14 }
0x156b   :  { %8314 = vrsqrt.f32 %v3569_v19  ;;  %vm3579_vm11 = vweird.f32 %v3569_v19 }
0x156e   :  { %v3558_v43 = vpop.xlane.xlu1 %3557 }
0x156f   :  { %v3566_v21 = vmul.f32 %v3558_v43, %v8737_v33 }
0x1571   :  { %v8315_v24 = vpop.eup %8314  ;;  %v3570_v31 = vadd.f32 1e-05, %v3566_v21 }
0x1572   :  { %v3574_v60 = vmul.f32 %v8315_v24, %v3569_v19  ;;  %vm3580_vm10 = vweird.f32 %v8315_v24 }
0x1573   :  { %8316 = vrsqrt.f32 %v3570_v31  ;;  %vm3581_vm12 = vmor %vm3579_vm11, %vm3580_vm10  ;;  %vm3589_vm14 = vweird.f32 %v3570_v31 }
0x1574   :  { %v3575_v53 = vmul.f32 %v8315_v24, %v3574_v60  ;;  %v3622_v60 = vperm.slane %v7154_v46, 0 }
0x1576   :  { %v3576_v63 = vmul.f32 0.5, %v3575_v53  ;;  %v3561_v14 = vpop.xlane.xlu0 %3560 }
0x1577   :  { %v3567_v6 = vmul.f32 %v3561_v14, %v8737_v33 }
0x1578   :  { %v3577_v37 = vsub.f32 1.5, %v3576_v63  ;;  %v8526_v63 = vld [vmem:[%s13112_s3 + $0x18] sm:$0xff] }
0x1579   :  { %v8317_v35 = vpop.eup %8316  ;;  %v3571_v40 = vadd.f32 1e-05, %v3567_v6  ;;  %4032 = vmatpush.msra.mxu1 %v8526_v63 }
0x157a   :  { %v3578_v43 = vmul.f32 %v8315_v24, %v3577_v37  ;;  %v3584_v21 = vmul.f32 %v8317_v35, %v3570_v31  ;;  %vm3590_vm13 = vweird.f32 %v8317_v35  ;;  %v8529_v31 = vld [vmem:[%s13112_s3] sm:$0xff] }
0x157b   :  { %8318 = vrsqrt.f32 %v3571_v40  ;;  %4033 = vmatpush.msra.mxu1 %v8527_v25  ;;  %vm3591_vm2 = vmor %vm3589_vm14, %vm3590_vm13  ;;  %vm3599_vm4 = vweird.f32 %v3571_v40 }
0x157c   :  { %v3582_v61 = vsel %vm3581_vm12, %v8315_v24, %v3578_v43  ;;  %v3585_v8 = vmul.f32 %v8317_v35, %v3584_v21  ;;  %v8528_v43 = vld [vmem:[%s13112_s3 + $0x8] sm:$0xff] }
0x157d   :  { %v3613_v11 = vmul.f32 %v3582_v61, %v11060_v42  ;;  %4034 = vmatpush.msra.mxu1 %v8528_v43 }
0x157e   :  { %v3586_v19 = vmul.f32 0.5, %v3585_v8  ;;  %v3564_v53 = vpop.xlane.xlu2 %3563 }
0x157f   :  { %v3618_v48 = vmul.f32 %v11173_v4, %v3613_v11  ;;  %v3568_v55 = vmul.f32 %v3564_v53, %v8737_v33  ;;  %4035 = vmatpush.msra.mxu1 %v8529_v31 }
0x1580   :  { %v3587_v24 = vsub.f32 1.5, %v3586_v19 }
0x1581   :  { %v8319_v14 = vpop.eup %8318  ;;  %v3623_v42 = vadd.f32 %v3622_v60, %v3618_v48  ;;  %v3572_v6 = vadd.f32 1e-05, %v3568_v55 }
0x1582   :  { %v3588_v62 = vmul.f32 %v8317_v35, %v3587_v24  ;;  %v3594_v37 = vmul.f32 %v8319_v14, %v3571_v40  ;;  %vm3600_vm3 = vweird.f32 %v8319_v14 }
0x1583   :  { %8320 = vrsqrt.f32 %v3572_v6  ;;  %7168 = vmatmul.msk.f32.vlgmr.msrb.gmra.mxu1 %vm139_vm1, %v3623_v42  ;;  %7172 = vmatmul.msk.f32.vlgmr.msra.gmra.mxu2 %vm139_vm1, %v3623_v42  ;;  %vm3601_vm5 = vmor %vm3599_vm4, %vm3600_vm3  ;;  %vm3609_vm7 = vweird.f32 %v3572_v6 }
0x1584   :  { %v3592_v17 = vsel %vm3591_vm2, %v8317_v35, %v3588_v62  ;;  %v3595_v46 = vmul.f32 %v8319_v14, %v3594_v37 }
0x1585   :  { %v3614_v21 = vmul.f32 %v3592_v17, %v11067_v26 }
0x1586   :  { %v3596_v27 = vmul.f32 0.5, %v3595_v46 }
0x1587   :  { %v3619_v61 = vmul.f32 %v11173_v4, %v3614_v21 }
0x1588   :  { %v3597_v8 = vsub.f32 1.5, %v3596_v27 }
0x1589   :  { %v8321_v11 = vpop.eup %8320  ;;  %v3624_v35 = vadd.f32 %v3622_v60, %v3619_v61 }
0x158a   :  { %v3598_v15 = vmul.f32 %v8319_v14, %v3597_v8  ;;  %v3604_v19 = vmul.f32 %v8321_v11, %v3572_v6  ;;  %vm3610_vm6 = vweird.f32 %v8321_v11 }
0x158b   :  { %7169 = vmatmul.msk.f32.gmra.mxu1 %vm139_vm1, %v3624_v35  ;;  %7173 = vmatmul.msk.f32.gmra.mxu2 %vm139_vm1, %v3624_v35  ;;  %vm3611_vm8 = vmor %vm3609_vm7, %vm3610_vm6 }
0x158c   :  { %v3602_v26 = vsel %vm3601_vm5, %v8319_v14, %v3598_v15  ;;  %v3605_v53 = vmul.f32 %v8321_v11, %v3604_v19 }
0x158d   :  { %v3615_v48 = vmul.f32 %v3602_v26, %v11074_v38 }
0x158e   :  { %v3606_v55 = vmul.f32 0.5, %v3605_v53 }
0x158f   :  { %v3620_v63 = vmul.f32 %v11173_v4, %v3615_v48 }
0x1590   :  { %v3607_v24 = vsub.f32 1.5, %v3606_v55 }
0x1591   :  { %v3625_v42 = vadd.f32 %v3622_v60, %v3620_v63 }
0x1592   :  { %v3608_v25 = vmul.f32 %v8321_v11, %v3607_v24 }
0x1593   :  { %7170 = vmatmul.msk.f32.gmra.mxu1 %vm139_vm1, %v3625_v42  ;;  %7174 = vmatmul.msk.f32.gmra.mxu2 %vm139_vm1, %v3625_v42 }
0x1594   :  { %v3612_v40 = vsel %vm3611_vm8, %v8321_v11, %v3608_v25 }
0x1595   :  { %v3616_v62 = vmul.f32 %v3612_v40, %v11081_v12 }
0x1597   :  { %v3621_v14 = vmul.f32 %v11173_v4, %v3616_v62 }
0x1599   :  { %v3626_v37 = vadd.f32 %v3622_v60, %v3621_v14 }
0x159b   :  { %7171 = vmatmul.msk.f32.gmra.mxu1 %vm139_vm1, %v3626_v37  ;;  %7175 = vmatmul.msk.f32.gmra.mxu2 %vm139_vm1, %v3626_v37 }
0x1600   :  { %v11210_v38 = vpop.f32.mrf.mxu1 }
0x1601   :  { %v3718_v43 = vmul.f32 %v11210_v38, %v9035_v1  ;;  %v3714_v35 = vmul.f32 %v11210_v38, %v9119_v16  ;;  %v3710_v53 = vmul.f32 %v11210_v38, %v9054_v9  ;;  %v3726_v25 = vmul.f32 %v11210_v38, %v13298_v49 }
0x1602   :  { %v3722_v62 = vmul.f32 %v11210_v38, %v13325_v54 }
0x1606   :  { %v11254_v19 = vpop.f32.mrf.mxu2 }
0x1608   :  { %v11212_v17 = vpop.f32.mrf.mxu1 }
0x1609   :  { %v3719_v6 = vmul.f32 %v11212_v17, %v9039_v3  ;;  %v3715_v31 = vmul.f32 %v11212_v17, %v9043_v51  ;;  %v3711_v8 = vmul.f32 %v11212_v17, %v9045_v7  ;;  %v3727_v15 = vmul.f32 %v11212_v17, %v9078_v41 }
0x160b   :  { %3828 = vrot.lane.b32.xlu2 %v3719_v6, %s8630_s13 }
0x160e   :  { %v11265_v55 = vpop.f32.mrf.mxu2 }
0x1610   :  { %v11217_v46 = vpop.f32.mrf.mxu1 }
0x1611   :  { %v3720_v12 = vmul.f32 %v11217_v46, %v9066_v23  ;;  %v3716_v4 = vmul.f32 %v11217_v46, %v9037_v2  ;;  %v3712_v11 = vmul.f32 %v11217_v46, %v9047_v45  ;;  %v3728_v26 = vmul.f32 %v11217_v46, %v9062_v18 }
0x1612   :  { %v3708_v48 = vmul.f32 %v11217_v46, %v13297_v5  ;;  %v3724_v42 = vmul.f32 %v11217_v46, %v13300_v59  ;;  %v3758_v6 = vmul.f32 %v11217_v46, %v13328_v47 }
0x1613   :  { %3830 = vrot.lane.b32.xlu0 %v3720_v12, %s8630_s13  ;;  %3822 = vrot.lane.b32.xlu2 %v3716_v4, %s8630_s13  ;;  %v3707_v12 = vmul.f32 %v11212_v17, %v13324_v10  ;;  %v3706_v4 = vmul.f32 %v11210_v38, %v13330_v52 }
0x1616   :  { %v11282_v14 = vpop.f32.mrf.mxu2 }
0x1617   :  { %v3759_v37 = vmul.f32 %v11282_v14, %v13328_v47 }
0x1618   :  { %v11225_v60 = vpop.f32.mrf.mxu1 }
0x1619   :  { %v3721_v21 = vmul.f32 %v11225_v60, %v9033_v0  ;;  %v3713_v27 = vmul.f32 %v11225_v60, %v9041_v36  ;;  %v3717_v61 = vmul.f32 %v11225_v60, %v9104_v44  ;;  %v3729_v63 = vmul.f32 %v11225_v60, %v13295_v28 }
0x161a   :  { %v3709_v24 = vmul.f32 %v11225_v60, %v9074_v29  ;;  %v3725_v40 = vmul.f32 %v11225_v60, %v13326_v39 }
0x161b   :  { %3826 = vrot.lane.b32.xlu0 %v3718_v43, %s8630_s13  ;;  %3832 = vrot.lane.b32.xlu1 %v3721_v21, %s8630_s13  ;;  %v7832_v43 = vpack.i.bf16 %v3759_v37, %v3758_v6  ;;  %v3757_v21 = vmul.f32 %v11265_v55, %v13332_v20 }
0x161c   :  { %3816 = vrot.lane.b32.xlu2 %v3713_v27, %s8630_s13  ;;  %v3751_v27 = vmul.f32 %v11282_v14, %v13333_v22 }
0x1623   :  { %3820 = vrot.lane.b32.xlu0 %v3715_v31, %s8630_s13  ;;  %3824 = vrot.lane.b32.xlu1 %v3717_v61, %s8630_s13  ;;  %v3756_v31 = vmul.f32 %v11212_v17, %v13332_v20  ;;  %v3750_v61 = vmul.f32 %v11217_v46, %v13333_v22 }
0x1624   :  { %3812 = vrot.lane.b32.xlu2 %v3711_v8, %s8630_s13  ;;  %v3723_v8 = vmul.f32 %v11212_v17, %v13327_v13 }
0x162b   :  { %3814 = vrot.lane.b32.xlu0 %v3712_v11, %s8630_s13  ;;  %3818 = vrot.lane.b32.xlu1 %v3714_v35, %s8630_s13  ;;  %v7837_v11 = vpack.i.bf16 %v3757_v21, %v3756_v31  ;;  %v11308_v35 = vpop.f32.mrf.mxu2  ;;  %v13354_v21 = vld [vmem:[#allocation32_spill] sm:$0xff]  ;;  %v13355_v31 = vld [vmem:[#allocation29_spill] sm:$0xff] }
0x162c   :  { %3844 = vrot.lane.b32.xlu2 %v3727_v15, %s8630_s13  ;;  %v7847_v15 = vpack.i.bf16 %v3751_v27, %v3750_v61  ;;  %v3737_v27 = vmul.f32 %v11308_v35, %v13354_v21  ;;  %v3773_v61 = vmul.f32 %v11265_v55, %v13355_v31 }
0x1633   :  { %3846 = vrot.lane.b32.xlu0 %v3728_v26, %s8630_s13  ;;  %3810 = vrot.lane.b32.xlu1 %v3710_v53, %s8630_s13  ;;  %v13350_v26 = vld [vmem:[#allocation18_spill] sm:$0xff] }
0x1634   :  { %3806 = vrot.lane.b32.xlu2 %v3708_v48, %s8630_s13  ;;  %v3755_v53 = vmul.f32 %v11254_v19, %v13350_v26  ;;  %v13351_v48 = vld [vmem:[#allocation24_spill] sm:$0xff] }
0x163b   :  { %3848 = vrot.lane.b32.xlu1 %v3729_v63, %s8630_s13  ;;  %3808 = vrot.lane.b32.xlu0 %v3709_v24, %s8630_s13  ;;  %v3753_v63 = vmul.f32 %v11308_v35, %v13351_v48  ;;  %v13352_v24 = vld [vmem:[#allocation19_spill] sm:$0xff] }
0x163c   :  { %3838 = vrot.lane.b32.xlu2 %v3724_v42, %s8630_s13  ;;  %v3775_v42 = vmul.f32 %v11282_v14, %v13352_v24 }
0x1643   :  { %3842 = vrot.lane.b32.xlu1 %v3726_v25, %s8630_s13  ;;  %3840 = vrot.lane.b32.xlu0 %v3725_v40, %s8630_s13  ;;  %v3754_v25 = vmul.f32 %v11210_v38, %v13350_v26  ;;  %v3752_v40 = vmul.f32 %v11225_v60, %v13351_v48 }
0x1644   :  { %3834 = vrot.lane.b32.xlu2 %v3722_v62, %s8630_s13  ;;  %v3774_v62 = vmul.f32 %v11217_v46, %v13352_v24 }
0x1645   :  { %v7842_v37 = vpack.i.bf16 %v3755_v53, %v3754_v25  ;;  %v7912_v6 = vpack.i.bf16 %v3753_v63, %v3752_v40  ;;  %v13356_v40 = vld [vmem:[#allocation26_spill] sm:$0xff] }
0x164b   :  { %3804 = vrot.lane.b32.xlu1 %v3707_v12, %s8630_s13  ;;  %3802 = vrot.lane.b32.xlu0 %v3706_v4, %s8630_s13  ;;  %v7867_v12 = vpack.i.bf16 %v3775_v42, %v3774_v62  ;;  %v13353_v4 = vld [vmem:[#allocation20_spill] sm:$0xff]  ;;  %v3747_v62 = vmul.f32 %v11254_v19, %v13356_v40 }
0x164c   :  { %7833 = vrot.lane.b32.xlu2 %v7832_v43, %s8632_s18  ;;  %v3749_v43 = vmul.f32 %v11265_v55, %v13353_v4 }
0x1653   :  { %3836 = vrot.lane.b32.xlu1 %v3723_v8, %s8630_s13  ;;  %7838 = vrot.lane.b32.xlu0 %v7837_v11, %s8632_s18  ;;  %v3748_v8 = vmul.f32 %v11212_v17, %v13353_v4  ;;  %v3736_v11 = vmul.f32 %v11225_v60, %v13354_v21 }
0x1654   :  { %7848 = vrot.lane.b32.xlu2 %v7847_v15, %s8632_s18  ;;  %v3772_v15 = vmul.f32 %v11212_v17, %v13355_v31 }
0x1655   :  { %v7852_v53 = vpack.i.bf16 %v3749_v43, %v3748_v8  ;;  %v7927_v63 = vpack.i.bf16 %v3737_v27, %v3736_v11  ;;  %v13358_v11 = vld [vmem:[#allocation27_spill] sm:$0xff] }
0x1656   :  { %v7877_v42 = vpack.i.bf16 %v3773_v61, %v3772_v15  ;;  %v3743_v15 = vmul.f32 %v11282_v14, %v13358_v11 }
0x165b   :  { %7843 = vrot.lane.b32.xlu1 %v7842_v37, %s8632_s18  ;;  %7913 = vrot.lane.b32.xlu0 %v7912_v6, %s8632_s18  ;;  %v13357_v37 = vld [vmem:[#allocation28_spill] sm:$0xff] }
0x165c   :  { %7868 = vrot.lane.b32.xlu2 %v7867_v12, %s8632_s18  ;;  %v3771_v6 = vmul.f32 %v11254_v19, %v13357_v37  ;;  %v3746_v12 = vmul.f32 %v11210_v38, %v13356_v40  ;;  %v3770_v43 = vmul.f32 %v11210_v38, %v13357_v37 }
0x165e   :  { %v7857_v27 = vpack.i.bf16 %v3747_v62, %v3746_v12  ;;  %v7887_v61 = vpack.i.bf16 %v3771_v6, %v3770_v43  ;;  %v13360_v6 = vld [vmem:[#allocation25_spill] sm:$0xff] }
0x165f   :  { %v3741_v12 = vmul.f32 %v11265_v55, %v13360_v6  ;;  %v3740_v31 = vmul.f32 %v11212_v17, %v13360_v6 }
0x1663   :  { %7853 = vrot.lane.b32.xlu1 %v7852_v53, %s8632_s18  ;;  %7928 = vrot.lane.b32.xlu0 %v7927_v63, %s8632_s18  ;;  %v13359_v53 = vld [vmem:[#allocation31_spill] sm:$0xff] }
0x1664   :  { %7878 = vrot.lane.b32.xlu2 %v7877_v42, %s8632_s18  ;;  %v3735_v63 = vmul.f32 %v11282_v14, %v13359_v53  ;;  %v3742_v42 = vmul.f32 %v11217_v46, %v13358_v11  ;;  %v3734_v21 = vmul.f32 %v11217_v46, %v13359_v53  ;;  %v7872_v53 = vpack.i.bf16 %v3741_v12, %v3740_v31 }
0x1665   :  { %v3829_v25 = vpop.permute.xlu2 %3828 }
0x1666   :  { %v7862_v48 = vpack.i.bf16 %v3743_v15, %v3742_v42  ;;  %v7892_v62 = vpack.i.bf16 %v3735_v63, %v3734_v21  ;;  %v13363_v42 = vld [vmem:[#allocation16_spill] sm:$0xff] }
0x1667   :  { %v3760_v37 = vmul.f32 %v11225_v60, %v13363_v42 }
0x166b   :  { %7858 = vrot.lane.b32.xlu1 %v7857_v27, %s8632_s18  ;;  %v13361_v27 = vld [vmem:[#allocation33_spill] sm:$0xff] }
0x166c   :  { %7888 = vrot.lane.b32.xlu2 %v7887_v61, %s8632_s18  ;;  %v3733_v61 = vmul.f32 %v11265_v55, %v13361_v27  ;;  %v3732_v24 = vmul.f32 %v11212_v17, %v13361_v27 }
0x166d   :  { %v3823_v8 = vpop.permute.xlu2 %3822 }
0x166e   :  { %v7902_v15 = vpack.i.bf16 %v3733_v61, %v3732_v24 }
0x1673   :  { %7863 = vrot.lane.b32.xlu1 %v7862_v48, %s8632_s18  ;;  %v13362_v48 = vld [vmem:[#allocation21_spill] sm:$0xff] }
0x1674   :  { %7893 = vrot.lane.b32.xlu2 %v7892_v62, %s8632_s18  ;;  %v3739_v21 = vmul.f32 %v11254_v19, %v13362_v48  ;;  %v3761_v62 = vmul.f32 %v11308_v35, %v13363_v42  ;;  %v3738_v40 = vmul.f32 %v11210_v38, %v13362_v48 }
0x1676   :  { %v3817_v43 = vpop.permute.xlu2 %3816  ;;  %v7882_v27 = vpack.i.bf16 %v3739_v21, %v3738_v40  ;;  %v7907_v31 = vpack.i.bf16 %v3761_v62, %v3760_v37  ;;  %v13366_v62 = vld [vmem:[#allocation17_spill] sm:$0xff] }
0x167b   :  { %7873 = vrot.lane.b32.xlu1 %v7872_v53, %s8632_s18  ;;  %v13364_v53 = vld [vmem:[#allocation34_spill] sm:$0xff] }
0x167c   :  { %7903 = vrot.lane.b32.xlu2 %v7902_v15, %s8632_s18  ;;  %v3767_v12 = vmul.f32 %v11282_v14, %v13364_v53  ;;  %v13365_v15 = vld [vmem:[#allocation23_spill] sm:$0xff]  ;;  %v3766_v48 = vmul.f32 %v11217_v46, %v13364_v53  ;;  %v3745_v14 = vmul.f32 %v11308_v35, %v13366_v62  ;;  %v3744_v53 = vmul.f32 %v11225_v60, %v13366_v62 }
0x167d   :  { %v3777_v4 = vmul.f32 %v11308_v35, %v13365_v15  ;;  %v3776_v42 = vmul.f32 %v11225_v60, %v13365_v15 }
0x167e   :  { %v3813_v63 = vpop.permute.xlu2 %3812  ;;  %v7897_v40 = vpack.i.bf16 %v3767_v12, %v3766_v48  ;;  %v7917_v6 = vpack.i.bf16 %v3745_v14, %v3744_v53 }
0x167f   :  { %v7922_v37 = vpack.i.bf16 %v3777_v4, %v3776_v42  ;;  %v13367_v42 = vld [vmem:[#allocation30_spill] sm:$0xff] }
0x1680   :  { %v3769_v12 = vmul.f32 %v11308_v35, %v13367_v42 }
0x1683   :  { %7883 = vrot.lane.b32.xlu1 %v7882_v27, %s8632_s18 }
0x1684   :  { %7908 = vrot.lane.b32.xlu2 %v7907_v31, %s8632_s18 }
0x1685   :  { %v3831_v24 = vpop.permute.xlu0 %3830 }
0x1686   :  { %v3845_v61 = vpop.permute.xlu2 %3844 }
0x168b   :  { %7898 = vrot.lane.b32.xlu1 %v7897_v40, %s8632_s18 }
0x168c   :  { %7923 = vrot.lane.b32.xlu2 %v7922_v37, %s8632_s18  ;;  %v3768_v37 = vmul.f32 %v11225_v60, %v13367_v42 }
0x168d   :  { %v3827_v27 = vpop.permute.xlu0 %3826  ;;  %v3833_v21 = vpop.permute.xlu1 %3832 }
0x168e   :  { %v3807_v31 = vpop.permute.xlu2 %3806  ;;  %7176 = vmatpush.xpose.msk.msra.mxu3 %vm635_vm15, %v3833_v21  ;;  %v7932_v21 = vpack.i.bf16 %v3769_v12, %v3768_v37 }
0x1692   :  { %7177 = vmatpush.xpose.msk.msra.mxu3 %vm635_vm15, %v3831_v24 }
0x1693   :  { %7918 = vrot.lane.b32.xlu1 %v7917_v6, %s8632_s18 }
0x1695   :  { %v3821_v4 = vpop.permute.xlu0 %3820  ;;  %v3825_v48 = vpop.permute.xlu1 %3824 }
0x1696   :  { %v3839_v40 = vpop.permute.xlu2 %3838  ;;  %7178 = vmatpush.xpose.msk.msra.mxu3 %vm635_vm15, %v3829_v25 }
0x169a   :  { %7179 = vmatpush.xpose.msk.msra.mxu3 %vm635_vm15, %v3827_v27 }
0x169b   :  { %7933 = vrot.lane.b32.xlu1 %v7932_v21, %s8632_s18 }
0x169d   :  { %v3819_v53 = vpop.permute.xlu1 %3818  ;;  %v3815_v6 = vpop.permute.xlu0 %3814 }
0x169e   :  { %v3835_v24 = vpop.permute.xlu2 %3834  ;;  %7180 = vmatpush.xpose.msk.msra.mxu3 %vm635_vm15, %v3825_v48 }
0x16a2   :  { %7181 = vmatpush.xpose.msk.msra.mxu3 %vm635_vm15, %v3823_v8 }
0x16a5   :  { %v3811_v14 = vpop.permute.xlu1 %3810  ;;  %v3847_v25 = vpop.permute.xlu0 %3846 }
0x16a6   :  { %v7834_v35 = vpop.permute.xlu2 %7833  ;;  %7182 = vmatpush.xpose.msk.msra.mxu3 %vm635_vm15, %v3821_v4 }
0x16aa   :  { %7183 = vmatpush.xpose.msk.msra.mxu3 %vm635_vm15, %v3819_v53 }
0x16ad   :  { %v3849_v15 = vpop.permute.xlu1 %3848  ;;  %v3809_v27 = vpop.permute.xlu0 %3808 }
0x16ae   :  { %v11411_v12 = vpop.permute.xlu2 %7848  ;;  %7184 = vmatpush.xpose.msk.msra.mxu3 %vm635_vm15, %v3817_v43  ;;  %7196 = vmatpush.xpose.msk.msra.mxu0 %vm635_vm15, %v3849_v15 }
0x16b2   :  { %7185 = vmatpush.xpose.msk.msra.mxu3 %vm635_vm15, %v3815_v6  ;;  %7197 = vmatpush.xpose.msk.msra.mxu0 %vm635_vm15, %v3847_v25  ;;  %v7836_v25 = vunpack.i.h.bf16 %v7834_v35 }
0x16b5   :  { %v3843_v8 = vpop.permute.xlu1 %3842  ;;  %v3841_v4 = vpop.permute.xlu0 %3840 }
0x16b6   :  { %v11417_v48 = vpop.permute.xlu2 %7868  ;;  %7186 = vmatpush.xpose.msk.msra.mxu3 %vm635_vm15, %v3813_v63  ;;  %7198 = vmatpush.xpose.msk.msra.mxu0 %vm635_vm15, %v3845_v61 }
0x16ba   :  { %7187 = vmatpush.xpose.msk.msra.mxu3 %vm635_vm15, %v3811_v14  ;;  %7199 = vmatpush.xpose.msk.msra.mxu0 %vm635_vm15, %v3843_v8 }
0x16bd   :  { %v3805_v43 = vpop.permute.xlu1 %3804  ;;  %v3803_v61 = vpop.permute.xlu0 %3802 }
0x16be   :  { %v11423_v37 = vpop.permute.xlu2 %7878  ;;  %7188 = vmatpush.xpose.msk.msra.mxu3 %vm635_vm15, %v3809_v27  ;;  %7200 = vmatpush.xpose.msk.msra.mxu0 %vm635_vm15, %v3841_v4  ;;  %v7835_v27 = vunpack.i.l.bf16 %v7834_v35  ;;  %v7851_v35 = vunpack.i.h.bf16 %v11411_v12 }
0x16c0   :  { %v4236_v20 = vsel %vm139_vm1, %v7835_v27, %v7836_v25 }
0x16c2   :  { %7189 = vmatpush.xpose.msk.msra.mxu3 %vm635_vm15, %v3807_v31  ;;  %7201 = vmatpush.xpose.msk.msra.mxu0 %vm635_vm15, %v3839_v40 }
0x16c5   :  { %v3837_v15 = vpop.permute.xlu1 %3836  ;;  %v7839_v6 = vpop.permute.xlu0 %7838 }
0x16c6   :  { %v11429_v63 = vpop.permute.xlu2 %7888  ;;  %7190 = vmatpush.xpose.msk.msra.mxu3 %vm635_vm15, %v3805_v43  ;;  %7202 = vmatpush.xpose.msk.msra.mxu0 %vm635_vm15, %v3837_v15  ;;  %v7841_v43 = vunpack.i.h.bf16 %v7839_v6  ;;  %v7840_v15 = vunpack.i.l.bf16 %v7839_v6  ;;  %v7850_v6 = vunpack.i.l.bf16 %v11411_v12 }
0x16ca   :  { %7191 = vmatpush.xpose.msk.msra.mxu3 %vm635_vm15, %v3803_v61  ;;  %7203 = vmatpush.xpose.msk.msra.mxu0 %vm635_vm15, %v3835_v24 }
0x16cd   :  { %v7844_v21 = vpop.permute.xlu1 %7843  ;;  %7192 = vmatmul.msk.f32.vlgmr.msra.gmra.mxu3 %vm635_vm15, %v11210_v38  ;;  %7204 = vmatmul.msk.f32.vlgmr.msra.gmra.mxu0 %vm635_vm15, %v11210_v38  ;;  %v7914_v42 = vpop.permute.xlu0 %7913 }
0x16ce   :  { %v11439_v31 = vpop.permute.xlu2 %7893  ;;  %v7846_v62 = vunpack.i.h.bf16 %v7844_v21  ;;  %v7845_v22 = vunpack.i.l.bf16 %v7844_v21  ;;  %v7916_v11 = vunpack.i.h.bf16 %v7914_v42  ;;  %v7915_v52 = vunpack.i.l.bf16 %v7914_v42 }
0x16cf   :  { %v7871_v21 = vunpack.i.h.bf16 %v11417_v48 }
0x16d0   :  { %v4234_v27 = vsel %vm139_vm1, %v7845_v22, %v7846_v62  ;;  %v7890_v22 = vunpack.i.l.bf16 %v11429_v63 }
0x16d5   :  { %v7854_v40 = vpop.permute.xlu1 %7853  ;;  %7193 = vmatmul.msk.f32.gmra.mxu3 %vm635_vm15, %v11212_v17  ;;  %7205 = vmatmul.msk.f32.gmra.mxu0 %vm635_vm15, %v11212_v17 }
0x16d6   :  { %v11445_v53 = vpop.permute.xlu2 %7903 }
0x16dd   :  { %v7859_v24 = vpop.permute.xlu1 %7858  ;;  %7194 = vmatmul.msk.f32.gmra.mxu3 %vm635_vm15, %v11217_v46  ;;  %7206 = vmatmul.msk.f32.gmra.mxu0 %vm635_vm15, %v11217_v46  ;;  %v4235_v46 = vsel %vm139_vm1, %v7840_v15, %v7841_v43  ;;  %v7855_v43 = vunpack.i.l.bf16 %v7854_v40  ;;  %v4233_v15 = vsel %vm139_vm1, %v7915_v52, %v7916_v11 }
0x16de   :  { %v7909_v14 = vpop.permute.xlu2 %7908  ;;  %v7861_v62 = vunpack.i.h.bf16 %v7859_v24 }
0x16df   :  { %v7911_v8 = vunpack.i.h.bf16 %v7909_v14  ;;  %v7910_v4 = vunpack.i.l.bf16 %v7909_v14  ;;  %v7870_v14 = vunpack.i.l.bf16 %v11417_v48  ;;  %v4232_v48 = vsel %vm139_vm1, %v7850_v6, %v7851_v35 }
0x16e1   :  { %v4237_v61 = vsel %vm139_vm1, %v7910_v4, %v7911_v8  ;;  %v7881_v8 = vunpack.i.h.bf16 %v11423_v37  ;;  %v7856_v4 = vunpack.i.h.bf16 %v7854_v40 }
0x16e2   :  { %4270 = vmatpush.msrb.mxu0 %v4237_v61  ;;  %v4244_v61 = vsel %vm139_vm1, %v7870_v14, %v7871_v21 }
0x16e3   :  { %v4231_v40 = vsel %vm139_vm1, %v7855_v43, %v7856_v4 }
0x16e4   :  { %4271 = vmatpush.msrb.mxu0 %v4236_v20 }
0x16e5   :  { %v7864_v26 = vpop.permute.xlu1 %7863  ;;  %7195 = vmatmul.msk.f32.gmra.mxu3 %vm635_vm15, %v11225_v60  ;;  %7207 = vmatmul.msk.f32.gmra.mxu0 %vm635_vm15, %v11225_v60  ;;  %v7880_v60 = vunpack.i.l.bf16 %v11423_v37 }
0x16e6   :  { %v7924_v20 = vpop.permute.xlu2 %7923  ;;  %4272 = vmatpush.msrb.mxu0 %v4235_v46  ;;  %v7891_v46 = vunpack.i.h.bf16 %v11429_v63  ;;  %v7866_v14 = vunpack.i.h.bf16 %v7864_v26 }
0x16e7   :  { %v7926_v42 = vunpack.i.h.bf16 %v7924_v20  ;;  %v7925_v25 = vunpack.i.l.bf16 %v7924_v20  ;;  %v7860_v20 = vunpack.i.l.bf16 %v7859_v24  ;;  %v4243_v52 = vsel %vm139_vm1, %v7880_v60, %v7881_v8  ;;  %v7929_v8 = vpop.permute.xlu0 %7928 }
0x16e8   :  { %4273 = vmatpush.msrb.mxu0 %v4234_v27  ;;  %v4242_v35 = vsel %vm139_vm1, %v7890_v22, %v7891_v46  ;;  %v7865_v24 = vunpack.i.l.bf16 %v7864_v26  ;;  %v7896_v22 = vunpack.i.h.bf16 %v11439_v31  ;;  %v7895_v26 = vunpack.i.l.bf16 %v11439_v31 }
0x16e9   :  { %v4245_v12 = vsel %vm139_vm1, %v7925_v25, %v7926_v42  ;;  %v4230_v11 = vsel %vm139_vm1, %v7860_v20, %v7861_v62 }
0x16ea   :  { %4274 = vmatpush.msrb.mxu0 %v4233_v15  ;;  %4307 = vmatpush.msrb.mxu1 %v4245_v12  ;;  %v4228_v12 = vsel %vm139_vm1, %v7865_v24, %v7866_v14  ;;  %v4224_v31 = vsel %vm139_vm1, %v7895_v26, %v7896_v22 }
0x16ec   :  { %4275 = vmatpush.msrb.mxu0 %v4232_v48  ;;  %4308 = vmatpush.msrb.mxu1 %v4244_v61  ;;  %v7931_v48 = vunpack.i.h.bf16 %v7929_v8  ;;  %v7930_v61 = vunpack.i.l.bf16 %v7929_v8 }
0x16ed   :  { %v7874_v37 = vpop.permute.xlu1 %7873 }
0x16ee   :  { %4276 = vmatpush.msrb.mxu0 %v4231_v40  ;;  %4309 = vmatpush.msrb.mxu1 %v4243_v52  ;;  %v7876_v27 = vunpack.i.h.bf16 %v7874_v37  ;;  %v7875_v15 = vunpack.i.l.bf16 %v7874_v37 }
0x16f0   :  { %4277 = vmatpush.msrb.mxu0 %v4230_v11  ;;  %4310 = vmatpush.msrb.mxu1 %v4242_v35  ;;  %v4227_v46 = vsel %vm139_vm1, %v7875_v15, %v7876_v27  ;;  %v7906_v35 = vunpack.i.h.bf16 %v11445_v53  ;;  %v8531_v15 = vld [vmem:[%s13111_s2] sm:$0xff] }
0x16f5   :  { %v7884_v6 = vpop.permute.xlu1 %7883 }
0x16f6   :  { %v7886_v60 = vunpack.i.h.bf16 %v7884_v6  ;;  %v7885_v43 = vunpack.i.l.bf16 %v7884_v6  ;;  %v7905_v6 = vunpack.i.l.bf16 %v11445_v53  ;;  %v8530_v53 = vld [vmem:[%s13111_s2 + $0x8] sm:$0xff] }
0x16f8   :  { %v4226_v20 = vsel %vm139_vm1, %v7885_v43, %v7886_v60 }
0x16fd   :  { %v7899_v21 = vpop.permute.xlu1 %7898 }
0x16fe   :  { %v7901_v37 = vunpack.i.h.bf16 %v7899_v21  ;;  %v7900_v40 = vunpack.i.l.bf16 %v7899_v21  ;;  %v4223_v21 = vsel %vm139_vm1, %v7905_v6, %v7906_v35 }
0x1700   :  { %v4240_v24 = vsel %vm139_vm1, %v7900_v40, %v7901_v37  ;;  %v8534_v37 = vld [vmem:[%s13111_s2 + $0x28] sm:$0xff] }
0x1705   :  { %v7919_v63 = vpop.permute.xlu1 %7918 }
0x1706   :  { %v7921_v42 = vunpack.i.h.bf16 %v7919_v63  ;;  %v7920_v25 = vunpack.i.l.bf16 %v7919_v63  ;;  %v4225_v63 = vsel %vm139_vm1, %v7930_v61, %v7931_v48 }
0x1708   :  { %v4229_v4 = vsel %vm139_vm1, %v7920_v25, %v7921_v42 }
0x1709   :  { %4278 = vmatpush.msrb.mxu0 %v4229_v4 }
0x170b   :  { %4279 = vmatpush.msrb.mxu0 %v4228_v12  ;;  %v8532_v12 = vld [vmem:[%s13111_s2 + $0x18] sm:$0xff] }
0x170d   :  { %v7934_v62 = vpop.permute.xlu1 %7933  ;;  %4280 = vmatpush.msrb.mxu0 %v4227_v46  ;;  %v8533_v46 = vld [vmem:[%s13111_s2 + $0x10] sm:$0xff] }
0x170e   :  { %v7936_v52 = vunpack.i.h.bf16 %v7934_v62  ;;  %v7935_v11 = vunpack.i.l.bf16 %v7934_v62 }
0x170f   :  { %4281 = vmatpush.msrb.mxu0 %v4226_v20 }
0x1710   :  { %v4241_v14 = vsel %vm139_vm1, %v7935_v11, %v7936_v52  ;;  %v8535_v11 = vld [vmem:[%s13111_s2 + $0x20] sm:$0xff] }
0x1711   :  { %4282 = vmatpush.msrb.mxu0 %v4225_v63  ;;  %4311 = vmatpush.msrb.mxu1 %v4241_v14 }
0x1713   :  { %4283 = vmatpush.msrb.mxu0 %v4224_v31  ;;  %4312 = vmatpush.msrb.mxu1 %v4240_v24  ;;  %v8536_v31 = vld [vmem:[%s13111_s2 + $0x38] sm:$0xff] }
0x1715   :  { %4284 = vmatpush.msrb.mxu0 %v4223_v21 }
0x174a   :  { %v3956_v42 = vpop.f32.mrf.mxu0 }
0x174b   :  { %v3957_v25 = vadd.f32 %v8530_v53, %v3956_v42  ;;  %v8537_v42 = vld [vmem:[%s13111_s2 + $0x30] sm:$0xff] }
0x174d   :  { %v3968_v8 = vsel %vm754_vm0, %v3957_v25, -inf }
0x1750   :  { %v3927_v27 = vpop.f32.mrf.mxu3 }
0x1751   :  { %v3928_v4 = vadd.f32 %v8531_v15, %v3927_v27 }
0x1752   :  { %v3959_v60 = vpop.f32.mrf.mxu0 }
0x1753   :  { %v3969_v43 = vmax.f32 %v3928_v4, %v3968_v8  ;;  %v3960_v48 = vadd.f32 %v8532_v12, %v3959_v60  ;;  %v3731_v8 = vmul.f32 %v11254_v19, %v13323_v50  ;;  %v3730_v60 = vmul.f32 %v11210_v38, %v13323_v50 }
0x1754   :  { %v3763_v12 = vmul.f32 %v11254_v19, %v9401_v57 }
0x1755   :  { %3970 = vmax.xlane.f32.xlu0 %v3969_v43  ;;  %v3972_v26 = vsel %vm754_vm0, %v3960_v48, -inf  ;;  %v7942_v43 = vpack.i.bf16 %v3731_v8, %v3730_v60 }
0x1758   :  { %v3930_v61 = vpop.f32.mrf.mxu3 }
0x1759   :  { %v3931_v22 = vadd.f32 %v8533_v46, %v3930_v61  ;;  %v3762_v61 = vmul.f32 %v11210_v38, %v9401_v57 }
0x175a   :  { %v3962_v62 = vpop.f32.mrf.mxu0 }
0x175b   :  { %v3973_v20 = vmax.f32 %v3931_v22, %v3972_v26  ;;  %v3963_v40 = vadd.f32 %v8534_v37, %v3962_v62  ;;  %v7947_v46 = vpack.i.bf16 %v3763_v12, %v3762_v61  ;;  %v3765_v26 = vmul.f32 %v11265_v55, %v9451_v34 }
0x175c   :  { %v3764_v62 = vmul.f32 %v11212_v17, %v9451_v34 }
0x175d   :  { %3974 = vmax.xlane.f32.xlu1 %v3973_v20  ;;  %v3976_v6 = vsel %vm754_vm0, %v3963_v40, -inf }
0x175e   :  { %v7937_v20 = vpack.i.bf16 %v3765_v26, %v3764_v62 }
0x1760   :  { %v3933_v52 = vpop.f32.mrf.mxu3 }
0x1761   :  { %v3934_v35 = vadd.f32 %v8535_v11, %v3933_v52 }
0x1762   :  { %v3965_v14 = vpop.f32.mrf.mxu0 }
0x1763   :  { %v3977_v63 = vmax.f32 %v3934_v35, %v3976_v6  ;;  %v3966_v24 = vadd.f32 %v8536_v31, %v3965_v14 }
0x1765   :  { %3978 = vmax.xlane.f32.xlu2 %v3977_v63  ;;  %v3980_v27 = vsel %vm754_vm0, %v3966_v24, -inf }
0x1768   :  { %v3936_v21 = vpop.f32.mrf.mxu3 }
0x1769   :  { %v3937_v53 = vadd.f32 %v8537_v42, %v3936_v21 }
0x176b   :  { %v3981_v15 = vmax.f32 %v3937_v53, %v3980_v27 }
0x176d   :  { %3982 = vmax.xlane.f32.xlu0 %v3981_v15 }
0x1776   :  { %7943 = vrot.lane.b32.xlu1 %v7942_v43, %s8632_s18 }
0x177d   :  { %7948 = vrot.lane.b32.xlu2 %v7947_v46, %s8632_s18 }
0x1781   :  { %7938 = vrot.lane.b32.xlu0 %v7937_v20, %s8632_s18 }
0x17c8   :  { %v3971_v37 = vpop.xlane.xlu0 %3970 }
0x17c9   :  { %v3984_v52 = vsub.f32 %v3928_v4, %v3971_v37  ;;  %v3985_v11 = vsub.f32 %v3957_v25, %v3971_v37 }
0x17cb   :  { %v3992_v6 = vmul.f32 1.442695, %v3984_v52  ;;  %v3994_v19 = vmul.f32 1.442695, %v3985_v11 }
0x17cd   :  { %8322 = vpow2.f32 %v3992_v6 }
0x17ce   :  { %8324 = vpow2.f32 %v3994_v19 }
0x17d0   :  { %v3975_v38 = vpop.xlane.xlu1 %3974 }
0x17d1   :  { %v3986_v63 = vsub.f32 %v3931_v22, %v3975_v38  ;;  %v3987_v14 = vsub.f32 %v3960_v48, %v3975_v38 }
0x17d3   :  { %v8323_v31 = vpop.eup %8322  ;;  %v3996_v55 = vmul.f32 1.442695, %v3986_v63  ;;  %v3998_v21 = vmul.f32 1.442695, %v3987_v14 }
0x17d4   :  { %v8325_v42 = vpop.eup %8324  ;;  %4036 = vmatmul.f32.vlgmr.msra.gmra.mxu1 %v8323_v31 }
0x17d5   :  { %8326 = vpow2.f32 %v3996_v55  ;;  %7208 = vmatmul.msk.f32.vlgmr.msrb.gmra.mxu2 %vm754_vm0, %v8325_v42  ;;  %v7220_v55 = vld [vmem:[%s13114_s5 + $0xb0] sm:$0xff] }
0x17d6   :  { %8328 = vpow2.f32 %v3998_v21  ;;  %v7219_v21 = vld [vmem:[%s13114_s5 + $0xa8] sm:$0xff] }
0x17d8   :  { %v3979_v17 = vpop.xlane.xlu2 %3978 }
0x17d9   :  { %v3988_v27 = vsub.f32 %v3934_v35, %v3979_v17  ;;  %v3989_v4 = vsub.f32 %v3963_v40, %v3979_v17  ;;  %v7218_v17 = vld [vmem:[%s13114_s5 + $0xa0] sm:$0xff] }
0x17db   :  { %v8327_v25 = vpop.eup %8326  ;;  %v4000_v15 = vmul.f32 1.442695, %v3988_v27  ;;  %v4002_v8 = vmul.f32 1.442695, %v3989_v4  ;;  %v7217_v27 = vld [vmem:[%s13114_s5 + $0x98] sm:$0xff]  ;;  %v7216_v4 = vld [vmem:[%s13114_s5 + $0x90] sm:$0xff] }
0x17dc   :  { %v8329_v60 = vpop.eup %8328  ;;  %4039 = vmatmul.f32.gmra.mxu1 %v8327_v25 }
0x17dd   :  { %8330 = vpow2.f32 %v4000_v15  ;;  %7209 = vmatmul.msk.f32.gmra.mxu2 %vm754_vm0, %v8329_v60 }
0x17de   :  { %8332 = vpow2.f32 %v4002_v8 }
0x17e0   :  { %v3983_v48 = vpop.xlane.xlu0 %3982 }
0x17e1   :  { %v3990_v22 = vsub.f32 %v3937_v53, %v3983_v48  ;;  %v3991_v43 = vsub.f32 %v3966_v24, %v3983_v48  ;;  %v7949_v24 = vpop.permute.xlu2 %7948 }
0x17e2   :  { %v7951_v11 = vunpack.i.h.bf16 %v7949_v24  ;;  %v7950_v6 = vunpack.i.l.bf16 %v7949_v24 }
0x17e3   :  { %v8331_v12 = vpop.eup %8330  ;;  %v4004_v61 = vmul.f32 1.442695, %v3990_v22  ;;  %v4006_v46 = vmul.f32 1.442695, %v3991_v43 }
0x17e4   :  { %v8333_v26 = vpop.eup %8332  ;;  %4042 = vmatmul.f32.gmra.mxu1 %v8331_v12  ;;  %v4238_v14 = vsel %vm139_vm1, %v7950_v6, %v7951_v11 }
0x17e5   :  { %8334 = vpow2.f32 %v4004_v61  ;;  %7210 = vmatmul.msk.f32.gmra.mxu2 %vm754_vm0, %v8333_v26 }
0x17e6   :  { %8336 = vpow2.f32 %v4006_v46 }
0x17e8   :  { %v7944_v40 = vpop.permute.xlu1 %7943 }
0x17e9   :  { %v7946_v35 = vunpack.i.h.bf16 %v7944_v40  ;;  %v7945_v62 = vunpack.i.l.bf16 %v7944_v40 }
0x17eb   :  { %v8335_v20 = vpop.eup %8334  ;;  %v4222_v37 = vsel %vm139_vm1, %v7945_v62, %v7946_v35 }
0x17ec   :  { %v8337_v52 = vpop.eup %8336  ;;  %4045 = vmatmul.f32.gmra.mxu1 %v8335_v20  ;;  %4285 = vmatpush.msrb.mxu0 %v4222_v37 }
0x17ed   :  { %7211 = vmatmul.msk.f32.gmra.mxu2 %vm754_vm0, %v8337_v52  ;;  %4286 = vmatmul.f32.vlgmr.msrb.gmra.mxu0 %v8323_v31  ;;  %v7221_v31 = vld [vmem:[%s13114_s5 + $0xb8] sm:$0xff] }
0x17ee   :  { %4366 = vmatpush.msra.mxu2 %v7221_v31 }
0x17f0   :  { %4367 = vmatpush.msra.mxu2 %v7220_v55 }
0x17f2   :  { %4368 = vmatpush.msra.mxu2 %v7219_v21 }
0x17f3   :  { %v7939_v53 = vpop.permute.xlu0 %7938 }
0x17f4   :  { %v7941_v19 = vunpack.i.h.bf16 %v7939_v53  ;;  %v7940_v38 = vunpack.i.l.bf16 %v7939_v53  ;;  %4369 = vmatpush.msra.mxu2 %v7218_v17 }
0x17f5   :  { %4289 = vmatmul.f32.gmra.mxu0 %v8327_v25 }
0x17f6   :  { %v4239_v63 = vsel %vm139_vm1, %v7940_v38, %v7941_v19  ;;  %4370 = vmatpush.msra.mxu2 %v7217_v27 }
0x17f7   :  { %4313 = vmatpush.msrb.mxu1 %v4239_v63 }
0x17f8   :  { %4371 = vmatpush.msra.mxu2 %v7216_v4  ;;  %v7157_v4 = vld [vmem:[%s13117_s8 + $0xc8] sm:$0xff] }
0x17f9   :  { %4314 = vmatpush.msrb.mxu1 %v4238_v14 }
0x17fa   :  { %7212 = vmatmul.msk.f32.vlgmr.msrb.gmra.mxu1 %vm754_vm0, %v8325_v42 }
0x17fd   :  { %4292 = vmatmul.f32.gmra.mxu0 %v8331_v12 }
0x1802   :  { %7213 = vmatmul.msk.f32.gmra.mxu1 %vm754_vm0, %v8329_v60 }
0x1805   :  { %4295 = vmatmul.f32.gmra.mxu0 %v8335_v20 }
0x180a   :  { %7214 = vmatmul.msk.f32.gmra.mxu1 %vm754_vm0, %v8333_v26 }
0x1812   :  { %7215 = vmatmul.msk.f32.gmra.mxu1 %vm754_vm0, %v8337_v52 }
0x1851   :  { %v4037_v42 = vpop.f32.mrf.mxu1 }
0x1858   :  { %v4066_v8 = vpop.f32.mrf.mxu2 }
0x1859   :  { %v4040_v25 = vpop.f32.mrf.mxu1  ;;  %v4067_v60 = vadd.f32 %v4066_v8, %v4037_v42 }
0x185b   :  { %8338 = vrcp.f32 %v4067_v60 }
0x1860   :  { %v4069_v22 = vpop.f32.mrf.mxu2 }
0x1861   :  { %v4043_v15 = vpop.f32.mrf.mxu1  ;;  %v4070_v12 = vadd.f32 %v4069_v22, %v4040_v25  ;;  %v8339_v26 = vpop.eup %8338  ;;  %v4343_v25 = vperm.slane %v7157_v4, 0 }
0x1863   :  { %8340 = vrcp.f32 %v4070_v12 }
0x1868   :  { %v4072_v40 = vpop.f32.mrf.mxu2 }
0x1869   :  { %v4046_v48 = vpop.f32.mrf.mxu1  ;;  %v4073_v20 = vadd.f32 %v4072_v40, %v4043_v15  ;;  %v8341_v24 = vpop.eup %8340 }
0x186a   :  { %v4287_v43 = vpop.f32.mrf.mxu0 }
0x186b   :  { %8342 = vrcp.f32 %v4073_v20 }
0x1870   :  { %v4075_v11 = vpop.f32.mrf.mxu2 }
0x1871   :  { %v4076_v19 = vadd.f32 %v4075_v11, %v4046_v48  ;;  %v8343_v14 = vpop.eup %8342 }
0x1872   :  { %v4290_v62 = vpop.f32.mrf.mxu0 }
0x1873   :  { %8344 = vrcp.f32 %v4076_v19 }
0x1877   :  { %v4316_v61 = vpop.f32.mrf.mxu1 }
0x1878   :  { %v4317_v46 = vadd.f32 %v4316_v61, %v4287_v43 }
0x1879   :  { %v8345_v17 = vpop.eup %8344 }
0x187a   :  { %v4332_v35 = vmul.f32 %v8339_v26, %v4317_v46  ;;  %v4293_v6 = vpop.f32.mrf.mxu0 }
0x187c   :  { %7222 = vmatmul.msk.f32.vlgmr.msra.gmra.mxu2 %vm635_vm15, %v4332_v35 }
0x187f   :  { %v4319_v37 = vpop.f32.mrf.mxu1 }
0x1880   :  { %v4320_v52 = vadd.f32 %v4319_v37, %v4290_v62 }
0x1882   :  { %v4333_v53 = vmul.f32 %v8341_v24, %v4320_v52  ;;  %v4296_v55 = vpop.f32.mrf.mxu0 }
0x1884   :  { %7223 = vmatmul.msk.f32.gmra.mxu2 %vm635_vm15, %v4333_v53 }
0x1887   :  { %v4322_v38 = vpop.f32.mrf.mxu1 }
0x1888   :  { %v4323_v63 = vadd.f32 %v4322_v38, %v4293_v6 }
0x188a   :  { %v4334_v31 = vmul.f32 %v8343_v14, %v4323_v63 }
0x188c   :  { %7224 = vmatmul.msk.f32.gmra.mxu2 %vm635_vm15, %v4334_v31 }
0x188f   :  { %v4325_v21 = vpop.f32.mrf.mxu1 }
0x1890   :  { %v4326_v42 = vadd.f32 %v4325_v21, %v4296_v55 }
0x1892   :  { %v4335_v27 = vmul.f32 %v8345_v17, %v4326_v42 }
0x1894   :  { %7225 = vmatmul.msk.f32.gmra.mxu2 %vm635_vm15, %v4335_v27 }
0x18ff   :  { %v4373_v15 = vpop.f32.mrf.mxu2 }
0x1900   :  { %v4374_v8 = vadd.f32 %v4373_v15, %v4343_v25  ;;  %v7229_v15 = vld [vmem:[%s13115_s6 + $0x78] sm:$0xff] }
0x1901   :  { %4517 = vmatpush.msrb.mxu3 %v7229_v15 }
0x1902   :  { %v11568_v60 = vadd.f32 %v4374_v8, %v11039_v32  ;;  %v7228_v8 = vld [vmem:[%s13115_s6 + $0x70] sm:$0xff] }
0x1903   :  { %4518 = vmatpush.msrb.mxu3 %v7228_v8 }
0x1904   :  { %v4389_v48 = vsel %vm139_vm1, %v11568_v60, 0.0 }
0x1905   :  { %4390 = vadd.xlane.f32.xlu0 %v4389_v48  ;;  %v7227_v48 = vld [vmem:[%s13115_s6 + $0x68] sm:$0xff] }
0x1906   :  { %4519 = vmatpush.msrb.mxu3 %v7227_v48  ;;  %v7247_v48 = vld [vmem:[%s13116_s7 + $0x1e8] sm:$0xff] }
0x1907   :  { %v4376_v22 = vpop.f32.mrf.mxu2 }
0x1908   :  { %v4377_v43 = vadd.f32 %v4376_v22, %v4343_v25  ;;  %v7226_v22 = vld [vmem:[%s13115_s6 + $0x60] sm:$0xff] }
0x1909   :  { %4520 = vmatpush.msrb.mxu3 %v7226_v22 }
0x190a   :  { %v11573_v12 = vadd.f32 %v4377_v43, %v11044_v58 }
0x190c   :  { %v4392_v61 = vsel %vm139_vm1, %v11573_v12, 0.0 }
0x190d   :  { %4393 = vadd.xlane.f32.xlu1 %v4392_v61 }
0x190f   :  { %v4379_v46 = vpop.f32.mrf.mxu2 }
0x1910   :  { %v4380_v26 = vadd.f32 %v4379_v46, %v4343_v25 }
0x1912   :  { %v11578_v40 = vadd.f32 %v4380_v26, %v11049_v30 }
0x1914   :  { %v4395_v32 = vsel %vm139_vm1, %v11578_v40, 0.0 }
0x1915   :  { %4396 = vadd.xlane.f32.xlu2 %v4395_v32 }
0x1917   :  { %v4382_v35 = vpop.f32.mrf.mxu2 }
0x1918   :  { %v4383_v62 = vadd.f32 %v4382_v35, %v4343_v25 }
0x191a   :  { %v11583_v20 = vadd.f32 %v4383_v62, %v11054_v56 }
0x191c   :  { %v4398_v58 = vsel %vm139_vm1, %v11583_v20, 0.0 }
0x191d   :  { %4399 = vadd.xlane.f32.xlu0 %v4398_v58 }
0x1978   :  { %v4391_v37 = vpop.xlane.xlu0 %4390 }
0x1979   :  { %v4401_v52 = vmul.f32 %v4391_v37, %v8737_v33 }
0x197b   :  { %v4405_v24 = vsub.f32 %v11568_v60, %v4401_v52 }
0x197d   :  { %v4409_v30 = vmul.f32 %v4405_v24, %v4405_v24 }
0x197f   :  { %v4413_v53 = vsel %vm139_vm1, %v4409_v30, 0.0 }
0x1980   :  { %v4394_v11 = vpop.xlane.xlu1 %4393  ;;  %4414 = vadd.xlane.f32.xlu2 %v4413_v53 }
0x1981   :  { %v4402_v6 = vmul.f32 %v4394_v11, %v8737_v33  ;;  %v7155_v11 = vld [vmem:[%s13117_s8 + $0xb8] sm:$0xff] }
0x1983   :  { %v11592_v19 = vsub.f32 %v11573_v12, %v4402_v6 }
0x1985   :  { %v4410_v56 = vmul.f32 %v11592_v19, %v11592_v19 }
0x1987   :  { %v4416_v38 = vsel %vm139_vm1, %v4410_v56, 0.0 }
0x1988   :  { %4417 = vadd.xlane.f32.xlu1 %v4416_v38  ;;  %v4397_v63 = vpop.xlane.xlu2 %4396 }
0x1989   :  { %v4403_v14 = vmul.f32 %v4397_v63, %v8737_v33  ;;  %v7156_v63 = vld [vmem:[%s13117_s8 + $0xc0] sm:$0xff] }
0x198a   :  { %v11640_v15 = vperm.slane %v7156_v63, 0 }
0x198b   :  { %v11599_v31 = vsub.f32 %v11578_v40, %v4403_v14 }
0x198d   :  { %v4411_v55 = vmul.f32 %v11599_v31, %v11599_v31 }
0x198f   :  { %v4419_v21 = vsel %vm139_vm1, %v4411_v55, 0.0 }
0x1990   :  { %4420 = vadd.xlane.f32.xlu0 %v4419_v21  ;;  %v4400_v42 = vpop.xlane.xlu0 %4399  ;;  %v11632_v21 = vperm.slane %v7155_v11, 0 }
0x1991   :  { %v4404_v17 = vmul.f32 %v4400_v42, %v8737_v33  ;;  %v7249_v42 = vld [vmem:[%s13116_s7 + $0x1f8] sm:$0xff] }
0x1992   :  { %4555 = vmatpush.msra.mxu0 %v7249_v42  ;;  %v7242_v42 = vld [vmem:[%s13116_s7 + $0x1c0] sm:$0xff] }
0x1993   :  { %v11606_v27 = vsub.f32 %v11583_v20, %v4404_v17  ;;  %v7248_v17 = vld [vmem:[%s13116_s7 + $0x1f0] sm:$0xff] }
0x1994   :  { %4556 = vmatpush.msra.mxu0 %v7248_v17 }
0x1995   :  { %v4412_v4 = vmul.f32 %v11606_v27, %v11606_v27 }
0x1996   :  { %4557 = vmatpush.msra.mxu0 %v7247_v48  ;;  %v7240_v48 = vld [vmem:[%s13116_s7 + $0x1b0] sm:$0xff] }
0x1997   :  { %v4422_v25 = vsel %vm139_vm1, %v4412_v4, 0.0 }
0x1998   :  { %4423 = vadd.xlane.f32.xlu2 %v4422_v25 }
0x19f3   :  { %v4415_v43 = vpop.xlane.xlu2 %4414 }
0x19f4   :  { %v4425_v61 = vmul.f32 %v4415_v43, %v8737_v33 }
0x19f6   :  { %v4429_v46 = vadd.f32 1e-05, %v4425_v61 }
0x19f8   :  { %8346 = vrsqrt.f32 %v4429_v46  ;;  %vm4439_vm10 = vweird.f32 %v4429_v46 }
0x19fb   :  { %v4418_v26 = vpop.xlane.xlu1 %4417 }
0x19fc   :  { %v4426_v32 = vmul.f32 %v4418_v26, %v8737_v33  ;;  %v7246_v26 = vld [vmem:[%s13116_s7 + $0x1e0] sm:$0xff] }
0x19fd   :  { %4558 = vmatpush.msra.mxu0 %v7246_v26 }
0x19fe   :  { %v8347_v35 = vpop.eup %8346  ;;  %v4430_v62 = vadd.f32 1e-05, %v4426_v32 }
0x19ff   :  { %v4434_v58 = vmul.f32 %v8347_v35, %v4429_v46  ;;  %vm4440_vm9 = vweird.f32 %v8347_v35 }
0x1a00   :  { %8348 = vrsqrt.f32 %v4430_v62  ;;  %vm4441_vm11 = vmor %vm4439_vm10, %vm4440_vm9  ;;  %vm4449_vm13 = vweird.f32 %v4430_v62 }
0x1a01   :  { %v4435_v37 = vmul.f32 %v8347_v35, %v4434_v58 }
0x1a03   :  { %v4436_v52 = vmul.f32 0.5, %v4435_v37  ;;  %v4421_v30 = vpop.xlane.xlu0 %4420  ;;  %v7245_v37 = vld [vmem:[%s13116_s7 + $0x1d8] sm:$0xff] }
0x1a04   :  { %v4427_v53 = vmul.f32 %v4421_v30, %v8737_v33  ;;  %4559 = vmatpush.msra.mxu0 %v7245_v37 }
0x1a05   :  { %v4437_v6 = vsub.f32 1.5, %v4436_v52 }
0x1a06   :  { %v8349_v56 = vpop.eup %8348  ;;  %v4431_v38 = vadd.f32 1e-05, %v4427_v53  ;;  %v7244_v53 = vld [vmem:[%s13116_s7 + $0x1d0] sm:$0xff] }
0x1a07   :  { %v4438_v14 = vmul.f32 %v8347_v35, %v4437_v6  ;;  %v4444_v55 = vmul.f32 %v8349_v56, %v4430_v62  ;;  %vm4450_vm12 = vweird.f32 %v8349_v56  ;;  %4560 = vmatpush.msra.mxu0 %v7244_v53 }
0x1a08   :  { %8350 = vrsqrt.f32 %v4431_v38  ;;  %vm4451_vm14 = vmor %vm4449_vm13, %vm4450_vm12  ;;  %vm4459_vm3 = vweird.f32 %v4431_v38 }
0x1a09   :  { %v4442_v4 = vsel %vm4441_vm11, %v8347_v35, %v4438_v14  ;;  %v4445_v25 = vmul.f32 %v8349_v56, %v4444_v55  ;;  %v7243_v14 = vld [vmem:[%s13116_s7 + $0x1c8] sm:$0xff] }
0x1a0a   :  { %v4473_v8 = vmul.f32 %v4442_v4, %v4405_v24  ;;  %4561 = vmatpush.msra.mxu0 %v7243_v14 }
0x1a0b   :  { %v4446_v22 = vmul.f32 0.5, %v4445_v25  ;;  %v4424_v43 = vpop.xlane.xlu2 %4423 }
0x1a0c   :  { %v4478_v61 = vmul.f32 %v11632_v21, %v4473_v8  ;;  %v4428_v46 = vmul.f32 %v4424_v43, %v8737_v33  ;;  %4562 = vmatpush.msra.mxu0 %v7242_v42 }
0x1a0d   :  { %v4447_v32 = vsub.f32 1.5, %v4446_v22 }
0x1a0e   :  { %v8351_v35 = vpop.eup %8350  ;;  %v4483_v24 = vadd.f32 %v11640_v15, %v4478_v61  ;;  %v4432_v58 = vadd.f32 1e-05, %v4428_v46  ;;  %v7239_v46 = vld [vmem:[%s13116_s7 + $0x1a8] sm:$0xff] }
0x1a0f   :  { %v4448_v52 = vmul.f32 %v8349_v56, %v4447_v32  ;;  %v4454_v30 = vmul.f32 %v8351_v35, %v4431_v38  ;;  %vm4460_vm2 = vweird.f32 %v8351_v35  ;;  %v7238_v32 = vld [vmem:[%s13116_s7 + $0x1a0] sm:$0xff] }
0x1a10   :  { %8352 = vrsqrt.f32 %v4432_v58  ;;  %7230 = vmatmul.msk.f32.vlgmr.msrb.gmra.mxu3 %vm139_vm1, %v4483_v24  ;;  %vm4461_vm4 = vmor %vm4459_vm3, %vm4460_vm2  ;;  %vm4469_vm6 = vweird.f32 %v4432_v58 }
0x1a11   :  { %v4452_v11 = vsel %vm4451_vm14, %v8349_v56, %v4448_v52  ;;  %v4455_v6 = vmul.f32 %v8351_v35, %v4454_v30 }
0x1a12   :  { %v4474_v63 = vmul.f32 %v4452_v11, %v11592_v19  ;;  %v7241_v19 = vld [vmem:[%s13116_s7 + $0x1b8] sm:$0xff] }
0x1a13   :  { %v4456_v62 = vmul.f32 0.5, %v4455_v6  ;;  %4563 = vmatpush.msra.mxu0 %v7241_v19  ;;  %v7236_v6 = vld [vmem:[%s13116_s7 + $0x190] sm:$0xff] }
0x1a14   :  { %v4479_v55 = vmul.f32 %v11632_v21, %v4474_v63  ;;  %v7234_v63 = vld [vmem:[%s13116_s7 + $0x180] sm:$0xff] }
0x1a15   :  { %v4457_v17 = vsub.f32 1.5, %v4456_v62  ;;  %4564 = vmatpush.msra.mxu0 %v7240_v48 }
0x1a16   :  { %v8353_v56 = vpop.eup %8352  ;;  %v4484_v4 = vadd.f32 %v11640_v15, %v4479_v55 }
0x1a17   :  { %v4458_v25 = vmul.f32 %v8351_v35, %v4457_v17  ;;  %v4464_v8 = vmul.f32 %v8353_v56, %v4432_v58  ;;  %vm4470_vm5 = vweird.f32 %v8353_v56  ;;  %4565 = vmatpush.msra.mxu0 %v7239_v46  ;;  %v7235_v58 = vld [vmem:[%s13116_s7 + $0x188] sm:$0xff] }
0x1a18   :  { %7231 = vmatmul.msk.f32.gmra.mxu3 %vm139_vm1, %v4484_v4  ;;  %vm4471_vm7 = vmor %vm4469_vm6, %vm4470_vm5 }
0x1a19   :  { %v4462_v22 = vsel %vm4461_vm4, %v8351_v35, %v4458_v25  ;;  %v4465_v43 = vmul.f32 %v8353_v56, %v4464_v8  ;;  %4566 = vmatpush.msra.mxu0 %v7238_v32 }
0x1a1a   :  { %v4475_v61 = vmul.f32 %v4462_v22, %v11599_v31  ;;  %v7237_v31 = vld [vmem:[%s13116_s7 + $0x198] sm:$0xff]  ;;  %v7158_v22 = vld [vmem:[%s13117_s8 + $0xd0] sm:$0xff] }
0x1a1b   :  { %v4466_v26 = vmul.f32 0.5, %v4465_v43  ;;  %4567 = vmatpush.msra.mxu0 %v7237_v31  ;;  %v4588_v43 = vperm.slane %v7158_v22, 0 }
0x1a1c   :  { %v4480_v38 = vmul.f32 %v11632_v21, %v4475_v61 }
0x1a1d   :  { %v4467_v24 = vsub.f32 1.5, %v4466_v26  ;;  %4568 = vmatpush.msra.mxu0 %v7236_v6 }
0x1a1e   :  { %v4485_v35 = vadd.f32 %v11640_v15, %v4480_v38 }
0x1a1f   :  { %v4468_v37 = vmul.f32 %v8353_v56, %v4467_v24  ;;  %4569 = vmatpush.msra.mxu0 %v7235_v58 }
0x1a20   :  { %7232 = vmatmul.msk.f32.gmra.mxu3 %vm139_vm1, %v4485_v35 }
0x1a21   :  { %v4472_v52 = vsel %vm4471_vm7, %v8353_v56, %v4468_v37  ;;  %4570 = vmatpush.msra.mxu0 %v7234_v63 }
0x1a22   :  { %v4476_v30 = vmul.f32 %v4472_v52, %v11606_v27  ;;  %v7159_v27 = vld [vmem:[%s13117_s8 + $0xd8] sm:$0xff] }
0x1a24   :  { %v4481_v53 = vmul.f32 %v11632_v21, %v4476_v30  ;;  %v4492_v21 = vperm.slane %v7159_v27, 0 }
0x1a26   :  { %v4486_v11 = vadd.f32 %v11640_v15, %v4481_v53 }
0x1a28   :  { %7233 = vmatmul.msk.f32.gmra.mxu3 %vm139_vm1, %v4486_v11 }
0x1a93   :  { %v4522_v15 = vpop.f32.mrf.mxu3 }
0x1a94   :  { %v4523_v14 = vadd.f32 %v4522_v15, %v4492_v21 }
0x1a96   :  { %v4534_v62 = vmax.f32 %v4523_v14, 0.0 }
0x1a98   :  { %4571 = vmatmul.f32.vlgmr.msra.gmra.mxu0 %v4534_v62 }
0x1a9b   :  { %v4525_v55 = vpop.f32.mrf.mxu3 }
0x1a9c   :  { %v4526_v42 = vadd.f32 %v4525_v55, %v4492_v21 }
0x1a9e   :  { %v4535_v17 = vmax.f32 %v4526_v42, 0.0 }
0x1aa0   :  { %4574 = vmatmul.f32.gmra.mxu0 %v4535_v17 }
0x1aa3   :  { %v4528_v56 = vpop.f32.mrf.mxu3 }
0x1aa4   :  { %v4529_v4 = vadd.f32 %v4528_v56, %v4492_v21 }
0x1aa6   :  { %v4536_v19 = vmax.f32 %v4529_v4, 0.0 }
0x1aa8   :  { %4577 = vmatmul.f32.gmra.mxu0 %v4536_v19 }
0x1aab   :  { %v4531_v25 = vpop.f32.mrf.mxu3 }
0x1aac   :  { %v4532_v8 = vadd.f32 %v4531_v25, %v4492_v21 }
0x1aae   :  { %v4537_v48 = vmax.f32 %v4532_v8, 0.0 }
0x1ab0   :  { %4580 = vmatmul.f32.gmra.mxu0 %v4537_v48 }
0x1b15   :  { %v4572_v61 = vpop.f32.mrf.mxu0 }
0x1b16   :  { %v4584_v46 = vadd.f32 %v4572_v61, %v11568_v60  ;;  %v7263_v61 = vld [vmem:[%s13113_s4 + $0x130] sm:$0xff] }
0x1b17   :  { %4732 = vmatpush.msra.mxu1 %v7263_v61  ;;  %v8550_v61 = vld [vmem:[%s13112_s3 + $0x48] sm:$0xff] }
0x1b18   :  { %v11707_v26 = vadd.f32 %v4588_v43, %v4584_v46  ;;  %v7264_v46 = vld [vmem:[%s13113_s4 + $0x138] sm:$0xff] }
0x1b19   :  { %4761 = vmatpush.msrb.mxu2 %v7264_v46  ;;  %v8551_v46 = vld [vmem:[%s13112_s3 + $0x88] sm:$0xff] }
0x1b1a   :  { %v4601_v38 = vsel %vm139_vm1, %v11707_v26, 0.0 }
0x1b1b   :  { %4602 = vadd.xlane.f32.xlu1 %v4601_v38  ;;  %v7261_v38 = vld [vmem:[%s13113_s4 + $0x120] sm:$0xff] }
0x1b1c   :  { %4733 = vmatpush.msra.mxu1 %v7261_v38 }
0x1b1d   :  { %v4575_v32 = vpop.f32.mrf.mxu0 }
0x1b1e   :  { %v4585_v24 = vadd.f32 %v4575_v32, %v11573_v12  ;;  %v7262_v32 = vld [vmem:[%s13113_s4 + $0x128] sm:$0xff] }
0x1b1f   :  { %4762 = vmatpush.msrb.mxu2 %v7262_v32  ;;  %v8552_v32 = vld [vmem:[%s13112_s3 + $0x40] sm:$0xff] }
0x1b20   :  { %v11712_v35 = vadd.f32 %v4588_v43, %v4585_v24  ;;  %v7259_v24 = vld [vmem:[%s13113_s4 + $0x110] sm:$0xff] }
0x1b21   :  { %4734 = vmatpush.msra.mxu1 %v7259_v24  ;;  %v8553_v24 = vld [vmem:[%s13112_s3 + $0x80] sm:$0xff] }
0x1b22   :  { %v4604_v31 = vsel %vm139_vm1, %v11712_v35, 0.0 }
0x1b23   :  { %4605 = vadd.xlane.f32.xlu0 %v4604_v31  ;;  %v7260_v31 = vld [vmem:[%s13113_s4 + $0x118] sm:$0xff] }
0x1b24   :  { %4763 = vmatpush.msrb.mxu2 %v7260_v31 }
0x1b25   :  { %v4578_v37 = vpop.f32.mrf.mxu0 }
0x1b26   :  { %v4586_v52 = vadd.f32 %v4578_v37, %v11578_v40  ;;  %v7257_v37 = vld [vmem:[%s13113_s4 + $0x100] sm:$0xff] }
0x1b27   :  { %4735 = vmatpush.msra.mxu1 %v7257_v37 }
0x1b28   :  { %v11717_v30 = vadd.f32 %v4588_v43, %v4586_v52  ;;  %v7258_v52 = vld [vmem:[%s13113_s4 + $0x108] sm:$0xff] }
0x1b29   :  { %4764 = vmatpush.msrb.mxu2 %v7258_v52 }
0x1b2a   :  { %v4607_v60 = vsel %vm139_vm1, %v11717_v30, 0.0 }
0x1b2b   :  { %4608 = vadd.xlane.f32.xlu2 %v4607_v60 }
0x1b2d   :  { %v4581_v53 = vpop.f32.mrf.mxu0 }
0x1b2e   :  { %v4587_v11 = vadd.f32 %v4581_v53, %v11583_v20 }
0x1b30   :  { %v11722_v6 = vadd.f32 %v4588_v43, %v4587_v11  ;;  %v8538_v11 = vld [vmem:[%s13112_s3 + $0x78] sm:$0xff] }
0x1b31   :  { %5092 = vmatpush.msrb.mxu1 %v8538_v11 }
0x1b32   :  { %v4610_v12 = vsel %vm139_vm1, %v11722_v6, 0.0 }
0x1b33   :  { %4611 = vadd.xlane.f32.xlu1 %v4610_v12  ;;  %v8539_v12 = vld [vmem:[%s13112_s3 + $0xb8] sm:$0xff] }
0x1b34   :  { %5129 = vmatpush.msra.mxu2 %v8539_v12 }
0x1b8e   :  { %v4603_v58 = vpop.xlane.xlu1 %4602 }
0x1b8f   :  { %v4613_v63 = vmul.f32 %v4603_v58, %v8737_v33 }
0x1b91   :  { %v11728_v40 = vsub.f32 %v11707_v26, %v4613_v63  ;;  %v8540_v63 = vld [vmem:[%s13112_s3 + $0x70] sm:$0xff] }
0x1b92   :  { %5093 = vmatpush.msrb.mxu1 %v8540_v63 }
0x1b93   :  { %v4621_v27 = vmul.f32 %v11728_v40, %v11728_v40 }
0x1b95   :  { %v4625_v21 = vsel %vm139_vm1, %v4621_v27, 0.0  ;;  %v8541_v27 = vld [vmem:[%s13112_s3 + $0xb0] sm:$0xff] }
0x1b96   :  { %4626 = vadd.xlane.f32.xlu0 %v4625_v21  ;;  %v4606_v15 = vpop.xlane.xlu0 %4605  ;;  %5130 = vmatpush.msra.mxu2 %v8541_v27  ;;  %v8542_v21 = vld [vmem:[%s13112_s3 + $0x68] sm:$0xff]  ;;  %v8555_v27 = vld [vmem:[%s13112_s3 + $0x30] sm:$0xff] }
0x1b97   :  { %v4614_v20 = vmul.f32 %v4606_v15, %v8737_v33  ;;  %5094 = vmatpush.msrb.mxu1 %v8542_v21  ;;  %v8543_v15 = vld [vmem:[%s13112_s3 + $0xa8] sm:$0xff] }
0x1b98   :  { %5131 = vmatpush.msra.mxu2 %v8543_v15  ;;  %v7251_v21 = vld [vmem:[%s13117_s8 + $0xe8] sm:$0xff] }
0x1b99   :  { %v11735_v14 = vsub.f32 %v11712_v35, %v4614_v20  ;;  %v8544_v20 = vld [vmem:[%s13112_s3 + $0x60] sm:$0xff] }
0x1b9a   :  { %5095 = vmatpush.msrb.mxu1 %v8544_v20 }
0x1b9b   :  { %v4622_v62 = vmul.f32 %v11735_v14, %v11735_v14 }
0x1b9d   :  { %v4628_v55 = vsel %vm139_vm1, %v4622_v62, 0.0  ;;  %v8545_v62 = vld [vmem:[%s13112_s3 + $0xa0] sm:$0xff] }
0x1b9e   :  { %v4609_v42 = vpop.xlane.xlu2 %4608  ;;  %4629 = vadd.xlane.f32.xlu2 %v4628_v55  ;;  %5132 = vmatpush.msra.mxu2 %v8545_v62 }
0x1b9f   :  { %v4615_v17 = vmul.f32 %v4609_v42, %v8737_v33 }
0x1ba1   :  { %v11742_v56 = vsub.f32 %v11717_v30, %v4615_v17  ;;  %v8546_v17 = vld [vmem:[%s13112_s3 + $0x58] sm:$0xff] }
0x1ba2   :  { %5096 = vmatpush.msrb.mxu1 %v8546_v17 }
0x1ba3   :  { %v4623_v4 = vmul.f32 %v11742_v56, %v11742_v56 }
0x1ba5   :  { %v4631_v19 = vsel %vm139_vm1, %v4623_v4, 0.0  ;;  %v8547_v4 = vld [vmem:[%s13112_s3 + $0x98] sm:$0xff] }
0x1ba6   :  { %4632 = vadd.xlane.f32.xlu1 %v4631_v19  ;;  %v4612_v25 = vpop.xlane.xlu1 %4611  ;;  %5133 = vmatpush.msra.mxu2 %v8547_v4  ;;  %v4694_v4 = vperm.slane %v7251_v21, 0 }
0x1ba7   :  { %v4616_v8 = vmul.f32 %v4612_v25, %v8737_v33 }
0x1ba9   :  { %v11749_v48 = vsub.f32 %v11722_v6, %v4616_v8  ;;  %v8548_v8 = vld [vmem:[%s13112_s3 + $0x50] sm:$0xff] }
0x1baa   :  { %5097 = vmatpush.msrb.mxu1 %v8548_v8 }
0x1bab   :  { %v4624_v22 = vmul.f32 %v11749_v48, %v11749_v48 }
0x1bac   :  { %5098 = vmatpush.msrb.mxu1 %v8550_v61 }
0x1bad   :  { %v4634_v43 = vsel %vm139_vm1, %v4624_v22, 0.0  ;;  %v8549_v22 = vld [vmem:[%s13112_s3 + $0x90] sm:$0xff] }
0x1bae   :  { %4635 = vadd.xlane.f32.xlu0 %v4634_v43  ;;  %5134 = vmatpush.msra.mxu2 %v8549_v22  ;;  %v8557_v22 = vld [vmem:[%s13112_s3 + $0x20] sm:$0xff] }
0x1baf   :  { %5099 = vmatpush.msrb.mxu1 %v8552_v32 }
0x1bb0   :  { %5135 = vmatpush.msra.mxu2 %v8551_v46 }
0x1bb2   :  { %5136 = vmatpush.msra.mxu2 %v8553_v24 }
0x1c09   :  { %v4627_v60 = vpop.xlane.xlu0 %4626 }
0x1c0a   :  { %v4637_v53 = vmul.f32 %v4627_v60, %v8737_v33  ;;  %v8554_v60 = vld [vmem:[%s13112_s3 + $0x38] sm:$0xff] }
0x1c0b   :  { %5100 = vmatpush.msrb.mxu1 %v8554_v60 }
0x1c0c   :  { %v4641_v58 = vadd.f32 1e-05, %v4637_v53  ;;  %v7250_v53 = vld [vmem:[%s13117_s8 + $0xe0] sm:$0xff] }
0x1c0d   :  { %5101 = vmatpush.msrb.mxu1 %v8555_v27  ;;  %v11841_v62 = vperm.slane %v7250_v53, 0 }
0x1c0e   :  { %8354 = vrsqrt.f32 %v4641_v58  ;;  %vm4651_vm9 = vweird.f32 %v4641_v58 }
0x1c11   :  { %v4630_v55 = vpop.xlane.xlu2 %4629 }
0x1c12   :  { %v4638_v42 = vmul.f32 %v4630_v55, %v8737_v33  ;;  %v8556_v55 = vld [vmem:[%s13112_s3 + $0x28] sm:$0xff] }
0x1c13   :  { %5102 = vmatpush.msrb.mxu1 %v8556_v55 }
0x1c14   :  { %v8355_v19 = vpop.eup %8354  ;;  %v4642_v25 = vadd.f32 1e-05, %v4638_v42 }
0x1c15   :  { %v4646_v43 = vmul.f32 %v8355_v19, %v4641_v58  ;;  %vm4652_vm8 = vweird.f32 %v8355_v19  ;;  %5103 = vmatpush.msrb.mxu1 %v8557_v22 }
0x1c16   :  { %8356 = vrsqrt.f32 %v4642_v25  ;;  %vm4653_vm10 = vmor %vm4651_vm9, %vm4652_vm8  ;;  %vm4661_vm12 = vweird.f32 %v4642_v25 }
0x1c17   :  { %v4647_v38 = vmul.f32 %v8355_v19, %v4646_v43 }
0x1c19   :  { %v4648_v31 = vmul.f32 0.5, %v4647_v38  ;;  %v4633_v37 = vpop.xlane.xlu1 %4632  ;;  %v8558_v38 = vld [vmem:[%s13112_s3 + $0x18] sm:$0xff] }
0x1c1a   :  { %v4639_v52 = vmul.f32 %v4633_v37, %v8737_v33  ;;  %5104 = vmatpush.msrb.mxu1 %v8558_v38 }
0x1c1b   :  { %v4649_v11 = vsub.f32 1.5, %v4648_v31  ;;  %v8559_v31 = vld [vmem:[%s13112_s3 + $0x10] sm:$0xff] }
0x1c1c   :  { %v8357_v12 = vpop.eup %8356  ;;  %v4643_v63 = vadd.f32 1e-05, %v4639_v52  ;;  %5105 = vmatpush.msrb.mxu1 %v8559_v31 }
0x1c1d   :  { %v4650_v15 = vmul.f32 %v8355_v19, %v4649_v11  ;;  %v4656_v20 = vmul.f32 %v8357_v12, %v4642_v25  ;;  %vm4662_vm11 = vweird.f32 %v8357_v12  ;;  %v8560_v11 = vld [vmem:[%s13112_s3 + $0x8] sm:$0xff]  ;;  %v8561_v25 = vld [vmem:[%s13112_s3] sm:$0xff] }
0x1c1e   :  { %8358 = vrsqrt.f32 %v4643_v63  ;;  %vm4663_vm13 = vmor %vm4661_vm12, %vm4662_vm11  ;;  %5106 = vmatpush.msrb.mxu1 %v8560_v11  ;;  %vm4671_vm2 = vweird.f32 %v4643_v63 }
0x1c1f   :  { %v4654_v42 = vsel %vm4653_vm10, %v8355_v19, %v4650_v15  ;;  %v4657_v17 = vmul.f32 %v8357_v12, %v4656_v20 }
0x1c20   :  { %v4685_v8 = vmul.f32 %v4654_v42, %v11728_v40  ;;  %5107 = vmatpush.msrb.mxu1 %v8561_v25 }
0x1c21   :  { %v4658_v58 = vmul.f32 0.5, %v4657_v17  ;;  %v4636_v43 = vpop.xlane.xlu0 %4635 }
0x1c22   :  { %v4690_v61 = vmul.f32 %v11841_v62, %v4685_v8  ;;  %v4640_v46 = vmul.f32 %v4636_v43, %v8737_v33 }
0x1c23   :  { %v4659_v19 = vsub.f32 1.5, %v4658_v58 }
0x1c24   :  { %v8359_v32 = vpop.eup %8358  ;;  %v4695_v40 = vadd.f32 %v4694_v4, %v4690_v61  ;;  %v4644_v24 = vadd.f32 1e-05, %v4640_v46 }
0x1c25   :  { %v4660_v37 = vmul.f32 %v8357_v12, %v4659_v19  ;;  %v4666_v52 = vmul.f32 %v8359_v32, %v4643_v63  ;;  %vm4672_vm14 = vweird.f32 %v8359_v32 }
0x1c26   :  { %8360 = vrsqrt.f32 %v4644_v24  ;;  %7265 = vmatmul.msk.f32.vlgmr.msra.gmra.mxu1 %vm139_vm1, %v4695_v40  ;;  %7269 = vmatmul.msk.f32.vlgmr.msrb.gmra.mxu2 %vm139_vm1, %v4695_v40  ;;  %vm4673_vm3 = vmor %vm4671_vm2, %vm4672_vm14  ;;  %vm4681_vm5 = vweird.f32 %v4644_v24 }
0x1c27   :  { %v4664_v60 = vsel %vm4663_vm13, %v8357_v12, %v4660_v37  ;;  %v4667_v53 = vmul.f32 %v8359_v32, %v4666_v52 }
0x1c28   :  { %v4686_v27 = vmul.f32 %v4664_v60, %v11735_v14 }
0x1c29   :  { %v4668_v21 = vmul.f32 0.5, %v4667_v53 }
0x1c2a   :  { %v4691_v15 = vmul.f32 %v11841_v62, %v4686_v27 }
0x1c2b   :  { %v4669_v20 = vsub.f32 1.5, %v4668_v21 }
0x1c2c   :  { %v8361_v55 = vpop.eup %8360  ;;  %v4696_v12 = vadd.f32 %v4694_v4, %v4691_v15 }
0x1c2d   :  { %v4670_v42 = vmul.f32 %v8359_v32, %v4669_v20  ;;  %v4676_v17 = vmul.f32 %v8361_v55, %v4644_v24  ;;  %vm4682_vm4 = vweird.f32 %v8361_v55 }
0x1c2e   :  { %7266 = vmatmul.msk.f32.gmra.mxu1 %vm139_vm1, %v4696_v12  ;;  %7270 = vmatmul.msk.f32.gmra.mxu2 %vm139_vm1, %v4696_v12  ;;  %vm4683_vm6 = vmor %vm4681_vm5, %vm4682_vm4 }
0x1c2f   :  { %v4674_v14 = vsel %vm4673_vm3, %v8359_v32, %v4670_v42  ;;  %v4677_v8 = vmul.f32 %v8361_v55, %v4676_v17 }
0x1c30   :  { %v4687_v22 = vmul.f32 %v4674_v14, %v11742_v56 }
0x1c31   :  { %v4678_v58 = vmul.f32 0.5, %v4677_v8 }
0x1c32   :  { %v4692_v43 = vmul.f32 %v11841_v62, %v4687_v22 }
0x1c33   :  { %v4679_v61 = vsub.f32 1.5, %v4678_v58 }
0x1c34   :  { %v4697_v46 = vadd.f32 %v4694_v4, %v4692_v43 }
0x1c35   :  { %v4680_v38 = vmul.f32 %v8361_v55, %v4679_v61 }
0x1c36   :  { %7267 = vmatmul.msk.f32.gmra.mxu1 %vm139_vm1, %v4697_v46  ;;  %7271 = vmatmul.msk.f32.gmra.mxu2 %vm139_vm1, %v4697_v46 }
0x1c37   :  { %v4684_v63 = vsel %vm4683_vm6, %v8361_v55, %v4680_v38 }
0x1c38   :  { %v4688_v19 = vmul.f32 %v4684_v63, %v11749_v48 }
0x1c3a   :  { %v4693_v32 = vmul.f32 %v11841_v62, %v4688_v19 }
0x1c3c   :  { %v4698_v40 = vadd.f32 %v4694_v4, %v4693_v32 }
0x1c3e   :  { %7268 = vmatmul.msk.f32.gmra.mxu1 %vm139_vm1, %v4698_v40  ;;  %7272 = vmatmul.msk.f32.gmra.mxu2 %vm139_vm1, %v4698_v40  ;;  %v13368_v40 = vld [vmem:[#allocation18_spill] sm:$0xff] }
0x1ca3   :  { %v11878_v56 = vpop.f32.mrf.mxu1 }
0x1ca4   :  { %v4790_v53 = vmul.f32 %v11878_v56, %v9035_v1  ;;  %v4786_v27 = vmul.f32 %v11878_v56, %v9119_v16  ;;  %v4782_v15 = vmul.f32 %v11878_v56, %v9054_v9  ;;  %v4798_v8 = vmul.f32 %v11878_v56, %v13298_v49 }
0x1ca5   :  { %v4794_v46 = vmul.f32 %v11878_v56, %v13325_v54 }
0x1ca9   :  { %v11928_v42 = vpop.f32.mrf.mxu2 }
0x1cab   :  { %v11880_v31 = vpop.f32.mrf.mxu1 }
0x1cac   :  { %v4791_v24 = vmul.f32 %v11880_v31, %v9039_v3  ;;  %v4787_v21 = vmul.f32 %v11880_v31, %v9043_v51  ;;  %v4783_v25 = vmul.f32 %v11880_v31, %v9045_v7  ;;  %v4799_v55 = vmul.f32 %v11880_v31, %v9078_v41 }
0x1cad   :  { %v4779_v61 = vmul.f32 %v11880_v31, %v13324_v10  ;;  %v4795_v19 = vmul.f32 %v11880_v31, %v13327_v13 }
0x1cae   :  { %4900 = vrot.lane.b32.xlu0 %v4791_v24, %s8630_s13  ;;  %v4827_v24 = vmul.f32 %v11928_v42, %v13368_v40 }
0x1cb1   :  { %v11939_v22 = vpop.f32.mrf.mxu2 }
0x1cb3   :  { %v11885_v37 = vpop.f32.mrf.mxu1 }
0x1cb4   :  { %v4792_v48 = vmul.f32 %v11885_v37, %v9066_v23  ;;  %v4788_v4 = vmul.f32 %v11885_v37, %v9037_v2  ;;  %v4784_v20 = vmul.f32 %v11885_v37, %v9047_v45  ;;  %v4800_v17 = vmul.f32 %v11885_v37, %v9062_v18 }
0x1cb5   :  { %v4780_v14 = vmul.f32 %v11885_v37, %v13297_v5  ;;  %v4796_v58 = vmul.f32 %v11885_v37, %v13300_v59 }
0x1cb6   :  { %4902 = vrot.lane.b32.xlu1 %v4792_v48, %s8630_s13  ;;  %v4830_v48 = vmul.f32 %v11885_v37, %v13328_v47 }
0x1cb9   :  { %v11954_v63 = vpop.f32.mrf.mxu2 }
0x1cba   :  { %v4831_v32 = vmul.f32 %v11954_v63, %v13328_v47 }
0x1cbb   :  { %v11890_v62 = vpop.f32.mrf.mxu1 }
0x1cbc   :  { %v4793_v52 = vmul.f32 %v11890_v62, %v9033_v0  ;;  %v4789_v60 = vmul.f32 %v11890_v62, %v9104_v44  ;;  %v4785_v11 = vmul.f32 %v11890_v62, %v9041_v36  ;;  %v4801_v12 = vmul.f32 %v11890_v62, %v13295_v28 }
0x1cbd   :  { %v4781_v43 = vmul.f32 %v11890_v62, %v9074_v29  ;;  %v4797_v38 = vmul.f32 %v11890_v62, %v13326_v39 }
0x1cbe   :  { %4894 = vrot.lane.b32.xlu1 %v4788_v4, %s8630_s13  ;;  %4904 = vrot.lane.b32.xlu2 %v4793_v52, %s8630_s13  ;;  %v4826_v4 = vmul.f32 %v11878_v56, %v13368_v40  ;;  %v7952_v52 = vpack.i.bf16 %v4831_v32, %v4830_v48  ;;  %v13375_v32 = vld [vmem:[#allocation20_spill] sm:$0xff] }
0x1cbf   :  { %4896 = vrot.lane.b32.xlu0 %v4789_v60, %s8630_s13  ;;  %v13369_v60 = vld [vmem:[#allocation9_spill] sm:$0xff] }
0x1cc6   :  { %4898 = vrot.lane.b32.xlu2 %v4790_v53, %s8630_s13  ;;  %4888 = vrot.lane.b32.xlu1 %v4785_v11, %s8630_s13  ;;  %v4778_v53 = vmul.f32 %v11878_v56, %v13369_v60  ;;  %v7962_v11 = vpack.i.bf16 %v4827_v24, %v4826_v4  ;;  %v4821_v24 = vmul.f32 %v11939_v22, %v13375_v32 }
0x1cc7   :  { %4890 = vrot.lane.b32.xlu0 %v4786_v27, %s8630_s13  ;;  %v13370_v27 = vld [vmem:[#allocation27_spill] sm:$0xff] }
0x1cce   :  { %4892 = vrot.lane.b32.xlu2 %v4787_v21, %s8630_s13  ;;  %4884 = vrot.lane.b32.xlu1 %v4783_v25, %s8630_s13  ;;  %v4815_v21 = vmul.f32 %v11954_v63, %v13370_v27  ;;  %v13371_v25 = vld [vmem:[#allocation14_spill] sm:$0xff] }
0x1ccf   :  { %4882 = vrot.lane.b32.xlu0 %v4782_v15, %s8630_s13  ;;  %v4829_v15 = vmul.f32 %v11939_v22, %v13371_v25 }
0x1cd6   :  { %4886 = vrot.lane.b32.xlu2 %v4784_v20, %s8630_s13  ;;  %4916 = vrot.lane.b32.xlu1 %v4799_v55, %s8630_s13  ;;  %v13372_v20 = vld [vmem:[#allocation15_spill] sm:$0xff] }
0x1cd7   :  { %4920 = vrot.lane.b32.xlu0 %v4801_v12, %s8630_s13  ;;  %v4823_v55 = vmul.f32 %v11954_v63, %v13372_v20  ;;  %v4814_v12 = vmul.f32 %v11885_v37, %v13370_v27 }
0x1cde   :  { %4918 = vrot.lane.b32.xlu2 %v4800_v17, %s8630_s13  ;;  %4878 = vrot.lane.b32.xlu1 %v4780_v14, %s8630_s13  ;;  %v4828_v17 = vmul.f32 %v11880_v31, %v13371_v25  ;;  %v4822_v14 = vmul.f32 %v11885_v37, %v13372_v20 }
0x1cdf   :  { %4914 = vrot.lane.b32.xlu0 %v4798_v8, %s8630_s13  ;;  %v7982_v8 = vpack.i.bf16 %v4815_v21, %v4814_v12  ;;  %v13377_v12 = vld [vmem:[#allocation26_spill] sm:$0xff] }
0x1ce6   :  { %4910 = vrot.lane.b32.xlu1 %v4796_v58, %s8630_s13  ;;  %4880 = vrot.lane.b32.xlu2 %v4781_v43, %s8630_s13  ;;  %v7957_v58 = vpack.i.bf16 %v4829_v15, %v4828_v17  ;;  %v7967_v43 = vpack.i.bf16 %v4823_v55, %v4822_v14  ;;  %v13376_v15 = vld [vmem:[#allocation28_spill] sm:$0xff]  ;;  %v4819_v17 = vmul.f32 %v11928_v42, %v13377_v12 }
0x1ce7   :  { %4876 = vrot.lane.b32.xlu0 %v4779_v61, %s8630_s13  ;;  %v13373_v61 = vld [vmem:[#allocation25_spill] sm:$0xff]  ;;  %v4843_v55 = vmul.f32 %v11928_v42, %v13376_v15  ;;  %v4842_v14 = vmul.f32 %v11878_v56, %v13376_v15 }
0x1ce8   :  { %v4812_v48 = vmul.f32 %v11880_v31, %v13373_v61 }
0x1cee   :  { %4906 = vrot.lane.b32.xlu1 %v4794_v46, %s8630_s13  ;;  %4912 = vrot.lane.b32.xlu2 %v4797_v38, %s8630_s13  ;;  %v4813_v46 = vmul.f32 %v11939_v22, %v13373_v61  ;;  %v13374_v38 = vld [vmem:[#allocation21_spill] sm:$0xff] }
0x1cef   :  { %4908 = vrot.lane.b32.xlu0 %v4795_v19, %s8630_s13  ;;  %v4811_v19 = vmul.f32 %v11928_v42, %v13374_v38  ;;  %v4810_v4 = vmul.f32 %v11878_v56, %v13374_v38 }
0x1cf6   :  { %7953 = vrot.lane.b32.xlu1 %v7952_v52, %s8632_s18  ;;  %4874 = vrot.lane.b32.xlu2 %v4778_v53, %s8630_s13  ;;  %v4820_v52 = vmul.f32 %v11880_v31, %v13375_v32  ;;  %v7992_v53 = vpack.i.bf16 %v4813_v46, %v4812_v48  ;;  %v13378_v46 = vld [vmem:[#allocation34_spill] sm:$0xff] }
0x1cf7   :  { %7963 = vrot.lane.b32.xlu0 %v7962_v11, %s8632_s18  ;;  %v8002_v11 = vpack.i.bf16 %v4811_v19, %v4810_v4  ;;  %v4839_v19 = vmul.f32 %v11954_v63, %v13378_v46  ;;  %v4838_v4 = vmul.f32 %v11885_v37, %v13378_v46 }
0x1cf8   :  { %v7972_v21 = vpack.i.bf16 %v4821_v24, %v4820_v52  ;;  %v13379_v24 = vld [vmem:[#allocation19_spill] sm:$0xff] }
0x1cf9   :  { %v4847_v48 = vmul.f32 %v11954_v63, %v13379_v24  ;;  %v4846_v52 = vmul.f32 %v11885_v37, %v13379_v24 }
0x1cfe   :  { %7983 = vrot.lane.b32.xlu1 %v7982_v8, %s8632_s18  ;;  %7958 = vrot.lane.b32.xlu2 %v7957_v58, %s8632_s18  ;;  %v4818_v8 = vmul.f32 %v11878_v56, %v13377_v12  ;;  %v8007_v58 = vpack.i.bf16 %v4843_v55, %v4842_v14 }
0x1cff   :  { %7968 = vrot.lane.b32.xlu0 %v7967_v43, %s8632_s18 }
0x1d00   :  { %v7977_v43 = vpack.i.bf16 %v4819_v17, %v4818_v8  ;;  %v13380_v17 = vld [vmem:[#allocation16_spill] sm:$0xff]  ;;  %v13381_v8 = vld [vmem:[#allocation29_spill] sm:$0xff] }
0x1d06   :  { %7993 = vrot.lane.b32.xlu1 %v7992_v53, %s8632_s18  ;;  %8003 = vrot.lane.b32.xlu2 %v8002_v11, %s8632_s18  ;;  %v8017_v53 = vpack.i.bf16 %v4839_v19, %v4838_v4  ;;  %v4775_v11 = vpop.f32.mrf.mxu2  ;;  %v4844_v19 = vmul.f32 %v11880_v31, %v13381_v8 }
0x1d07   :  { %7973 = vrot.lane.b32.xlu0 %v7972_v21, %s8632_s18  ;;  %v7987_v21 = vpack.i.bf16 %v4847_v48, %v4846_v52  ;;  %v4833_v14 = vmul.f32 %v4775_v11, %v13380_v17  ;;  %v13382_v52 = vld [vmem:[#allocation24_spill] sm:$0xff] }
0x1d08   :  { %v4824_v46 = vmul.f32 %v11890_v62, %v13382_v52 }
0x1d0e   :  { %8008 = vrot.lane.b32.xlu1 %v8007_v58, %s8632_s18  ;;  %v4845_v58 = vmul.f32 %v11939_v22, %v13381_v8 }
0x1d0f   :  { %7978 = vrot.lane.b32.xlu0 %v7977_v43, %s8632_s18  ;;  %v4832_v43 = vmul.f32 %v11890_v62, %v13380_v17 }
0x1d10   :  { %v7997_v48 = vpack.i.bf16 %v4845_v58, %v4844_v19  ;;  %v13384_v58 = vld [vmem:[#allocation17_spill] sm:$0xff] }
0x1d11   :  { %v8027_v4 = vpack.i.bf16 %v4833_v14, %v4832_v43  ;;  %v4817_v43 = vmul.f32 %v4775_v11, %v13384_v58 }
0x1d16   :  { %8018 = vrot.lane.b32.xlu1 %v8017_v53, %s8632_s18  ;;  %v4825_v53 = vmul.f32 %v4775_v11, %v13382_v52 }
0x1d17   :  { %7988 = vrot.lane.b32.xlu0 %v7987_v21, %s8632_s18  ;;  %v13383_v21 = vld [vmem:[#allocation31_spill] sm:$0xff] }
0x1d18   :  { %v4905_v55 = vpop.permute.xlu2 %4904  ;;  %v4806_v17 = vmul.f32 %v11885_v37, %v13383_v21  ;;  %v8032_v61 = vpack.i.bf16 %v4825_v53, %v4824_v46 }
0x1d19   :  { %7273 = vmatpush.xpose.msk.msra.mxu3 %vm635_vm15, %v4905_v55  ;;  %v4807_v55 = vmul.f32 %v11954_v63, %v13383_v21  ;;  %v13385_v63 = vld [vmem:[#allocation33_spill] sm:$0xff]  ;;  %v13387_v21 = vld [vmem:[#allocation23_spill] sm:$0xff] }
0x1d1a   :  { %v4804_v46 = vmul.f32 %v11880_v31, %v13385_v63 }
0x1d1b   :  { %v8012_v15 = vpack.i.bf16 %v4807_v55, %v4806_v17  ;;  %v13386_v55 = vld [vmem:[#allocation30_spill] sm:$0xff] }
0x1d1e   :  { %8028 = vrot.lane.b32.xlu1 %v8027_v4, %s8632_s18  ;;  %v4805_v4 = vmul.f32 %v11939_v22, %v13385_v63  ;;  %v4840_v63 = vmul.f32 %v11890_v62, %v13386_v55 }
0x1d1f   :  { %7998 = vrot.lane.b32.xlu0 %v7997_v48, %s8632_s18  ;;  %v4816_v48 = vmul.f32 %v11890_v62, %v13384_v58  ;;  %v4849_v58 = vmul.f32 %v4775_v11, %v13387_v21 }
0x1d20   :  { %v4899_v38 = vpop.permute.xlu2 %4898  ;;  %v4901_v19 = vpop.permute.xlu0 %4900 }
0x1d21   :  { %v8037_v17 = vpack.i.bf16 %v4817_v43, %v4816_v48  ;;  %v4848_v43 = vmul.f32 %v11890_v62, %v13387_v21 }
0x1d26   :  { %8033 = vrot.lane.b32.xlu1 %v8032_v61, %s8632_s18  ;;  %v8022_v61 = vpack.i.bf16 %v4805_v4, %v4804_v46  ;;  %v8042_v4 = vpack.i.bf16 %v4849_v58, %v4848_v43 }
0x1d27   :  { %8013 = vrot.lane.b32.xlu0 %v8012_v15, %s8632_s18 }
0x1d28   :  { %v4903_v14 = vpop.permute.xlu1 %4902  ;;  %v4893_v15 = vpop.permute.xlu2 %4892 }
0x1d29   :  { %7274 = vmatpush.xpose.msk.msra.mxu3 %vm635_vm15, %v4903_v14  ;;  %v4841_v14 = vmul.f32 %v4775_v11, %v13386_v55 }
0x1d2d   :  { %7275 = vmatpush.xpose.msk.msra.mxu3 %vm635_vm15, %v4901_v19  ;;  %v8052_v19 = vpack.i.bf16 %v4841_v14, %v4840_v63 }
0x1d2e   :  { %8038 = vrot.lane.b32.xlu1 %v8037_v17, %s8632_s18 }
0x1d2f   :  { %8023 = vrot.lane.b32.xlu0 %v8022_v61, %s8632_s18 }
0x1d30   :  { %v4895_v53 = vpop.permute.xlu1 %4894  ;;  %v4887_v48 = vpop.permute.xlu2 %4886 }
0x1d31   :  { %v4897_v52 = vpop.permute.xlu0 %4896  ;;  %7276 = vmatpush.xpose.msk.msra.mxu3 %vm635_vm15, %v4899_v38  ;;  %v13388_v38 = vld [vmem:[#allocation32_spill] sm:$0xff] }
0x1d32   :  { %v4809_v61 = vmul.f32 %v4775_v11, %v13388_v38  ;;  %v4808_v55 = vmul.f32 %v11890_v62, %v13388_v38 }
0x1d34   :  { %v8047_v63 = vpack.i.bf16 %v4809_v61, %v4808_v55 }
0x1d35   :  { %7277 = vmatpush.xpose.msk.msra.mxu3 %vm635_vm15, %v4897_v52 }
0x1d36   :  { %8053 = vrot.lane.b32.xlu1 %v8052_v19, %s8632_s18 }
0x1d37   :  { %8043 = vrot.lane.b32.xlu0 %v8042_v4, %s8632_s18 }
0x1d38   :  { %v4889_v46 = vpop.permute.xlu1 %4888  ;;  %v4919_v14 = vpop.permute.xlu2 %4918 }
0x1d39   :  { %v4891_v17 = vpop.permute.xlu0 %4890  ;;  %7278 = vmatpush.xpose.msk.msra.mxu3 %vm635_vm15, %v4895_v53 }
0x1d3d   :  { %7279 = vmatpush.xpose.msk.msra.mxu3 %vm635_vm15, %v4893_v15 }
0x1d3f   :  { %8048 = vrot.lane.b32.xlu0 %v8047_v63, %s8632_s18 }
0x1d40   :  { %v4885_v52 = vpop.permute.xlu1 %4884  ;;  %v4881_v11 = vpop.permute.xlu2 %4880 }
0x1d41   :  { %v4883_v58 = vpop.permute.xlu0 %4882  ;;  %7280 = vmatpush.xpose.msk.msra.mxu3 %vm635_vm15, %v4891_v17 }
0x1d45   :  { %7281 = vmatpush.xpose.msk.msra.mxu3 %vm635_vm15, %v4889_v46 }
0x1d48   :  { %v4917_v43 = vpop.permute.xlu1 %4916  ;;  %v4913_v55 = vpop.permute.xlu2 %4912 }
0x1d49   :  { %v4921_v19 = vpop.permute.xlu0 %4920  ;;  %7282 = vmatpush.xpose.msk.msra.mxu3 %vm635_vm15, %v4887_v48 }
0x1d4a   :  { %7293 = vmatpush.xpose.msk.msrb.mxu0 %vm635_vm15, %v4921_v19 }
0x1d4d   :  { %7283 = vmatpush.xpose.msk.msra.mxu3 %vm635_vm15, %v4885_v52 }
0x1d4e   :  { %7294 = vmatpush.xpose.msk.msrb.mxu0 %vm635_vm15, %v4919_v14 }
0x1d50   :  { %v4879_v15 = vpop.permute.xlu1 %4878  ;;  %v4875_v46 = vpop.permute.xlu2 %4874 }
0x1d51   :  { %v4915_v53 = vpop.permute.xlu0 %4914  ;;  %7284 = vmatpush.xpose.msk.msra.mxu3 %vm635_vm15, %v4883_v58 }
0x1d52   :  { %7295 = vmatpush.xpose.msk.msrb.mxu0 %vm635_vm15, %v4917_v43 }
0x1d55   :  { %7285 = vmatpush.xpose.msk.msra.mxu3 %vm635_vm15, %v4881_v11 }
0x1d56   :  { %7296 = vmatpush.xpose.msk.msrb.mxu0 %vm635_vm15, %v4915_v53 }
0x1d58   :  { %v4911_v4 = vpop.permute.xlu1 %4910 }
0x1d59   :  { %v4877_v48 = vpop.permute.xlu0 %4876  ;;  %7286 = vmatpush.xpose.msk.msra.mxu3 %vm635_vm15, %v4879_v15 }
0x1d5a   :  { %7297 = vmatpush.xpose.msk.msrb.mxu0 %vm635_vm15, %v4913_v55 }
0x1d5d   :  { %7287 = vmatpush.xpose.msk.msra.mxu3 %vm635_vm15, %v4877_v48 }
0x1d5e   :  { %7298 = vmatpush.xpose.msk.msrb.mxu0 %vm635_vm15, %v4911_v4  ;;  %v7959_v4 = vpop.permute.xlu2 %7958 }
0x1d5f   :  { %v7961_v27 = vunpack.i.h.bf16 %v7959_v4  ;;  %v7960_v8 = vunpack.i.l.bf16 %v7959_v4 }
0x1d60   :  { %v4907_v17 = vpop.permute.xlu1 %4906 }
0x1d61   :  { %v4909_v61 = vpop.permute.xlu0 %4908  ;;  %7288 = vmatpush.xpose.msk.msra.mxu3 %vm635_vm15, %v4875_v46  ;;  %v5307_v32 = vsel %vm139_vm1, %v7960_v8, %v7961_v27 }
0x1d62   :  { %7299 = vmatpush.xpose.msk.msrb.mxu0 %vm635_vm15, %v4909_v61 }
0x1d64   :  { %7289 = vmatmul.msk.f32.vlgmr.msra.gmra.mxu3 %vm635_vm15, %v11878_v56 }
0x1d66   :  { %7300 = vmatpush.xpose.msk.msrb.mxu0 %vm635_vm15, %v4907_v17 }
0x1d68   :  { %v7954_v63 = vpop.permute.xlu1 %7953 }
0x1d69   :  { %7301 = vmatmul.msk.f32.vlgmr.msrb.gmra.mxu0 %vm635_vm15, %v11878_v56  ;;  %v7964_v52 = vpop.permute.xlu0 %7963  ;;  %v7956_v46 = vunpack.i.h.bf16 %v7954_v63  ;;  %v7955_v17 = vunpack.i.l.bf16 %v7954_v63 }
0x1d6a   :  { %v7966_v38 = vunpack.i.h.bf16 %v7964_v52  ;;  %v7965_v24 = vunpack.i.l.bf16 %v7964_v52 }
0x1d6c   :  { %7290 = vmatmul.msk.f32.gmra.mxu3 %vm635_vm15, %v11880_v31  ;;  %v5306_v63 = vsel %vm139_vm1, %v7965_v24, %v7966_v38 }
0x1d70   :  { %v12093_v58 = vpop.permute.xlu1 %7983 }
0x1d71   :  { %7302 = vmatmul.msk.f32.gmra.mxu0 %vm635_vm15, %v11880_v31  ;;  %v7969_v14 = vpop.permute.xlu0 %7968  ;;  %v7986_v24 = vunpack.i.h.bf16 %v12093_v58 }
0x1d72   :  { %v7971_v13 = vunpack.i.h.bf16 %v7969_v14 }
0x1d74   :  { %7291 = vmatmul.msk.f32.gmra.mxu3 %vm635_vm15, %v11885_v37 }
0x1d78   :  { %v12099_v43 = vpop.permute.xlu1 %7993 }
0x1d79   :  { %7303 = vmatmul.msk.f32.gmra.mxu0 %vm635_vm15, %v11885_v37  ;;  %v7974_v19 = vpop.permute.xlu0 %7973 }
0x1d7a   :  { %v7976_v4 = vunpack.i.h.bf16 %v7974_v19 }
0x1d7c   :  { %7292 = vmatmul.msk.f32.gmra.mxu3 %vm635_vm15, %v11890_v62 }
0x1d80   :  { %v12105_v11 = vpop.permute.xlu1 %8008 }
0x1d81   :  { %7304 = vmatmul.msk.f32.gmra.mxu0 %vm635_vm15, %v11890_v62  ;;  %v7979_v15 = vpop.permute.xlu0 %7978  ;;  %v5308_v62 = vsel %vm139_vm1, %v7955_v17, %v7956_v46 }
0x1d82   :  { %v7981_v52 = vunpack.i.h.bf16 %v7979_v15  ;;  %v7980_v46 = vunpack.i.l.bf16 %v7979_v15 }
0x1d88   :  { %v12109_v53 = vpop.permute.xlu1 %8018 }
0x1d89   :  { %v12111_v55 = vpop.permute.xlu0 %7988 }
0x1d90   :  { %v8029_v48 = vpop.permute.xlu1 %8028 }
0x1d91   :  { %v8031_v61 = vunpack.i.h.bf16 %v8029_v48  ;;  %v8030_v37 = vunpack.i.l.bf16 %v8029_v48  ;;  %v12113_v21 = vpop.permute.xlu0 %7998  ;;  %v7970_v48 = vunpack.i.l.bf16 %v7969_v14 }
0x1d93   :  { %v5309_v12 = vsel %vm139_vm1, %v8030_v37, %v8031_v61  ;;  %v7975_v61 = vunpack.i.l.bf16 %v7974_v19  ;;  %v5304_v27 = vsel %vm139_vm1, %v7970_v48, %v7971_v13  ;;  %v5302_v19 = vsel %vm139_vm1, %v7980_v46, %v7981_v52 }
0x1d94   :  { %5342 = vmatpush.msra.mxu0 %v5309_v12  ;;  %v7995_v13 = vunpack.i.l.bf16 %v12099_v43  ;;  %v8001_v46 = vunpack.i.h.bf16 %v12113_v21 }
0x1d96   :  { %5343 = vmatpush.msra.mxu0 %v5308_v62 }
0x1d98   :  { %v8034_v40 = vpop.permute.xlu1 %8033  ;;  %5344 = vmatpush.msra.mxu0 %v5307_v32  ;;  %v5303_v32 = vsel %vm139_vm1, %v7975_v61, %v7976_v4  ;;  %v7991_v61 = vunpack.i.h.bf16 %v12111_v55 }
0x1d99   :  { %v8036_v20 = vunpack.i.h.bf16 %v8034_v40  ;;  %v8035_v25 = vunpack.i.l.bf16 %v8034_v40  ;;  %v12119_v60 = vpop.permute.xlu0 %8013  ;;  %v7985_v40 = vunpack.i.l.bf16 %v12093_v58 }
0x1d9a   :  { %5345 = vmatpush.msra.mxu0 %v5306_v63 }
0x1d9b   :  { %v5305_v12 = vsel %vm139_vm1, %v8035_v25, %v8036_v20  ;;  %v8004_v25 = vpop.permute.xlu2 %8003  ;;  %v7996_v20 = vunpack.i.h.bf16 %v12099_v43  ;;  %v5300_v63 = vsel %vm139_vm1, %v7985_v40, %v7986_v24  ;;  %v8011_v24 = vunpack.i.h.bf16 %v12105_v11 }
0x1d9c   :  { %5346 = vmatpush.msra.mxu0 %v5305_v12  ;;  %v8006_v37 = vunpack.i.h.bf16 %v8004_v25  ;;  %v8005_v62 = vunpack.i.l.bf16 %v8004_v25  ;;  %v7990_v12 = vunpack.i.l.bf16 %v12111_v55  ;;  %v8021_v25 = vunpack.i.h.bf16 %v12109_v53 }
0x1d9d   :  { %v5299_v58 = vsel %vm139_vm1, %v7995_v13, %v7996_v20  ;;  %v8020_v20 = vunpack.i.l.bf16 %v12109_v53 }
0x1d9e   :  { %5347 = vmatpush.msra.mxu0 %v5304_v27  ;;  %v5298_v4 = vsel %vm139_vm1, %v8005_v62, %v8006_v37  ;;  %v8000_v27 = vunpack.i.l.bf16 %v12113_v21 }
0x1da0   :  { %v8039_v8 = vpop.permute.xlu1 %8038  ;;  %5348 = vmatpush.msra.mxu0 %v5303_v32 }
0x1da1   :  { %v8041_v38 = vunpack.i.h.bf16 %v8039_v8  ;;  %v8040_v14 = vunpack.i.l.bf16 %v8039_v8  ;;  %v8024_v17 = vpop.permute.xlu0 %8023  ;;  %v8010_v8 = vunpack.i.l.bf16 %v12105_v11  ;;  %v8015_v11 = vunpack.i.l.bf16 %v12119_v60 }
0x1da2   :  { %5349 = vmatpush.msra.mxu0 %v5302_v19  ;;  %v5315_v19 = vsel %vm139_vm1, %v8000_v27, %v8001_v46  ;;  %v8563_v46 = vld [vmem:[%s13111_s2] sm:$0xff] }
0x1da3   :  { %v5301_v15 = vsel %vm139_vm1, %v8040_v14, %v8041_v38  ;;  %v5316_v38 = vsel %vm139_vm1, %v7990_v12, %v7991_v61  ;;  %v5314_v13 = vsel %vm139_vm1, %v8010_v8, %v8011_v24  ;;  %v5312_v61 = vsel %vm139_vm1, %v8020_v20, %v8021_v25 }
0x1da4   :  { %5350 = vmatpush.msra.mxu0 %v5301_v15  ;;  %v8016_v15 = vunpack.i.h.bf16 %v12119_v60 }
0x1da6   :  { %5351 = vmatpush.msra.mxu0 %v5300_v63  ;;  %v8026_v63 = vunpack.i.h.bf16 %v8024_v17  ;;  %v5296_v53 = vsel %vm139_vm1, %v8015_v11, %v8016_v15 }
0x1da8   :  { %5352 = vmatpush.msra.mxu0 %v5299_v58  ;;  %v8054_v40 = vpop.permute.xlu1 %8053  ;;  %v8025_v58 = vunpack.i.l.bf16 %v8024_v17  ;;  %v8562_v17 = vld [vmem:[%s13111_s2 + $0x8] sm:$0xff] }
0x1da9   :  { %v8044_v48 = vpop.permute.xlu0 %8043  ;;  %v8056_v14 = vunpack.i.h.bf16 %v8054_v40  ;;  %v8055_v55 = vunpack.i.l.bf16 %v8054_v40  ;;  %v8564_v40 = vld [vmem:[%s13111_s2 + $0x18] sm:$0xff] }
0x1daa   :  { %v8046_v52 = vunpack.i.h.bf16 %v8044_v48  ;;  %v8045_v43 = vunpack.i.l.bf16 %v8044_v48  ;;  %5353 = vmatpush.msra.mxu0 %v5298_v4  ;;  %v5295_v12 = vsel %vm139_vm1, %v8025_v58, %v8026_v63 }
0x1dab   :  { %v5313_v4 = vsel %vm139_vm1, %v8055_v55, %v8056_v14  ;;  %v8565_v55 = vld [vmem:[%s13111_s2 + $0x10] sm:$0xff] }
0x1dac   :  { %v5317_v32 = vsel %vm139_vm1, %v8045_v43, %v8046_v52 }
0x1dad   :  { %5379 = vmatpush.msra.mxu1 %v5317_v32 }
0x1daf   :  { %5380 = vmatpush.msra.mxu1 %v5316_v38 }
0x1db1   :  { %v8049_v21 = vpop.permute.xlu0 %8048  ;;  %5381 = vmatpush.msra.mxu1 %v5315_v19 }
0x1db2   :  { %v8051_v37 = vunpack.i.h.bf16 %v8049_v21  ;;  %v8050_v62 = vunpack.i.l.bf16 %v8049_v21 }
0x1db3   :  { %5382 = vmatpush.msra.mxu1 %v5314_v13  ;;  %v8566_v13 = vld [vmem:[%s13111_s2 + $0x28] sm:$0xff] }
0x1db4   :  { %v5297_v48 = vsel %vm139_vm1, %v8050_v62, %v8051_v37  ;;  %v8567_v37 = vld [vmem:[%s13111_s2 + $0x20] sm:$0xff] }
0x1db5   :  { %5354 = vmatpush.msra.mxu0 %v5297_v48  ;;  %5383 = vmatpush.msra.mxu1 %v5313_v4  ;;  %v8568_v4 = vld [vmem:[%s13111_s2 + $0x38] sm:$0xff] }
0x1db7   :  { %5355 = vmatpush.msra.mxu0 %v5296_v53  ;;  %5384 = vmatpush.msra.mxu1 %v5312_v61 }
0x1db9   :  { %5356 = vmatpush.msra.mxu0 %v5295_v12  ;;  %v8569_v12 = vld [vmem:[%s13111_s2 + $0x30] sm:$0xff] }
0x1de6   :  { %v5028_v60 = vpop.f32.mrf.mxu0 }
0x1de7   :  { %v5029_v52 = vadd.f32 %v8562_v17, %v5028_v60  ;;  %v4999_v43 = vpop.f32.mrf.mxu3 }
0x1de8   :  { %v5000_v27 = vadd.f32 %v8563_v46, %v4999_v43  ;;  %v4835_v46 = vmul.f32 %v11928_v42, %v9401_v57 }
0x1de9   :  { %v5040_v32 = vsel %vm754_vm0, %v5029_v52, -inf }
0x1dea   :  { %v5041_v24 = vmax.f32 %v5000_v27, %v5040_v32  ;;  %v4834_v32 = vmul.f32 %v11878_v56, %v9401_v57 }
0x1dec   :  { %5042 = vmax.xlane.f32.xlu2 %v5041_v24  ;;  %v8067_v24 = vpack.i.bf16 %v4835_v46, %v4834_v32 }
0x1dee   :  { %v5031_v8 = vpop.f32.mrf.mxu0 }
0x1def   :  { %v5032_v38 = vadd.f32 %v8564_v40, %v5031_v8  ;;  %v5002_v14 = vpop.f32.mrf.mxu3  ;;  %v4803_v8 = vmul.f32 %v11928_v42, %v13323_v50  ;;  %v4802_v40 = vmul.f32 %v11878_v56, %v13323_v50 }
0x1df0   :  { %v5003_v19 = vadd.f32 %v8565_v55, %v5002_v14  ;;  %v4837_v55 = vmul.f32 %v11939_v22, %v9451_v34 }
0x1df1   :  { %v5044_v25 = vsel %vm754_vm0, %v5032_v38, -inf  ;;  %v8062_v14 = vpack.i.bf16 %v4803_v8, %v4802_v40 }
0x1df2   :  { %v5045_v20 = vmax.f32 %v5003_v19, %v5044_v25  ;;  %v4836_v25 = vmul.f32 %v11880_v31, %v9451_v34 }
0x1df4   :  { %5046 = vmax.xlane.f32.xlu0 %v5045_v20  ;;  %v8057_v20 = vpack.i.bf16 %v4837_v55, %v4836_v25 }
0x1df6   :  { %v5034_v21 = vpop.f32.mrf.mxu0 }
0x1df7   :  { %v5035_v15 = vadd.f32 %v8566_v13, %v5034_v21  ;;  %v5005_v11 = vpop.f32.mrf.mxu3 }
0x1df8   :  { %v5006_v62 = vadd.f32 %v8567_v37, %v5005_v11 }
0x1df9   :  { %v5048_v63 = vsel %vm754_vm0, %v5035_v15, -inf }
0x1dfa   :  { %v5049_v58 = vmax.f32 %v5006_v62, %v5048_v63 }
0x1dfc   :  { %5050 = vmax.xlane.f32.xlu1 %v5049_v58 }
0x1dfe   :  { %v5037_v48 = vpop.f32.mrf.mxu0 }
0x1dff   :  { %v5038_v53 = vadd.f32 %v8568_v4, %v5037_v48  ;;  %v5008_v61 = vpop.f32.mrf.mxu3 }
0x1e00   :  { %v5009_v60 = vadd.f32 %v8569_v12, %v5008_v61 }
0x1e01   :  { %v5052_v17 = vsel %vm754_vm0, %v5038_v53, -inf }
0x1e02   :  { %v5053_v43 = vmax.f32 %v5009_v60, %v5052_v17 }
0x1e04   :  { %5054 = vmax.xlane.f32.xlu2 %v5053_v43 }
0x1e08   :  { %8068 = vrot.lane.b32.xlu0 %v8067_v24, %s8632_s18 }
0x1e15   :  { %8063 = vrot.lane.b32.xlu1 %v8062_v14, %s8632_s18 }
0x1e1c   :  { %8058 = vrot.lane.b32.xlu2 %v8057_v20, %s8632_s18 }
0x1e5f   :  { %v5043_v21 = vpop.xlane.xlu2 %5042 }
0x1e60   :  { %v5056_v13 = vsub.f32 %v5000_v27, %v5043_v21  ;;  %v5057_v11 = vsub.f32 %v5029_v52, %v5043_v21 }
0x1e62   :  { %v5064_v37 = vmul.f32 1.442695, %v5056_v13  ;;  %v5066_v42 = vmul.f32 1.442695, %v5057_v11 }
0x1e64   :  { %8362 = vpow2.f32 %v5064_v37 }
0x1e65   :  { %8364 = vpow2.f32 %v5066_v42 }
0x1e67   :  { %v5047_v56 = vpop.xlane.xlu0 %5046 }
0x1e68   :  { %v5058_v63 = vsub.f32 %v5003_v19, %v5047_v56  ;;  %v5059_v58 = vsub.f32 %v5032_v38, %v5047_v56 }
0x1e6a   :  { %v8363_v48 = vpop.eup %8362  ;;  %v5068_v4 = vmul.f32 1.442695, %v5058_v63  ;;  %v5070_v61 = vmul.f32 1.442695, %v5059_v58  ;;  %v7318_v58 = vld [vmem:[%s13114_s5 + $0xe8] sm:$0xff] }
0x1e6b   :  { %v8365_v22 = vpop.eup %8364  ;;  %5108 = vmatmul.f32.vlgmr.msrb.gmra.mxu1 %v8363_v48  ;;  %5438 = vmatpush.msrb.mxu2 %v7318_v58 }
0x1e6c   :  { %8366 = vpow2.f32 %v5068_v4  ;;  %7305 = vmatmul.msk.f32.vlgmr.msra.gmra.mxu2 %vm754_vm0, %v8365_v22  ;;  %v7317_v4 = vld [vmem:[%s13114_s5 + $0xe0] sm:$0xff] }
0x1e6d   :  { %8368 = vpow2.f32 %v5070_v61  ;;  %5439 = vmatpush.msrb.mxu2 %v7317_v4  ;;  %v7315_v61 = vld [vmem:[%s13114_s5 + $0xd0] sm:$0xff] }
0x1e6f   :  { %v5051_v31 = vpop.xlane.xlu1 %5050 }
0x1e70   :  { %v5060_v12 = vsub.f32 %v5006_v62, %v5051_v31  ;;  %v5061_v27 = vsub.f32 %v5035_v15, %v5051_v31  ;;  %v7314_v31 = vld [vmem:[%s13114_s5 + $0xc8] sm:$0xff] }
0x1e72   :  { %v8367_v52 = vpop.eup %8366  ;;  %v5072_v17 = vmul.f32 1.442695, %v5060_v12  ;;  %v5074_v43 = vmul.f32 1.442695, %v5061_v27  ;;  %v7313_v12 = vld [vmem:[%s13114_s5 + $0xc0] sm:$0xff] }
0x1e73   :  { %v8369_v46 = vpop.eup %8368  ;;  %5111 = vmatmul.f32.gmra.mxu1 %v8367_v52 }
0x1e74   :  { %8370 = vpow2.f32 %v5072_v17  ;;  %7306 = vmatmul.msk.f32.gmra.mxu2 %vm754_vm0, %v8369_v46 }
0x1e75   :  { %8372 = vpow2.f32 %v5074_v43 }
0x1e77   :  { %v5055_v38 = vpop.xlane.xlu2 %5054 }
0x1e78   :  { %v5062_v19 = vsub.f32 %v5009_v60, %v5055_v38  ;;  %v5063_v32 = vsub.f32 %v5038_v53, %v5055_v38 }
0x1e7a   :  { %v8371_v24 = vpop.eup %8370  ;;  %v5076_v8 = vmul.f32 1.442695, %v5062_v19  ;;  %v5078_v40 = vmul.f32 1.442695, %v5063_v32  ;;  %v8069_v15 = vpop.permute.xlu0 %8068 }
0x1e7b   :  { %v8373_v14 = vpop.eup %8372  ;;  %5114 = vmatmul.f32.gmra.mxu1 %v8371_v24  ;;  %v8071_v20 = vunpack.i.h.bf16 %v8069_v15  ;;  %v8070_v21 = vunpack.i.l.bf16 %v8069_v15 }
0x1e7c   :  { %8374 = vpow2.f32 %v5076_v8  ;;  %7307 = vmatmul.msk.f32.gmra.mxu2 %vm754_vm0, %v8373_v14 }
0x1e7d   :  { %8376 = vpow2.f32 %v5078_v40  ;;  %v5310_v53 = vsel %vm139_vm1, %v8070_v21, %v8071_v20 }
0x1e7f   :  { %v8059_v62 = vpop.permute.xlu2 %8058 }
0x1e80   :  { %v8061_v55 = vunpack.i.h.bf16 %v8059_v62  ;;  %v8060_v25 = vunpack.i.l.bf16 %v8059_v62 }
0x1e82   :  { %v8375_v13 = vpop.eup %8374  ;;  %v5311_v11 = vsel %vm139_vm1, %v8060_v25, %v8061_v55 }
0x1e83   :  { %v8377_v60 = vpop.eup %8376  ;;  %5117 = vmatmul.f32.gmra.mxu1 %v8375_v13 }
0x1e84   :  { %7308 = vmatmul.msk.f32.gmra.mxu2 %vm754_vm0, %v8377_v60  ;;  %5385 = vmatpush.msra.mxu1 %v5311_v11 }
0x1e86   :  { %5386 = vmatpush.msra.mxu1 %v5310_v53 }
0x1e87   :  { %v8064_v37 = vpop.permute.xlu1 %8063 }
0x1e88   :  { %v8066_v42 = vunpack.i.h.bf16 %v8064_v37  ;;  %v8065_v56 = vunpack.i.l.bf16 %v8064_v37 }
0x1e8a   :  { %v5294_v63 = vsel %vm139_vm1, %v8065_v56, %v8066_v42 }
0x1e8b   :  { %5357 = vmatpush.msra.mxu0 %v5294_v63  ;;  %7309 = vmatmul.msk.f32.vlgmr.msra.gmra.mxu1 %vm754_vm0, %v8365_v22 }
0x1e8c   :  { %5358 = vmatmul.f32.vlgmr.msra.gmra.mxu0 %v8363_v48  ;;  %v7316_v48 = vld [vmem:[%s13114_s5 + $0xd8] sm:$0xff] }
0x1e8d   :  { %5440 = vmatpush.msrb.mxu2 %v7316_v48 }
0x1e8f   :  { %5441 = vmatpush.msrb.mxu2 %v7315_v61 }
0x1e91   :  { %5442 = vmatpush.msrb.mxu2 %v7314_v31  ;;  %v7254_v31 = vld [vmem:[%s13117_s8 + $0x100] sm:$0xff] }
0x1e93   :  { %7310 = vmatmul.msk.f32.gmra.mxu1 %vm754_vm0, %v8369_v46  ;;  %5443 = vmatpush.msrb.mxu2 %v7313_v12  ;;  %v5415_v12 = vperm.slane %v7254_v31, 0 }
0x1e94   :  { %5361 = vmatmul.f32.gmra.mxu0 %v8367_v52 }
0x1e9b   :  { %7311 = vmatmul.msk.f32.gmra.mxu1 %vm754_vm0, %v8373_v14 }
0x1e9c   :  { %5364 = vmatmul.f32.gmra.mxu0 %v8371_v24 }
0x1ea3   :  { %7312 = vmatmul.msk.f32.gmra.mxu1 %vm754_vm0, %v8377_v60 }
0x1ea4   :  { %5367 = vmatmul.f32.gmra.mxu0 %v8375_v13 }
0x1ee8   :  { %v5109_v22 = vpop.f32.mrf.mxu1 }
0x1eef   :  { %v5138_v52 = vpop.f32.mrf.mxu2 }
0x1ef0   :  { %v5112_v27 = vpop.f32.mrf.mxu1  ;;  %v5139_v46 = vadd.f32 %v5138_v52, %v5109_v22 }
0x1ef2   :  { %8378 = vrcp.f32 %v5139_v46 }
0x1ef7   :  { %v5141_v38 = vpop.f32.mrf.mxu2 }
0x1ef8   :  { %v5115_v17 = vpop.f32.mrf.mxu1  ;;  %v5142_v32 = vadd.f32 %v5141_v38, %v5112_v27  ;;  %v8379_v40 = vpop.eup %8378 }
0x1efa   :  { %8380 = vrcp.f32 %v5142_v32 }
0x1eff   :  { %v5144_v14 = vpop.f32.mrf.mxu2 }
0x1f00   :  { %v5118_v43 = vpop.f32.mrf.mxu1  ;;  %v5145_v55 = vadd.f32 %v5144_v14, %v5115_v17  ;;  %v8381_v21 = vpop.eup %8380 }
0x1f02   :  { %8382 = vrcp.f32 %v5145_v55 }
0x1f07   :  { %v5147_v11 = vpop.f32.mrf.mxu2 }
0x1f08   :  { %v5388_v19 = vpop.f32.mrf.mxu1  ;;  %v5148_v53 = vadd.f32 %v5147_v11, %v5118_v43  ;;  %v8383_v56 = vpop.eup %8382 }
0x1f09   :  { %v5359_v24 = vpop.f32.mrf.mxu0 }
0x1f0a   :  { %v5389_v8 = vadd.f32 %v5388_v19, %v5359_v24  ;;  %8384 = vrcp.f32 %v5148_v53 }
0x1f0c   :  { %v5404_v15 = vmul.f32 %v8379_v40, %v5389_v8 }
0x1f0e   :  { %7319 = vmatmul.msk.f32.vlgmr.msrb.gmra.mxu2 %vm635_vm15, %v5404_v15 }
0x1f10   :  { %v5391_v62 = vpop.f32.mrf.mxu1  ;;  %v8385_v61 = vpop.eup %8384 }
0x1f11   :  { %v5362_v25 = vpop.f32.mrf.mxu0 }
0x1f12   :  { %v5392_v20 = vadd.f32 %v5391_v62, %v5362_v25 }
0x1f14   :  { %v5405_v13 = vmul.f32 %v8381_v21, %v5392_v20 }
0x1f16   :  { %7320 = vmatmul.msk.f32.gmra.mxu2 %vm635_vm15, %v5405_v13 }
0x1f18   :  { %v5394_v60 = vpop.f32.mrf.mxu1 }
0x1f19   :  { %v5365_v37 = vpop.f32.mrf.mxu0 }
0x1f1a   :  { %v5395_v42 = vadd.f32 %v5394_v60, %v5365_v37 }
0x1f1c   :  { %v5406_v63 = vmul.f32 %v8383_v56, %v5395_v42 }
0x1f1e   :  { %7321 = vmatmul.msk.f32.gmra.mxu2 %vm635_vm15, %v5406_v63 }
0x1f20   :  { %v5397_v58 = vpop.f32.mrf.mxu1 }
0x1f21   :  { %v5368_v4 = vpop.f32.mrf.mxu0 }
0x1f22   :  { %v5398_v48 = vadd.f32 %v5397_v58, %v5368_v4 }
0x1f24   :  { %v5407_v22 = vmul.f32 %v8385_v61, %v5398_v48 }
0x1f26   :  { %7322 = vmatmul.msk.f32.gmra.mxu2 %vm635_vm15, %v5407_v22 }
0x1f91   :  { %v5445_v27 = vpop.f32.mrf.mxu2 }
0x1f92   :  { %v5446_v52 = vadd.f32 %v5445_v27, %v5415_v12  ;;  %v7325_v27 = vld [vmem:[%s13115_s6 + $0x90] sm:$0xff] }
0x1f94   :  { %v12232_v17 = vadd.f32 %v5446_v52, %v11707_v26  ;;  %v7324_v52 = vld [vmem:[%s13115_s6 + $0x88] sm:$0xff] }
0x1f96   :  { %v5461_v43 = vsel %vm139_vm1, %v12232_v17, 0.0 }
0x1f97   :  { %5462 = vadd.xlane.f32.xlu2 %v5461_v43  ;;  %v7323_v43 = vld [vmem:[%s13115_s6 + $0x80] sm:$0xff] }
0x1f99   :  { %v5448_v46 = vpop.f32.mrf.mxu2 }
0x1f9a   :  { %v5449_v38 = vadd.f32 %v5448_v46, %v5415_v12 }
0x1f9c   :  { %v12237_v19 = vadd.f32 %v5449_v38, %v11712_v35 }
0x1f9e   :  { %v5464_v32 = vsel %vm139_vm1, %v12237_v19, 0.0 }
0x1f9f   :  { %5465 = vadd.xlane.f32.xlu1 %v5464_v32 }
0x1fa1   :  { %v5451_v24 = vpop.f32.mrf.mxu2 }
0x1fa2   :  { %v5452_v8 = vadd.f32 %v5451_v24, %v5415_v12 }
0x1fa4   :  { %v12242_v40 = vadd.f32 %v5452_v8, %v11717_v30 }
0x1fa6   :  { %v5467_v26 = vsel %vm139_vm1, %v12242_v40, 0.0 }
0x1fa7   :  { %5468 = vadd.xlane.f32.xlu0 %v5467_v26 }
0x1fa9   :  { %v5454_v14 = vpop.f32.mrf.mxu2 }
0x1faa   :  { %v5455_v15 = vadd.f32 %v5454_v14, %v5415_v12  ;;  %v7326_v12 = vld [vmem:[%s13115_s6 + $0x98] sm:$0xff] }
0x1fab   :  { %5589 = vmatpush.msrb.mxu3 %v7326_v12 }
0x1fac   :  { %v12247_v62 = vadd.f32 %v5455_v15, %v11722_v6 }
0x1fad   :  { %5590 = vmatpush.msrb.mxu3 %v7325_v27  ;;  %v7344_v27 = vld [vmem:[%s13116_s7 + $0x268] sm:$0xff] }
0x1fae   :  { %v5470_v35 = vsel %vm139_vm1, %v12247_v62, 0.0 }
0x1faf   :  { %5471 = vadd.xlane.f32.xlu2 %v5470_v35  ;;  %5591 = vmatpush.msrb.mxu3 %v7324_v52 }
0x1fb1   :  { %5592 = vmatpush.msrb.mxu3 %v7323_v43 }
0x200a   :  { %v5463_v55 = vpop.xlane.xlu2 %5462 }
0x200b   :  { %v5473_v25 = vmul.f32 %v5463_v55, %v8737_v33 }
0x200d   :  { %v5477_v20 = vsub.f32 %v12232_v17, %v5473_v25 }
0x200f   :  { %v5481_v30 = vmul.f32 %v5477_v20, %v5477_v20 }
0x2011   :  { %v5485_v21 = vsel %vm139_vm1, %v5481_v30, 0.0 }
0x2012   :  { %5486 = vadd.xlane.f32.xlu1 %v5485_v21  ;;  %v5466_v13 = vpop.xlane.xlu1 %5465  ;;  %v7252_v21 = vld [vmem:[%s13117_s8 + $0xf0] sm:$0xff] }
0x2013   :  { %v5474_v11 = vmul.f32 %v5466_v13, %v8737_v33 }
0x2015   :  { %v12256_v60 = vsub.f32 %v12237_v19, %v5474_v11 }
0x2017   :  { %v5482_v6 = vmul.f32 %v12256_v60, %v12256_v60 }
0x2019   :  { %v5488_v53 = vsel %vm139_vm1, %v5482_v6, 0.0 }
0x201a   :  { %5489 = vadd.xlane.f32.xlu0 %v5488_v53  ;;  %v5469_v37 = vpop.xlane.xlu0 %5468  ;;  %v7253_v53 = vld [vmem:[%s13117_s8 + $0xf8] sm:$0xff] }
0x201b   :  { %v5475_v42 = vmul.f32 %v5469_v37, %v8737_v33 }
0x201d   :  { %v12263_v56 = vsub.f32 %v12242_v40, %v5475_v42 }
0x201f   :  { %v5483_v63 = vmul.f32 %v12263_v56, %v12263_v56 }
0x2021   :  { %v5491_v58 = vsel %vm139_vm1, %v5483_v63, 0.0  ;;  %v12296_v63 = vperm.slane %v7252_v21, 0 }
0x2022   :  { %5492 = vadd.xlane.f32.xlu2 %v5491_v58  ;;  %v5472_v4 = vpop.xlane.xlu2 %5471  ;;  %v7346_v58 = vld [vmem:[%s13116_s7 + $0x278] sm:$0xff] }
0x2023   :  { %v5476_v48 = vmul.f32 %v5472_v4, %v8737_v33  ;;  %v7345_v4 = vld [vmem:[%s13116_s7 + $0x270] sm:$0xff]  ;;  %5627 = vmatpush.msrb.mxu0 %v7346_v58 }
0x2025   :  { %v12270_v61 = vsub.f32 %v12247_v62, %v5476_v48  ;;  %5628 = vmatpush.msrb.mxu0 %v7345_v4 }
0x2027   :  { %v5484_v22 = vmul.f32 %v12270_v61, %v12270_v61  ;;  %5629 = vmatpush.msrb.mxu0 %v7344_v27 }
0x2029   :  { %v5494_v31 = vsel %vm139_vm1, %v5484_v22, 0.0 }
0x202a   :  { %5495 = vadd.xlane.f32.xlu1 %v5494_v31  ;;  %v12304_v31 = vperm.slane %v7253_v53, 0  ;;  %v7340_v53 = vld [vmem:[%s13116_s7 + $0x248] sm:$0xff] }
0x2085   :  { %v5487_v46 = vpop.xlane.xlu1 %5486 }
0x2086   :  { %v5497_v38 = vmul.f32 %v5487_v46, %v8737_v33 }
0x2088   :  { %v5501_v32 = vadd.f32 1e-05, %v5497_v38 }
0x208a   :  { %8386 = vrsqrt.f32 %v5501_v32  ;;  %vm5511_vm8 = vweird.f32 %v5501_v32 }
0x208d   :  { %v5490_v24 = vpop.xlane.xlu0 %5489 }
0x208e   :  { %v5498_v8 = vmul.f32 %v5490_v24, %v8737_v33 }
0x2090   :  { %v8387_v26 = vpop.eup %8386  ;;  %v5502_v14 = vadd.f32 1e-05, %v5498_v8 }
0x2091   :  { %v5506_v15 = vmul.f32 %v8387_v26, %v5501_v32  ;;  %vm5512_vm7 = vweird.f32 %v8387_v26  ;;  %v7343_v32 = vld [vmem:[%s13116_s7 + $0x260] sm:$0xff] }
0x2092   :  { %8388 = vrsqrt.f32 %v5502_v14  ;;  %vm5513_vm9 = vmor %vm5511_vm8, %vm5512_vm7  ;;  %vm5521_vm11 = vweird.f32 %v5502_v14  ;;  %5630 = vmatpush.msrb.mxu0 %v7343_v32  ;;  %v7335_v32 = vld [vmem:[%s13116_s7 + $0x220] sm:$0xff] }
0x2093   :  { %v5507_v35 = vmul.f32 %v8387_v26, %v5506_v15  ;;  %v7342_v15 = vld [vmem:[%s13116_s7 + $0x258] sm:$0xff] }
0x2094   :  { %5631 = vmatpush.msrb.mxu0 %v7342_v15 }
0x2095   :  { %v5508_v55 = vmul.f32 0.5, %v5507_v35  ;;  %v5493_v25 = vpop.xlane.xlu2 %5492 }
0x2096   :  { %v5499_v30 = vmul.f32 %v5493_v25, %v8737_v33  ;;  %v7341_v25 = vld [vmem:[%s13116_s7 + $0x250] sm:$0xff] }
0x2097   :  { %v5509_v13 = vsub.f32 1.5, %v5508_v55  ;;  %5632 = vmatpush.msrb.mxu0 %v7341_v25 }
0x2098   :  { %v8389_v11 = vpop.eup %8388  ;;  %v5503_v6 = vadd.f32 1e-05, %v5499_v30 }
0x2099   :  { %v5510_v37 = vmul.f32 %v8387_v26, %v5509_v13  ;;  %v5516_v42 = vmul.f32 %v8389_v11, %v5502_v14  ;;  %vm5522_vm10 = vweird.f32 %v8389_v11  ;;  %5633 = vmatpush.msrb.mxu0 %v7340_v53 }
0x209a   :  { %8390 = vrsqrt.f32 %v5503_v6  ;;  %vm5523_vm12 = vmor %vm5521_vm11, %vm5522_vm10  ;;  %vm5531_vm14 = vweird.f32 %v5503_v6 }
0x209b   :  { %v5514_v48 = vsel %vm5513_vm9, %v8387_v26, %v5510_v37  ;;  %v5517_v22 = vmul.f32 %v8389_v11, %v5516_v42  ;;  %v7339_v42 = vld [vmem:[%s13116_s7 + $0x240] sm:$0xff] }
0x209c   :  { %v5545_v12 = vmul.f32 %v5514_v48, %v5477_v20  ;;  %5634 = vmatpush.msrb.mxu0 %v7339_v42 }
0x209d   :  { %v5518_v52 = vmul.f32 0.5, %v5517_v22  ;;  %v5496_v43 = vpop.xlane.xlu1 %5495 }
0x209e   :  { %v5550_v46 = vmul.f32 %v12296_v63, %v5545_v12  ;;  %v5500_v38 = vmul.f32 %v5496_v43, %v8737_v33  ;;  %v7337_v12 = vld [vmem:[%s13116_s7 + $0x230] sm:$0xff] }
0x209f   :  { %v5519_v24 = vsub.f32 1.5, %v5518_v52 }
0x20a0   :  { %v8391_v8 = vpop.eup %8390  ;;  %v5555_v20 = vadd.f32 %v12304_v31, %v5550_v46  ;;  %v5504_v26 = vadd.f32 1e-05, %v5500_v38  ;;  %v7336_v46 = vld [vmem:[%s13116_s7 + $0x228] sm:$0xff] }
0x20a1   :  { %v5520_v35 = vmul.f32 %v8389_v11, %v5519_v24  ;;  %v5526_v55 = vmul.f32 %v8391_v8, %v5503_v6  ;;  %vm5532_vm13 = vweird.f32 %v8391_v8 }
0x20a2   :  { %8392 = vrsqrt.f32 %v5504_v26  ;;  %7327 = vmatmul.msk.f32.vlgmr.msrb.gmra.mxu3 %vm139_vm1, %v5555_v20  ;;  %vm5533_vm2 = vmor %vm5531_vm14, %vm5532_vm13  ;;  %vm5541_vm4 = vweird.f32 %v5504_v26 }
0x20a3   :  { %v5524_v30 = vsel %vm5523_vm12, %v8389_v11, %v5520_v35  ;;  %v5527_v21 = vmul.f32 %v8391_v8, %v5526_v55 }
0x20a4   :  { %v5546_v13 = vmul.f32 %v5524_v30, %v12256_v60  ;;  %v7338_v60 = vld [vmem:[%s13116_s7 + $0x238] sm:$0xff]  ;;  %v7333_v30 = vld [vmem:[%s13116_s7 + $0x210] sm:$0xff] }
0x20a5   :  { %v5528_v14 = vmul.f32 0.5, %v5527_v21  ;;  %5635 = vmatpush.msrb.mxu0 %v7338_v60  ;;  %v7331_v21 = vld [vmem:[%s13116_s7 + $0x200] sm:$0xff] }
0x20a6   :  { %v5551_v37 = vmul.f32 %v12296_v63, %v5546_v13 }
0x20a7   :  { %v5529_v58 = vsub.f32 1.5, %v5528_v14  ;;  %5636 = vmatpush.msrb.mxu0 %v7337_v12  ;;  %v7255_v12 = vld [vmem:[%s13117_s8 + $0x108] sm:$0xff] }
0x20a8   :  { %v8393_v11 = vpop.eup %8392  ;;  %v5556_v4 = vadd.f32 %v12304_v31, %v5551_v37 }
0x20a9   :  { %v5530_v48 = vmul.f32 %v8391_v8, %v5529_v58  ;;  %v5536_v22 = vmul.f32 %v8393_v11, %v5504_v26  ;;  %vm5542_vm3 = vweird.f32 %v8393_v11  ;;  %5637 = vmatpush.msrb.mxu0 %v7336_v46  ;;  %v7332_v26 = vld [vmem:[%s13116_s7 + $0x208] sm:$0xff] }
0x20aa   :  { %7328 = vmatmul.msk.f32.gmra.mxu3 %vm139_vm1, %v5556_v4  ;;  %vm5543_vm5 = vmor %vm5541_vm4, %vm5542_vm3 }
0x20ab   :  { %v5534_v27 = vsel %vm5533_vm2, %v8391_v8, %v5530_v48  ;;  %v5537_v52 = vmul.f32 %v8393_v11, %v5536_v22  ;;  %5638 = vmatpush.msrb.mxu0 %v7335_v32 }
0x20ac   :  { %v5547_v43 = vmul.f32 %v5534_v27, %v12263_v56  ;;  %v7334_v56 = vld [vmem:[%s13116_s7 + $0x218] sm:$0xff]  ;;  %v5660_v27 = vperm.slane %v7255_v12, 0 }
0x20ad   :  { %v5538_v38 = vmul.f32 0.5, %v5537_v52  ;;  %5639 = vmatpush.msrb.mxu0 %v7334_v56 }
0x20ae   :  { %v5552_v6 = vmul.f32 %v12296_v63, %v5547_v43 }
0x20af   :  { %v5539_v24 = vsub.f32 1.5, %v5538_v38  ;;  %5640 = vmatpush.msrb.mxu0 %v7333_v30 }
0x20b0   :  { %v5557_v8 = vadd.f32 %v12304_v31, %v5552_v6 }
0x20b1   :  { %v5540_v20 = vmul.f32 %v8393_v11, %v5539_v24  ;;  %5641 = vmatpush.msrb.mxu0 %v7332_v26 }
0x20b2   :  { %7329 = vmatmul.msk.f32.gmra.mxu3 %vm139_vm1, %v5557_v8 }
0x20b3   :  { %v5544_v15 = vsel %vm5543_vm5, %v8393_v11, %v5540_v20  ;;  %5642 = vmatpush.msrb.mxu0 %v7331_v21 }
0x20b4   :  { %v5548_v35 = vmul.f32 %v5544_v15, %v12270_v61  ;;  %v7256_v61 = vld [vmem:[%s13117_s8 + $0x110] sm:$0xff] }
0x20b6   :  { %v5553_v55 = vmul.f32 %v12296_v63, %v5548_v35  ;;  %v5564_v63 = vperm.slane %v7256_v61, 0 }
0x20b8   :  { %v5558_v25 = vadd.f32 %v12304_v31, %v5553_v55 }
0x20ba   :  { %7330 = vmatmul.msk.f32.gmra.mxu3 %vm139_vm1, %v5558_v25 }
0x2125   :  { %v5594_v31 = vpop.f32.mrf.mxu3 }
0x2126   :  { %v5595_v13 = vadd.f32 %v5594_v31, %v5564_v63 }
0x2128   :  { %v5606_v53 = vmax.f32 %v5595_v13, 0.0 }
0x212a   :  { %5643 = vmatmul.f32.vlgmr.msrb.gmra.mxu0 %v5606_v53 }
0x212d   :  { %v5597_v14 = vpop.f32.mrf.mxu3 }
0x212e   :  { %v5598_v37 = vadd.f32 %v5597_v14, %v5564_v63 }
0x2130   :  { %v5607_v42 = vmax.f32 %v5598_v37, 0.0 }
0x2132   :  { %5646 = vmatmul.f32.gmra.mxu0 %v5607_v42 }
0x2135   :  { %v5600_v58 = vpop.f32.mrf.mxu3 }
0x2136   :  { %v5601_v11 = vadd.f32 %v5600_v58, %v5564_v63 }
0x2138   :  { %v5608_v4 = vmax.f32 %v5601_v11, 0.0 }
0x213a   :  { %5649 = vmatmul.f32.gmra.mxu0 %v5608_v4 }
0x213d   :  { %v5603_v60 = vpop.f32.mrf.mxu3 }
0x213e   :  { %v5604_v48 = vadd.f32 %v5603_v60, %v5564_v63 }
0x2140   :  { %v5609_v22 = vmax.f32 %v5604_v48, 0.0 }
0x2142   :  { %5652 = vmatmul.f32.gmra.mxu0 %v5609_v22 }
0x21a7   :  { %v5644_v52 = vpop.f32.mrf.mxu0 }
0x21a8   :  { %v5656_v43 = vadd.f32 %v5644_v52, %v12232_v17  ;;  %v7361_v52 = vld [vmem:[%s13113_s4 + $0x178] sm:$0xff] }
0x21a9   :  { %5833 = vmatpush.msra.mxu2 %v7361_v52 }
0x21aa   :  { %v12371_v46 = vadd.f32 %v5660_v27, %v5656_v43  ;;  %v7358_v43 = vld [vmem:[%s13113_s4 + $0x160] sm:$0xff] }
0x21ac   :  { %v5673_v38 = vsel %vm139_vm1, %v12371_v46, 0.0 }
0x21ad   :  { %5674 = vadd.xlane.f32.xlu0 %v5673_v38  ;;  %v7359_v38 = vld [vmem:[%s13113_s4 + $0x168] sm:$0xff] }
0x21ae   :  { %5834 = vmatpush.msra.mxu2 %v7359_v38  ;;  %v8585_v38 = vld [vmem:[%s13112_s3 + $0x80] sm:$0xff] }
0x21af   :  { %v5647_v6 = vpop.f32.mrf.mxu0 }
0x21b0   :  { %v5657_v32 = vadd.f32 %v5647_v6, %v12237_v19  ;;  %v7356_v6 = vld [vmem:[%s13113_s4 + $0x150] sm:$0xff] }
0x21b2   :  { %v12376_v24 = vadd.f32 %v5660_v27, %v5657_v32  ;;  %v7357_v32 = vld [vmem:[%s13113_s4 + $0x158] sm:$0xff] }
0x21b3   :  { %5835 = vmatpush.msra.mxu2 %v7357_v32 }
0x21b4   :  { %v5676_v8 = vsel %vm139_vm1, %v12376_v24, 0.0 }
0x21b5   :  { %5677 = vadd.xlane.f32.xlu2 %v5676_v8  ;;  %v7354_v8 = vld [vmem:[%s13113_s4 + $0x140] sm:$0xff] }
0x21b7   :  { %v5650_v56 = vpop.f32.mrf.mxu0 }
0x21b8   :  { %v5658_v20 = vadd.f32 %v5650_v56, %v12242_v40  ;;  %v7355_v56 = vld [vmem:[%s13113_s4 + $0x148] sm:$0xff] }
0x21b9   :  { %5836 = vmatpush.msra.mxu2 %v7355_v56  ;;  %v8586_v56 = vld [vmem:[%s13112_s3 + $0x38] sm:$0xff] }
0x21ba   :  { %v12381_v15 = vadd.f32 %v5660_v27, %v5658_v20 }
0x21bc   :  { %v5679_v17 = vsel %vm139_vm1, %v12381_v15, 0.0 }
0x21bd   :  { %5680 = vadd.xlane.f32.xlu1 %v5679_v17 }
0x21bf   :  { %v5653_v35 = vpop.f32.mrf.mxu0 }
0x21c0   :  { %v5659_v55 = vadd.f32 %v5653_v35, %v12247_v62  ;;  %v8570_v35 = vld [vmem:[%s13112_s3 + $0x78] sm:$0xff] }
0x21c2   :  { %v12386_v25 = vadd.f32 %v5660_v27, %v5659_v55  ;;  %v7360_v27 = vld [vmem:[%s13113_s4 + $0x170] sm:$0xff]  ;;  %v8571_v55 = vld [vmem:[%s13112_s3 + $0xb8] sm:$0xff] }
0x21c3   :  { %5804 = vmatpush.msrb.mxu1 %v7360_v27  ;;  %6201 = vmatpush.msrb.mxu2 %v8571_v55  ;;  %v8583_v27 = vld [vmem:[%s13112_s3 + $0x88] sm:$0xff] }
0x21c4   :  { %v5682_v19 = vsel %vm139_vm1, %v12386_v25, 0.0 }
0x21c5   :  { %5683 = vadd.xlane.f32.xlu0 %v5682_v19  ;;  %5805 = vmatpush.msrb.mxu1 %v7358_v43  ;;  %v8584_v43 = vld [vmem:[%s13112_s3 + $0x40] sm:$0xff] }
0x21c7   :  { %5806 = vmatpush.msrb.mxu1 %v7356_v6 }
0x21c9   :  { %5807 = vmatpush.msrb.mxu1 %v7354_v8 }
0x21cb   :  { %6164 = vmatpush.msra.mxu1 %v8570_v35 }
0x2220   :  { %v5675_v30 = vpop.xlane.xlu0 %5674 }
0x2221   :  { %v5685_v26 = vmul.f32 %v5675_v30, %v8737_v33  ;;  %v8572_v30 = vld [vmem:[%s13112_s3 + $0x70] sm:$0xff] }
0x2222   :  { %6165 = vmatpush.msra.mxu1 %v8572_v30  ;;  %v8587_v30 = vld [vmem:[%s13112_s3 + $0x30] sm:$0xff] }
0x2223   :  { %v12392_v40 = vsub.f32 %v12371_v46, %v5685_v26  ;;  %v8573_v26 = vld [vmem:[%s13112_s3 + $0xb0] sm:$0xff] }
0x2224   :  { %6202 = vmatpush.msrb.mxu2 %v8573_v26  ;;  %v7348_v26 = vld [vmem:[%s13117_s8 + $0x120] sm:$0xff] }
0x2225   :  { %v5693_v21 = vmul.f32 %v12392_v40, %v12392_v40 }
0x2227   :  { %v5697_v61 = vsel %vm139_vm1, %v5693_v21, 0.0  ;;  %v8574_v21 = vld [vmem:[%s13112_s3 + $0x68] sm:$0xff] }
0x2228   :  { %5698 = vadd.xlane.f32.xlu2 %v5697_v61  ;;  %v5678_v63 = vpop.xlane.xlu2 %5677  ;;  %6166 = vmatpush.msra.mxu1 %v8574_v21  ;;  %v8575_v61 = vld [vmem:[%s13112_s3 + $0xa8] sm:$0xff] }
0x2229   :  { %v5686_v62 = vmul.f32 %v5678_v63, %v8737_v33  ;;  %6203 = vmatpush.msrb.mxu2 %v8575_v61  ;;  %v8576_v63 = vld [vmem:[%s13112_s3 + $0x60] sm:$0xff] }
0x222a   :  { %6167 = vmatpush.msra.mxu1 %v8576_v63 }
0x222b   :  { %v12399_v31 = vsub.f32 %v12376_v24, %v5686_v62  ;;  %v8577_v62 = vld [vmem:[%s13112_s3 + $0xa0] sm:$0xff] }
0x222c   :  { %6204 = vmatpush.msrb.mxu2 %v8577_v62  ;;  %v8588_v62 = vld [vmem:[%s13112_s3 + $0x28] sm:$0xff] }
0x222d   :  { %v5694_v13 = vmul.f32 %v12399_v31, %v12399_v31 }
0x222f   :  { %v5700_v53 = vsel %vm139_vm1, %v5694_v13, 0.0 }
0x2230   :  { %v5681_v14 = vpop.xlane.xlu1 %5680  ;;  %5701 = vadd.xlane.f32.xlu1 %v5700_v53 }
0x2231   :  { %v5687_v37 = vmul.f32 %v5681_v14, %v8737_v33  ;;  %v8578_v14 = vld [vmem:[%s13112_s3 + $0x58] sm:$0xff] }
0x2232   :  { %6168 = vmatpush.msra.mxu1 %v8578_v14  ;;  %v5766_v14 = vperm.slane %v7348_v26, 0 }
0x2233   :  { %v12406_v42 = vsub.f32 %v12381_v15, %v5687_v37  ;;  %v8579_v37 = vld [vmem:[%s13112_s3 + $0x98] sm:$0xff] }
0x2234   :  { %6205 = vmatpush.msrb.mxu2 %v8579_v37 }
0x2235   :  { %v5695_v58 = vmul.f32 %v12406_v42, %v12406_v42 }
0x2237   :  { %v5703_v11 = vsel %vm139_vm1, %v5695_v58, 0.0 }
0x2238   :  { %5704 = vadd.xlane.f32.xlu0 %v5703_v11  ;;  %v5684_v4 = vpop.xlane.xlu0 %5683 }
0x2239   :  { %v5688_v60 = vmul.f32 %v5684_v4, %v8737_v33  ;;  %v8580_v4 = vld [vmem:[%s13112_s3 + $0x50] sm:$0xff] }
0x223a   :  { %6169 = vmatpush.msra.mxu1 %v8580_v4  ;;  %v8589_v4 = vld [vmem:[%s13112_s3 + $0x20] sm:$0xff] }
0x223b   :  { %v12413_v48 = vsub.f32 %v12386_v25, %v5688_v60  ;;  %v8581_v60 = vld [vmem:[%s13112_s3 + $0x90] sm:$0xff] }
0x223c   :  { %6206 = vmatpush.msrb.mxu2 %v8581_v60 }
0x223d   :  { %v5696_v22 = vmul.f32 %v12413_v48, %v12413_v48 }
0x223e   :  { %6207 = vmatpush.msrb.mxu2 %v8583_v27  ;;  %v8590_v27 = vld [vmem:[%s13112_s3 + $0x18] sm:$0xff] }
0x223f   :  { %v5706_v12 = vsel %vm139_vm1, %v5696_v22, 0.0 }
0x2240   :  { %5707 = vadd.xlane.f32.xlu2 %v5706_v12  ;;  %v8582_v12 = vld [vmem:[%s13112_s3 + $0x48] sm:$0xff]  ;;  %6208 = vmatpush.msrb.mxu2 %v8585_v38  ;;  %v8591_v38 = vld [vmem:[%s13112_s3 + $0x10] sm:$0xff] }
0x2241   :  { %6170 = vmatpush.msra.mxu1 %v8582_v12 }
0x2243   :  { %6171 = vmatpush.msra.mxu1 %v8584_v43 }
0x2245   :  { %6172 = vmatpush.msra.mxu1 %v8586_v56 }
0x2247   :  { %6173 = vmatpush.msra.mxu1 %v8587_v30 }
0x2249   :  { %6174 = vmatpush.msra.mxu1 %v8588_v62 }
0x224b   :  { %6175 = vmatpush.msra.mxu1 %v8589_v4 }
0x224d   :  { %6176 = vmatpush.msra.mxu1 %v8590_v27 }
0x224f   :  { %6177 = vmatpush.msra.mxu1 %v8591_v38 }
0x229b   :  { %v5699_v20 = vpop.xlane.xlu2 %5698 }
0x229c   :  { %v5709_v17 = vmul.f32 %v5699_v20, %v8737_v33  ;;  %v7347_v20 = vld [vmem:[%s13117_s8 + $0x118] sm:$0xff] }
0x229d   :  { %v12505_v63 = vperm.slane %v7347_v20, 0  ;;  %v8592_v20 = vld [vmem:[%s13112_s3 + $0x8] sm:$0xff] }
0x229e   :  { %v5713_v19 = vadd.f32 1e-05, %v5709_v17  ;;  %6178 = vmatpush.msra.mxu1 %v8592_v20 }
0x22a0   :  { %8394 = vrsqrt.f32 %v5713_v19  ;;  %vm5723_vm7 = vweird.f32 %v5713_v19 }
0x22a3   :  { %v5702_v13 = vpop.xlane.xlu1 %5701 }
0x22a4   :  { %v5710_v53 = vmul.f32 %v5702_v13, %v8737_v33 }
0x22a6   :  { %v8395_v58 = vpop.eup %8394  ;;  %v5714_v11 = vadd.f32 1e-05, %v5710_v53 }
0x22a7   :  { %v5718_v22 = vmul.f32 %v8395_v58, %v5713_v19  ;;  %vm5724_vm6 = vweird.f32 %v8395_v58 }
0x22a8   :  { %8396 = vrsqrt.f32 %v5714_v11  ;;  %vm5725_vm8 = vmor %vm5723_vm7, %vm5724_vm6  ;;  %vm5733_vm10 = vweird.f32 %v5714_v11 }
0x22a9   :  { %v5719_v52 = vmul.f32 %v8395_v58, %v5718_v22 }
0x22ab   :  { %v5720_v6 = vmul.f32 0.5, %v5719_v52  ;;  %v5705_v32 = vpop.xlane.xlu0 %5704 }
0x22ac   :  { %v5711_v8 = vmul.f32 %v5705_v32, %v8737_v33 }
0x22ad   :  { %v5721_v17 = vsub.f32 1.5, %v5720_v6 }
0x22ae   :  { %v8397_v35 = vpop.eup %8396  ;;  %v5715_v55 = vadd.f32 1e-05, %v5711_v8 }
0x22af   :  { %v5722_v21 = vmul.f32 %v8395_v58, %v5721_v17  ;;  %v5728_v61 = vmul.f32 %v8397_v35, %v5714_v11  ;;  %vm5734_vm9 = vweird.f32 %v8397_v35  ;;  %v8593_v11 = vld [vmem:[%s13112_s3] sm:$0xff] }
0x22b0   :  { %8398 = vrsqrt.f32 %v5715_v55  ;;  %vm5735_vm11 = vmor %vm5733_vm10, %vm5734_vm9  ;;  %6179 = vmatpush.msra.mxu1 %v8593_v11  ;;  %vm5743_vm13 = vweird.f32 %v5715_v55 }
0x22b1   :  { %v5726_v13 = vsel %vm5725_vm8, %v8395_v58, %v5722_v21  ;;  %v5729_v53 = vmul.f32 %v8397_v35, %v5728_v61 }
0x22b2   :  { %v5757_v37 = vmul.f32 %v5726_v13, %v12392_v40 }
0x22b3   :  { %v5730_v19 = vmul.f32 0.5, %v5729_v53  ;;  %v5708_v60 = vpop.xlane.xlu2 %5707 }
0x22b4   :  { %v5762_v22 = vmul.f32 %v12505_v63, %v5757_v37  ;;  %v5712_v12 = vmul.f32 %v5708_v60, %v8737_v33 }
0x22b5   :  { %v5731_v58 = vsub.f32 1.5, %v5730_v19 }
0x22b6   :  { %v8399_v52 = vpop.eup %8398  ;;  %v5767_v40 = vadd.f32 %v5766_v14, %v5762_v22  ;;  %v5716_v43 = vadd.f32 1e-05, %v5712_v12 }
0x22b7   :  { %v5732_v6 = vmul.f32 %v8397_v35, %v5731_v58  ;;  %v5738_v32 = vmul.f32 %v8399_v52, %v5715_v55  ;;  %vm5744_vm12 = vweird.f32 %v8399_v52 }
0x22b8   :  { %8400 = vrsqrt.f32 %v5716_v43  ;;  %7362 = vmatmul.msk.f32.vlgmr.msrb.gmra.mxu1 %vm139_vm1, %v5767_v40  ;;  %7366 = vmatmul.msk.f32.vlgmr.msra.gmra.mxu2 %vm139_vm1, %v5767_v40  ;;  %vm5745_vm14 = vmor %vm5743_vm13, %vm5744_vm12  ;;  %vm5753_vm3 = vweird.f32 %v5716_v43 }
0x22b9   :  { %v5736_v8 = vsel %vm5735_vm11, %v8397_v35, %v5732_v6  ;;  %v5739_v56 = vmul.f32 %v8399_v52, %v5738_v32 }
0x22ba   :  { %v5758_v17 = vmul.f32 %v5736_v8, %v12399_v31 }
0x22bb   :  { %v5740_v30 = vmul.f32 0.5, %v5739_v56 }
0x22bc   :  { %v5763_v26 = vmul.f32 %v12505_v63, %v5758_v17 }
0x22bd   :  { %v5741_v21 = vsub.f32 1.5, %v5740_v30  ;;  %v13390_v30 = vld [vmem:[#allocation14_spill] sm:$0xff] }
0x22be   :  { %v8401_v61 = vpop.eup %8400  ;;  %v5768_v35 = vadd.f32 %v5766_v14, %v5763_v26  ;;  %v13391_v26 = vld [vmem:[#allocation15_spill] sm:$0xff] }
0x22bf   :  { %v5742_v62 = vmul.f32 %v8399_v52, %v5741_v21  ;;  %v5748_v13 = vmul.f32 %v8401_v61, %v5716_v43  ;;  %vm5754_vm2 = vweird.f32 %v8401_v61 }
0x22c0   :  { %7363 = vmatmul.msk.f32.gmra.mxu1 %vm139_vm1, %v5768_v35  ;;  %7367 = vmatmul.msk.f32.gmra.mxu2 %vm139_vm1, %v5768_v35  ;;  %vm5755_vm4 = vmor %vm5753_vm3, %vm5754_vm2 }
0x22c1   :  { %v5746_v31 = vsel %vm5745_vm14, %v8399_v52, %v5742_v62  ;;  %v5749_v53 = vmul.f32 %v8401_v61, %v5748_v13 }
0x22c2   :  { %v5759_v37 = vmul.f32 %v5746_v31, %v12406_v42  ;;  %v13393_v31 = vld [vmem:[#allocation18_spill] sm:$0xff] }
0x22c3   :  { %v5750_v4 = vmul.f32 0.5, %v5749_v53 }
0x22c4   :  { %v5764_v19 = vmul.f32 %v12505_v63, %v5759_v37  ;;  %v13394_v37 = vld [vmem:[#allocation20_spill] sm:$0xff] }
0x22c5   :  { %v5751_v60 = vsub.f32 1.5, %v5750_v4 }
0x22c6   :  { %v5769_v22 = vadd.f32 %v5766_v14, %v5764_v19  ;;  %v13395_v19 = vld [vmem:[#allocation19_spill] sm:$0xff] }
0x22c7   :  { %v5752_v12 = vmul.f32 %v8401_v61, %v5751_v60 }
0x22c8   :  { %7364 = vmatmul.msk.f32.gmra.mxu1 %vm139_vm1, %v5769_v22  ;;  %7368 = vmatmul.msk.f32.gmra.mxu2 %vm139_vm1, %v5769_v22 }
0x22c9   :  { %v5756_v55 = vsel %vm5755_vm4, %v8401_v61, %v5752_v12  ;;  %v13392_v61 = vld [vmem:[#allocation13_spill] sm:$0xff] }
0x22ca   :  { %v5760_v27 = vmul.f32 %v5756_v55, %v12413_v48 }
0x22cc   :  { %v5765_v58 = vmul.f32 %v12505_v63, %v5760_v27 }
0x22ce   :  { %v5770_v52 = vadd.f32 %v5766_v14, %v5765_v58 }
0x22d0   :  { %7365 = vmatmul.msk.f32.gmra.mxu1 %vm139_vm1, %v5770_v52  ;;  %7369 = vmatmul.msk.f32.gmra.mxu2 %vm139_vm1, %v5770_v52 }
0x2335   :  { %v12542_v42 = vpop.f32.mrf.mxu1 }
0x2336   :  { %v5862_v6 = vmul.f32 %v12542_v42, %v9035_v1  ;;  %v5898_v22 = vmul.f32 %v12542_v42, %v13393_v31 }
0x233d   :  { %v12544_v40 = vpop.f32.mrf.mxu1 }
0x233e   :  { %v5863_v43 = vmul.f32 %v12544_v40, %v9039_v3  ;;  %v5855_v1 = vmul.f32 %v12544_v40, %v9045_v7  ;;  %v12586_v7 = vpop.f32.mrf.mxu2  ;;  %v5867_v35 = vmul.f32 %v12544_v40, %v13392_v61  ;;  %v5892_v12 = vmul.f32 %v12544_v40, %v13394_v37 }
0x233f   :  { %v5899_v53 = vmul.f32 %v12586_v7, %v13393_v31 }
0x2340   :  { %5972 = vrot.lane.b32.xlu2 %v5863_v43, %s8630_s13 }
0x2341   :  { %v8082_v27 = vpack.i.bf16 %v5899_v53, %v5898_v22  ;;  %v13406_v22 = vld [vmem:[#allocation16_spill] sm:$0xff] }
0x2345   :  { %v12549_v38 = vpop.f32.mrf.mxu1 }
0x2346   :  { %v5864_v48 = vmul.f32 %v12549_v38, %v9066_v23  ;;  %v5860_v63 = vmul.f32 %v12549_v38, %v9037_v2  ;;  %v5859_v2 = vmul.f32 %v12544_v40, %v9043_v51  ;;  %v5871_v51 = vmul.f32 %v12544_v40, %v9078_v41  ;;  %v12597_v41 = vpop.f32.mrf.mxu2 }
0x2347   :  { %v5901_v11 = vmul.f32 %v12597_v41, %v13390_v30  ;;  %v5893_v4 = vmul.f32 %v12597_v41, %v13394_v37  ;;  %v5918_v55 = vmul.f32 %v12549_v38, %v13395_v19 }
0x2348   :  { %5974 = vrot.lane.b32.xlu0 %v5864_v48, %s8630_s13  ;;  %5966 = vrot.lane.b32.xlu2 %v5860_v63, %s8630_s13  ;;  %v13396_v48 = vld [vmem:[#allocation32_spill] sm:$0xff] }
0x2349   :  { %v8092_v58 = vpack.i.bf16 %v5893_v4, %v5892_v12  ;;  %v13405_v4 = vld [vmem:[#allocation34_spill] sm:$0xff] }
0x234d   :  { %v12557_v14 = vpop.f32.mrf.mxu1 }
0x234e   :  { %v5865_v3 = vmul.f32 %v12557_v14, %v9033_v0  ;;  %v5857_v32 = vmul.f32 %v12557_v14, %v9041_v36  ;;  %v5861_v23 = vmul.f32 %v12557_v14, %v9104_v44  ;;  %v5856_v0 = vmul.f32 %v12549_v38, %v9047_v45  ;;  %v12614_v20 = vpop.f32.mrf.mxu2 }
0x234f   :  { %v5858_v36 = vmul.f32 %v12542_v42, %v9119_v16  ;;  %v5872_v44 = vmul.f32 %v12549_v38, %v9062_v18  ;;  %v5854_v45 = vmul.f32 %v12542_v42, %v9054_v9  ;;  %v5852_v16 = vmul.f32 %v12549_v38, %v13297_v5 }
0x2350   :  { %5970 = vrot.lane.b32.xlu0 %v5862_v6, %s8630_s13  ;;  %5976 = vrot.lane.b32.xlu1 %v5865_v3, %s8630_s13  ;;  %v5873_v8 = vmul.f32 %v12557_v14, %v13295_v28  ;;  %v5853_v18 = vmul.f32 %v12557_v14, %v9074_v29  ;;  %v5868_v9 = vmul.f32 %v12549_v38, %v13300_v59  ;;  %v13397_v6 = vld [vmem:[#allocation26_spill] sm:$0xff] }
0x2351   :  { %5960 = vrot.lane.b32.xlu2 %v5857_v32, %s8630_s13  ;;  %v5870_v5 = vmul.f32 %v12542_v42, %v13298_v49  ;;  %v5869_v56 = vmul.f32 %v12557_v14, %v13326_v39  ;;  %v5866_v28 = vmul.f32 %v12542_v42, %v13325_v54  ;;  %v5903_v29 = vmul.f32 %v12614_v20, %v13328_v47  ;;  %v13389_v39 = vld [vmem:[#allocation9_spill] sm:$0xff] }
0x2352   :  { %v5902_v49 = vmul.f32 %v12549_v38, %v13328_v47  ;;  %v5851_v59 = vmul.f32 %v12544_v40, %v13324_v10  ;;  %v5850_v54 = vmul.f32 %v12542_v42, %v13389_v39  ;;  %v5895_v21 = vmul.f32 %v12614_v20, %v13391_v26  ;;  %v13398_v32 = vld [vmem:[#allocation29_spill] sm:$0xff] }
0x2353   :  { %v5900_v47 = vmul.f32 %v12544_v40, %v13390_v30  ;;  %v5894_v10 = vmul.f32 %v12549_v38, %v13391_v26  ;;  %v5919_v60 = vmul.f32 %v12614_v20, %v13395_v19  ;;  %v5891_v3 = vmul.f32 %v12586_v7, %v13397_v6 }
0x2354   :  { %v8072_v17 = vpack.i.bf16 %v5903_v29, %v5902_v49  ;;  %v5911_v19 = vmul.f32 %v12614_v20, %v13405_v4 }
0x2355   :  { %v8077_v62 = vpack.i.bf16 %v5901_v11, %v5900_v47  ;;  %v8087_v13 = vpack.i.bf16 %v5895_v21, %v5894_v10  ;;  %v8107_v43 = vpack.i.bf16 %v5919_v60, %v5918_v55  ;;  %v13403_v47 = vld [vmem:[#allocation21_spill] sm:$0xff]  ;;  %v5910_v55 = vmul.f32 %v12549_v38, %v13405_v4 }
0x2356   :  { %v12655_v52 = vpop.f32.mrf.mxu2  ;;  %v5883_v10 = vmul.f32 %v12586_v7, %v13403_v47 }
0x2357   :  { %v5881_v63 = vmul.f32 %v12655_v52, %v13396_v48  ;;  %v5905_v12 = vmul.f32 %v12655_v52, %v13406_v22 }
0x2358   :  { %5964 = vrot.lane.b32.xlu0 %v5859_v2, %s8630_s13  ;;  %5968 = vrot.lane.b32.xlu1 %v5861_v23, %s8630_s13  ;;  %v5917_v2 = vmul.f32 %v12597_v41, %v13398_v32  ;;  %v5880_v23 = vmul.f32 %v12557_v14, %v13396_v48 }
0x2359   :  { %5956 = vrot.lane.b32.xlu2 %v5855_v1, %s8630_s13  ;;  %v5890_v1 = vmul.f32 %v12542_v42, %v13397_v6 }
0x2360   :  { %5958 = vrot.lane.b32.xlu0 %v5856_v0, %s8630_s13  ;;  %5962 = vrot.lane.b32.xlu1 %v5858_v36, %s8630_s13  ;;  %v5916_v0 = vmul.f32 %v12544_v40, %v13398_v32  ;;  %v8167_v36 = vpack.i.bf16 %v5881_v63, %v5880_v23  ;;  %v13407_v63 = vld [vmem:[#allocation24_spill] sm:$0xff] }
0x2361   :  { %5988 = vrot.lane.b32.xlu2 %v5871_v51, %s8630_s13  ;;  %v8097_v51 = vpack.i.bf16 %v5891_v3, %v5890_v1  ;;  %v13408_v3 = vld [vmem:[#allocation23_spill] sm:$0xff] }
0x2362   :  { %v5921_v32 = vmul.f32 %v12655_v52, %v13408_v3  ;;  %v5920_v23 = vmul.f32 %v12557_v14, %v13408_v3 }
0x2368   :  { %5990 = vrot.lane.b32.xlu0 %v5872_v44, %s8630_s13  ;;  %5954 = vrot.lane.b32.xlu1 %v5854_v45, %s8630_s13  ;;  %v8117_v44 = vpack.i.bf16 %v5917_v2, %v5916_v0  ;;  %v5896_v2 = vmul.f32 %v12557_v14, %v13407_v63  ;;  %v8162_v0 = vpack.i.bf16 %v5921_v32, %v5920_v23 }
0x2369   :  { %5950 = vrot.lane.b32.xlu2 %v5852_v16, %s8630_s13  ;;  %v13399_v16 = vld [vmem:[#allocation27_spill] sm:$0xff] }
0x2370   :  { %5992 = vrot.lane.b32.xlu1 %v5873_v8, %s8630_s13  ;;  %5952 = vrot.lane.b32.xlu0 %v5853_v18, %s8630_s13  ;;  %v5887_v8 = vmul.f32 %v12614_v20, %v13399_v16  ;;  %v13400_v18 = vld [vmem:[#allocation28_spill] sm:$0xff] }
0x2371   :  { %5982 = vrot.lane.b32.xlu2 %v5868_v9, %s8630_s13  ;;  %v5915_v9 = vmul.f32 %v12586_v7, %v13400_v18 }
0x2378   :  { %5986 = vrot.lane.b32.xlu1 %v5870_v5, %s8630_s13  ;;  %5984 = vrot.lane.b32.xlu0 %v5869_v56, %s8630_s13  ;;  %v5886_v5 = vmul.f32 %v12549_v38, %v13399_v16  ;;  %v5914_v56 = vmul.f32 %v12542_v42, %v13400_v18 }
0x2379   :  { %5978 = vrot.lane.b32.xlu2 %v5866_v28, %s8630_s13 }
0x237a   :  { %v8102_v28 = vpack.i.bf16 %v5887_v8, %v5886_v5  ;;  %v8127_v29 = vpack.i.bf16 %v5915_v9, %v5914_v56 }
0x2380   :  { %5948 = vrot.lane.b32.xlu1 %v5851_v59, %s8630_s13  ;;  %5946 = vrot.lane.b32.xlu0 %v5850_v54, %s8630_s13  ;;  %v13401_v59 = vld [vmem:[#allocation25_spill] sm:$0xff]  ;;  %v13402_v54 = vld [vmem:[#allocation31_spill] sm:$0xff] }
0x2381   :  { %8073 = vrot.lane.b32.xlu2 %v8072_v17, %s8632_s18  ;;  %v5885_v39 = vmul.f32 %v12597_v41, %v13401_v59  ;;  %v5879_v17 = vmul.f32 %v12614_v20, %v13402_v54  ;;  %v5884_v30 = vmul.f32 %v12544_v40, %v13401_v59  ;;  %v5878_v11 = vmul.f32 %v12549_v38, %v13402_v54 }
0x2382   :  { %v5897_v20 = vmul.f32 %v12655_v52, %v13407_v63 }
0x2383   :  { %v8112_v26 = vpack.i.bf16 %v5885_v39, %v5884_v30  ;;  %v8132_v21 = vpack.i.bf16 %v5879_v17, %v5878_v11 }
0x2384   :  { %v8152_v1 = vpack.i.bf16 %v5897_v20, %v5896_v2 }
0x2388   :  { %5980 = vrot.lane.b32.xlu1 %v5867_v35, %s8630_s13  ;;  %8078 = vrot.lane.b32.xlu0 %v8077_v62, %s8632_s18  ;;  %v13404_v35 = vld [vmem:[#allocation33_spill] sm:$0xff] }
0x2389   :  { %8088 = vrot.lane.b32.xlu2 %v8087_v13, %s8632_s18  ;;  %v5877_v62 = vmul.f32 %v12597_v41, %v13404_v35  ;;  %v5882_v13 = vmul.f32 %v12542_v42, %v13403_v47  ;;  %v5876_v31 = vmul.f32 %v12544_v40, %v13404_v35 }
0x238b   :  { %v8122_v53 = vpack.i.bf16 %v5883_v10, %v5882_v13  ;;  %v8142_v37 = vpack.i.bf16 %v5877_v62, %v5876_v31 }
0x2390   :  { %8083 = vrot.lane.b32.xlu1 %v8082_v27, %s8632_s18  ;;  %8093 = vrot.lane.b32.xlu0 %v8092_v58, %s8632_s18  ;;  %v5904_v27 = vmul.f32 %v12557_v14, %v13406_v22  ;;  %v8137_v58 = vpack.i.bf16 %v5911_v19, %v5910_v55 }
0x2391   :  { %8108 = vrot.lane.b32.xlu2 %v8107_v43, %s8632_s18 }
0x2392   :  { %v8147_v43 = vpack.i.bf16 %v5905_v12, %v5904_v27 }
0x2398   :  { %8168 = vrot.lane.b32.xlu1 %v8167_v36, %s8632_s18  ;;  %8098 = vrot.lane.b32.xlu0 %v8097_v51, %s8632_s18 }
0x2399   :  { %8118 = vrot.lane.b32.xlu2 %v8117_v44, %s8632_s18  ;;  %v13409_v44 = vld [vmem:[#allocation17_spill] sm:$0xff] }
0x239a   :  { %v5973_v45 = vpop.permute.xlu2 %5972  ;;  %v5889_v16 = vmul.f32 %v12655_v52, %v13409_v44  ;;  %v5888_v18 = vmul.f32 %v12557_v14, %v13409_v44 }
0x239c   :  { %v8157_v9 = vpack.i.bf16 %v5889_v16, %v5888_v18 }
0x23a0   :  { %8103 = vrot.lane.b32.xlu0 %v8102_v28, %s8632_s18  ;;  %v13410_v28 = vld [vmem:[#allocation30_spill] sm:$0xff] }
0x23a1   :  { %8128 = vrot.lane.b32.xlu2 %v8127_v29, %s8632_s18  ;;  %v5913_v29 = vmul.f32 %v12655_v52, %v13410_v28  ;;  %v5912_v39 = vmul.f32 %v12557_v14, %v13410_v28 }
0x23a2   :  { %v5967_v49 = vpop.permute.xlu2 %5966 }
0x23a3   :  { %v8172_v54 = vpack.i.bf16 %v5913_v29, %v5912_v39 }
0x23a8   :  { %8113 = vrot.lane.b32.xlu0 %v8112_v26, %s8632_s18 }
0x23a9   :  { %8133 = vrot.lane.b32.xlu2 %v8132_v21, %s8632_s18 }
0x23ab   :  { %v5961_v61 = vpop.permute.xlu2 %5960 }
0x23b0   :  { %8123 = vrot.lane.b32.xlu0 %v8122_v53, %s8632_s18 }
0x23b1   :  { %8143 = vrot.lane.b32.xlu2 %v8142_v37, %s8632_s18 }
0x23b3   :  { %v5957_v60 = vpop.permute.xlu2 %5956 }
0x23b8   :  { %8138 = vrot.lane.b32.xlu0 %v8137_v58, %s8632_s18 }
0x23b9   :  { %8148 = vrot.lane.b32.xlu2 %v8147_v43, %s8632_s18 }
0x23ba   :  { %v5975_v48 = vpop.permute.xlu0 %5974 }
0x23bb   :  { %v5989_v6 = vpop.permute.xlu2 %5988 }
0x23c0   :  { %8153 = vrot.lane.b32.xlu0 %v8152_v1, %s8632_s18 }
0x23c1   :  { %8163 = vrot.lane.b32.xlu2 %v8162_v0, %s8632_s18 }
0x23c2   :  { %v5971_v36 = vpop.permute.xlu0 %5970  ;;  %v5977_v51 = vpop.permute.xlu1 %5976 }
0x23c3   :  { %v5951_v8 = vpop.permute.xlu2 %5950  ;;  %7370 = vmatpush.xpose.msk.msra.mxu3 %vm635_vm15, %v5977_v51 }
0x23c7   :  { %7371 = vmatpush.xpose.msk.msra.mxu3 %vm635_vm15, %v5975_v48 }
0x23c8   :  { %8158 = vrot.lane.b32.xlu0 %v8157_v9, %s8632_s18 }
0x23ca   :  { %v5965_v5 = vpop.permute.xlu0 %5964  ;;  %v5969_v56 = vpop.permute.xlu1 %5968 }
0x23cb   :  { %v5983_v59 = vpop.permute.xlu2 %5982  ;;  %7372 = vmatpush.xpose.msk.msra.mxu3 %vm635_vm15, %v5973_v45 }
0x23cf   :  { %7373 = vmatpush.xpose.msk.msra.mxu3 %vm635_vm15, %v5971_v36 }
0x23d0   :  { %8173 = vrot.lane.b32.xlu0 %v8172_v54, %s8632_s18 }
0x23d2   :  { %v5959_v17 = vpop.permute.xlu0 %5958  ;;  %v5963_v30 = vpop.permute.xlu1 %5962 }
0x23d3   :  { %v5979_v11 = vpop.permute.xlu2 %5978  ;;  %7374 = vmatpush.xpose.msk.msra.mxu3 %vm635_vm15, %v5969_v56 }
0x23d7   :  { %7375 = vmatpush.xpose.msk.msra.mxu3 %vm635_vm15, %v5967_v49 }
0x23da   :  { %v5991_v26 = vpop.permute.xlu0 %5990  ;;  %v5955_v52 = vpop.permute.xlu1 %5954 }
0x23db   :  { %v8074_v21 = vpop.permute.xlu2 %8073  ;;  %7376 = vmatpush.xpose.msk.msra.mxu3 %vm635_vm15, %v5965_v5 }
0x23dc   :  { %v8076_v58 = vunpack.i.h.bf16 %v8074_v21  ;;  %v8075_v43 = vunpack.i.l.bf16 %v8074_v21 }
0x23de   :  { %v6380_v1 = vsel %vm139_vm1, %v8075_v43, %v8076_v58 }
0x23df   :  { %7377 = vmatpush.xpose.msk.msra.mxu3 %vm635_vm15, %v5963_v30 }
0x23e2   :  { %v5993_v45 = vpop.permute.xlu1 %5992  ;;  %v5953_v47 = vpop.permute.xlu0 %5952 }
0x23e3   :  { %v12743_v10 = vpop.permute.xlu2 %8088  ;;  %7378 = vmatpush.xpose.msk.msra.mxu3 %vm635_vm15, %v5961_v61  ;;  %7390 = vmatpush.xpose.msk.msra.mxu0 %vm635_vm15, %v5993_v45 }
0x23e7   :  { %7379 = vmatpush.xpose.msk.msra.mxu3 %vm635_vm15, %v5959_v17  ;;  %7391 = vmatpush.xpose.msk.msra.mxu0 %vm635_vm15, %v5991_v26  ;;  %v8090_v26 = vunpack.i.l.bf16 %v12743_v10 }
0x23ea   :  { %v5987_v49 = vpop.permute.xlu1 %5986  ;;  %v5985_v35 = vpop.permute.xlu0 %5984 }
0x23eb   :  { %v12749_v62 = vpop.permute.xlu2 %8108  ;;  %7380 = vmatpush.xpose.msk.msra.mxu3 %vm635_vm15, %v5957_v60  ;;  %7392 = vmatpush.xpose.msk.msra.mxu0 %vm635_vm15, %v5989_v6 }
0x23ec   :  { %v8111_v36 = vunpack.i.h.bf16 %v12749_v62  ;;  %v8110_v44 = vunpack.i.l.bf16 %v12749_v62 }
0x23ee   :  { %v6388_v29 = vsel %vm139_vm1, %v8110_v44, %v8111_v36 }
0x23ef   :  { %7381 = vmatpush.xpose.msk.msra.mxu3 %vm635_vm15, %v5955_v52  ;;  %7393 = vmatpush.xpose.msk.msra.mxu0 %vm635_vm15, %v5987_v49 }
0x23f2   :  { %v5949_v13 = vpop.permute.xlu1 %5948  ;;  %v5947_v61 = vpop.permute.xlu0 %5946 }
0x23f3   :  { %v8119_v31 = vpop.permute.xlu2 %8118  ;;  %7382 = vmatpush.xpose.msk.msra.mxu3 %vm635_vm15, %v5953_v47  ;;  %7394 = vmatpush.xpose.msk.msra.mxu0 %vm635_vm15, %v5985_v35 }
0x23f4   :  { %v8121_v9 = vunpack.i.h.bf16 %v8119_v31  ;;  %v8120_v5 = vunpack.i.l.bf16 %v8119_v31 }
0x23f6   :  { %v6387_v39 = vsel %vm139_vm1, %v8120_v5, %v8121_v9 }
0x23f7   :  { %7383 = vmatpush.xpose.msk.msra.mxu3 %vm635_vm15, %v5951_v8  ;;  %7395 = vmatpush.xpose.msk.msra.mxu0 %vm635_vm15, %v5983_v59 }
0x23fa   :  { %v5981_v53 = vpop.permute.xlu1 %5980  ;;  %v8079_v37 = vpop.permute.xlu0 %8078 }
0x23fb   :  { %v8129_v4 = vpop.permute.xlu2 %8128  ;;  %7384 = vmatpush.xpose.msk.msra.mxu3 %vm635_vm15, %v5949_v13  ;;  %7396 = vmatpush.xpose.msk.msra.mxu0 %vm635_vm15, %v5981_v53  ;;  %v8081_v6 = vunpack.i.h.bf16 %v8079_v37  ;;  %v8080_v3 = vunpack.i.l.bf16 %v8079_v37 }
0x23fc   :  { %v8131_v28 = vunpack.i.h.bf16 %v8129_v4 }
0x23ff   :  { %7385 = vmatpush.xpose.msk.msra.mxu3 %vm635_vm15, %v5947_v61  ;;  %7397 = vmatpush.xpose.msk.msra.mxu0 %vm635_vm15, %v5979_v11  ;;  %v8091_v11 = vunpack.i.h.bf16 %v12743_v10 }
0x2401   :  { %v6376_v13 = vsel %vm139_vm1, %v8090_v26, %v8091_v11 }
0x2402   :  { %v12763_v19 = vpop.permute.xlu0 %8093  ;;  %7386 = vmatmul.msk.f32.vlgmr.msra.gmra.mxu3 %vm635_vm15, %v12542_v42  ;;  %7398 = vmatmul.msk.f32.vlgmr.msra.gmra.mxu0 %vm635_vm15, %v12542_v42  ;;  %v8084_v20 = vpop.permute.xlu1 %8083 }
0x2403   :  { %v12769_v60 = vpop.permute.xlu2 %8133  ;;  %v8086_v2 = vunpack.i.h.bf16 %v8084_v20  ;;  %v8085_v23 = vunpack.i.l.bf16 %v8084_v20  ;;  %v8096_v45 = vunpack.i.h.bf16 %v12763_v19  ;;  %v8095_v47 = vunpack.i.l.bf16 %v12763_v19 }
0x2405   :  { %v6378_v18 = vsel %vm139_vm1, %v8085_v23, %v8086_v2  ;;  %v6375_v61 = vsel %vm139_vm1, %v8095_v47, %v8096_v45  ;;  %v8135_v2 = vunpack.i.l.bf16 %v12769_v60 }
0x240a   :  { %v12771_v22 = vpop.permute.xlu0 %8098  ;;  %7387 = vmatmul.msk.f32.gmra.mxu3 %vm635_vm15, %v12544_v40  ;;  %7399 = vmatmul.msk.f32.gmra.mxu0 %vm635_vm15, %v12544_v40  ;;  %v8169_v43 = vpop.permute.xlu1 %8168 }
0x240b   :  { %v12777_v12 = vpop.permute.xlu2 %8143  ;;  %v8101_v35 = vunpack.i.h.bf16 %v12771_v22  ;;  %v8100_v62 = vunpack.i.l.bf16 %v12771_v22 }
0x240c   :  { %v8146_v44 = vunpack.i.h.bf16 %v12777_v12 }
0x240d   :  { %v6374_v10 = vsel %vm139_vm1, %v8100_v62, %v8101_v35  ;;  %v8598_v35 = vld [vmem:[%s13111_s2 + $0x28] sm:$0xff] }
0x2412   :  { %v12779_v55 = vpop.permute.xlu0 %8103  ;;  %7388 = vmatmul.msk.f32.gmra.mxu3 %vm635_vm15, %v12549_v38  ;;  %7400 = vmatmul.msk.f32.gmra.mxu0 %vm635_vm15, %v12549_v38  ;;  %v6379_v38 = vsel %vm139_vm1, %v8080_v3, %v8081_v6  ;;  %v8171_v6 = vunpack.i.h.bf16 %v8169_v43  ;;  %v8170_v3 = vunpack.i.l.bf16 %v8169_v43 }
0x2413   :  { %v8149_v27 = vpop.permute.xlu2 %8148  ;;  %v8106_v53 = vunpack.i.h.bf16 %v12779_v55  ;;  %v8105_v37 = vunpack.i.l.bf16 %v12779_v55  ;;  %v8136_v55 = vunpack.i.h.bf16 %v12769_v60 }
0x2414   :  { %v8151_v48 = vunpack.i.h.bf16 %v8149_v27  ;;  %v8150_v63 = vunpack.i.l.bf16 %v8149_v27 }
0x2415   :  { %v6372_v20 = vsel %vm139_vm1, %v8105_v37, %v8106_v53  ;;  %v6368_v60 = vsel %vm139_vm1, %v8135_v2, %v8136_v55 }
0x2416   :  { %v6381_v32 = vsel %vm139_vm1, %v8150_v63, %v8151_v48 }
0x2417   :  { %6414 = vmatpush.msrb.mxu0 %v6381_v32 }
0x2419   :  { %6415 = vmatpush.msrb.mxu0 %v6380_v1 }
0x241a   :  { %v8114_v0 = vpop.permute.xlu0 %8113  ;;  %7389 = vmatmul.msk.f32.gmra.mxu3 %vm635_vm15, %v12557_v14  ;;  %7401 = vmatmul.msk.f32.gmra.mxu0 %vm635_vm15, %v12557_v14  ;;  %v8130_v14 = vunpack.i.l.bf16 %v8129_v4 }
0x241b   :  { %v8164_v51 = vpop.permute.xlu2 %8163  ;;  %6416 = vmatpush.msrb.mxu0 %v6379_v38  ;;  %v8116_v27 = vunpack.i.h.bf16 %v8114_v0  ;;  %v8115_v58 = vunpack.i.l.bf16 %v8114_v0 }
0x241c   :  { %v8166_v16 = vunpack.i.h.bf16 %v8164_v51  ;;  %v8165_v8 = vunpack.i.l.bf16 %v8164_v51  ;;  %v6386_v54 = vsel %vm139_vm1, %v8130_v14, %v8131_v28 }
0x241d   :  { %6417 = vmatpush.msrb.mxu0 %v6378_v18  ;;  %v6371_v32 = vsel %vm139_vm1, %v8115_v58, %v8116_v27  ;;  %v8600_v27 = vld [vmem:[%s13111_s2 + $0x38] sm:$0xff] }
0x241e   :  { %v6389_v56 = vsel %vm139_vm1, %v8165_v8, %v8166_v16  ;;  %v8145_v16 = vunpack.i.l.bf16 %v12777_v12  ;;  %v6369_v8 = vsel %vm139_vm1, %v8170_v3, %v8171_v6  ;;  %v8594_v12 = vld [vmem:[%s13111_s2 + $0x8] sm:$0xff]  ;;  %v5907_v3 = vmul.f32 %v12586_v7, %v9401_v57 }
0x241f   :  { %6451 = vmatpush.msrb.mxu1 %v6389_v56 }
0x2420   :  { %v6367_v5 = vsel %vm139_vm1, %v8145_v16, %v8146_v44 }
0x2421   :  { %6452 = vmatpush.msrb.mxu1 %v6388_v29  ;;  %v8595_v29 = vld [vmem:[%s13111_s2] sm:$0xff] }
0x2422   :  { %v8124_v59 = vpop.permute.xlu0 %8123 }
0x2423   :  { %6453 = vmatpush.msrb.mxu1 %v6387_v39  ;;  %v8126_v48 = vunpack.i.h.bf16 %v8124_v59  ;;  %v8125_v63 = vunpack.i.l.bf16 %v8124_v59 }
0x2425   :  { %6454 = vmatpush.msrb.mxu1 %v6386_v54  ;;  %v6370_v1 = vsel %vm139_vm1, %v8125_v63, %v8126_v48  ;;  %v8601_v48 = vld [vmem:[%s13111_s2 + $0x30] sm:$0xff] }
0x242a   :  { %v8139_v17 = vpop.permute.xlu0 %8138 }
0x242b   :  { %v8141_v0 = vunpack.i.h.bf16 %v8139_v17  ;;  %v8140_v38 = vunpack.i.l.bf16 %v8139_v17 }
0x242d   :  { %v6384_v9 = vsel %vm139_vm1, %v8140_v38, %v8141_v0 }
0x2432   :  { %v8154_v30 = vpop.permute.xlu0 %8153 }
0x2433   :  { %v8156_v52 = vunpack.i.h.bf16 %v8154_v30  ;;  %v8155_v21 = vunpack.i.l.bf16 %v8154_v30  ;;  %v8596_v30 = vld [vmem:[%s13111_s2 + $0x18] sm:$0xff] }
0x2435   :  { %v6377_v49 = vsel %vm139_vm1, %v8155_v21, %v8156_v52  ;;  %v8597_v52 = vld [vmem:[%s13111_s2 + $0x10] sm:$0xff] }
0x2436   :  { %6418 = vmatpush.msrb.mxu0 %v6377_v49 }
0x2438   :  { %6419 = vmatpush.msrb.mxu0 %v6376_v13 }
0x243a   :  { %v8159_v31 = vpop.permute.xlu0 %8158  ;;  %6420 = vmatpush.msrb.mxu0 %v6375_v61  ;;  %v8599_v61 = vld [vmem:[%s13111_s2 + $0x20] sm:$0xff] }
0x243b   :  { %v8161_v4 = vunpack.i.h.bf16 %v8159_v31  ;;  %v8160_v19 = vunpack.i.l.bf16 %v8159_v31 }
0x243c   :  { %6421 = vmatpush.msrb.mxu0 %v6374_v10 }
0x243d   :  { %v6373_v22 = vsel %vm139_vm1, %v8160_v19, %v8161_v4  ;;  %v5909_v4 = vmul.f32 %v12597_v41, %v9451_v34  ;;  %v5908_v19 = vmul.f32 %v12544_v40, %v9451_v34  ;;  %v5875_v34 = vmul.f32 %v12586_v7, %v13323_v50 }
0x243e   :  { %6422 = vmatpush.msrb.mxu0 %v6373_v22  ;;  %v5874_v40 = vmul.f32 %v12542_v42, %v13323_v50 }
0x243f   :  { %v8177_v22 = vpack.i.bf16 %v5909_v4, %v5908_v19  ;;  %v7412_v4 = vld [vmem:[%s13114_s5 + $0x100] sm:$0xff] }
0x2440   :  { %6423 = vmatpush.msrb.mxu0 %v6372_v20  ;;  %v8182_v6 = vpack.i.bf16 %v5875_v34, %v5874_v40 }
0x2442   :  { %v8174_v23 = vpop.permute.xlu0 %8173  ;;  %6424 = vmatpush.msrb.mxu0 %v6371_v32  ;;  %v5906_v32 = vmul.f32 %v12542_v42, %v9401_v57 }
0x2443   :  { %v8176_v36 = vunpack.i.h.bf16 %v8174_v23  ;;  %v8175_v51 = vunpack.i.l.bf16 %v8174_v23 }
0x2444   :  { %6425 = vmatpush.msrb.mxu0 %v6370_v1  ;;  %v8187_v55 = vpack.i.bf16 %v5907_v3, %v5906_v32 }
0x2445   :  { %v6385_v18 = vsel %vm139_vm1, %v8175_v51, %v8176_v36 }
0x2446   :  { %6426 = vmatpush.msrb.mxu0 %v6369_v8  ;;  %6455 = vmatpush.msrb.mxu1 %v6385_v18 }
0x2448   :  { %6427 = vmatpush.msrb.mxu0 %v6368_v60  ;;  %6456 = vmatpush.msrb.mxu1 %v6384_v9 }
0x244a   :  { %6428 = vmatpush.msrb.mxu0 %v6367_v5 }
0x247f   :  { %v6100_v56 = vpop.f32.mrf.mxu0 }
0x2480   :  { %v6101_v28 = vadd.f32 %v8594_v12, %v6100_v56 }
0x2482   :  { %v6112_v39 = vsel %vm754_vm0, %v6101_v28, -inf }
0x2485   :  { %v6071_v14 = vpop.f32.mrf.mxu3 }
0x2486   :  { %v6072_v59 = vadd.f32 %v8595_v29, %v6071_v14 }
0x2487   :  { %v6103_v54 = vpop.f32.mrf.mxu0 }
0x2488   :  { %v6113_v17 = vmax.f32 %v6072_v59, %v6112_v39  ;;  %v6104_v11 = vadd.f32 %v8596_v30, %v6103_v54 }
0x248a   :  { %6114 = vmax.xlane.f32.xlu0 %v6113_v17  ;;  %v6116_v45 = vsel %vm754_vm0, %v6104_v11, -inf }
0x248d   :  { %v6074_v26 = vpop.f32.mrf.mxu3 }
0x248e   :  { %v6075_v21 = vadd.f32 %v8597_v52, %v6074_v26 }
0x248f   :  { %v6106_v47 = vpop.f32.mrf.mxu0 }
0x2490   :  { %v6117_v49 = vmax.f32 %v6075_v21, %v6116_v45  ;;  %v6107_v62 = vadd.f32 %v8598_v35, %v6106_v47 }
0x2492   :  { %6118 = vmax.xlane.f32.xlu1 %v6117_v49  ;;  %v6120_v10 = vsel %vm754_vm0, %v6107_v62, -inf }
0x2495   :  { %v6077_v13 = vpop.f32.mrf.mxu3 }
0x2496   :  { %v6078_v31 = vadd.f32 %v8599_v61, %v6077_v13 }
0x2497   :  { %v6109_v37 = vpop.f32.mrf.mxu0 }
0x2498   :  { %v6121_v53 = vmax.f32 %v6078_v31, %v6120_v10  ;;  %v6110_v58 = vadd.f32 %v8600_v27, %v6109_v37  ;;  %v7415_v10 = vld [vmem:[%s13114_s5 + $0x118] sm:$0xff]  ;;  %v7413_v37 = vld [vmem:[%s13114_s5 + $0x108] sm:$0xff] }
0x2499   :  { %6510 = vmatpush.msra.mxu2 %v7415_v10  ;;  %v7411_v27 = vld [vmem:[%s13114_s5 + $0xf8] sm:$0xff] }
0x249a   :  { %6122 = vmax.xlane.f32.xlu2 %v6121_v53  ;;  %v6124_v41 = vsel %vm754_vm0, %v6110_v58, -inf  ;;  %v7414_v53 = vld [vmem:[%s13114_s5 + $0x110] sm:$0xff] }
0x249b   :  { %6511 = vmatpush.msra.mxu2 %v7414_v53 }
0x249d   :  { %v6080_v43 = vpop.f32.mrf.mxu3  ;;  %6512 = vmatpush.msra.mxu2 %v7413_v37 }
0x249e   :  { %v6081_v63 = vadd.f32 %v8601_v48, %v6080_v43  ;;  %8178 = vrot.lane.b32.xlu0 %v8177_v22, %s8632_s18 }
0x249f   :  { %6513 = vmatpush.msra.mxu2 %v7412_v4 }
0x24a0   :  { %v6125_v20 = vmax.f32 %v6081_v63, %v6124_v41 }
0x24a1   :  { %6514 = vmatpush.msra.mxu2 %v7411_v27 }
0x24a2   :  { %6126 = vmax.xlane.f32.xlu1 %v6125_v20 }
0x24b2   :  { %8183 = vrot.lane.b32.xlu2 %v8182_v6, %s8632_s18 }
0x24bb   :  { %8188 = vrot.lane.b32.xlu1 %v8187_v55, %s8632_s18 }
0x24fd   :  { %v6115_v2 = vpop.xlane.xlu0 %6114 }
0x24fe   :  { %v6128_v23 = vsub.f32 %v6072_v59, %v6115_v2  ;;  %v6129_v1 = vsub.f32 %v6101_v28, %v6115_v2 }
0x2500   :  { %v6136_v0 = vmul.f32 1.442695, %v6128_v23  ;;  %v6138_v38 = vmul.f32 1.442695, %v6129_v1 }
0x2502   :  { %8402 = vpow2.f32 %v6136_v0 }
0x2503   :  { %8404 = vpow2.f32 %v6138_v38 }
0x2505   :  { %v6119_v50 = vpop.xlane.xlu1 %6118 }
0x2506   :  { %v6130_v36 = vsub.f32 %v6075_v21, %v6119_v50  ;;  %v6131_v51 = vsub.f32 %v6104_v11, %v6119_v50 }
0x2508   :  { %v8403_v44 = vpop.eup %8402  ;;  %v6140_v16 = vmul.f32 1.442695, %v6130_v36  ;;  %v6142_v8 = vmul.f32 1.442695, %v6131_v51 }
0x2509   :  { %v8405_v7 = vpop.eup %8404  ;;  %6180 = vmatmul.f32.vlgmr.msra.gmra.mxu1 %v8403_v44 }
0x250a   :  { %8406 = vpow2.f32 %v6140_v16  ;;  %7402 = vmatmul.msk.f32.vlgmr.msrb.gmra.mxu2 %vm754_vm0, %v8405_v7 }
0x250b   :  { %8408 = vpow2.f32 %v6142_v8 }
0x250d   :  { %v6123_v57 = vpop.xlane.xlu2 %6122 }
0x250e   :  { %v6132_v42 = vsub.f32 %v6078_v31, %v6123_v57  ;;  %v6133_v18 = vsub.f32 %v6107_v62, %v6123_v57 }
0x2510   :  { %v8407_v60 = vpop.eup %8406  ;;  %v6144_v9 = vmul.f32 1.442695, %v6132_v42  ;;  %v6146_v5 = vmul.f32 1.442695, %v6133_v18  ;;  %v8179_v56 = vpop.permute.xlu0 %8178 }
0x2511   :  { %v8409_v12 = vpop.eup %8408  ;;  %v8181_v28 = vunpack.i.h.bf16 %v8179_v56  ;;  %v8180_v14 = vunpack.i.l.bf16 %v8179_v56  ;;  %6183 = vmatmul.f32.gmra.mxu1 %v8407_v60 }
0x2512   :  { %8410 = vpow2.f32 %v6144_v9  ;;  %7403 = vmatmul.msk.f32.gmra.mxu2 %vm754_vm0, %v8409_v12 }
0x2513   :  { %8412 = vpow2.f32 %v6146_v5  ;;  %v6383_v29 = vsel %vm139_vm1, %v8180_v14, %v8181_v28 }
0x2514   :  { %6457 = vmatpush.msrb.mxu1 %v6383_v29 }
0x2515   :  { %v6127_v59 = vpop.xlane.xlu1 %6126  ;;  %v8184_v39 = vpop.permute.xlu2 %8183 }
0x2516   :  { %v6134_v54 = vsub.f32 %v6081_v63, %v6127_v59  ;;  %v6135_v17 = vsub.f32 %v6110_v58, %v6127_v59  ;;  %v8186_v30 = vunpack.i.h.bf16 %v8184_v39  ;;  %v8185_v11 = vunpack.i.l.bf16 %v8184_v39  ;;  %v7410_v58 = vld [vmem:[%s13114_s5 + $0xf0] sm:$0xff] }
0x2517   :  { %6515 = vmatpush.msra.mxu2 %v7410_v58 }
0x2518   :  { %v8411_v26 = vpop.eup %8410  ;;  %v6148_v52 = vmul.f32 1.442695, %v6134_v54  ;;  %v6150_v21 = vmul.f32 1.442695, %v6135_v17  ;;  %v6366_v45 = vsel %vm139_vm1, %v8185_v11, %v8186_v30 }
0x2519   :  { %v8413_v47 = vpop.eup %8412  ;;  %6186 = vmatmul.f32.gmra.mxu1 %v8411_v26  ;;  %6429 = vmatpush.msrb.mxu0 %v6366_v45 }
0x251a   :  { %8414 = vpow2.f32 %v6148_v52  ;;  %7404 = vmatmul.msk.f32.gmra.mxu2 %vm754_vm0, %v8413_v47  ;;  %6430 = vmatmul.f32.vlgmr.msrb.gmra.mxu0 %v8403_v44 }
0x251b   :  { %8416 = vpow2.f32 %v6150_v21 }
0x2520   :  { %v8415_v49 = vpop.eup %8414 }
0x2521   :  { %v8417_v35 = vpop.eup %8416  ;;  %6189 = vmatmul.f32.gmra.mxu1 %v8415_v49 }
0x2522   :  { %7405 = vmatmul.msk.f32.gmra.mxu2 %vm754_vm0, %v8417_v35  ;;  %6433 = vmatmul.f32.gmra.mxu0 %v8407_v60 }
0x252a   :  { %6436 = vmatmul.f32.gmra.mxu0 %v8411_v26 }
0x252d   :  { %v8189_v62 = vpop.permute.xlu1 %8188 }
0x252e   :  { %v8191_v13 = vunpack.i.h.bf16 %v8189_v62  ;;  %v8190_v61 = vunpack.i.l.bf16 %v8189_v62 }
0x2530   :  { %v6382_v31 = vsel %vm139_vm1, %v8190_v61, %v8191_v13 }
0x2531   :  { %6458 = vmatpush.msrb.mxu1 %v6382_v31 }
0x2532   :  { %6439 = vmatmul.f32.gmra.mxu0 %v8415_v49  ;;  %7406 = vmatmul.msk.f32.vlgmr.msrb.gmra.mxu1 %vm754_vm0, %v8405_v7 }
0x253a   :  { %7407 = vmatmul.msk.f32.gmra.mxu1 %vm754_vm0, %v8409_v12  ;;  %v7351_v12 = vld [vmem:[%s13117_s8 + $0x138] sm:$0xff] }
0x253b   :  { %v6487_v28 = vperm.slane %v7351_v12, 0  ;;  %v7442_v12 = vld [vmem:[%s13116_s7 + $0x2f0] sm:$0xff] }
0x2542   :  { %7408 = vmatmul.msk.f32.gmra.mxu1 %vm754_vm0, %v8413_v47 }
0x254a   :  { %7409 = vmatmul.msk.f32.gmra.mxu1 %vm754_vm0, %v8417_v35 }
0x2586   :  { %v6181_v19 = vpop.f32.mrf.mxu1 }
0x258d   :  { %v6210_v48 = vpop.f32.mrf.mxu2 }
0x258e   :  { %v6184_v22 = vpop.f32.mrf.mxu1  ;;  %v6211_v63 = vadd.f32 %v6210_v48, %v6181_v19 }
0x2590   :  { %8418 = vrcp.f32 %v6211_v63 }
0x2595   :  { %v6213_v20 = vpop.f32.mrf.mxu2 }
0x2596   :  { %v6187_v43 = vpop.f32.mrf.mxu1  ;;  %v6214_v40 = vadd.f32 %v6213_v20, %v6184_v22  ;;  %v8419_v32 = vpop.eup %8418 }
0x2597   :  { %v6431_v34 = vpop.f32.mrf.mxu0 }
0x2598   :  { %8420 = vrcp.f32 %v6214_v40  ;;  %v7422_v40 = vld [vmem:[%s13115_s6 + $0xb0] sm:$0xff] }
0x259d   :  { %v6216_v55 = vpop.f32.mrf.mxu2 }
0x259e   :  { %v6190_v41 = vpop.f32.mrf.mxu1  ;;  %v6217_v1 = vadd.f32 %v6216_v55, %v6187_v43  ;;  %v8421_v50 = vpop.eup %8420 }
0x259f   :  { %v6434_v23 = vpop.f32.mrf.mxu0 }
0x25a0   :  { %8422 = vrcp.f32 %v6217_v1 }
0x25a5   :  { %v6219_v51 = vpop.f32.mrf.mxu2 }
0x25a6   :  { %v6220_v16 = vadd.f32 %v6219_v51, %v6190_v41  ;;  %v8423_v57 = vpop.eup %8422 }
0x25a7   :  { %v6437_v44 = vpop.f32.mrf.mxu0 }
0x25a8   :  { %8424 = vrcp.f32 %v6220_v16 }
0x25ae   :  { %v8425_v5 = vpop.eup %8424 }
0x25af   :  { %v6460_v6 = vpop.f32.mrf.mxu1  ;;  %v6440_v18 = vpop.f32.mrf.mxu0 }
0x25b0   :  { %v6461_v3 = vadd.f32 %v6460_v6, %v6431_v34  ;;  %v7423_v34 = vld [vmem:[%s13115_s6 + $0xb8] sm:$0xff]  ;;  %v7421_v6 = vld [vmem:[%s13115_s6 + $0xa8] sm:$0xff] }
0x25b1   :  { %6661 = vmatpush.msrb.mxu3 %v7423_v34  ;;  %v7434_v34 = vld [vmem:[%s13116_s7 + $0x2b0] sm:$0xff] }
0x25b2   :  { %v6476_v2 = vmul.f32 %v8419_v32, %v6461_v3  ;;  %v7420_v3 = vld [vmem:[%s13115_s6 + $0xa0] sm:$0xff] }
0x25b3   :  { %6662 = vmatpush.msrb.mxu3 %v7422_v40 }
0x25b4   :  { %7416 = vmatmul.msk.f32.vlgmr.msra.gmra.mxu2 %vm635_vm15, %v6476_v2 }
0x25b5   :  { %6663 = vmatpush.msrb.mxu3 %v7421_v6 }
0x25b7   :  { %v6463_v0 = vpop.f32.mrf.mxu1  ;;  %6664 = vmatpush.msrb.mxu3 %v7420_v3 }
0x25b8   :  { %v6464_v38 = vadd.f32 %v6463_v0, %v6434_v23 }
0x25ba   :  { %v6477_v36 = vmul.f32 %v8421_v50, %v6464_v38 }
0x25bc   :  { %7417 = vmatmul.msk.f32.gmra.mxu2 %vm635_vm15, %v6477_v36 }
0x25bf   :  { %v6466_v8 = vpop.f32.mrf.mxu1 }
0x25c0   :  { %v6467_v7 = vadd.f32 %v6466_v8, %v6437_v44  ;;  %v7349_v8 = vld [vmem:[%s13117_s8 + $0x128] sm:$0xff] }
0x25c2   :  { %v6478_v42 = vmul.f32 %v8423_v57, %v6467_v7 }
0x25c4   :  { %7418 = vmatmul.msk.f32.gmra.mxu2 %vm635_vm15, %v6478_v42 }
0x25c7   :  { %v6469_v60 = vpop.f32.mrf.mxu1 }
0x25c8   :  { %v6470_v9 = vadd.f32 %v6469_v60, %v6440_v18  ;;  %v7350_v18 = vld [vmem:[%s13117_s8 + $0x130] sm:$0xff] }
0x25ca   :  { %v6479_v56 = vmul.f32 %v8425_v5, %v6470_v9  ;;  %v12968_v5 = vperm.slane %v7349_v8, 0  ;;  %v7429_v8 = vld [vmem:[%s13116_s7 + $0x288] sm:$0xff] }
0x25cc   :  { %7419 = vmatmul.msk.f32.gmra.mxu2 %vm635_vm15, %v6479_v56  ;;  %v7443_v56 = vld [vmem:[%s13116_s7 + $0x2f8] sm:$0xff] }
0x25cd   :  { %6699 = vmatpush.msra.mxu0 %v7443_v56 }
0x25cf   :  { %6700 = vmatpush.msra.mxu0 %v7442_v12 }
0x2637   :  { %v6517_v14 = vpop.f32.mrf.mxu2 }
0x2638   :  { %v6518_v29 = vadd.f32 %v6517_v14, %v6487_v28 }
0x263a   :  { %v12904_v59 = vadd.f32 %v6518_v29, %v12371_v46  ;;  %v12976_v29 = vperm.slane %v7350_v18, 0 }
0x263c   :  { %v6533_v39 = vsel %vm139_vm1, %v12904_v59, 0.0 }
0x263d   :  { %6534 = vadd.xlane.f32.xlu0 %v6533_v39 }
0x263f   :  { %v6520_v54 = vpop.f32.mrf.mxu2 }
0x2640   :  { %v6521_v17 = vadd.f32 %v6520_v54, %v6487_v28  ;;  %v7441_v54 = vld [vmem:[%s13116_s7 + $0x2e8] sm:$0xff] }
0x2641   :  { %6701 = vmatpush.msra.mxu0 %v7441_v54 }
0x2642   :  { %v12909_v30 = vadd.f32 %v6521_v17, %v12376_v24 }
0x2644   :  { %v6536_v11 = vsel %vm139_vm1, %v12909_v30, 0.0 }
0x2645   :  { %6537 = vadd.xlane.f32.xlu2 %v6536_v11 }
0x2647   :  { %v6523_v26 = vpop.f32.mrf.mxu2 }
0x2648   :  { %v6524_v52 = vadd.f32 %v6523_v26, %v6487_v28 }
0x264a   :  { %v12914_v21 = vadd.f32 %v6524_v52, %v12381_v15 }
0x264c   :  { %v6539_v46 = vsel %vm139_vm1, %v12914_v21, 0.0 }
0x264d   :  { %6540 = vadd.xlane.f32.xlu1 %v6539_v46  ;;  %v7440_v46 = vld [vmem:[%s13116_s7 + $0x2e0] sm:$0xff] }
0x264e   :  { %6702 = vmatpush.msra.mxu0 %v7440_v46 }
0x264f   :  { %v6526_v45 = vpop.f32.mrf.mxu2 }
0x2650   :  { %v6527_v47 = vadd.f32 %v6526_v45, %v6487_v28 }
0x2652   :  { %v12919_v49 = vadd.f32 %v6527_v47, %v12386_v25 }
0x2654   :  { %v6542_v24 = vsel %vm139_vm1, %v12919_v49, 0.0 }
0x2655   :  { %6543 = vadd.xlane.f32.xlu2 %v6542_v24 }
0x26b0   :  { %v6535_v35 = vpop.xlane.xlu0 %6534 }
0x26b1   :  { %v6545_v62 = vmul.f32 %v6535_v35, %v8737_v33 }
0x26b3   :  { %v6549_v13 = vsub.f32 %v12904_v59, %v6545_v62  ;;  %v7439_v62 = vld [vmem:[%s13116_s7 + $0x2d8] sm:$0xff] }
0x26b4   :  { %6703 = vmatpush.msra.mxu0 %v7439_v62 }
0x26b5   :  { %v6553_v15 = vmul.f32 %v6549_v13, %v6549_v13 }
0x26b7   :  { %v6557_v61 = vsel %vm139_vm1, %v6553_v15, 0.0 }
0x26b8   :  { %6558 = vadd.xlane.f32.xlu0 %v6557_v61  ;;  %v6538_v31 = vpop.xlane.xlu2 %6537  ;;  %v7438_v61 = vld [vmem:[%s13116_s7 + $0x2d0] sm:$0xff] }
0x26b9   :  { %v6546_v10 = vmul.f32 %v6538_v31, %v8737_v33  ;;  %6704 = vmatpush.msra.mxu0 %v7438_v61 }
0x26bb   :  { %v12928_v53 = vsub.f32 %v12909_v30, %v6546_v10 }
0x26bd   :  { %v6554_v25 = vmul.f32 %v12928_v53, %v12928_v53 }
0x26bf   :  { %v6560_v37 = vsel %vm139_vm1, %v6554_v25, 0.0 }
0x26c0   :  { %6561 = vadd.xlane.f32.xlu1 %v6560_v37  ;;  %v6541_v4 = vpop.xlane.xlu1 %6540  ;;  %v7437_v37 = vld [vmem:[%s13116_s7 + $0x2c8] sm:$0xff] }
0x26c1   :  { %v6547_v19 = vmul.f32 %v6541_v4, %v8737_v33  ;;  %6705 = vmatpush.msra.mxu0 %v7437_v37 }
0x26c3   :  { %v12935_v27 = vsub.f32 %v12914_v21, %v6547_v19 }
0x26c5   :  { %v6555_v58 = vmul.f32 %v12935_v27, %v12935_v27 }
0x26c7   :  { %v6563_v22 = vsel %vm139_vm1, %v6555_v58, 0.0  ;;  %v7436_v58 = vld [vmem:[%s13116_s7 + $0x2c0] sm:$0xff] }
0x26c8   :  { %6564 = vadd.xlane.f32.xlu2 %v6563_v22  ;;  %v6544_v43 = vpop.xlane.xlu2 %6543  ;;  %6706 = vmatpush.msra.mxu0 %v7436_v58 }
0x26c9   :  { %v6548_v48 = vmul.f32 %v6544_v43, %v8737_v33 }
0x26cb   :  { %v12942_v63 = vsub.f32 %v12919_v49, %v6548_v48 }
0x26cd   :  { %v6556_v41 = vmul.f32 %v12942_v63, %v12942_v63 }
0x26cf   :  { %v6566_v20 = vsel %vm139_vm1, %v6556_v41, 0.0 }
0x26d0   :  { %6567 = vadd.xlane.f32.xlu0 %v6566_v20 }
0x272b   :  { %v6559_v32 = vpop.xlane.xlu0 %6558 }
0x272c   :  { %v6569_v55 = vmul.f32 %v6559_v32, %v8737_v33  ;;  %v7433_v32 = vld [vmem:[%s13116_s7 + $0x2a8] sm:$0xff] }
0x272e   :  { %v6573_v2 = vadd.f32 1e-05, %v6569_v55 }
0x2730   :  { %8426 = vrsqrt.f32 %v6573_v2  ;;  %vm6583_vm0 = vweird.f32 %v6573_v2 }
0x2733   :  { %v6562_v23 = vpop.xlane.xlu1 %6561 }
0x2734   :  { %v6570_v1 = vmul.f32 %v6562_v23, %v8737_v33  ;;  %v7432_v23 = vld [vmem:[%s13116_s7 + $0x2a0] sm:$0xff] }
0x2736   :  { %v8427_v0 = vpop.eup %8426  ;;  %v6574_v38 = vadd.f32 1e-05, %v6570_v1 }
0x2737   :  { %v6578_v50 = vmul.f32 %v8427_v0, %v6573_v2  ;;  %vm6584_vm15 = vweird.f32 %v8427_v0 }
0x2738   :  { %8428 = vrsqrt.f32 %v6574_v38  ;;  %vm6585_vm5 = vmor %vm6583_vm0, %vm6584_vm15  ;;  %vm6593_vm7 = vweird.f32 %v6574_v38 }
0x2739   :  { %v6579_v36 = vmul.f32 %v8427_v0, %v6578_v50 }
0x273b   :  { %v6580_v51 = vmul.f32 0.5, %v6579_v36  ;;  %v6565_v44 = vpop.xlane.xlu2 %6564 }
0x273c   :  { %v6571_v16 = vmul.f32 %v6565_v44, %v8737_v33 }
0x273d   :  { %v6581_v7 = vsub.f32 1.5, %v6580_v51 }
0x273e   :  { %v8429_v57 = vpop.eup %8428  ;;  %v6575_v42 = vadd.f32 1e-05, %v6571_v16  ;;  %v7430_v16 = vld [vmem:[%s13116_s7 + $0x290] sm:$0xff] }
0x273f   :  { %v6582_v60 = vmul.f32 %v8427_v0, %v6581_v7  ;;  %v6588_v9 = vmul.f32 %v8429_v57, %v6574_v38  ;;  %vm6594_vm6 = vweird.f32 %v8429_v57  ;;  %v7428_v7 = vld [vmem:[%s13116_s7 + $0x280] sm:$0xff] }
0x2740   :  { %8430 = vrsqrt.f32 %v6575_v42  ;;  %vm6595_vm8 = vmor %vm6593_vm7, %vm6594_vm6  ;;  %vm6603_vm10 = vweird.f32 %v6575_v42 }
0x2741   :  { %v6586_v28 = vsel %vm6585_vm5, %v8427_v0, %v6582_v60  ;;  %v6589_v14 = vmul.f32 %v8429_v57, %v6588_v9 }
0x2742   :  { %v6617_v39 = vmul.f32 %v6586_v28, %v6549_v13 }
0x2743   :  { %v6590_v17 = vmul.f32 0.5, %v6589_v14  ;;  %v6568_v11 = vpop.xlane.xlu0 %6567 }
0x2744   :  { %v6622_v26 = vmul.f32 %v12968_v5, %v6617_v39  ;;  %v6572_v52 = vmul.f32 %v6568_v11, %v8737_v33 }
0x2745   :  { %v6591_v45 = vsub.f32 1.5, %v6590_v17  ;;  %v7352_v17 = vld [vmem:[%s13117_s8 + $0x140] sm:$0xff] }
0x2746   :  { %v8431_v47 = vpop.eup %8430  ;;  %v6627_v24 = vadd.f32 %v12976_v29, %v6622_v26  ;;  %v6576_v35 = vadd.f32 1e-05, %v6572_v52  ;;  %v6732_v11 = vperm.slane %v7352_v17, 0 }
0x2747   :  { %v6592_v13 = vmul.f32 %v8429_v57, %v6591_v45  ;;  %v6598_v15 = vmul.f32 %v8431_v47, %v6575_v42  ;;  %vm6604_vm9 = vweird.f32 %v8431_v47 }
0x2748   :  { %8432 = vrsqrt.f32 %v6576_v35  ;;  %7424 = vmatmul.msk.f32.vlgmr.msrb.gmra.mxu3 %vm139_vm1, %v6627_v24  ;;  %vm6605_vm11 = vmor %vm6603_vm10, %vm6604_vm9  ;;  %vm6613_vm13 = vweird.f32 %v6576_v35 }
0x2749   :  { %v6596_v31 = vsel %vm6595_vm8, %v8429_v57, %v6592_v13  ;;  %v6599_v10 = vmul.f32 %v8431_v47, %v6598_v15 }
0x274a   :  { %v6618_v25 = vmul.f32 %v6596_v31, %v12928_v53  ;;  %v7435_v53 = vld [vmem:[%s13116_s7 + $0x2b8] sm:$0xff] }
0x274b   :  { %v6600_v4 = vmul.f32 0.5, %v6599_v10  ;;  %6707 = vmatpush.msra.mxu0 %v7435_v53 }
0x274c   :  { %v6623_v19 = vmul.f32 %v12968_v5, %v6618_v25 }
0x274d   :  { %v6601_v22 = vsub.f32 1.5, %v6600_v4  ;;  %6708 = vmatpush.msra.mxu0 %v7434_v34 }
0x274e   :  { %v8433_v43 = vpop.eup %8432  ;;  %v6628_v48 = vadd.f32 %v12976_v29, %v6623_v19 }
0x274f   :  { %v6602_v41 = vmul.f32 %v8431_v47, %v6601_v22  ;;  %v6608_v20 = vmul.f32 %v8433_v43, %v6576_v35  ;;  %vm6614_vm12 = vweird.f32 %v8433_v43  ;;  %6709 = vmatpush.msra.mxu0 %v7433_v32 }
0x2750   :  { %7425 = vmatmul.msk.f32.gmra.mxu3 %vm139_vm1, %v6628_v48  ;;  %vm6615_vm14 = vmor %vm6613_vm13, %vm6614_vm12 }
0x2751   :  { %v6606_v40 = vsel %vm6605_vm11, %v8431_v47, %v6602_v41  ;;  %v6609_v6 = vmul.f32 %v8433_v43, %v6608_v20  ;;  %6710 = vmatpush.msra.mxu0 %v7432_v23 }
0x2752   :  { %v6619_v3 = vmul.f32 %v6606_v40, %v12935_v27  ;;  %v7431_v27 = vld [vmem:[%s13116_s7 + $0x298] sm:$0xff] }
0x2753   :  { %v6610_v55 = vmul.f32 0.5, %v6609_v6  ;;  %6711 = vmatpush.msra.mxu0 %v7431_v27  ;;  %v42_v27 = vld [vmem:[%s13118_s9 + $0x30] sm:$0xff] }
0x2754   :  { %v6624_v2 = vmul.f32 %v12968_v5, %v6619_v3 }
0x2755   :  { %v6611_v1 = vsub.f32 1.5, %v6610_v55  ;;  %6712 = vmatpush.msra.mxu0 %v7430_v16 }
0x2756   :  { %v6629_v0 = vadd.f32 %v12976_v29, %v6624_v2 }
0x2757   :  { %v6612_v38 = vmul.f32 %v8433_v43, %v6611_v1  ;;  %6713 = vmatpush.msra.mxu0 %v7429_v8  ;;  %v44_v1 = vld [vmem:[%s13118_s9 + $0x40] sm:$0xff] }
0x2758   :  { %7426 = vmatmul.msk.f32.gmra.mxu3 %vm139_vm1, %v6629_v0  ;;  %6860 = vmatpush.msra.mxu1 %v44_v1  ;;  %v43_v0 = vld [vmem:[%s13118_s9 + $0x38] sm:$0xff] }
0x2759   :  { %v6616_v50 = vsel %vm6615_vm14, %v8433_v43, %v6612_v38  ;;  %6714 = vmatpush.msra.mxu0 %v7428_v7  ;;  %v41_v38 = vld [vmem:[%s13118_s9 + $0x28] sm:$0xff] }
0x275a   :  { %v6620_v36 = vmul.f32 %v6616_v50, %v12942_v63  ;;  %v7353_v63 = vld [vmem:[%s13117_s8 + $0x148] sm:$0xff]  ;;  %6861 = vmatpush.msra.mxu1 %v43_v0 }
0x275b   :  { %v6636_v57 = vperm.slane %v7353_v63, 0 }
0x275c   :  { %v6625_v51 = vmul.f32 %v12968_v5, %v6620_v36  ;;  %6862 = vmatpush.msra.mxu1 %v42_v27 }
0x275e   :  { %v6630_v44 = vadd.f32 %v12976_v29, %v6625_v51  ;;  %6863 = vmatpush.msra.mxu1 %v41_v38 }
0x2760   :  { %7427 = vmatmul.msk.f32.gmra.mxu3 %vm139_vm1, %v6630_v44 }
0x27cb   :  { %v6666_v42 = vpop.f32.mrf.mxu3 }
0x27cc   :  { %v6667_v18 = vadd.f32 %v6666_v42, %v6636_v57 }
0x27ce   :  { %v6678_v60 = vmax.f32 %v6667_v18, 0.0 }
0x27d0   :  { %6715 = vmatmul.f32.vlgmr.msra.gmra.mxu0 %v6678_v60 }
0x27d3   :  { %v6669_v9 = vpop.f32.mrf.mxu3 }
0x27d4   :  { %v6670_v5 = vadd.f32 %v6669_v9, %v6636_v57  ;;  %v38_v9 = vld [vmem:[%s13118_s9 + $0x10] sm:$0xff] }
0x27d6   :  { %v6679_v56 = vmax.f32 %v6670_v5, 0.0 }
0x27d8   :  { %6718 = vmatmul.f32.gmra.mxu0 %v6679_v56 }
0x27db   :  { %v6672_v12 = vpop.f32.mrf.mxu3 }
0x27dc   :  { %v6673_v28 = vadd.f32 %v6672_v12, %v6636_v57 }
0x27de   :  { %v6680_v14 = vmax.f32 %v6673_v28, 0.0  ;;  %v39_v28 = vld [vmem:[%s13118_s9 + $0x18] sm:$0xff] }
0x27e0   :  { %6721 = vmatmul.f32.gmra.mxu0 %v6680_v14 }
0x27e3   :  { %v6675_v29 = vpop.f32.mrf.mxu3 }
0x27e4   :  { %v6676_v39 = vadd.f32 %v6675_v29, %v6636_v57 }
0x27e6   :  { %v6681_v54 = vmax.f32 %v6676_v39, 0.0  ;;  %v6825_v39 = vperm.slane %v38_v9, 0 }
0x27e8   :  { %6724 = vmatmul.f32.gmra.mxu0 %v6681_v54 }
0x284d   :  { %v6716_v26 = vpop.f32.mrf.mxu0 }
0x284e   :  { %v6728_v52 = vadd.f32 %v6716_v26, %v12904_v59 }
0x2850   :  { %v6733_v46 = vadd.f32 %v6732_v11, %v6728_v52 }
0x2852   :  { %v6737_v45 = vsel %vm139_vm1, %v6733_v46, 0.0 }
0x2853   :  { %6738 = vadd.xlane.f32.xlu1 %v6737_v45 }
0x2855   :  { %v6719_v47 = vpop.f32.mrf.mxu0 }
0x2856   :  { %v6729_v24 = vadd.f32 %v6719_v47, %v12909_v30 }
0x2858   :  { %v6734_v35 = vadd.f32 %v6732_v11, %v6729_v24 }
0x285a   :  { %v6740_v62 = vsel %vm139_vm1, %v6734_v35, 0.0 }
0x285b   :  { %6741 = vadd.xlane.f32.xlu2 %v6740_v62 }
0x285d   :  { %v6722_v13 = vpop.f32.mrf.mxu0 }
0x285e   :  { %v6730_v15 = vadd.f32 %v6722_v13, %v12914_v21 }
0x2860   :  { %v6735_v61 = vadd.f32 %v6732_v11, %v6730_v15 }
0x2862   :  { %v6743_v31 = vsel %vm139_vm1, %v6735_v61, 0.0 }
0x2863   :  { %6744 = vadd.xlane.f32.xlu0 %v6743_v31 }
0x2865   :  { %v6725_v10 = vpop.f32.mrf.mxu0 }
0x2866   :  { %v6731_v59 = vadd.f32 %v6725_v10, %v12919_v49 }
0x2868   :  { %v6736_v25 = vadd.f32 %v6732_v11, %v6731_v59  ;;  %v6830_v11 = vperm.slane %v39_v28, 0 }
0x286a   :  { %v6746_v37 = vsel %vm139_vm1, %v6736_v25, 0.0 }
0x286b   :  { %6747 = vadd.xlane.f32.xlu1 %v6746_v37 }
0x28c6   :  { %v6739_v4 = vpop.xlane.xlu1 %6738 }
0x28c7   :  { %v6749_v30 = vmul.f32 %v6739_v4, %v8737_v33 }
0x28c9   :  { %v6753_v19 = vsub.f32 %v6733_v46, %v6749_v30 }
0x28cb   :  { %v6757_v58 = vmul.f32 %v6753_v19, %v6753_v19 }
0x28cd   :  { %v6761_v22 = vsel %vm139_vm1, %v6757_v58, 0.0 }
0x28ce   :  { %6762 = vadd.xlane.f32.xlu2 %v6761_v22  ;;  %v6742_v21 = vpop.xlane.xlu2 %6741 }
0x28cf   :  { %v6750_v43 = vmul.f32 %v6742_v21, %v8737_v33 }
0x28d1   :  { %v13053_v48 = vsub.f32 %v6734_v35, %v6750_v43 }
0x28d3   :  { %v6758_v49 = vmul.f32 %v13053_v48, %v13053_v48 }
0x28d5   :  { %v6764_v53 = vsel %vm139_vm1, %v6758_v49, 0.0 }
0x28d6   :  { %v6745_v41 = vpop.xlane.xlu0 %6744  ;;  %6765 = vadd.xlane.f32.xlu0 %v6764_v53 }
0x28d7   :  { %v6751_v20 = vmul.f32 %v6745_v41, %v8737_v33 }
0x28d9   :  { %v13059_v34 = vsub.f32 %v6735_v61, %v6751_v20 }
0x28db   :  { %v6759_v40 = vmul.f32 %v13059_v34, %v13059_v34 }
0x28dd   :  { %v6767_v6 = vsel %vm139_vm1, %v6759_v40, 0.0 }
0x28de   :  { %6768 = vadd.xlane.f32.xlu1 %v6767_v6  ;;  %v6748_v3 = vpop.xlane.xlu1 %6747 }
0x28df   :  { %v6752_v32 = vmul.f32 %v6748_v3, %v8737_v33 }
0x28e1   :  { %v13065_v55 = vsub.f32 %v6736_v25, %v6752_v32 }
0x28e3   :  { %v6760_v2 = vmul.f32 %v13065_v55, %v13065_v55 }
0x28e5   :  { %v6770_v23 = vsel %vm139_vm1, %v6760_v2, 0.0 }
0x28e6   :  { %6771 = vadd.xlane.f32.xlu2 %v6770_v23 }
0x2941   :  { %v6763_v50 = vpop.xlane.xlu2 %6762 }
0x2942   :  { %v6773_v36 = vmul.f32 %v6763_v50, %v8737_v33 }
0x2944   :  { %v6777_v51 = vadd.f32 1e-05, %v6773_v36 }
0x2946   :  { %8434 = vrsqrt.f32 %v6777_v51  ;;  %vm6787_vm3 = vweird.f32 %v6777_v51 }
0x2949   :  { %v6766_v44 = vpop.xlane.xlu0 %6765 }
0x294a   :  { %v6774_v16 = vmul.f32 %v6766_v44, %v8737_v33 }
0x294c   :  { %v8435_v8 = vpop.eup %8434  ;;  %v6778_v7 = vadd.f32 1e-05, %v6774_v16 }
0x294d   :  { %v6782_v63 = vmul.f32 %v8435_v8, %v6777_v51  ;;  %vm6788_vm2 = vweird.f32 %v8435_v8 }
0x294e   :  { %8436 = vrsqrt.f32 %v6778_v7  ;;  %vm6789_vm4 = vmor %vm6787_vm3, %vm6788_vm2  ;;  %vm6797_vm0 = vweird.f32 %v6778_v7 }
0x294f   :  { %v6783_v57 = vmul.f32 %v8435_v8, %v6782_v63 }
0x2951   :  { %v6784_v42 = vmul.f32 0.5, %v6783_v57  ;;  %v6769_v18 = vpop.xlane.xlu1 %6768 }
0x2952   :  { %v6775_v60 = vmul.f32 %v6769_v18, %v8737_v33 }
0x2953   :  { %v6785_v5 = vsub.f32 1.5, %v6784_v42 }
0x2954   :  { %v8437_v56 = vpop.eup %8436  ;;  %v6779_v12 = vadd.f32 1e-05, %v6775_v60 }
0x2955   :  { %v6786_v14 = vmul.f32 %v8435_v8, %v6785_v5  ;;  %v6792_v29 = vmul.f32 %v8437_v56, %v6778_v7  ;;  %vm6798_vm15 = vweird.f32 %v8437_v56 }
0x2956   :  { %8438 = vrsqrt.f32 %v6779_v12  ;;  %vm6799_vm5 = vmor %vm6797_vm0, %vm6798_vm15  ;;  %vm6807_vm7 = vweird.f32 %v6779_v12 }
0x2957   :  { %v6790_v54 = vsel %vm6789_vm4, %v8435_v8, %v6786_v14  ;;  %v6793_v17 = vmul.f32 %v8437_v56, %v6792_v29 }
0x2958   :  { %v6821_v26 = vmul.f32 %v6790_v54, %v6753_v19 }
0x2959   :  { %v6794_v52 = vmul.f32 0.5, %v6793_v17  ;;  %v6772_v46 = vpop.xlane.xlu2 %6771 }
0x295a   :  { %v6826_v45 = vmul.f32 %v6825_v39, %v6821_v26  ;;  %v6776_v47 = vmul.f32 %v6772_v46, %v8737_v33 }
0x295b   :  { %v6795_v24 = vsub.f32 1.5, %v6794_v52 }
0x295c   :  { %v8439_v35 = vpop.eup %8438  ;;  %v6831_v62 = vadd.f32 %v6830_v11, %v6826_v45  ;;  %v6780_v13 = vadd.f32 1e-05, %v6776_v47 }
0x295d   :  { %v6796_v15 = vmul.f32 %v8437_v56, %v6795_v24  ;;  %v6802_v61 = vmul.f32 %v8439_v35, %v6779_v12  ;;  %vm6808_vm6 = vweird.f32 %v8439_v35 }
0x295e   :  { %8440 = vrsqrt.f32 %v6780_v13  ;;  %7444 = vmatmul.msk.f32.vlgmr.msra.gmra.mxu1 %vm139_vm1, %v6831_v62  ;;  %vm6809_vm8 = vmor %vm6807_vm7, %vm6808_vm6  ;;  %vm6817_vm10 = vweird.f32 %v6780_v13 }
0x295f   :  { %v6800_v31 = vsel %vm6799_vm5, %v8437_v56, %v6796_v15  ;;  %v6803_v10 = vmul.f32 %v8439_v35, %v6802_v61 }
0x2960   :  { %v6822_v59 = vmul.f32 %v6800_v31, %v13053_v48 }
0x2961   :  { %v6804_v25 = vmul.f32 0.5, %v6803_v10 }
0x2962   :  { %v6827_v37 = vmul.f32 %v6825_v39, %v6822_v59 }
0x2963   :  { %v6805_v4 = vsub.f32 1.5, %v6804_v25 }
0x2964   :  { %v8441_v33 = vpop.eup %8440  ;;  %v6832_v30 = vadd.f32 %v6830_v11, %v6827_v37 }
0x2965   :  { %v6806_v19 = vmul.f32 %v8439_v35, %v6805_v4  ;;  %v6812_v58 = vmul.f32 %v8441_v33, %v6780_v13  ;;  %vm6818_vm9 = vweird.f32 %v8441_v33 }
0x2966   :  { %7445 = vmatmul.msk.f32.gmra.mxu1 %vm139_vm1, %v6832_v30  ;;  %vm6819_vm11 = vmor %vm6817_vm10, %vm6818_vm9 }
0x2967   :  { %v6810_v22 = vsel %vm6809_vm8, %v8439_v35, %v6806_v19  ;;  %v6813_v21 = vmul.f32 %v8441_v33, %v6812_v58 }
0x2968   :  { %v6823_v43 = vmul.f32 %v6810_v22, %v13059_v34  ;;  %v40_v34 = vld [vmem:[%s13118_s9 + $0x20] sm:$0xff]  ;;  %s8634_s9 = smov 128  }
0x2969   :  { %v6814_v49 = vmul.f32 0.5, %v6813_v21  ;;  %v6835_v2 = vperm.slane %v40_v34, 0 }
0x296a   :  { %v6828_v53 = vmul.f32 %v6825_v39, %v6823_v43 }
0x296b   :  { %v6815_v41 = vsub.f32 1.5, %v6814_v49 }
0x296c   :  { %v6833_v48 = vadd.f32 %v6830_v11, %v6828_v53 }
0x296d   :  { %v6816_v20 = vmul.f32 %v8441_v33, %v6815_v41 }
0x296e   :  { %7446 = vmatmul.msk.f32.gmra.mxu1 %vm139_vm1, %v6833_v48 }
0x296f   :  { %v6820_v40 = vsel %vm6819_vm11, %v8441_v33, %v6816_v20 }
0x2970   :  { %v6824_v6 = vmul.f32 %v6820_v40, %v13065_v55 }
0x2972   :  { %v6829_v3 = vmul.f32 %v6825_v39, %v6824_v6 }
0x2974   :  { %v6834_v32 = vadd.f32 %v6830_v11, %v6829_v3 }
0x2976   :  { %7447 = vmatmul.msk.f32.gmra.mxu1 %vm139_vm1, %v6834_v32 }
0x29db   :  { %v6865_v23 = vpop.f32.mrf.mxu1 }
0x29dc   :  { %v6866_v1 = vadd.f32 %v6865_v23, %v6835_v2 }
0x29de   :  { %6877 = vst.msk [vmem:[#allocation2] sm:$0xff] %vm139_vm1, %v6866_v1 }
0x29e3   :  { %v6868_v0 = vpop.f32.mrf.mxu1 }
0x29e4   :  { %v6869_v27 = vadd.f32 %v6868_v0, %v6835_v2 }
0x29e6   :  { %6878 = vst.msk [vmem:[#allocation2 + $0x8] sm:$0xff] %vm139_vm1, %v6869_v27 }
0x29eb   :  { %v6871_v38 = vpop.f32.mrf.mxu1 }
0x29ec   :  { %v6872_v50 = vadd.f32 %v6871_v38, %v6835_v2 }
0x29ee   :  { %6879 = vst.msk [vmem:[#allocation2 + $0x10] sm:$0xff] %vm139_vm1, %v6872_v50 }
0x29f3   :  { %v6874_v55 = vpop.f32.mrf.mxu1 }
0x29f4   :  { %v6875_v36 = vadd.f32 %v6874_v55, %v6835_v2 }
0x29f6   :  { %6880 = vst.msk [vmem:[#allocation2 + $0x18] sm:$0xff] %vm139_vm1, %v6875_v36 }
0x29f7   :  { %6893 = dma.vmem_to_hbm [thread:$0]  %s6886_s14, 512, %s6888_s16, [#allocation3], %s8634_s9, %s8634_s9, %s8635_s17  }
0x29f8   :  { %8626 = dma.done.wait [#allocation3], 512  }
0x29f9   :  { %8627 = vsyncadd [#allocation3], 4294966784 }
0x29fa   :  { %6898 = vsyncpa [#allocation3], 1 }

</bundles_post_ra>
